<compile_context>
chip_gen: v7x
topology: tpu7x:2x2x1
jax: 0.10.0
libtpu: 0.0.40
codegen_flags: <defaults>
</compile_context>

<pallas_src>
import jax
import jax.numpy as jnp
import numpy as np
from jax import lax
from jax.experimental import pallas as pl
from jax.experimental.pallas import tpu as pltpu

EPS = 1e-5  # torch LayerNorm / PyG GraphNorm default eps


def _round_up(v, m):
    return (v + m - 1) // m * m


def _vmem_limit_bytes(operands, outputs):
    """Explicit scoped-VMEM sizing from the actual operand set (review item)."""
    total = 0
    for t in list(operands) + list(outputs):
        total += int(np.prod(t.shape)) * jnp.dtype(t.dtype).itemsize
    # 2x for double buffering / live intermediates + headroom; clamp to a range
    # that is valid on v5e/v6e (128 MiB) and v7x (64 MiB physical).
    return int(min(64 << 20, max(32 << 20, 2 * total + (4 << 20))))


# ---------------------------------------------------------------------------
# Kernel 1: encoder -> 2x hetero SAGE (+GraphNorm) -> staff classifier
# ---------------------------------------------------------------------------

def piano_svsep_node_kernel(
        # graph data
        x_ref, a1_ref, a2_ref, id1_ref, id2_ref,
        # encoder first_linear
        enc_w_ref, enc_b_ref, enc_g_ref, enc_beta_ref,
        # SAGE layer 0 (three weight tiles) + GraphNorm
        s0_wa1_ref, s0_wa2_ref, s0_ws_ref, s0_b_ref,
        gn_w_ref, gn_b_ref, gn_ms_ref,
        # SAGE layer 1
        s1_wa1_ref, s1_wa2_ref, s1_ws_ref, s1_b_ref,
        # staff classifier
        st_w1_ref, st_b1_ref, st_g_ref, st_beta_ref, st_w2_ref, st_b2_ref,
        # outputs
        hid_ref, staff_ref):
    f32 = jnp.float32
    bf16 = jnp.bfloat16

    def layer_norm(v, g, b):
        mu = jnp.mean(v, axis=-1, keepdims=True)
        var = jnp.mean((v - mu) ** 2, axis=-1, keepdims=True)
        return (v - mu) * lax.rsqrt(var + EPS) * g + b

    # ---- encoder first_linear: LayerNorm(ReLU(x @ We + be)) ----
    x = x_ref[...]                                                    # (N, Fp) bf16
    h = jnp.dot(x, enc_w_ref[...], preferred_element_type=f32) + enc_b_ref[...]
    h = jnp.maximum(h, 0.0)
    h = layer_norm(h, enc_g_ref[...], enc_beta_ref[...])

    a1 = a1_ref[...]                                                  # (N, N) bf16 counts
    a2 = a2_ref[...]
    id1 = id1_ref[...]                                                # (N, 1) f32 1/deg
    id2 = id2_ref[...]

    def sage(hf, wa1, wa2, ws, b):
        # mean-aggregate per edge type (f32 accumulation, exact counts, f32 1/deg),
        # then three (H,H) dots into one f32 accumulator.
        hb = hf.astype(bf16)
        agg1 = (jnp.dot(a1, hb, preferred_element_type=f32) * id1).astype(bf16)
        agg2 = (jnp.dot(a2, hb, preferred_element_type=f32) * id2).astype(bf16)
        return (jnp.dot(agg1, wa1, preferred_element_type=f32)
                + jnp.dot(agg2, wa2, preferred_element_type=f32)
                + jnp.dot(hb, ws, preferred_element_type=f32) + b)

    # ---- hetero SAGE layer 0: conv -> relu -> GraphNorm ----
    h = sage(h, s0_wa1_ref[...], s0_wa2_ref[...], s0_ws_ref[...], s0_b_ref[...])
    h = jnp.maximum(h, 0.0)                                           # activation (dropout = id)
    mu = jnp.mean(h, axis=0, keepdims=True)                           # GraphNorm over nodes
    centered = h - gn_ms_ref[...] * mu
    var = jnp.mean(centered * centered, axis=0, keepdims=True)
    h = gn_w_ref[...] * centered * lax.rsqrt(var + EPS) + gn_b_ref[...]

    # ---- hetero SAGE layer 1 (no activation / norm) ----
    h = sage(h, s1_wa1_ref[...], s1_wa2_ref[...], s1_ws_ref[...], s1_b_ref[...])
    hid_ref[...] = h                                                  # (N, H) f32

    # ---- staff classifier: Linear -> ReLU -> LN -> 2 lane reductions -> Sigmoid ----
    hb = h.astype(bf16)
    s = jnp.dot(hb, st_w1_ref[...], preferred_element_type=f32) + st_b1_ref[...]
    s = jnp.maximum(s, 0.0)
    s = layer_norm(s, st_g_ref[...], st_beta_ref[...])
    w2 = st_w2_ref[...]                                               # (2, H) f32
    l0 = jnp.sum(s * w2[0:1, :], axis=-1, keepdims=True)              # (N, 1)
    l1 = jnp.sum(s * w2[1:2, :], axis=-1, keepdims=True)
    lane = lax.broadcasted_iota(jnp.int32, (s.shape[0], 2), 1)
    logits = jnp.where(lane == 0, l0, l1) + st_b2_ref[...]            # (N, 2)
    staff_ref[...] = jax.nn.sigmoid(logits)


# ---------------------------------------------------------------------------
# Kernel 2: edge decoder (grid over edge tiles, "parallel")
# ---------------------------------------------------------------------------

def piano_svsep_edge_kernel(hrow_ref, hcol_ref, sbias_ref,
                            w1r_ref, w1c_ref, ln_g_ref, ln_b_ref,
                            w2_ref, b2_ref, out_ref):
    f32 = jnp.float32
    # z = h[row] @ W1r^T + h[col] @ W1c^T + (score @ W1s^T + b1)
    z = (jnp.dot(hrow_ref[...], w1r_ref[...], preferred_element_type=f32)
         + jnp.dot(hcol_ref[...], w1c_ref[...], preferred_element_type=f32)
         + sbias_ref[...])
    z = jnp.maximum(z, 0.0)                                           # relu (dropout = id)
    mu = jnp.mean(z, axis=-1, keepdims=True)
    var = jnp.mean((z - mu) ** 2, axis=-1, keepdims=True)
    z = (z - mu) * lax.rsqrt(var + EPS) * ln_g_ref[...] + ln_b_ref[...]
    # lin2 as a lane reduction: (E_t, 1), no padded-head matmul / padded store.
    out_ref[...] = jnp.sum(z * w2_ref[...], axis=-1, keepdims=True) + b2_ref[...]


# ---------------------------------------------------------------------------
# Parameters (torch-layout) + host-side packing into kernel operands
# ---------------------------------------------------------------------------

def init_params(key, input_features, hidden_features):
    H = hidden_features
    keys = jax.random.split(key, 16)

    def w(k, shape):
        return (0.02 * jax.random.normal(k, shape)).astype(jnp.float32)

    zeros = lambda shape: jnp.zeros(shape, jnp.float32)
    ones = lambda shape: jnp.ones(shape, jnp.float32)

    p = {}
    # encoder first_linear: Linear(F_in, H) + LayerNorm(H)
    p["enc_lin_w"] = w(keys[0], (H, input_features))
    p["enc_lin_b"] = zeros((1, H))
    p["enc_ln_g"] = ones((1, H))
    p["enc_ln_b"] = zeros((1, H))
    # 2 hetero SAGE layers x 2 edge types (lin_l with bias, lin_r without)
    ki = 1
    for layer in range(2):
        for et in range(2):
            p[f"sage{layer}_wl{et}"] = w(keys[ki], (H, H)); ki += 1
            p[f"sage{layer}_bl{et}"] = zeros((1, H))
            p[f"sage{layer}_wr{et}"] = w(keys[ki], (H, H)); ki += 1
    # GraphNorm (applied after layer 0 only for num_layers=2)
    p["gn0_w"] = ones((1, H))
    p["gn0_b"] = zeros((1, H))
    p["gn0_ms"] = ones((1, H))
    # staff_clf: Linear(H,H) -> LN(H) -> Linear(H,2) -> Sigmoid
    p["st_w1"] = w(keys[ki], (H, H)); ki += 1
    p["st_b1"] = zeros((1, H))
    p["st_ln_g"] = ones((1, H))
    p["st_ln_b"] = zeros((1, H))
    p["st_w2"] = w(keys[ki], (2, H)); ki += 1
    p["st_b2"] = zeros((1, 2))
    # decoder lin1 (H, 2H+3) split column-wise + LN(H) + lin2 (1, H)
    p["dec_w1r"] = w(keys[ki], (H, H)); ki += 1
    p["dec_w1c"] = w(keys[ki], (H, H)); ki += 1
    p["dec_w1s"] = w(keys[ki], (H, 3)); ki += 1
    p["dec_b1"] = zeros((1, H))
    p["dec_ln_g"] = ones((1, H))
    p["dec_ln_b"] = zeros((1, H))
    p["dec_w2"] = w(keys[ki], (1, H)); ki += 1
    p["dec_b2"] = zeros((1, 1))
    return p


def pack_params(params, input_features):
    """One-time host prep: transpose to (in,out), fold the hetero 'mean' 0.5
    factor into per-tile SAGE weights, keep MXU operands bf16 and all norm /
    bias / head-reduction params f32."""
    H = params["enc_lin_w"].shape[0]
    Fp = _round_up(input_features, 128)
    bf16 = jnp.bfloat16
    kp = {}

    enc_w = params["enc_lin_w"].T                                       # (F, H)
    kp["enc_w"] = jnp.pad(enc_w, ((0, Fp - input_features), (0, 0))).astype(bf16)
    kp["enc_b"] = params["enc_lin_b"]
    kp["enc_g"] = params["enc_ln_g"]
    kp["enc_beta"] = params["enc_ln_b"]

    for l in range(2):
        kp[f"sage{l}_wa1"] = (0.5 * params[f"sage{l}_wl0"].T).astype(bf16)     # (H, H)
        kp[f"sage{l}_wa2"] = (0.5 * params[f"sage{l}_wl1"].T).astype(bf16)
        kp[f"sage{l}_ws"] = (0.5 * (params[f"sage{l}_wr0"]
                                    + params[f"sage{l}_wr1"]).T).astype(bf16)
        kp[f"sage{l}_b"] = 0.5 * (params[f"sage{l}_bl0"] + params[f"sage{l}_bl1"])

    kp["gn0_w"] = params["gn0_w"]
    kp["gn0_b"] = params["gn0_b"]
    kp["gn0_ms"] = params["gn0_ms"]

    kp["st_w1"] = params["st_w1"].T.astype(bf16)
    kp["st_b1"] = params["st_b1"]
    kp["st_g"] = params["st_ln_g"]
    kp["st_beta"] = params["st_ln_b"]
    kp["st_w2"] = params["st_w2"]            # (2, H) f32 row vectors -> lane reductions
    kp["st_b2"] = params["st_b2"]            # (1, 2)

    kp["dec_w1r"] = params["dec_w1r"].T.astype(bf16)                     # (H, H)
    kp["dec_w1c"] = params["dec_w1c"].T.astype(bf16)
    kp["dec_w1s_t"] = params["dec_w1s"].T                                # (3, H) f32 (XLA side)
    kp["dec_b1"] = params["dec_b1"]
    kp["dec_g"] = params["dec_ln_g"]
    kp["dec_beta"] = params["dec_ln_b"]
    kp["dec_w2"] = params["dec_w2"]          # (1, H) f32 row vector -> lane reduction
    kp["dec_b2"] = params["dec_b2"]          # (1, 1)
    return kp


def build_adjs(edge_index_list, num_nodes):
    """Dense adjacency edge counts (exact in bf16) + f32 inverse-degree vectors.
    Together these reproduce PyG scatter-mean aggregation src->dst exactly."""
    adjs, inv_degs = [], []
    for ei in edge_index_list:
        a = jnp.zeros((num_nodes, num_nodes), jnp.float32).at[ei[1], ei[0]].add(1.0)
        deg = jnp.sum(a, axis=1, keepdims=True)
        adjs.append(a.astype(jnp.bfloat16))                  # counts < 256 -> exact in bf16
        inv_degs.append(1.0 / jnp.maximum(deg, 1.0))         # f32
    return adjs, inv_degs


def build_norm_adjs(edge_index_list, num_nodes):
    """f32 row-normalized adjacencies for the pure-JAX reference."""
    adjs = []
    for ei in edge_index_list:
        a = jnp.zeros((num_nodes, num_nodes), jnp.float32).at[ei[1], ei[0]].add(1.0)
        deg = jnp.sum(a, axis=1, keepdims=True)
        adjs.append(a / jnp.maximum(deg, 1.0))
    return adjs


# ---------------------------------------------------------------------------
# Full forward (node pallas_call + edge-tiled decoder pallas_call)
# ---------------------------------------------------------------------------

def piano_svsep_forward(kparams, x, edge_index_list, pot_edges, pot_chord_edges, batch,
                        onsets, durations, pitches, onset_beat, duration_beat, ts_beats,
                        *, edge_tile=256):
    del batch  # GraphNorm is called without batch in this config
    N, F = x.shape
    H = kparams["st_w1"].shape[0]
    E = pot_edges.shape[1]
    Fp = kparams["enc_w"].shape[0]
    f32, bf16 = jnp.float32, jnp.bfloat16

    # ---- XLA-side one-time graph prep ----
    (a1, a2), (id1, id2) = build_adjs(edge_index_list, N)
    x_pad = jnp.pad(x, ((0, 0), (0, Fp - F))).astype(bf16)

    # ---- node kernel: encoder + 2x SAGE + GraphNorm + staff head ----
    node_args = (x_pad, a1, a2, id1, id2,
                 kparams["enc_w"], kparams["enc_b"], kparams["enc_g"], kparams["enc_beta"],
                 kparams["sage0_wa1"], kparams["sage0_wa2"], kparams["sage0_ws"], kparams["sage0_b"],
                 kparams["gn0_w"], kparams["gn0_b"], kparams["gn0_ms"],
                 kparams["sage1_wa1"], kparams["sage1_wa2"], kparams["sage1_ws"], kparams["sage1_b"],
                 kparams["st_w1"], kparams["st_b1"], kparams["st_g"], kparams["st_beta"],
                 kparams["st_w2"], kparams["st_b2"])
    node_outs = (jax.ShapeDtypeStruct((N, H), f32),     # hidden_features
                 jax.ShapeDtypeStruct((N, 2), f32))     # staff logits (no lane padding)
    hidden, staff_logits = pl.pallas_call(
        piano_svsep_node_kernel,
        out_shape=node_outs,
        in_specs=[pl.BlockSpec(memory_space=pltpu.MemorySpace.VMEM)] * len(node_args),
        out_specs=tuple(pl.BlockSpec(memory_space=pltpu.MemorySpace.VMEM)
                        for _ in node_outs),
        compiler_params=pltpu.CompilerParams(
            vmem_limit_bytes=_vmem_limit_bytes(node_args, node_outs)),
    )(*node_args)

    # ---- edge-decoder prep: index gather (no one-hot matmuls) + score bias ----
    # TODO(synk): at scale, move this gather in-kernel via scalar-prefetched indices.
    row, col = pot_edges[0], pot_edges[1]
    h_row = hidden[row].astype(bf16)                     # (E, H)
    h_col = hidden[col].astype(bf16)
    offset_beat = onset_beat + duration_beat
    cont = 1.0 - jnp.tanh((onset_beat[col] - offset_beat[row]) / ts_beats[col])
    binary = (onsets[col] == (onsets[row] + durations[row])).astype(f32)
    pscore = jnp.abs(pitches[col] - pitches[row]) / 127.0
    score = jnp.stack([cont, binary, pscore], axis=1)                      # (E, 3) f32
    sbias = (jnp.dot(score, kparams["dec_w1s_t"], precision=lax.Precision.HIGHEST)
             + kparams["dec_b1"])                                          # (E, H) f32

    E_pad = _round_up(E, edge_tile)
    pad = E_pad - E
    if pad:
        h_row = jnp.pad(h_row, ((0, pad), (0, 0)))
        h_col = jnp.pad(h_col, ((0, pad), (0, 0)))
        sbias = jnp.pad(sbias, ((0, pad), (0, 0)))

    edge_args = (h_row, h_col, sbias,
                 kparams["dec_w1r"], kparams["dec_w1c"],
                 kparams["dec_g"], kparams["dec_beta"],
                 kparams["dec_w2"], kparams["dec_b2"])
    edge_in_specs = [
        pl.BlockSpec((edge_tile, H), lambda i: (i, 0)),     # h[row] stream
        pl.BlockSpec((edge_tile, H), lambda i: (i, 0)),     # h[col] stream
        pl.BlockSpec((edge_tile, H), lambda i: (i, 0)),     # score@W1s^T + b1 stream
        pl.BlockSpec((H, H), lambda i: (0, 0)),             # resident weights
        pl.BlockSpec((H, H), lambda i: (0, 0)),
        pl.BlockSpec((1, H), lambda i: (0, 0)),
        pl.BlockSpec((1, H), lambda i: (0, 0)),
        pl.BlockSpec((1, H), lambda i: (0, 0)),
        pl.BlockSpec((1, 1), lambda i: (0, 0)),
    ]
    dec_out_shape = jax.ShapeDtypeStruct((E_pad, 1), f32)
    dec = pl.pallas_call(
        piano_svsep_edge_kernel,
        out_shape=dec_out_shape,
        grid=(E_pad // edge_tile,),
        in_specs=edge_in_specs,
        out_specs=pl.BlockSpec((edge_tile, 1), lambda i: (i, 0)),
        compiler_params=pltpu.CompilerParams(
            dimension_semantics=("parallel",),
            vmem_limit_bytes=_vmem_limit_bytes(edge_args, (dec_out_shape,))),
    )(*edge_args)

    out = dec[:E, 0]
    pooling_logits = jnp.zeros_like(pot_chord_edges)        # chord_pooling_mode == 'none'
    return out, staff_logits, hidden, pooling_logits


# ---------------------------------------------------------------------------
# Pure-JAX f32 reference (torch-layout params, HIGHEST precision)
# ---------------------------------------------------------------------------

def reference_forward(params, x, edge_index_list, pot_edges, pot_chord_edges,
                      onsets, durations, pitches, onset_beat, duration_beat, ts_beats):
    P = lax.Precision.HIGHEST
    adjs = build_norm_adjs(edge_index_list, x.shape[0])

    def ln(v, g, b):
        mu = jnp.mean(v, -1, keepdims=True)
        var = jnp.mean((v - mu) ** 2, -1, keepdims=True)
        return (v - mu) * lax.rsqrt(var + EPS) * g + b

    h = jnp.maximum(jnp.dot(x, params["enc_lin_w"].T, precision=P) + params["enc_lin_b"], 0.0)
    h = ln(h, params["enc_ln_g"], params["enc_ln_b"])
    for layer, apply_norm in ((0, True), (1, False)):
        outs = []
        for et in range(2):
            agg = jnp.dot(adjs[et], h, precision=P)
            outs.append(jnp.dot(agg, params[f"sage{layer}_wl{et}"].T, precision=P)
                        + params[f"sage{layer}_bl{et}"]
                        + jnp.dot(h, params[f"sage{layer}_wr{et}"].T, precision=P))
        h = 0.5 * (outs[0] + outs[1])
        if apply_norm:
            h = jnp.maximum(h, 0.0)
            mu = jnp.mean(h, 0, keepdims=True)
            c = h - params["gn0_ms"] * mu
            var = jnp.mean(c * c, 0, keepdims=True)
            h = params["gn0_w"] * c * lax.rsqrt(var + EPS) + params["gn0_b"]
    hidden = h

    s = jnp.maximum(jnp.dot(hidden, params["st_w1"].T, precision=P) + params["st_b1"], 0.0)
    s = ln(s, params["st_ln_g"], params["st_ln_b"])
    staff = jax.nn.sigmoid(jnp.dot(s, params["st_w2"].T, precision=P) + params["st_b2"])

    row, col = pot_edges[0], pot_edges[1]
    offset_beat = onset_beat + duration_beat
    cont = 1.0 - jnp.tanh((onset_beat[col] - offset_beat[row]) / ts_beats[col])
    binary = (onsets[col] == (onsets[row] + durations[row])).astype(jnp.float32)
    pscore = jnp.abs(pitches[col] - pitches[row]) / 127.0
    score = jnp.stack([cont, binary, pscore], axis=1)
    z = (jnp.dot(hidden[row], params["dec_w1r"].T, precision=P)
         + jnp.dot(hidden[col], params["dec_w1c"].T, precision=P)
         + jnp.dot(score, params["dec_w1s"].T, precision=P) + params["dec_b1"])
    z = jnp.maximum(z, 0.0)
    z = ln(z, params["dec_ln_g"], params["dec_ln_b"])
    out = (jnp.dot(z, params["dec_w2"].T, precision=P) + params["dec_b2"]).reshape(-1)
    return out, staff, hidden, jnp.zeros_like(pot_chord_edges)


# ---------------------------------------------------------------------------
# Main
# ---------------------------------------------------------------------------

if __name__ == "__main__":
    N, F_IN, H = 256, 16, 128     # nodes (>=256 rows for full MXU M), input feats, hidden
    E, EC = 512, 16               # potential edges (2 edge tiles -> parallel grid), chord edges
    E_SCORE = 1024                # edges per score-graph relation

    key = jax.random.PRNGKey(0)
    kx, ke0, ke1, kpe, kce, kon, kpi, kpar = jax.random.split(key, 8)

    x = jax.random.normal(kx, (N, F_IN), jnp.float32)
    edge_index_list = [jax.random.randint(ke0, (2, E_SCORE), 0, N),
                       jax.random.randint(ke1, (2, E_SCORE), 0, N)]
    pot_edges = jax.random.randint(kpe, (2, E), 0, N)
    pot_chord_edges = jax.random.randint(kce, (2, EC), 0, N)
    batch = jnp.zeros((N,), jnp.int32)

    onsets = jnp.floor(jax.random.uniform(kon, (N,), minval=0.0, maxval=8.0)).astype(jnp.float32)
    durations = jnp.ones((N,), jnp.float32)
    pitches = jax.random.randint(kpi, (N,), 40, 90).astype(jnp.float32)
    onset_beat = onsets
    duration_beat = durations
    ts_beats = jnp.full((N,), 4.0, jnp.float32)

    params = init_params(kpar, F_IN, H)
    kparams = pack_params(params, F_IN)     # one-time host-side weight packing

    fwd = jax.jit(piano_svsep_forward)
    out, staff_logits, hidden_features, pooling_logits = jax.block_until_ready(
        fwd(kparams, x, edge_index_list, pot_edges, pot_chord_edges, batch,
            onsets, durations, pitches, onset_beat, duration_beat, ts_beats))

    ref_out, ref_staff, ref_hidden, ref_pool = reference_forward(
        params, x, edge_index_list, pot_edges, pot_chord_edges,
        onsets, durations, pitches, onset_beat, duration_beat, ts_beats)

    assert out.shape == (E,) and staff_logits.shape == (N, 2)
    assert hidden_features.shape == (N, H) and pooling_logits.shape == (2, EC)
    # bf16 MXU inputs (f32 accumulation) => compare against the f32 reference
    # with a bf16-appropriate tolerance.
    np.testing.assert_allclose(np.asarray(out), np.asarray(ref_out), rtol=2e-2, atol=2e-2)
    np.testing.assert_allclose(np.asarray(staff_logits), np.asarray(ref_staff), rtol=2e-2, atol=2e-2)
    np.testing.assert_allclose(np.asarray(hidden_features), np.asarray(ref_hidden), rtol=2e-2, atol=2e-2)
    np.testing.assert_allclose(np.asarray(pooling_logits), np.asarray(ref_pool))

    print("KERNEL_OK")
</pallas_src>

<mosaic_0001>
module attributes {stable_mosaic.version = 11 : i64} {
  func.func private @main(%arg0: i32) attributes {dimension_semantics = [#tpu.dimension_semantics<core_parallel>], iteration_bounds = array<i64: 2>, tpu.core_type = #tpu.core_type<sc_scalar_subcore>, window_params = []} {
    return
  }
}

module attributes {stable_mosaic.version = 11 : i64} {
  func.func private @main(%arg0: i32) attributes {dimension_semantics = [#tpu.dimension_semantics<core_parallel>], iteration_bounds = array<i64: 2>, tpu.core_type = #tpu.core_type<sc_scalar_subcore>, window_params = []} {
    return
  }
}

module attributes {stable_mosaic.version = 11 : i64} {
  func.func @piano_svsep_node_kernel(%arg0: memref<256x128xbf16, #tpu.memory_space<vmem>>, %arg1: memref<256x256xbf16, #tpu.memory_space<vmem>>, %arg2: memref<256x256xbf16, #tpu.memory_space<vmem>>, %arg3: memref<256x1xf32, #tpu.memory_space<vmem>>, %arg4: memref<256x1xf32, #tpu.memory_space<vmem>>, %arg5: memref<128x128xbf16, #tpu.memory_space<vmem>>, %arg6: memref<1x128xf32, #tpu.memory_space<vmem>>, %arg7: memref<1x128xf32, #tpu.memory_space<vmem>>, %arg8: memref<1x128xf32, #tpu.memory_space<vmem>>, %arg9: memref<128x128xbf16, #tpu.memory_space<vmem>>, %arg10: memref<128x128xbf16, #tpu.memory_space<vmem>>, %arg11: memref<128x128xbf16, #tpu.memory_space<vmem>>, %arg12: memref<1x128xf32, #tpu.memory_space<vmem>>, %arg13: memref<1x128xf32, #tpu.memory_space<vmem>>, %arg14: memref<1x128xf32, #tpu.memory_space<vmem>>, %arg15: memref<1x128xf32, #tpu.memory_space<vmem>>, %arg16: memref<128x128xbf16, #tpu.memory_space<vmem>>, %arg17: memref<128x128xbf16, #tpu.memory_space<vmem>>, %arg18: memref<128x128xbf16, #tpu.memory_space<vmem>>, %arg19: memref<1x128xf32, #tpu.memory_space<vmem>>, %arg20: memref<128x128xbf16, #tpu.memory_space<vmem>>, %arg21: memref<1x128xf32, #tpu.memory_space<vmem>>, %arg22: memref<1x128xf32, #tpu.memory_space<vmem>>, %arg23: memref<1x128xf32, #tpu.memory_space<vmem>>, %arg24: memref<2x128xf32, #tpu.memory_space<vmem>>, %arg25: memref<1x2xf32, #tpu.memory_space<vmem>>, %arg26: memref<256x128xf32, #tpu.memory_space<vmem>>, %arg27: memref<256x2xf32, #tpu.memory_space<vmem>>) attributes {dimension_semantics = [], scalar_prefetch = 0 : i64, scratch_operands = 0 : i64, tpu.core_type = #tpu.core_type<tc>} {
    %c0 = arith.constant 0 : index
    %c0_0 = arith.constant 0 : index
    %0 = vector.load %arg0[%c0, %c0_0] : memref<256x128xbf16, #tpu.memory_space<vmem>>, vector<256x128xbf16>
    %c0_1 = arith.constant 0 : index
    %c0_2 = arith.constant 0 : index
    %1 = vector.load %arg5[%c0_1, %c0_2] : memref<128x128xbf16, #tpu.memory_space<vmem>>, vector<128x128xbf16>
    %cst = arith.constant dense<0.000000e+00> : vector<256x128xf32>
    %2 = tpu.matmul %0, %1, %cst {dimension_numbers = #tpu.dot_dimension_numbers<[1], [0], [0], [1], [0, 0, 1, 1], [], []>} : vector<256x128xbf16>, vector<128x128xbf16>, vector<256x128xf32> -> vector<256x128xf32>
    %c0_3 = arith.constant 0 : index
    %c0_4 = arith.constant 0 : index
    %3 = vector.load %arg6[%c0_3, %c0_4] : memref<1x128xf32, #tpu.memory_space<vmem>>, vector<1x128xf32>
    %4 = vector.broadcast %3 : vector<1x128xf32> to vector<256x128xf32>
    %5 = arith.addf %2, %4 : vector<256x128xf32>
    %cst_5 = arith.constant 0.000000e+00 : f32
    %6 = vector.broadcast %cst_5 : f32 to vector<256x128xf32>
    %7 = arith.maximumf %5, %6 : vector<256x128xf32>
    %c0_6 = arith.constant 0 : index
    %c0_7 = arith.constant 0 : index
    %8 = vector.load %arg7[%c0_6, %c0_7] : memref<1x128xf32, #tpu.memory_space<vmem>>, vector<1x128xf32>
    %c0_8 = arith.constant 0 : index
    %c0_9 = arith.constant 0 : index
    %9 = vector.load %arg8[%c0_8, %c0_9] : memref<1x128xf32, #tpu.memory_space<vmem>>, vector<1x128xf32>
    %cst_10 = arith.constant dense<0.000000e+00> : vector<256xf32>
    %10 = vector.multi_reduction <add>, %7, %cst_10 [1] : vector<256x128xf32> to vector<256xf32>
    %11 = vector.shape_cast %10 : vector<256xf32> to vector<256x1xf32>
    %cst_11 = arith.constant 1.280000e+02 : f32
    %12 = vector.broadcast %cst_11 : f32 to vector<256x1xf32>
    %13 = arith.divf %11, %12 : vector<256x1xf32>
    %14 = vector.broadcast %13 : vector<256x1xf32> to vector<256x128xf32>
    %15 = arith.subf %7, %14 : vector<256x128xf32>
    %16 = arith.mulf %15, %15 : vector<256x128xf32>
    %cst_12 = arith.constant dense<0.000000e+00> : vector<256xf32>
    %17 = vector.multi_reduction <add>, %16, %cst_12 [1] : vector<256x128xf32> to vector<256xf32>
    %18 = vector.shape_cast %17 : vector<256xf32> to vector<256x1xf32>
    %cst_13 = arith.constant 1.280000e+02 : f32
    %19 = vector.broadcast %cst_13 : f32 to vector<256x1xf32>
    %20 = arith.divf %18, %19 : vector<256x1xf32>
    %21 = vector.broadcast %13 : vector<256x1xf32> to vector<256x128xf32>
    %22 = arith.subf %7, %21 : vector<256x128xf32>
    %cst_14 = arith.constant 9.99999974E-6 : f32
    %23 = vector.broadcast %cst_14 : f32 to vector<256x1xf32>
    %24 = arith.addf %20, %23 : vector<256x1xf32>
    %25 = math.rsqrt %24 : vector<256x1xf32>
    %26 = vector.broadcast %25 : vector<256x1xf32> to vector<256x128xf32>
    %27 = arith.mulf %22, %26 : vector<256x128xf32>
    %28 = vector.broadcast %8 : vector<1x128xf32> to vector<256x128xf32>
    %29 = arith.mulf %27, %28 : vector<256x128xf32>
    %30 = vector.broadcast %9 : vector<1x128xf32> to vector<256x128xf32>
    %31 = arith.addf %29, %30 : vector<256x128xf32>
    %c0_15 = arith.constant 0 : index
    %c0_16 = arith.constant 0 : index
    %32 = vector.load %arg1[%c0_15, %c0_16] : memref<256x256xbf16, #tpu.memory_space<vmem>>, vector<256x256xbf16>
    %c0_17 = arith.constant 0 : index
    %c0_18 = arith.constant 0 : index
    %33 = vector.load %arg2[%c0_17, %c0_18] : memref<256x256xbf16, #tpu.memory_space<vmem>>, vector<256x256xbf16>
    %c0_19 = arith.constant 0 : index
    %c0_20 = arith.constant 0 : index
    %34 = vector.load %arg3[%c0_19, %c0_20] : memref<256x1xf32, #tpu.memory_space<vmem>>, vector<256x1xf32>
    %c0_21 = arith.constant 0 : index
    %c0_22 = arith.constant 0 : index
    %35 = vector.load %arg4[%c0_21, %c0_22] : memref<256x1xf32, #tpu.memory_space<vmem>>, vector<256x1xf32>
    %c0_23 = arith.constant 0 : index
    %c0_24 = arith.constant 0 : index
    %36 = vector.load %arg9[%c0_23, %c0_24] : memref<128x128xbf16, #tpu.memory_space<vmem>>, vector<128x128xbf16>
    %c0_25 = arith.constant 0 : index
    %c0_26 = arith.constant 0 : index
    %37 = vector.load %arg10[%c0_25, %c0_26] : memref<128x128xbf16, #tpu.memory_space<vmem>>, vector<128x128xbf16>
    %c0_27 = arith.constant 0 : index
    %c0_28 = arith.constant 0 : index
    %38 = vector.load %arg11[%c0_27, %c0_28] : memref<128x128xbf16, #tpu.memory_space<vmem>>, vector<128x128xbf16>
    %c0_29 = arith.constant 0 : index
    %c0_30 = arith.constant 0 : index
    %39 = vector.load %arg12[%c0_29, %c0_30] : memref<1x128xf32, #tpu.memory_space<vmem>>, vector<1x128xf32>
    %40 = arith.truncf %31 : vector<256x128xf32> to vector<256x128xbf16>
    %cst_31 = arith.constant dense<0.000000e+00> : vector<256x128xf32>
    %41 = tpu.matmul %32, %40, %cst_31 {dimension_numbers = #tpu.dot_dimension_numbers<[1], [0], [0], [1], [0, 0, 1, 1], [], []>} : vector<256x256xbf16>, vector<256x128xbf16>, vector<256x128xf32> -> vector<256x128xf32>
    %42 = vector.broadcast %34 : vector<256x1xf32> to vector<256x128xf32>
    %43 = arith.mulf %41, %42 : vector<256x128xf32>
    %44 = arith.truncf %43 : vector<256x128xf32> to vector<256x128xbf16>
    %cst_32 = arith.constant dense<0.000000e+00> : vector<256x128xf32>
    %45 = tpu.matmul %33, %40, %cst_32 {dimension_numbers = #tpu.dot_dimension_numbers<[1], [0], [0], [1], [0, 0, 1, 1], [], []>} : vector<256x256xbf16>, vector<256x128xbf16>, vector<256x128xf32> -> vector<256x128xf32>
    %46 = vector.broadcast %35 : vector<256x1xf32> to vector<256x128xf32>
    %47 = arith.mulf %45, %46 : vector<256x128xf32>
    %48 = arith.truncf %47 : vector<256x128xf32> to vector<256x128xbf16>
    %cst_33 = arith.constant dense<0.000000e+00> : vector<256x128xf32>
    %49 = tpu.matmul %44, %36, %cst_33 {dimension_numbers = #tpu.dot_dimension_numbers<[1], [0], [0], [1], [0, 0, 1, 1], [], []>} : vector<256x128xbf16>, vector<128x128xbf16>, vector<256x128xf32> -> vector<256x128xf32>
    %cst_34 = arith.constant dense<0.000000e+00> : vector<256x128xf32>
    %50 = tpu.matmul %48, %37, %cst_34 {dimension_numbers = #tpu.dot_dimension_numbers<[1], [0], [0], [1], [0, 0, 1, 1], [], []>} : vector<256x128xbf16>, vector<128x128xbf16>, vector<256x128xf32> -> vector<256x128xf32>
    %51 = arith.addf %49, %50 : vector<256x128xf32>
    %cst_35 = arith.constant dense<0.000000e+00> : vector<256x128xf32>
    %52 = tpu.matmul %40, %38, %cst_35 {dimension_numbers = #tpu.dot_dimension_numbers<[1], [0], [0], [1], [0, 0, 1, 1], [], []>} : vector<256x128xbf16>, vector<128x128xbf16>, vector<256x128xf32> -> vector<256x128xf32>
    %53 = arith.addf %51, %52 : vector<256x128xf32>
    %54 = vector.broadcast %39 : vector<1x128xf32> to vector<256x128xf32>
    %55 = arith.addf %53, %54 : vector<256x128xf32>
    %cst_36 = arith.constant 0.000000e+00 : f32
    %56 = vector.broadcast %cst_36 : f32 to vector<256x128xf32>
    %57 = arith.maximumf %55, %56 : vector<256x128xf32>
    %cst_37 = arith.constant dense<0.000000e+00> : vector<128xf32>
    %58 = vector.multi_reduction <add>, %57, %cst_37 [0] : vector<256x128xf32> to vector<128xf32>
    %59 = vector.shape_cast %58 : vector<128xf32> to vector<1x128xf32>
    %cst_38 = arith.constant 2.560000e+02 : f32
    %60 = vector.broadcast %cst_38 : f32 to vector<1x128xf32>
    %61 = arith.divf %59, %60 : vector<1x128xf32>
    %c0_39 = arith.constant 0 : index
    %c0_40 = arith.constant 0 : index
    %62 = vector.load %arg15[%c0_39, %c0_40] : memref<1x128xf32, #tpu.memory_space<vmem>>, vector<1x128xf32>
    %63 = arith.mulf %62, %61 : vector<1x128xf32>
    %64 = vector.broadcast %63 : vector<1x128xf32> to vector<256x128xf32>
    %65 = arith.subf %57, %64 : vector<256x128xf32>
    %66 = arith.mulf %65, %65 : vector<256x128xf32>
    %cst_41 = arith.constant dense<0.000000e+00> : vector<128xf32>
    %67 = vector.multi_reduction <add>, %66, %cst_41 [0] : vector<256x128xf32> to vector<128xf32>
    %68 = vector.shape_cast %67 : vector<128xf32> to vector<1x128xf32>
    %cst_42 = arith.constant 2.560000e+02 : f32
    %69 = vector.broadcast %cst_42 : f32 to vector<1x128xf32>
    %70 = arith.divf %68, %69 : vector<1x128xf32>
    %c0_43 = arith.constant 0 : index
    %c0_44 = arith.constant 0 : index
    %71 = vector.load %arg13[%c0_43, %c0_44] : memref<1x128xf32, #tpu.memory_space<vmem>>, vector<1x128xf32>
    %72 = vector.broadcast %71 : vector<1x128xf32> to vector<256x128xf32>
    %73 = arith.mulf %72, %65 : vector<256x128xf32>
    %cst_45 = arith.constant 9.99999974E-6 : f32
    %74 = vector.broadcast %cst_45 : f32 to vector<1x128xf32>
    %75 = arith.addf %70, %74 : vector<1x128xf32>
    %76 = math.rsqrt %75 : vector<1x128xf32>
    %77 = vector.broadcast %76 : vector<1x128xf32> to vector<256x128xf32>
    %78 = arith.mulf %73, %77 : vector<256x128xf32>
    %c0_46 = arith.constant 0 : index
    %c0_47 = arith.constant 0 : index
    %79 = vector.load %arg14[%c0_46, %c0_47] : memref<1x128xf32, #tpu.memory_space<vmem>>, vector<1x128xf32>
    %80 = vector.broadcast %79 : vector<1x128xf32> to vector<256x128xf32>
    %81 = arith.addf %78, %80 : vector<256x128xf32>
    %c0_48 = arith.constant 0 : index
    %c0_49 = arith.constant 0 : index
    %82 = vector.load %arg16[%c0_48, %c0_49] : memref<128x128xbf16, #tpu.memory_space<vmem>>, vector<128x128xbf16>
    %c0_50 = arith.constant 0 : index
    %c0_51 = arith.constant 0 : index
    %83 = vector.load %arg17[%c0_50, %c0_51] : memref<128x128xbf16, #tpu.memory_space<vmem>>, vector<128x128xbf16>
    %c0_52 = arith.constant 0 : index
    %c0_53 = arith.constant 0 : index
    %84 = vector.load %arg18[%c0_52, %c0_53] : memref<128x128xbf16, #tpu.memory_space<vmem>>, vector<128x128xbf16>
    %c0_54 = arith.constant 0 : index
    %c0_55 = arith.constant 0 : index
    %85 = vector.load %arg19[%c0_54, %c0_55] : memref<1x128xf32, #tpu.memory_space<vmem>>, vector<1x128xf32>
    %86 = arith.truncf %81 : vector<256x128xf32> to vector<256x128xbf16>
    %cst_56 = arith.constant dense<0.000000e+00> : vector<256x128xf32>
    %87 = tpu.matmul %32, %86, %cst_56 {dimension_numbers = #tpu.dot_dimension_numbers<[1], [0], [0], [1], [0, 0, 1, 1], [], []>} : vector<256x256xbf16>, vector<256x128xbf16>, vector<256x128xf32> -> vector<256x128xf32>
    %88 = vector.broadcast %34 : vector<256x1xf32> to vector<256x128xf32>
    %89 = arith.mulf %87, %88 : vector<256x128xf32>
    %90 = arith.truncf %89 : vector<256x128xf32> to vector<256x128xbf16>
    %cst_57 = arith.constant dense<0.000000e+00> : vector<256x128xf32>
    %91 = tpu.matmul %33, %86, %cst_57 {dimension_numbers = #tpu.dot_dimension_numbers<[1], [0], [0], [1], [0, 0, 1, 1], [], []>} : vector<256x256xbf16>, vector<256x128xbf16>, vector<256x128xf32> -> vector<256x128xf32>
    %92 = vector.broadcast %35 : vector<256x1xf32> to vector<256x128xf32>
    %93 = arith.mulf %91, %92 : vector<256x128xf32>
    %94 = arith.truncf %93 : vector<256x128xf32> to vector<256x128xbf16>
    %cst_58 = arith.constant dense<0.000000e+00> : vector<256x128xf32>
    %95 = tpu.matmul %90, %82, %cst_58 {dimension_numbers = #tpu.dot_dimension_numbers<[1], [0], [0], [1], [0, 0, 1, 1], [], []>} : vector<256x128xbf16>, vector<128x128xbf16>, vector<256x128xf32> -> vector<256x128xf32>
    %cst_59 = arith.constant dense<0.000000e+00> : vector<256x128xf32>
    %96 = tpu.matmul %94, %83, %cst_59 {dimension_numbers = #tpu.dot_dimension_numbers<[1], [0], [0], [1], [0, 0, 1, 1], [], []>} : vector<256x128xbf16>, vector<128x128xbf16>, vector<256x128xf32> -> vector<256x128xf32>
    %97 = arith.addf %95, %96 : vector<256x128xf32>
    %cst_60 = arith.constant dense<0.000000e+00> : vector<256x128xf32>
    %98 = tpu.matmul %86, %84, %cst_60 {dimension_numbers = #tpu.dot_dimension_numbers<[1], [0], [0], [1], [0, 0, 1, 1], [], []>} : vector<256x128xbf16>, vector<128x128xbf16>, vector<256x128xf32> -> vector<256x128xf32>
    %99 = arith.addf %97, %98 : vector<256x128xf32>
    %100 = vector.broadcast %85 : vector<1x128xf32> to vector<256x128xf32>
    %101 = arith.addf %99, %100 : vector<256x128xf32>
    %c0_61 = arith.constant 0 : index
    %c0_62 = arith.constant 0 : index
    %102 = vector.load %arg26[%c0_61, %c0_62] : memref<256x128xf32, #tpu.memory_space<vmem>>, vector<256x128xf32>
    tpu.vector_store %arg26[%c0_61, %c0_62], %101 {strides = array<i32>} : memref<256x128xf32, #tpu.memory_space<vmem>>, vector<256x128xf32>,
    %103 = arith.truncf %101 : vector<256x128xf32> to vector<256x128xbf16>
    %c0_63 = arith.constant 0 : index
    %c0_64 = arith.constant 0 : index
    %104 = vector.load %arg20[%c0_63, %c0_64] : memref<128x128xbf16, #tpu.memory_space<vmem>>, vector<128x128xbf16>
    %cst_65 = arith.constant dense<0.000000e+00> : vector<256x128xf32>
    %105 = tpu.matmul %103, %104, %cst_65 {dimension_numbers = #tpu.dot_dimension_numbers<[1], [0], [0], [1], [0, 0, 1, 1], [], []>} : vector<256x128xbf16>, vector<128x128xbf16>, vector<256x128xf32> -> vector<256x128xf32>
    %c0_66 = arith.constant 0 : index
    %c0_67 = arith.constant 0 : index
    %106 = vector.load %arg21[%c0_66, %c0_67] : memref<1x128xf32, #tpu.memory_space<vmem>>, vector<1x128xf32>
    %107 = vector.broadcast %106 : vector<1x128xf32> to vector<256x128xf32>
    %108 = arith.addf %105, %107 : vector<256x128xf32>
    %cst_68 = arith.constant 0.000000e+00 : f32
    %109 = vector.broadcast %cst_68 : f32 to vector<256x128xf32>
    %110 = arith.maximumf %108, %109 : vector<256x128xf32>
    %c0_69 = arith.constant 0 : index
    %c0_70 = arith.constant 0 : index
    %111 = vector.load %arg22[%c0_69, %c0_70] : memref<1x128xf32, #tpu.memory_space<vmem>>, vector<1x128xf32>
    %c0_71 = arith.constant 0 : index
    %c0_72 = arith.constant 0 : index
    %112 = vector.load %arg23[%c0_71, %c0_72] : memref<1x128xf32, #tpu.memory_space<vmem>>, vector<1x128xf32>
    %cst_73 = arith.constant dense<0.000000e+00> : vector<256xf32>
    %113 = vector.multi_reduction <add>, %110, %cst_73 [1] : vector<256x128xf32> to vector<256xf32>
    %114 = vector.shape_cast %113 : vector<256xf32> to vector<256x1xf32>
    %cst_74 = arith.constant 1.280000e+02 : f32
    %115 = vector.broadcast %cst_74 : f32 to vector<256x1xf32>
    %116 = arith.divf %114, %115 : vector<256x1xf32>
    %117 = vector.broadcast %116 : vector<256x1xf32> to vector<256x128xf32>
    %118 = arith.subf %110, %117 : vector<256x128xf32>
    %119 = arith.mulf %118, %118 : vector<256x128xf32>
    %cst_75 = arith.constant dense<0.000000e+00> : vector<256xf32>
    %120 = vector.multi_reduction <add>, %119, %cst_75 [1] : vector<256x128xf32> to vector<256xf32>
    %121 = vector.shape_cast %120 : vector<256xf32> to vector<256x1xf32>
    %cst_76 = arith.constant 1.280000e+02 : f32
    %122 = vector.broadcast %cst_76 : f32 to vector<256x1xf32>
    %123 = arith.divf %121, %122 : vector<256x1xf32>
    %124 = vector.broadcast %116 : vector<256x1xf32> to vector<256x128xf32>
    %125 = arith.subf %110, %124 : vector<256x128xf32>
    %cst_77 = arith.constant 9.99999974E-6 : f32
    %126 = vector.broadcast %cst_77 : f32 to vector<256x1xf32>
    %127 = arith.addf %123, %126 : vector<256x1xf32>
    %128 = math.rsqrt %127 : vector<256x1xf32>
    %129 = vector.broadcast %128 : vector<256x1xf32> to vector<256x128xf32>
    %130 = arith.mulf %125, %129 : vector<256x128xf32>
    %131 = vector.broadcast %111 : vector<1x128xf32> to vector<256x128xf32>
    %132 = arith.mulf %130, %131 : vector<256x128xf32>
    %133 = vector.broadcast %112 : vector<1x128xf32> to vector<256x128xf32>
    %134 = arith.addf %132, %133 : vector<256x128xf32>
    %c0_78 = arith.constant 0 : index
    %c0_79 = arith.constant 0 : index
    %135 = vector.load %arg24[%c0_78, %c0_79] : memref<2x128xf32, #tpu.memory_space<vmem>>, vector<2x128xf32>
    %136 = vector.extract_strided_slice %135 {offsets = [0, 0], sizes = [1, 128], strides = [1, 1]} : vector<2x128xf32> to vector<1x128xf32>
    %137 = vector.broadcast %136 : vector<1x128xf32> to vector<256x128xf32>
    %138 = arith.mulf %134, %137 : vector<256x128xf32>
    %cst_80 = arith.constant dense<0.000000e+00> : vector<256xf32>
    %139 = vector.multi_reduction <add>, %138, %cst_80 [1] : vector<256x128xf32> to vector<256xf32>
    %140 = vector.shape_cast %139 : vector<256xf32> to vector<256x1xf32>
    %141 = vector.extract_strided_slice %135 {offsets = [1, 0], sizes = [1, 128], strides = [1, 1]} : vector<2x128xf32> to vector<1x128xf32>
    %142 = vector.broadcast %141 : vector<1x128xf32> to vector<256x128xf32>
    %143 = arith.mulf %134, %142 : vector<256x128xf32>
    %cst_81 = arith.constant dense<0.000000e+00> : vector<256xf32>
    %144 = vector.multi_reduction <add>, %143, %cst_81 [1] : vector<256x128xf32> to vector<256xf32>
    %145 = vector.shape_cast %144 : vector<256xf32> to vector<256x1xf32>
    %146 = tpu.iota {dimensions = array<i32: 1>} : vector<256x2xi32>
    %c0_i32 = arith.constant 0 : i32
    %147 = vector.broadcast %c0_i32 : i32 to vector<256x2xi32>
    %148 = arith.cmpi eq, %146, %147 : vector<256x2xi32>
    %149 = vector.shape_cast %140 : vector<256x1xf32> to vector<256x1xf32>
    %150 = vector.broadcast %149 : vector<256x1xf32> to vector<256x2xf32>
    %151 = vector.shape_cast %145 : vector<256x1xf32> to vector<256x1xf32>
    %152 = vector.broadcast %151 : vector<256x1xf32> to vector<256x2xf32>
    %153 = arith.select %148, %150, %152 : vector<256x2xi1>, vector<256x2xf32>
    %c0_82 = arith.constant 0 : index
    %c0_83 = arith.constant 0 : index
    %154 = vector.load %arg25[%c0_82, %c0_83] : memref<1x2xf32, #tpu.memory_space<vmem>>, vector<1x2xf32>
    %155 = vector.broadcast %154 : vector<1x2xf32> to vector<256x2xf32>
    %156 = arith.addf %153, %155 : vector<256x2xf32>
    %157 = arith.negf %156 : vector<256x2xf32>
    %158 = math.exp %157 : vector<256x2xf32>
    %cst_84 = arith.constant 1.000000e+00 : f32
    %159 = vector.broadcast %cst_84 : f32 to vector<256x2xf32>
    %160 = arith.addf %159, %158 : vector<256x2xf32>
    %161 = arith.divf %159, %160 : vector<256x2xf32>
    %c0_85 = arith.constant 0 : index
    %c0_86 = arith.constant 0 : index
    %162 = vector.load %arg27[%c0_85, %c0_86] : memref<256x2xf32, #tpu.memory_space<vmem>>, vector<256x2xf32>
    tpu.vector_store %arg27[%c0_85, %c0_86], %161 {strides = array<i32>} : memref<256x2xf32, #tpu.memory_space<vmem>>, vector<256x2xf32>,
    return
  }
}

module attributes {stable_mosaic.version = 11 : i64} {
  func.func @piano_svsep_edge_kernel(%arg0: i32, %arg1: memref<256x128xbf16, #tpu.memory_space<vmem>>, %arg2: memref<256x128xbf16, #tpu.memory_space<vmem>>, %arg3: memref<256x128xf32, #tpu.memory_space<vmem>>, %arg4: memref<128x128xbf16, #tpu.memory_space<vmem>>, %arg5: memref<128x128xbf16, #tpu.memory_space<vmem>>, %arg6: memref<1x128xf32, #tpu.memory_space<vmem>>, %arg7: memref<1x128xf32, #tpu.memory_space<vmem>>, %arg8: memref<1x128xf32, #tpu.memory_space<vmem>>, %arg9: memref<1x1xf32, #tpu.memory_space<vmem>>, %arg10: memref<256x1xf32, #tpu.memory_space<vmem>>) attributes {dimension_semantics = [#tpu.dimension_semantics<parallel>], iteration_bounds = array<i64: 2>, scalar_prefetch = 0 : i64, scratch_operands = 0 : i64, tpu.core_type = #tpu.core_type<tc>, window_params = [{transform_indices = @transform_0, window_bounds = array<i64: 256, 128>}, {transform_indices = @transform_1, window_bounds = array<i64: 256, 128>}, {transform_indices = @transform_2, window_bounds = array<i64: 256, 128>}, {pipeline_mode = #tpu.pipeline_mode<synchronous>, transform_indices = @transform_3, window_bounds = array<i64: 128, 128>}, {pipeline_mode = #tpu.pipeline_mode<synchronous>, transform_indices = @transform_4, window_bounds = array<i64: 128, 128>}, {pipeline_mode = #tpu.pipeline_mode<synchronous>, transform_indices = @transform_5, window_bounds = array<i64: 1, 128>}, {pipeline_mode = #tpu.pipeline_mode<synchronous>, transform_indices = @transform_6, window_bounds = array<i64: 1, 128>}, {pipeline_mode = #tpu.pipeline_mode<synchronous>, transform_indices = @transform_7, window_bounds = array<i64: 1, 128>}, {pipeline_mode = #tpu.pipeline_mode<synchronous>, transform_indices = @transform_8, window_bounds = array<i64: 1, 1>}, {transform_indices = @transform_9, window_bounds = array<i64: 256, 1>}]} {
    %c0 = arith.constant 0 : index
    %c0_0 = arith.constant 0 : index
    %0 = vector.load %arg1[%c0, %c0_0] : memref<256x128xbf16, #tpu.memory_space<vmem>>, vector<256x128xbf16>
    %c0_1 = arith.constant 0 : index
    %c0_2 = arith.constant 0 : index
    %1 = vector.load %arg4[%c0_1, %c0_2] : memref<128x128xbf16, #tpu.memory_space<vmem>>, vector<128x128xbf16>
    %cst = arith.constant dense<0.000000e+00> : vector<256x128xf32>
    %2 = tpu.matmul %0, %1, %cst {dimension_numbers = #tpu.dot_dimension_numbers<[1], [0], [0], [1], [0, 0, 1, 1], [], []>} : vector<256x128xbf16>, vector<128x128xbf16>, vector<256x128xf32> -> vector<256x128xf32>
    %c0_3 = arith.constant 0 : index
    %c0_4 = arith.constant 0 : index
    %3 = vector.load %arg2[%c0_3, %c0_4] : memref<256x128xbf16, #tpu.memory_space<vmem>>, vector<256x128xbf16>
    %c0_5 = arith.constant 0 : index
    %c0_6 = arith.constant 0 : index
    %4 = vector.load %arg5[%c0_5, %c0_6] : memref<128x128xbf16, #tpu.memory_space<vmem>>, vector<128x128xbf16>
    %cst_7 = arith.constant dense<0.000000e+00> : vector<256x128xf32>
    %5 = tpu.matmul %3, %4, %cst_7 {dimension_numbers = #tpu.dot_dimension_numbers<[1], [0], [0], [1], [0, 0, 1, 1], [], []>} : vector<256x128xbf16>, vector<128x128xbf16>, vector<256x128xf32> -> vector<256x128xf32>
    %6 = arith.addf %2, %5 : vector<256x128xf32>
    %c0_8 = arith.constant 0 : index
    %c0_9 = arith.constant 0 : index
    %7 = vector.load %arg3[%c0_8, %c0_9] : memref<256x128xf32, #tpu.memory_space<vmem>>, vector<256x128xf32>
    %8 = arith.addf %6, %7 : vector<256x128xf32>
    %cst_10 = arith.constant 0.000000e+00 : f32
    %9 = vector.broadcast %cst_10 : f32 to vector<256x128xf32>
    %10 = arith.maximumf %8, %9 : vector<256x128xf32>
    %cst_11 = arith.constant dense<0.000000e+00> : vector<256xf32>
    %11 = vector.multi_reduction <add>, %10, %cst_11 [1] : vector<256x128xf32> to vector<256xf32>
    %12 = vector.shape_cast %11 : vector<256xf32> to vector<256x1xf32>
    %cst_12 = arith.constant 1.280000e+02 : f32
    %13 = vector.broadcast %cst_12 : f32 to vector<256x1xf32>
    %14 = arith.divf %12, %13 : vector<256x1xf32>
    %15 = vector.broadcast %14 : vector<256x1xf32> to vector<256x128xf32>
    %16 = arith.subf %10, %15 : vector<256x128xf32>
    %17 = arith.mulf %16, %16 : vector<256x128xf32>
    %cst_13 = arith.constant dense<0.000000e+00> : vector<256xf32>
    %18 = vector.multi_reduction <add>, %17, %cst_13 [1] : vector<256x128xf32> to vector<256xf32>
    %19 = vector.shape_cast %18 : vector<256xf32> to vector<256x1xf32>
    %cst_14 = arith.constant 1.280000e+02 : f32
    %20 = vector.broadcast %cst_14 : f32 to vector<256x1xf32>
    %21 = arith.divf %19, %20 : vector<256x1xf32>
    %22 = vector.broadcast %14 : vector<256x1xf32> to vector<256x128xf32>
    %23 = arith.subf %10, %22 : vector<256x128xf32>
    %cst_15 = arith.constant 9.99999974E-6 : f32
    %24 = vector.broadcast %cst_15 : f32 to vector<256x1xf32>
    %25 = arith.addf %21, %24 : vector<256x1xf32>
    %26 = math.rsqrt %25 : vector<256x1xf32>
    %27 = vector.broadcast %26 : vector<256x1xf32> to vector<256x128xf32>
    %28 = arith.mulf %23, %27 : vector<256x128xf32>
    %c0_16 = arith.constant 0 : index
    %c0_17 = arith.constant 0 : index
    %29 = vector.load %arg6[%c0_16, %c0_17] : memref<1x128xf32, #tpu.memory_space<vmem>>, vector<1x128xf32>
    %30 = vector.broadcast %29 : vector<1x128xf32> to vector<256x128xf32>
    %31 = arith.mulf %28, %30 : vector<256x128xf32>
    %c0_18 = arith.constant 0 : index
    %c0_19 = arith.constant 0 : index
    %32 = vector.load %arg7[%c0_18, %c0_19] : memref<1x128xf32, #tpu.memory_space<vmem>>, vector<1x128xf32>
    %33 = vector.broadcast %32 : vector<1x128xf32> to vector<256x128xf32>
    %34 = arith.addf %31, %33 : vector<256x128xf32>
    %c0_20 = arith.constant 0 : index
    %c0_21 = arith.constant 0 : index
    %35 = vector.load %arg8[%c0_20, %c0_21] : memref<1x128xf32, #tpu.memory_space<vmem>>, vector<1x128xf32>
    %36 = vector.broadcast %35 : vector<1x128xf32> to vector<256x128xf32>
    %37 = arith.mulf %34, %36 : vector<256x128xf32>
    %cst_22 = arith.constant dense<0.000000e+00> : vector<256xf32>
    %38 = vector.multi_reduction <add>, %37, %cst_22 [1] : vector<256x128xf32> to vector<256xf32>
    %39 = vector.shape_cast %38 : vector<256xf32> to vector<256x1xf32>
    %c0_23 = arith.constant 0 : index
    %c0_24 = arith.constant 0 : index
    %40 = vector.load %arg9[%c0_23, %c0_24] : memref<1x1xf32, #tpu.memory_space<vmem>>, vector<1x1xf32>
    %41 = vector.broadcast %40 : vector<1x1xf32> to vector<256x1xf32>
    %42 = arith.addf %39, %41 : vector<256x1xf32>
    %c0_25 = arith.constant 0 : index
    %c0_26 = arith.constant 0 : index
    %43 = vector.load %arg10[%c0_25, %c0_26] : memref<256x1xf32, #tpu.memory_space<vmem>>, vector<256x1xf32>
    tpu.vector_store %arg10[%c0_25, %c0_26], %42 {strides = array<i32>} : memref<256x1xf32, #tpu.memory_space<vmem>>, vector<256x1xf32>,
    return
  }
  func.func @transform_0(%arg0: i32) -> (i32, i32) {
    %c0_i32 = arith.constant 0 : i32
    %c0_i32_0 = arith.constant 0 : i32
    return %arg0, %c0_i32 : i32, i32
  }
  func.func @transform_1(%arg0: i32) -> (i32, i32) {
    %c0_i32 = arith.constant 0 : i32
    %c0_i32_0 = arith.constant 0 : i32
    return %arg0, %c0_i32 : i32, i32
  }
  func.func @transform_2(%arg0: i32) -> (i32, i32) {
    %c0_i32 = arith.constant 0 : i32
    %c0_i32_0 = arith.constant 0 : i32
    return %arg0, %c0_i32 : i32, i32
  }
  func.func @transform_3(%arg0: i32) -> (i32, i32) {
    %c0_i32 = arith.constant 0 : i32
    %c0_i32_0 = arith.constant 0 : i32
    %c0_i32_1 = arith.constant 0 : i32
    return %c0_i32, %c0_i32_0 : i32, i32
  }
  func.func @transform_4(%arg0: i32) -> (i32, i32) {
    %c0_i32 = arith.constant 0 : i32
    %c0_i32_0 = arith.constant 0 : i32
    %c0_i32_1 = arith.constant 0 : i32
    return %c0_i32, %c0_i32_0 : i32, i32
  }
  func.func @transform_5(%arg0: i32) -> (i32, i32) {
    %c0_i32 = arith.constant 0 : i32
    %c0_i32_0 = arith.constant 0 : i32
    %c0_i32_1 = arith.constant 0 : i32
    return %c0_i32, %c0_i32_0 : i32, i32
  }
  func.func @transform_6(%arg0: i32) -> (i32, i32) {
    %c0_i32 = arith.constant 0 : i32
    %c0_i32_0 = arith.constant 0 : i32
    %c0_i32_1 = arith.constant 0 : i32
    return %c0_i32, %c0_i32_0 : i32, i32
  }
  func.func @transform_7(%arg0: i32) -> (i32, i32) {
    %c0_i32 = arith.constant 0 : i32
    %c0_i32_0 = arith.constant 0 : i32
    %c0_i32_1 = arith.constant 0 : i32
    return %c0_i32, %c0_i32_0 : i32, i32
  }
  func.func @transform_8(%arg0: i32) -> (i32, i32) {
    %c0_i32 = arith.constant 0 : i32
    %c0_i32_0 = arith.constant 0 : i32
    %c0_i32_1 = arith.constant 0 : i32
    return %c0_i32, %c0_i32_0 : i32, i32
  }
  func.func @transform_9(%arg0: i32) -> (i32, i32) {
    %c0_i32 = arith.constant 0 : i32
    %c0_i32_0 = arith.constant 0 : i32
    return %arg0, %c0_i32 : i32, i32
  }
}

</mosaic_0001>

<bundles_post_ra>
// kernel: piano_svsep_forward.3
= control target key start
LH: loop header
LB: loop body
LE: loop exit
PB: predicated region body
PF: predicated region fallthrough
CT: control target
= control target key end

     0   :  { %s2295_s11 = smov 0   ;;  %s3039_s0 = inlined_call_operand.vmem [shape: bf16[512,128], index: 0, kind: input, shape index: {}]   ;;  %s3040_s1 = inlined_call_operand.vmem [shape: bf16[512,128], index: 1, kind: input, shape index: {}]   ;;  %s3041_s2 = inlined_call_operand.vmem [shape: f32[512,128], index: 2, kind: input, shape index: {}]   ;;  %s3042_s3 = inlined_call_operand.vmem [shape: bf16[128,128], index: 3, kind: input, shape index: {}]   ;;  %s3043_s4 = inlined_call_operand.vmem [shape: bf16[128,128], index: 4, kind: input, shape index: {}]   ;;  %s3044_s5 = inlined_call_operand.vmem [shape: f32[1,128], index: 5, kind: input, shape index: {}]   ;;  %s3045_s6 = inlined_call_operand.vmem [shape: f32[1,128], index: 6, kind: input, shape index: {}]   ;;  %s3046_s7 = inlined_call_operand.vmem [shape: f32[1,128], index: 7, kind: input, shape index: {}]   ;;  %s3047_s8 = inlined_call_operand.<no memory space> [shape: f32[1,1], index: 8, kind: input, shape index: {}]   ;;  %s3048_s9 = inlined_call_operand.vmem [shape: f32[512,1], index: 9, kind: output, shape index: {}]  }
   0x1   :  { %v14_v0 = vstv %s3047_s8 }
   0x2   :  { %15 = vst [vmem:[#allocation2] sm:$0x1] %v14_v0 }
   0x3 LB: > { %s1871_s12 = sadd.s32 4294967295, %s2240_s11   ;;  %p1875_p0 = scmp.ge.s32.totalorder %s2240_s11, 1  ;;  %s2240_s11 = sphi %s2295_s11, %s21_s11  }
   0x4   : > { %p312_p1 = scmp.lt.s32.totalorder %s2240_s11, 3 }
   0x6   : > { %p313_p2 = pnand %p1875_p0, %p312_p1 }
   0x7   : > { %v2122_v1 = vld [vmem:[%s3043_s4] sm:$0xff] (!%p313_p2)   ;;  %s1876_s8 = sshll.u32 (!%p313_p2), %s1871_s12, 5  ;;  %v2124_v3 = vld [vmem:[%s3043_s4 + $0x8] sm:$0xff] (!%p313_p2)   ;;  %v2126_v5 = vld [vmem:[%s3043_s4 + $0x10] sm:$0xff] (!%p313_p2)   ;;  %vm1758_vm0 = vcmask (!%p313_p2), 7168  }
   0x8   : > { %316 = sbr.rel (%p313_p2) target bundleno = 781 (0x30d), region = 56  ;;  %v2123_v2 = vld [vmem:[%s3042_s3] sm:$0xff] (!%p313_p2)   ;;  %1986 = vmatprep.subr.bf16.mxu1 (!%p313_p2), %v2122_v1  ;;  %p359_p3 = scmp.lt.s32.totalorder (!%p313_p2), %s1876_s8, 63  ;;  %v2125_v4 = vld [vmem:[%s3042_s3 + $0x8] sm:$0xff] (!%p313_p2)   ;;  %v2127_v6 = vld [vmem:[%s3042_s3 + $0x10] sm:$0xff] (!%p313_p2)  }
   0x9   : > { %2034 = vmatprep.subr.bf16.mxu0 (!%p313_p2), %v2123_v2  ;;  %1987 = vmatpush3.bf16.msra.mxu1 (!%p313_p2), %v2122_v1  ;;  %v2128_v7 = vld [vmem:[%s3043_s4 + $0x18] sm:$0xff] (!%p313_p2)   ;;  %v2130_v9 = vld [vmem:[%s3043_s4 + $0x20] sm:$0xff] (!%p313_p2)   ;;  %v2132_v11 = vld [vmem:[%s3043_s4 + $0x28] sm:$0xff] (!%p313_p2)  }
   0xa   : > { %2035 = vmatpush3.bf16.msra.mxu0 (!%p313_p2), %v2123_v2  ;;  %1988 = vmatprep.subr.bf16.mxu1 (!%p313_p2), %v2124_v3  ;;  %v2129_v8 = vld [vmem:[%s3042_s3 + $0x18] sm:$0xff] (!%p313_p2)   ;;  %v2131_v10 = vld [vmem:[%s3042_s3 + $0x20] sm:$0xff] (!%p313_p2)   ;;  %v2133_v12 = vld [vmem:[%s3042_s3 + $0x28] sm:$0xff] (!%p313_p2)  }
   0xb   : > { %2036 = vmatprep.subr.bf16.mxu0 (!%p313_p2), %v2125_v4  ;;  %v2134_v15 = vld [vmem:[%s3043_s4 + $0x30] sm:$0xff] (!%p313_p2)   ;;  %v2136_v17 = vld [vmem:[%s3043_s4 + $0x38] sm:$0xff] (!%p313_p2)  }
   0xc   : > { %v2135_v16 = vld [vmem:[%s3042_s3 + $0x30] sm:$0xff] (!%p313_p2)   ;;  %v2137_v18 = vld [vmem:[%s3042_s3 + $0x38] sm:$0xff] (!%p313_p2)  }
   0xd   : > { %1989 = vmatpush3.bf16.msra.mxu1 (!%p313_p2), %v2124_v3 }
   0xe   : > { %2037 = vmatpush3.bf16.msra.mxu0 (!%p313_p2), %v2125_v4  ;;  %1990 = vmatprep.subr.bf16.mxu1 (!%p313_p2), %v2126_v5 }
   0xf   : > { %s3072_s8 = smov (!%p359_p3, %s1876_s8), 63  ;;  %2038 = vmatprep.subr.bf16.mxu0 %v2127_v6 }
  0x10   : > { %s1877_s29 = sshll.u32 %s3072_s8, 2  ;;  %s1881_s12 = sshll.u32 %s3072_s8, 3 }
  0x11   : > { %1991 = vmatpush3.bf16.msra.mxu1 %v2126_v5  ;;  %s2339_s16 = scalar_lea.vmem %s3040_s1, %s1877_s29  ;;  %s2347_s21 = scalar_lea.vmem %s3039_s0, %s1877_s29 }
  0x12   : > { %2039 = vmatpush3.bf16.msra.mxu0 %v2127_v6  ;;  %1992 = vmatprep.subr.bf16.mxu1 %v2128_v7  ;;  %v2138_v13 = vld [vmem:[%s2339_s16] sm:$0xff]   ;;  %v2140_v19 = vld [vmem:[%s2339_s16 + $0x8] sm:$0xff]   ;;  %v2142_v21 = vld [vmem:[%s2339_s16 + $0x10] sm:$0xff]   ;;  %s2402_s15 = scalar_lea.vmem %s3041_s2, %s1881_s12  ;;  %s2938_s24 = scalar_lea.vmem %s3048_s9, %s1881_s12 }
  0x13   : > { %2040 = vmatprep.subr.bf16.mxu0 %v2129_v8  ;;  %v2139_v14 = vld [vmem:[%s2347_s21] sm:$0xff]   ;;  %2002 = vmatprep.mubr.bf16.mxu1 %v2138_v13  ;;  %v2141_v20 = vld [vmem:[%s2347_s21 + $0x8] sm:$0xff]   ;;  %v2143_v22 = vld [vmem:[%s2347_s21 + $0x10] sm:$0xff]  }
  0x14   : > { %2050 = vmatprep.mubr.bf16.mxu0 %v2139_v14  ;;  %v2144_v23 = vld [vmem:[%s2339_s16 + $0x18] sm:$0xff]   ;;  %v2146_v25 = vld [vmem:[%s2339_s16 + $0x20] sm:$0xff]   ;;  %v2148_v27 = vld [vmem:[%s2339_s16 + $0x28] sm:$0xff]  }
  0x15   : > { %1993 = vmatpush3.bf16.msra.mxu1 %v2128_v7  ;;  %v2145_v24 = vld [vmem:[%s2347_s21 + $0x18] sm:$0xff]   ;;  %v2147_v26 = vld [vmem:[%s2347_s21 + $0x20] sm:$0xff]   ;;  %v2149_v28 = vld [vmem:[%s2347_s21 + $0x28] sm:$0xff]  }
  0x16   : > { %2041 = vmatpush3.bf16.msra.mxu0 %v2129_v8  ;;  %1994 = vmatprep.subr.bf16.mxu1 %v2130_v9  ;;  %v2150_v29 = vld [vmem:[%s2339_s16 + $0x30] sm:$0xff]   ;;  %v2152_v31 = vld [vmem:[%s2339_s16 + $0x38] sm:$0xff]   ;;  %v2154_v33 = vld [vmem:[%s2339_s16 + $0x40] sm:$0xff]  }
  0x17   : > { %2042 = vmatprep.subr.bf16.mxu0 %v2131_v10  ;;  %v2151_v30 = vld [vmem:[%s2347_s21 + $0x30] sm:$0xff]   ;;  %v2153_v32 = vld [vmem:[%s2347_s21 + $0x38] sm:$0xff]   ;;  %v2155_v34 = vld [vmem:[%s2347_s21 + $0x40] sm:$0xff]  }
  0x18   : > { %v2156_v35 = vld [vmem:[%s2339_s16 + $0x48] sm:$0xff]   ;;  %v2158_v37 = vld [vmem:[%s2339_s16 + $0x50] sm:$0xff]   ;;  %v2160_v39 = vld [vmem:[%s2339_s16 + $0x58] sm:$0xff]  }
  0x19   : > { %1995 = vmatpush3.bf16.msra.mxu1 %v2130_v9  ;;  %v2157_v36 = vld [vmem:[%s2347_s21 + $0x48] sm:$0xff]   ;;  %v2159_v38 = vld [vmem:[%s2347_s21 + $0x50] sm:$0xff]   ;;  %v2161_v40 = vld [vmem:[%s2347_s21 + $0x58] sm:$0xff]  }
  0x1a   : > { %2043 = vmatpush3.bf16.msra.mxu0 %v2131_v10  ;;  %1996 = vmatprep.subr.bf16.mxu1 %v2132_v11  ;;  %v2162_v41 = vld [vmem:[%s2339_s16 + $0x60] sm:$0xff]   ;;  %v2164_v43 = vld [vmem:[%s2339_s16 + $0x68] sm:$0xff]   ;;  %v2166_v45 = vld [vmem:[%s2339_s16 + $0x70] sm:$0xff]  }
  0x1b   : > { %2044 = vmatprep.subr.bf16.mxu0 %v2133_v12  ;;  %v2163_v42 = vld [vmem:[%s2347_s21 + $0x60] sm:$0xff]   ;;  %v2165_v44 = vld [vmem:[%s2347_s21 + $0x68] sm:$0xff]   ;;  %v2167_v46 = vld [vmem:[%s2347_s21 + $0x70] sm:$0xff]  }
  0x1c   : > { %v2168_v47 = vld [vmem:[%s2339_s16 + $0x78] sm:$0xff]   ;;  %v1091_v52 = vld [vmem:[%s2402_s15 + $0x10] sm:$0xff]  ;;  %v1089_v56 = vld [vmem:[%s2402_s15] sm:$0xff] }
  0x1d   : > { %1997 = vmatpush3.bf16.msra.mxu1 %v2132_v11  ;;  %v2169_v48 = vld [vmem:[%s2347_s21 + $0x78] sm:$0xff]   ;;  %v1090_v0 = vld [vmem:[%s2402_s15 + $0x8] sm:$0xff]  ;;  %v1095_v10 = vld [vmem:[%s2402_s15 + $0x30] sm:$0xff] }
  0x1e   : > { %2045 = vmatpush3.bf16.msra.mxu0 %v2133_v12  ;;  %1998 = vmatprep.subr.bf16.mxu1 %v2134_v15  ;;  %v1092_v60 = vld [vmem:[%s2402_s15 + $0x18] sm:$0xff] }
  0x1f   : > { %2046 = vmatprep.subr.bf16.mxu0 %v2135_v16 }
  0x21   : > { %1999 = vmatpush3.bf16.msra.mxu1 %v2134_v15 }
  0x22   : > { %2047 = vmatpush3.bf16.msra.mxu0 %v2135_v16  ;;  %2000 = vmatprep.subr.bf16.mxu1 %v2136_v17 }
  0x23   : > { %2048 = vmatprep.subr.bf16.mxu0 %v2137_v18 }
  0x25   : > { %2001 = vmatpush3.bf16.msra.mxu1 %v2136_v17 }
  0x26   : > { %2049 = vmatpush3.bf16.msra.mxu0 %v2137_v18 }
  0x28   : > { %2003 = vmatmul.mubr.bf16.vlgmr.msra.gmra.mrb[0].mxu1 %v2140_v19  ;;  %v1096_v19 = vld [vmem:[%s2402_s15 + $0x38] sm:$0xff] }
  0x29   : > { %2051 = vmatmul.mubr.bf16.vlgmr.msra.gmra.mrb[0].mxu0 %v2141_v20  ;;  %2006 = vmatprep.mubr.bf16.mxu1 %v2142_v21 }
  0x2a   : > { %2054 = vmatprep.mubr.bf16.mxu0 %v2143_v22 }
  0x30   : > { %2007 = vmatmul.mubr.bf16.gmra.mrb[4].mxu1 %v2144_v23  ;;  %v1093_v23 = vld [vmem:[%s2402_s15 + $0x20] sm:$0xff] }
  0x31   : > { %2055 = vmatmul.mubr.bf16.gmra.mrb[4].mxu0 %v2145_v24  ;;  %2010 = vmatprep.mubr.bf16.mxu1 %v2146_v25  ;;  %v1094_v25 = vld [vmem:[%s2402_s15 + $0x28] sm:$0xff] }
  0x32   : > { %2058 = vmatprep.mubr.bf16.mxu0 %v2147_v26 }
  0x38   : > { %2011 = vmatmul.mubr.bf16.gmra.mrb[8].mxu1 %v2148_v27 }
  0x39   : > { %2059 = vmatmul.mubr.bf16.gmra.mrb[8].mxu0 %v2149_v28  ;;  %2014 = vmatprep.mubr.bf16.mxu1 %v2150_v29 }
  0x3a   : > { %2062 = vmatprep.mubr.bf16.mxu0 %v2151_v30 }
  0x40   : > { %2015 = vmatmul.mubr.bf16.gmra.mrb[12].mxu1 %v2152_v31 }
  0x41   : > { %2063 = vmatmul.mubr.bf16.gmra.mrb[12].mxu0 %v2153_v32  ;;  %2018 = vmatprep.mubr.bf16.mxu1 %v2154_v33 }
  0x42   : > { %2066 = vmatprep.mubr.bf16.mxu0 %v2155_v34  ;;  %v1099_v34 = vld [vmem:[%s2402_s15 + $0x50] sm:$0xff] }
  0x48   : > { %2019 = vmatmul.mubr.bf16.gmra.mrb[16].mxu1 %v2156_v35 }
  0x49   : > { %2067 = vmatmul.mubr.bf16.gmra.mrb[16].mxu0 %v2157_v36  ;;  %2022 = vmatprep.mubr.bf16.mxu1 %v2158_v37 }
  0x4a   : > { %2070 = vmatprep.mubr.bf16.mxu0 %v2159_v38 }
  0x50   : > { %2023 = vmatmul.mubr.bf16.gmra.mrb[20].mxu1 %v2160_v39 }
  0x51   : > { %2071 = vmatmul.mubr.bf16.gmra.mrb[20].mxu0 %v2161_v40  ;;  %2026 = vmatprep.mubr.bf16.mxu1 %v2162_v41 }
  0x52   : > { %2074 = vmatprep.mubr.bf16.mxu0 %v2163_v42  ;;  %v1100_v42 = vld [vmem:[%s2402_s15 + $0x58] sm:$0xff] }
  0x58   : > { %2027 = vmatmul.mubr.bf16.gmra.mrb[24].mxu1 %v2164_v43 }
  0x59   : > { %2075 = vmatmul.mubr.bf16.gmra.mrb[24].mxu0 %v2165_v44  ;;  %2030 = vmatprep.mubr.bf16.mxu1 %v2166_v45 }
  0x5a   : > { %2078 = vmatprep.mubr.bf16.mxu0 %v2167_v46 }
  0x60   : > { %2031 = vmatmul.mubr.bf16.gmra.mrb[28].mxu1 %v2168_v47  ;;  %v1097_v47 = vld [vmem:[%s2402_s15 + $0x40] sm:$0xff] }
  0x61   : > { %2079 = vmatmul.mubr.bf16.gmra.mrb[28].mxu0 %v2169_v48 }
  0xfb   : > { %v2004_v49 = vpop.f32.mrb[0].mxu1 }
  0xfc   : > { %v2052_v50 = vpop.f32.mrb[0].mxu0  ;;  %v657_v51 = vpop.f32.mrb[1].mxu1 }
  0xfd   : > { %v971_v53 = vadd.f32 %v2052_v50, %v2004_v49  ;;  %v962_v54 = vpop.f32.mrb[1].mxu0  ;;  %v2005_v55 = vpop.f32.mrb[2].mxu1  ;;  %v1098_v49 = vld [vmem:[%s2402_s15 + $0x48] sm:$0xff] }
  0xfe   : > { %v963_v57 = vadd.f32 %v962_v54, %v657_v51  ;;  %v2053_v58 = vpop.f32.mrb[2].mxu0  ;;  %v660_v59 = vpop.f32.mrb[3].mxu1 }
  0xff   : > { %v974_v61 = vadd.f32 %v2053_v58, %v2005_v55  ;;  %v965_v62 = vpop.f32.mrb[3].mxu0  ;;  %v2407_v63 = vadd.f32 %v1091_v52, %v971_v53  ;;  %v1103_v58 = vld [vmem:[%s2402_s15 + $0x70] sm:$0xff] }
 0x100   : > { %v966_v1 = vadd.f32 %v965_v62, %v660_v59  ;;  %v2410_v2 = vadd.f32 %v1089_v56, %v963_v57 }
 0x101   : > { %v1155_v3 = vmax.f32 %v2407_v63, 0.0  ;;  %v2413_v4 = vadd.f32 %v1092_v60, %v974_v61 }
 0x102   : > { %v1153_v5 = vmax.f32 %v2410_v2, 0.0  ;;  %v2416_v6 = vadd.f32 %v1090_v0, %v966_v1 }
 0x103   : > { %1189 = vadd.xlane.f32.xlu1 %v1155_v3  ;;  %v2008_v7 = vpop.f32.mrb[4].mxu1  ;;  %v1156_v14 = vmax.f32 %v2413_v4, 0.0 }
 0x104   : > { %v2056_v8 = vpop.f32.mrb[4].mxu0  ;;  %1185 = vadd.xlane.f32.xlu0 %v1153_v5  ;;  %v673_v9 = vpop.f32.mrb[5].mxu1  ;;  %v1154_v18 = vmax.f32 %v2416_v6, 0.0 }
 0x105   : > { %v987_v11 = vadd.f32 %v2056_v8, %v2008_v7  ;;  %v978_v12 = vpop.f32.mrb[5].mxu0  ;;  %v2009_v13 = vpop.f32.mrb[6].mxu1  ;;  %v1104_v8 = vld [vmem:[%s2402_s15 + $0x78] sm:$0xff] }
 0x106   : > { %v979_v15 = vadd.f32 %v978_v12, %v673_v9  ;;  %v2057_v16 = vpop.f32.mrb[6].mxu0  ;;  %v676_v17 = vpop.f32.mrb[7].mxu1 }
 0x107   : > { %v990_v20 = vadd.f32 %v2057_v16, %v2009_v13  ;;  %1191 = vadd.xlane.f32.xlu1 %v1156_v14  ;;  %v981_v21 = vpop.f32.mrb[7].mxu0  ;;  %v2428_v22 = vadd.f32 %v1095_v10, %v987_v11  ;;  %v1101_v13 = vld [vmem:[%s2402_s15 + $0x60] sm:$0xff]  ;;  %v1102_v16 = vld [vmem:[%s2402_s15 + $0x68] sm:$0xff] }
 0x108   : > { %v982_v24 = vadd.f32 %v981_v21, %v676_v17  ;;  %1187 = vadd.xlane.f32.xlu0 %v1154_v18  ;;  %v2437_v28 = vadd.f32 %v1093_v23, %v979_v15 }
 0x109   : > { %v1159_v26 = vmax.f32 %v2428_v22, 0.0  ;;  %v2435_v27 = vadd.f32 %v1096_v19, %v990_v20 }
 0x10a   : > { %v2440_v31 = vadd.f32 %v1094_v25, %v982_v24  ;;  %v1157_v41 = vmax.f32 %v2437_v28, 0.0 }
 0x10b   : > { %v2012_v29 = vpop.f32.mrb[8].mxu1  ;;  %v1160_v30 = vmax.f32 %v2435_v27, 0.0 }
 0x10c   : > { %v2060_v32 = vpop.f32.mrb[8].mxu0  ;;  %1197 = vadd.xlane.f32.xlu0 %v1159_v26  ;;  %v689_v33 = vpop.f32.mrb[9].mxu1  ;;  %v1158_v45 = vmax.f32 %v2440_v31, 0.0 }
 0x10d   : > { %v1003_v35 = vadd.f32 %v2060_v32, %v2012_v29  ;;  %1199 = vadd.xlane.f32.xlu1 %v1160_v30  ;;  %v994_v36 = vpop.f32.mrb[9].mxu0  ;;  %v2013_v37 = vpop.f32.mrb[10].mxu1  ;;  %v1107_v32 = vld [vmem:[%s2402_s15 + $0x90] sm:$0xff] }
 0x10e   : > { %v995_v38 = vadd.f32 %v994_v36, %v689_v33  ;;  %v2061_v39 = vpop.f32.mrb[10].mxu0  ;;  %v692_v40 = vpop.f32.mrb[11].mxu1 }
 0x10f   : > { %v1006_v43 = vadd.f32 %v2061_v39, %v2013_v37  ;;  %v997_v44 = vpop.f32.mrb[11].mxu0  ;;  %v2450_v46 = vadd.f32 %v1099_v34, %v1003_v35 }
 0x110   : > { %v998_v48 = vadd.f32 %v997_v44, %v692_v40  ;;  %1193 = vadd.xlane.f32.xlu0 %v1157_v41  ;;  %v2461_v52 = vadd.f32 %v1097_v47, %v995_v38  ;;  %v1108_v40 = vld [vmem:[%s2402_s15 + $0x98] sm:$0xff] }
 0x111   : > { %1195 = vadd.xlane.f32.xlu1 %v1158_v45  ;;  %v1163_v50 = vmax.f32 %v2450_v46, 0.0  ;;  %v2459_v51 = vadd.f32 %v1100_v42, %v1006_v43 }
 0x112   : > { %v2464_v55 = vadd.f32 %v1098_v49, %v998_v48  ;;  %v1161_v7 = vmax.f32 %v2461_v52, 0.0  ;;  %v1105_v48 = vld [vmem:[%s2402_s15 + $0x80] sm:$0xff] }
 0x113   : > { %v2016_v53 = vpop.f32.mrb[12].mxu1  ;;  %v1164_v54 = vmax.f32 %v2459_v51, 0.0 }
 0x114   : > { %v2064_v56 = vpop.f32.mrb[12].mxu0  ;;  %1205 = vadd.xlane.f32.xlu0 %v1163_v50  ;;  %v705_v57 = vpop.f32.mrb[13].mxu1  ;;  %v1162_v11 = vmax.f32 %v2464_v55, 0.0 }
 0x115   : > { %v1019_v59 = vadd.f32 %v2064_v56, %v2016_v53  ;;  %v1010_v60 = vpop.f32.mrb[13].mxu0  ;;  %1207 = vadd.xlane.f32.xlu1 %v1164_v54  ;;  %v2017_v61 = vpop.f32.mrb[14].mxu1  ;;  %v1106_v53 = vld [vmem:[%s2402_s15 + $0x88] sm:$0xff] }
 0x116   : > { %v1011_v62 = vadd.f32 %v1010_v60, %v705_v57  ;;  %v2065_v0 = vpop.f32.mrb[14].mxu0  ;;  %v708_v1 = vpop.f32.mrb[15].mxu1 }
 0x117   : > { %v1022_v9 = vadd.f32 %v2065_v0, %v2017_v61  ;;  %v1013_v10 = vpop.f32.mrb[15].mxu0  ;;  %v2474_v12 = vadd.f32 %v1103_v58, %v1019_v59 }
 0x118   : > { %v1014_v15 = vadd.f32 %v1013_v10, %v708_v1  ;;  %1201 = vadd.xlane.f32.xlu0 %v1161_v7  ;;  %v2485_v20 = vadd.f32 %v1101_v13, %v1011_v62  ;;  %v1111_v1 = vld [vmem:[%s2402_s15 + $0xb0] sm:$0xff] }
 0x119   : > { %1203 = vadd.xlane.f32.xlu1 %v1162_v11  ;;  %v1167_v17 = vmax.f32 %v2474_v12, 0.0  ;;  %v2483_v19 = vadd.f32 %v1104_v8, %v1022_v9 }
 0x11a   : > { %v2488_v24 = vadd.f32 %v1102_v16, %v1014_v15  ;;  %v1165_v39 = vmax.f32 %v2485_v20, 0.0 }
 0x11b   : > { %v2020_v21 = vpop.f32.mrb[16].mxu1  ;;  %v1168_v23 = vmax.f32 %v2483_v19, 0.0 }
 0x11c   : > { %v2068_v25 = vpop.f32.mrb[16].mxu0  ;;  %1213 = vadd.xlane.f32.xlu0 %v1167_v17  ;;  %v721_v29 = vpop.f32.mrb[17].mxu1  ;;  %v1166_v44 = vmax.f32 %v2488_v24, 0.0 }
 0x11d   : > { %v1035_v33 = vadd.f32 %v2068_v25, %v2020_v21  ;;  %v1026_v34 = vpop.f32.mrb[17].mxu0  ;;  %1215 = vadd.xlane.f32.xlu1 %v1168_v23  ;;  %v2021_v35 = vpop.f32.mrb[18].mxu1  ;;  %v1112_v25 = vld [vmem:[%s2402_s15 + $0xb8] sm:$0xff] }
 0x11e   : > { %v1027_v36 = vadd.f32 %v1026_v34, %v721_v29  ;;  %v2069_v37 = vpop.f32.mrb[18].mxu0  ;;  %v724_v38 = vpop.f32.mrb[19].mxu1 }
 0x11f   : > { %v1038_v42 = vadd.f32 %v2069_v37, %v2021_v35  ;;  %v1029_v43 = vpop.f32.mrb[19].mxu0  ;;  %v2498_v47 = vadd.f32 %v1107_v32, %v1035_v33  ;;  %v1109_v35 = vld [vmem:[%s2402_s15 + $0xa0] sm:$0xff]  ;;  %v1110_v37 = vld [vmem:[%s2402_s15 + $0xa8] sm:$0xff] }
 0x120   : > { %v1030_v49 = vadd.f32 %v1029_v43, %v724_v38  ;;  %1209 = vadd.xlane.f32.xlu0 %v1165_v39  ;;  %v2509_v58 = vadd.f32 %v1105_v48, %v1027_v36 }
 0x121   : > { %1211 = vadd.xlane.f32.xlu1 %v1166_v44  ;;  %v1171_v56 = vmax.f32 %v2498_v47, 0.0  ;;  %v2507_v57 = vadd.f32 %v1108_v40, %v1038_v42 }
 0x122   : > { %v2512_v61 = vadd.f32 %v1106_v53, %v1030_v49  ;;  %v3055_v21 = vmax.f32 %v2509_v58, 0.0  ;;  %v3060_v47 = vmax.f32 %v2509_v58, 0.0 }
 0x123   : > { %v2024_v59 = vpop.f32.mrb[20].mxu1  ;;  %v1172_v60 = vmax.f32 %v2507_v57, 0.0 }
 0x124   : > { %v2072_v62 = vpop.f32.mrb[20].mxu0  ;;  %1221 = vadd.xlane.f32.xlu0 %v1171_v56  ;;  %v737_v0 = vpop.f32.mrb[21].mxu1  ;;  %v3053_v33 = vmax.f32 %v2512_v61, 0.0  ;;  %v3061_v57 = vmax.f32 %v2512_v61, 0.0 }
 0x125   : > { %v1051_v8 = vadd.f32 %v2072_v62, %v2024_v59  ;;  %v1042_v9 = vpop.f32.mrb[21].mxu0  ;;  %1223 = vadd.xlane.f32.xlu1 %v1172_v60  ;;  %v2025_v10 = vpop.f32.mrb[22].mxu1  ;;  %v1115_v62 = vld [vmem:[%s2402_s15 + $0xd0] sm:$0xff] }
 0x126   : > { %v1043_v13 = vadd.f32 %v1042_v9, %v737_v0  ;;  %v2073_v15 = vpop.f32.mrb[22].mxu0  ;;  %v740_v16 = vpop.f32.mrb[23].mxu1 }
 0x127   : > { %v1054_v29 = vadd.f32 %v2073_v15, %v2025_v10  ;;  %v1045_v32 = vpop.f32.mrb[23].mxu0  ;;  %v2522_v34 = vadd.f32 %v1111_v1, %v1051_v8 }
 0x128   : > { %v1046_v36 = vadd.f32 %v1045_v32, %v740_v16  ;;  %1217 = vadd.xlane.f32.xlu0 %v3055_v21  ;;  %v2533_v42 = vadd.f32 %v1109_v35, %v1043_v13  ;;  %v1116_v16 = vld [vmem:[%s2402_s15 + $0xd8] sm:$0xff] }
 0x129   : > { %1219 = vadd.xlane.f32.xlu1 %v3053_v33  ;;  %v3052_v38 = vmax.f32 %v2522_v34, 0.0  ;;  %v2531_v40 = vadd.f32 %v1112_v25, %v1054_v29  ;;  %v1118_v33 = vld [vmem:[%s2402_s15 + $0xe8] sm:$0xff]  ;;  %v3062_v58 = vmax.f32 %v2522_v34, 0.0 }
 0x12a   : > { %v2536_v49 = vadd.f32 %v1110_v37, %v1046_v36  ;;  %v3050_v15 = vmax.f32 %v2533_v42, 0.0  ;;  %v1113_v36 = vld [vmem:[%s2402_s15 + $0xc0] sm:$0xff]  ;;  %v3064_v34 = vmax.f32 %v2533_v42, 0.0 }
 0x12b   : > { %v2028_v43 = vpop.f32.mrb[24].mxu1  ;;  %v3051_v48 = vmax.f32 %v2531_v40, 0.0  ;;  %v3063_v61 = vmax.f32 %v2531_v40, 0.0 }
 0x12c   : > { %v2076_v53 = vpop.f32.mrb[24].mxu0  ;;  %1229 = vadd.xlane.f32.xlu0 %v3052_v38  ;;  %v753_v59 = vpop.f32.mrb[25].mxu1  ;;  %v3049_v32 = vmax.f32 %v2536_v49, 0.0  ;;  %v3065_v40 = vmax.f32 %v2536_v49, 0.0 }
 0x12d   : > { %v1067_v0 = vadd.f32 %v2076_v53, %v2028_v43  ;;  %v1058_v1 = vpop.f32.mrb[25].mxu0  ;;  %1231 = vadd.xlane.f32.xlu1 %v3051_v48  ;;  %v2029_v8 = vpop.f32.mrb[26].mxu1  ;;  %v1114_v43 = vld [vmem:[%s2402_s15 + $0xc8] sm:$0xff] }
 0x12e   : > { %v1059_v9 = vadd.f32 %v1058_v1, %v753_v59  ;;  %v2077_v10 = vpop.f32.mrb[26].mxu0  ;;  %v756_v13 = vpop.f32.mrb[27].mxu1 }
 0x12f   : > { %v1070_v25 = vadd.f32 %v2077_v10, %v2029_v8  ;;  %v1061_v29 = vpop.f32.mrb[27].mxu0  ;;  %v2546_v35 = vadd.f32 %v1115_v62, %v1067_v0 }
 0x130   : > { %v1062_v37 = vadd.f32 %v1061_v29, %v756_v13  ;;  %1225 = vadd.xlane.f32.xlu0 %v3050_v15  ;;  %v2557_v1 = vadd.f32 %v1113_v36, %v1059_v9 }
 0x131   : > { %1227 = vadd.xlane.f32.xlu1 %v3049_v32  ;;  %v3054_v53 = vmax.f32 %v2546_v35, 0.0  ;;  %v2555_v59 = vadd.f32 %v1116_v16, %v1070_v25  ;;  %v1117_v16 = vld [vmem:[%s2402_s15 + $0xe0] sm:$0xff]  ;;  %v3066_v42 = vmax.f32 %v2546_v35, 0.0 }
 0x132   : > { %v2560_v0 = vadd.f32 %v1114_v43, %v1062_v37  ;;  %v1177_v37 = vmax.f32 %v2557_v1, 0.0 }
 0x133   : > { %v2032_v8 = vpop.f32.mrb[28].mxu1  ;;  %v1180_v62 = vmax.f32 %v2555_v59, 0.0 }
 0x134   : > { %v2080_v10 = vpop.f32.mrb[28].mxu0  ;;  %1237 = vadd.xlane.f32.xlu0 %v3054_v53  ;;  %v769_v13 = vpop.f32.mrb[29].mxu1  ;;  %v3059_v38 = vmax.f32 %v2560_v0, 0.0  ;;  %v1119_v53 = vld [vmem:[%s2402_s15 + $0xf0] sm:$0xff]  ;;  %v3067_v59 = vmax.f32 %v2560_v0, 0.0 }
 0x135   : > { %v1083_v29 = vadd.f32 %v2080_v10, %v2032_v8  ;;  %v1074_v32 = vpop.f32.mrb[29].mxu0  ;;  %1239 = vadd.xlane.f32.xlu1 %v1180_v62  ;;  %v2033_v9 = vpop.f32.mrb[30].mxu1 }
 0x136   : > { %v1075_v25 = vadd.f32 %v1074_v32, %v769_v13  ;;  %v2081_v36 = vpop.f32.mrb[30].mxu0  ;;  %v772_v15 = vpop.f32.mrb[31].mxu1  ;;  %v1120_v32 = vld [vmem:[%s2402_s15 + $0xf8] sm:$0xff] }
 0x137   : > { %v1086_v43 = vadd.f32 %v2081_v36, %v2033_v9  ;;  %v1077_v48 = vpop.f32.mrb[31].mxu0  ;;  %v2581_v9 = vadd.f32 %v1119_v53, %v1083_v29 }
 0x138   : > { %v1078_v21 = vadd.f32 %v1077_v48, %v772_v15  ;;  %1233 = vadd.xlane.f32.xlu0 %v1177_v37  ;;  %v2573_v8 = vadd.f32 %v1117_v16, %v1075_v25 }
 0x139   : > { %1235 = vadd.xlane.f32.xlu1 %v3059_v38  ;;  %v2586_v15 = vadd.f32 %v1120_v32, %v1086_v43  ;;  %v3057_v16 = vmax.f32 %v2581_v9, 0.0 }
 0x13a   : > { %v3058_v10 = vmax.f32 %v2573_v8, 0.0  ;;  %v2579_v13 = vadd.f32 %v1118_v33, %v1078_v21 }
 0x13b   : > { %v1184_v21 = vmax.f32 %v2586_v15, 0.0 }
 0x13c   : > { %1241 = vadd.xlane.f32.xlu0 %v3058_v10  ;;  %v3056_v48 = vmax.f32 %v2579_v13, 0.0 }
 0x13e   : > { %1243 = vadd.xlane.f32.xlu1 %v3056_v48 }
 0x140   : > { %1245 = vadd.xlane.f32.xlu0 %v3057_v16 }
 0x142   : > { %1247 = vadd.xlane.f32.xlu1 %v1184_v21 }
 0x190   : > { %v1190_v33 = vpop.xlane.xlu1 %1189 }
 0x191   : > { %v1252_v53 = vmul.f32 0.0078125, %v1190_v33  ;;  %v1186_v29 = vpop.xlane.xlu0 %1185 }
 0x192   : > { %v1250_v25 = vmul.f32 0.0078125, %v1186_v29 }
 0x193   : > { %v2598_v36 = vsub.f32 %v1155_v3, %v1252_v53 }
 0x194   : > { %v1192_v43 = vpop.xlane.xlu1 %1191  ;;  %v2602_v32 = vsub.f32 %v1153_v5, %v1250_v25 }
 0x195   : > { %v1253_v48 = vmul.f32 0.0078125, %v1192_v43  ;;  %v1188_v16 = vpop.xlane.xlu0 %1187  ;;  %v1316_v10 = vmul.f32 %v2598_v36, %v2598_v36 }
 0x196   : > { %v1251_v38 = vmul.f32 0.0078125, %v1188_v16  ;;  %v1314_v5 = vmul.f32 %v2602_v32, %v2602_v32 }
 0x197   : > { %v2608_v33 = vsub.f32 %v1156_v14, %v1253_v48  ;;  %1350 = vadd.xlane.f32.xlu0 %v1316_v10 }
 0x198   : > { %v2612_v63 = vsub.f32 %v1154_v18, %v1251_v38 }
 0x199   : > { %v1198_v3 = vpop.xlane.xlu0 %1197  ;;  %v1317_v2 = vmul.f32 %v2608_v33, %v2608_v33 }
 0x19a   : > { %v1256_v53 = vmul.f32 0.0078125, %v1198_v3  ;;  %v1200_v29 = vpop.xlane.xlu1 %1199  ;;  %v1315_v18 = vmul.f32 %v2612_v63, %v2612_v63 }
 0x19b   : > { %v1257_v25 = vmul.f32 0.0078125, %v1200_v29  ;;  %1352 = vadd.xlane.f32.xlu1 %v1317_v2  ;;  %1346 = vadd.xlane.f32.xlu0 %v1314_v5 }
 0x19c   : > { %v2620_v4 = vsub.f32 %v1159_v26, %v1256_v53 }
 0x19d   : > { %v2624_v6 = vsub.f32 %v1160_v30, %v1257_v25  ;;  %v1194_v14 = vpop.xlane.xlu0 %1193 }
 0x19e   : > { %v1254_v38 = vmul.f32 0.0078125, %v1194_v14  ;;  %v1196_v10 = vpop.xlane.xlu1 %1195  ;;  %v1320_v48 = vmul.f32 %v2620_v4, %v2620_v4 }
 0x19f   : > { %v1255_v16 = vmul.f32 0.0078125, %v1196_v10  ;;  %1348 = vadd.xlane.f32.xlu1 %v1315_v18  ;;  %v1321_v30 = vmul.f32 %v2624_v6, %v2624_v6 }
 0x1a0   : > { %v2632_v22 = vsub.f32 %v1157_v41, %v1254_v38  ;;  %1358 = vadd.xlane.f32.xlu0 %v1320_v48 }
 0x1a1   : > { %v2636_v26 = vsub.f32 %v1158_v45, %v1255_v16  ;;  %v1206_v27 = vpop.xlane.xlu0 %1205 }
 0x1a2   : > { %v1260_v43 = vmul.f32 0.0078125, %v1206_v27  ;;  %v1208_v3 = vpop.xlane.xlu1 %1207  ;;  %v1318_v2 = vmul.f32 %v2632_v22, %v2632_v22 }
 0x1a3   : > { %v1261_v5 = vmul.f32 0.0078125, %v1208_v3  ;;  %1360 = vadd.xlane.f32.xlu1 %v1321_v30  ;;  %v1319_v45 = vmul.f32 %v2636_v26, %v2636_v26 }
 0x1a4   : > { %v2644_v28 = vsub.f32 %v1163_v50, %v1260_v43  ;;  %1354 = vadd.xlane.f32.xlu0 %v1318_v2 }
 0x1a5   : > { %v2648_v31 = vsub.f32 %v1164_v54, %v1261_v5  ;;  %v1202_v41 = vpop.xlane.xlu0 %1201 }
 0x1a6   : > { %v1258_v53 = vmul.f32 0.0078125, %v1202_v41  ;;  %v1204_v29 = vpop.xlane.xlu1 %1203  ;;  %v1324_v25 = vmul.f32 %v2644_v28, %v2644_v28 }
 0x1a7   : > { %v1259_v14 = vmul.f32 0.0078125, %v1204_v29  ;;  %1356 = vadd.xlane.f32.xlu1 %v1319_v45  ;;  %v1325_v54 = vmul.f32 %v2648_v31, %v2648_v31 }
 0x1a8   : > { %v2656_v46 = vsub.f32 %v1161_v7, %v1258_v53  ;;  %1366 = vadd.xlane.f32.xlu0 %v1324_v25 }
 0x1a9   : > { %v2660_v50 = vsub.f32 %v1162_v11, %v1259_v14  ;;  %v1214_v51 = vpop.xlane.xlu0 %1213 }
 0x1aa   : > { %v1264_v18 = vmul.f32 0.0078125, %v1214_v51  ;;  %v1216_v38 = vpop.xlane.xlu1 %1215  ;;  %v1322_v10 = vmul.f32 %v2656_v46, %v2656_v46 }
 0x1ab   : > { %v1265_v48 = vmul.f32 0.0078125, %v1216_v38  ;;  %1368 = vadd.xlane.f32.xlu1 %v1325_v54  ;;  %v1323_v11 = vmul.f32 %v2660_v50, %v2660_v50 }
 0x1ac   : > { %v2668_v52 = vsub.f32 %v1167_v17, %v1264_v18  ;;  %1362 = vadd.xlane.f32.xlu0 %v1322_v10 }
 0x1ad   : > { %v2672_v55 = vsub.f32 %v1168_v23, %v1265_v48  ;;  %v1210_v7 = vpop.xlane.xlu0 %1209 }
 0x1ae   : > { %v1262_v16 = vmul.f32 0.0078125, %v1210_v7  ;;  %v1212_v27 = vpop.xlane.xlu1 %1211  ;;  %v1328_v30 = vmul.f32 %v2668_v52, %v2668_v52 }
 0x1af   : > { %v1263_v43 = vmul.f32 0.0078125, %v1212_v27  ;;  %1364 = vadd.xlane.f32.xlu1 %v1323_v11  ;;  %v1329_v23 = vmul.f32 %v2672_v55, %v2672_v55 }
 0x1b0   : > { %v2680_v12 = vsub.f32 %v1165_v39, %v1262_v16  ;;  %1374 = vadd.xlane.f32.xlu0 %v1328_v30 }
 0x1b1   : > { %v2684_v17 = vsub.f32 %v1166_v44, %v1263_v43  ;;  %v1222_v19 = vpop.xlane.xlu0 %1221 }
 0x1b2   : > { %v1268_v3 = vmul.f32 0.0078125, %v1222_v19  ;;  %v1224_v2 = vpop.xlane.xlu1 %1223  ;;  %v1326_v5 = vmul.f32 %v2680_v12, %v2680_v12 }
 0x1b3   : > { %v1269_v41 = vmul.f32 0.0078125, %v1224_v2  ;;  %1376 = vadd.xlane.f32.xlu1 %v1329_v23  ;;  %v1327_v44 = vmul.f32 %v2684_v17, %v2684_v17 }
 0x1b4   : > { %v2692_v20 = vsub.f32 %v1171_v56, %v1268_v3  ;;  %1370 = vadd.xlane.f32.xlu0 %v1326_v5 }
 0x1b5   : > { %v2696_v24 = vsub.f32 %v1172_v60, %v1269_v41  ;;  %v1218_v39 = vpop.xlane.xlu0 %1217 }
 0x1b6   : > { %v1266_v45 = vmul.f32 0.0078125, %v1218_v39  ;;  %v1220_v53 = vpop.xlane.xlu1 %1219  ;;  %v1332_v29 = vmul.f32 %v2692_v20, %v2692_v20 }
 0x1b7   : > { %v1267_v25 = vmul.f32 0.0078125, %v1220_v53  ;;  %1372 = vadd.xlane.f32.xlu1 %v1327_v44  ;;  %v1333_v51 = vmul.f32 %v2696_v24, %v2696_v24 }
 0x1b8   : > { %v2704_v56 = vsub.f32 %v3060_v47, %v1266_v45  ;;  %1382 = vadd.xlane.f32.xlu0 %v1332_v29 }
 0x1b9   : > { %v2708_v60 = vsub.f32 %v3061_v57, %v1267_v25  ;;  %v1230_v14 = vpop.xlane.xlu0 %1229 }
 0x1ba   : > { %v1272_v54 = vmul.f32 0.0078125, %v1230_v14  ;;  %v1232_v18 = vpop.xlane.xlu1 %1231  ;;  %v1330_v38 = vmul.f32 %v2704_v56, %v2704_v56 }
 0x1bb   : > { %v1273_v10 = vmul.f32 0.0078125, %v1232_v18  ;;  %1384 = vadd.xlane.f32.xlu1 %v1333_v51  ;;  %v1331_v16 = vmul.f32 %v2708_v60, %v2708_v60 }
 0x1bc   : > { %v2716_v48 = vsub.f32 %v3062_v58, %v1272_v54  ;;  %1378 = vadd.xlane.f32.xlu0 %v1330_v38 }
 0x1bd   : > { %v2720_v7 = vsub.f32 %v3063_v61, %v1273_v10  ;;  %v1226_v11 = vpop.xlane.xlu0 %1225  ;;  %v3068_v61 = vmax.f32 %v2573_v8, 0.0  ;;  %v3070_v8 = vmax.f32 %v2581_v9, 0.0 }
 0x1be   : > { %v1270_v27 = vmul.f32 0.0078125, %v1226_v11  ;;  %v1228_v30 = vpop.xlane.xlu1 %1227  ;;  %v1336_v43 = vmul.f32 %v2716_v48, %v2716_v48 }
 0x1bf   : > { %v1271_v19 = vmul.f32 0.0078125, %v1228_v30  ;;  %1380 = vadd.xlane.f32.xlu1 %v1331_v16  ;;  %v1337_v5 = vmul.f32 %v2720_v7, %v2720_v7  ;;  %v3069_v16 = vmax.f32 %v2579_v13, 0.0 }
 0x1c0   : > { %v2728_v23 = vsub.f32 %v3064_v34, %v1270_v27  ;;  %1390 = vadd.xlane.f32.xlu0 %v1336_v43 }
 0x1c1   : > { %v2732_v3 = vsub.f32 %v3065_v40, %v1271_v19  ;;  %v1238_v2 = vpop.xlane.xlu0 %1237 }
 0x1c2   : > { %v1276_v41 = vmul.f32 0.0078125, %v1238_v2  ;;  %v1240_v39 = vpop.xlane.xlu1 %1239  ;;  %v1334_v44 = vmul.f32 %v2728_v23, %v2728_v23 }
 0x1c3   : > { %v1277_v45 = vmul.f32 0.0078125, %v1240_v39  ;;  %1392 = vadd.xlane.f32.xlu1 %v1337_v5  ;;  %v1335_v25 = vmul.f32 %v2732_v3, %v2732_v3 }
 0x1c4   : > { %v2740_v53 = vsub.f32 %v3066_v42, %v1276_v41  ;;  %1386 = vadd.xlane.f32.xlu0 %v1334_v44 }
 0x1c5   : > { %v2744_v49 = vsub.f32 %v1180_v62, %v1277_v45  ;;  %v1234_v29 = vpop.xlane.xlu0 %1233 }
 0x1c6   : > { %v1274_v47 = vmul.f32 0.0078125, %v1234_v29  ;;  %v1236_v57 = vpop.xlane.xlu1 %1235  ;;  %v1340_v14 = vmul.f32 %v2740_v53, %v2740_v53 }
 0x1c7   : > { %v1275_v51 = vmul.f32 0.0078125, %v1236_v57  ;;  %1388 = vadd.xlane.f32.xlu1 %v1335_v25  ;;  %v1341_v18 = vmul.f32 %v2744_v49, %v2744_v49 }
 0x1c8   : > { %v2752_v35 = vsub.f32 %v1177_v37, %v1274_v47  ;;  %1398 = vadd.xlane.f32.xlu0 %v1340_v14 }
 0x1c9   : > { %v2756_v62 = vsub.f32 %v3067_v59, %v1275_v51  ;;  %v1242_v54 = vpop.xlane.xlu0 %1241 }
 0x1ca   : > { %v1278_v38 = vmul.f32 0.0078125, %v1242_v54  ;;  %v1338_v10 = vmul.f32 %v2752_v35, %v2752_v35 }
 0x1cb   : > { %v1244_v58 = vpop.xlane.xlu1 %1243  ;;  %1400 = vadd.xlane.f32.xlu1 %v1341_v18  ;;  %v1339_v0 = vmul.f32 %v2756_v62, %v2756_v62 }
 0x1cc   : > { %v2764_v1 = vsub.f32 %v3068_v61, %v1278_v38  ;;  %v1279_v37 = vmul.f32 0.0078125, %v1244_v58  ;;  %1394 = vadd.xlane.f32.xlu0 %v1338_v10 }
 0x1cd   : > { %v1246_v11 = vpop.xlane.xlu0 %1245 }
 0x1ce   : > { %v2770_v27 = vsub.f32 %v3069_v16, %v1279_v37  ;;  %v1280_v30 = vmul.f32 0.0078125, %v1246_v11  ;;  %v1342_v43 = vmul.f32 %v2764_v1, %v2764_v1  ;;  %v2791_v11 = vld [vmem:[%s3044_s5] ss:$0 sm:$0xff] }
 0x1cf   : > { %v1248_v19 = vpop.xlane.xlu1 %1247  ;;  %1396 = vadd.xlane.f32.xlu1 %v1339_v0 }
 0x1d0   : > { %v2776_v34 = vsub.f32 %v3070_v8, %v1280_v30  ;;  %v1281_v40 = vmul.f32 0.0078125, %v1248_v19  ;;  %1402 = vadd.xlane.f32.xlu0 %v1342_v43  ;;  %v1343_v2 = vmul.f32 %v2770_v27, %v2770_v27  ;;  %v2797_v8 = vld [vmem:[%s3045_s6] ss:$0 sm:$0xff] }
 0x1d2   : > { %v2782_v13 = vsub.f32 %v1184_v21, %v1281_v40  ;;  %v1344_v5 = vmul.f32 %v2776_v34, %v2776_v34 }
 0x1d3   : > { %1404 = vadd.xlane.f32.xlu1 %v1343_v2 }
 0x1d4   : > { %1406 = vadd.xlane.f32.xlu0 %v1344_v5  ;;  %v1345_v41 = vmul.f32 %v2782_v13, %v2782_v13 }
 0x1d7   : > { %1408 = vadd.xlane.f32.xlu1 %v1345_v41 }
 0x224   : > { %v1351_v9 = vpop.xlane.xlu0 %1350 }
 0x225   : > { %v1412_v39 = vmul.f32 0.0078125, %v1351_v9  ;;  %v2803_v9 = vld [vmem:[%s3046_s7] ss:$0 sm:$0xff] }
 0x227   : > { %v1444_v44 = vadd.f32 1e-05, %v1412_v39 }
 0x228   : > { %v1353_v45 = vpop.xlane.xlu1 %1352  ;;  %v1347_v42 = vpop.xlane.xlu0 %1346 }
 0x229   : > { %2170 = vrsqrt.f32 %v1444_v44  ;;  %v1413_v29 = vmul.f32 0.0078125, %v1353_v45  ;;  %v1410_v25 = vmul.f32 0.0078125, %v1347_v42 }
 0x22b   : > { %v1445_v15 = vadd.f32 1e-05, %v1413_v29  ;;  %v1442_v21 = vadd.f32 1e-05, %v1410_v25 }
 0x22c   : > { %v1349_v47 = vpop.xlane.xlu1 %1348 }
 0x22d   : > { %2172 = vrsqrt.f32 %v1445_v15  ;;  %v1411_v57 = vmul.f32 0.0078125, %v1349_v47  ;;  %v1359_v14 = vpop.xlane.xlu0 %1358 }
 0x22e   : > { %2174 = vrsqrt.f32 %v1442_v21  ;;  %v1416_v51 = vmul.f32 0.0078125, %v1359_v14 }
 0x22f   : > { %v1443_v59 = vadd.f32 1e-05, %v1411_v57 }
 0x230   : > { %v1448_v54 = vadd.f32 1e-05, %v1416_v51  ;;  %v1361_v18 = vpop.xlane.xlu1 %1360 }
 0x231   : > { %2176 = vrsqrt.f32 %v1443_v59  ;;  %v1417_v38 = vmul.f32 0.0078125, %v1361_v18  ;;  %v1355_v10 = vpop.xlane.xlu0 %1354 }
 0x232   : > { %2178 = vrsqrt.f32 %v1448_v54  ;;  %v1414_v58 = vmul.f32 0.0078125, %v1355_v10 }
 0x233   : > { %v2171_v61 = vpop.eup %2170  ;;  %v1449_v37 = vadd.f32 1e-05, %v1417_v38 }
 0x234   : > { %v1446_v0 = vadd.f32 1e-05, %v1414_v58  ;;  %v1357_v16 = vpop.xlane.xlu1 %1356  ;;  %v1508_v30 = vmul.f32 %v2171_v61, %v2598_v36 }
 0x235   : > { %2180 = vrsqrt.f32 %v1449_v37  ;;  %v1415_v43 = vmul.f32 0.0078125, %v1357_v16  ;;  %v1367_v19 = vpop.xlane.xlu0 %1366 }
 0x236   : > { %2182 = vrsqrt.f32 %v1446_v0  ;;  %v1420_v40 = vmul.f32 0.0078125, %v1367_v19  ;;  %v1547_v2 = vmul.f32 %v2791_v11, %v1508_v30 }
 0x237   : > { %v2173_v5 = vpop.eup %2172  ;;  %v1447_v41 = vadd.f32 1e-05, %v1415_v43 }
 0x238   : > { %v2175_v36 = vpop.eup %2174  ;;  %v1452_v39 = vadd.f32 1e-05, %v1420_v40  ;;  %v1369_v44 = vpop.xlane.xlu1 %1368  ;;  %v1586_v45 = vadd.f32 %v2797_v8, %v1547_v2  ;;  %v1509_v42 = vmul.f32 %v2173_v5, %v2608_v33 }
 0x239   : > { %2184 = vrsqrt.f32 %v1447_v41  ;;  %v1421_v29 = vmul.f32 0.0078125, %v1369_v44  ;;  %v1363_v25 = vpop.xlane.xlu0 %1362  ;;  %v1506_v15 = vmul.f32 %v2175_v36, %v2602_v32 }
 0x23a   : > { %2186 = vrsqrt.f32 %v1452_v39  ;;  %v1418_v21 = vmul.f32 0.0078125, %v1363_v25  ;;  %v1625_v47 = vmul.f32 %v2803_v9, %v1586_v45  ;;  %v1548_v57 = vmul.f32 %v2791_v11, %v1509_v42 }
 0x23b   : > { %v2177_v14 = vpop.eup %2176  ;;  %v1453_v51 = vadd.f32 1e-05, %v1421_v29  ;;  %v1545_v59 = vmul.f32 %v2791_v11, %v1506_v15 }
 0x23c   : > { %v2179_v54 = vpop.eup %2178  ;;  %v1450_v18 = vadd.f32 1e-05, %v1418_v21  ;;  %v1365_v38 = vpop.xlane.xlu1 %1364  ;;  %1659 = vadd.xlane.f32.xlu0 %v1625_v47  ;;  %v1587_v33 = vadd.f32 %v2797_v8, %v1548_v57  ;;  %v1507_v10 = vmul.f32 %v2177_v14, %v2612_v63 }
 0x23d   : > { %2188 = vrsqrt.f32 %v1453_v51  ;;  %v1419_v32 = vmul.f32 0.0078125, %v1365_v38  ;;  %v1375_v58 = vpop.xlane.xlu0 %1374  ;;  %v1584_v61 = vadd.f32 %v2797_v8, %v1545_v59  ;;  %v1512_v37 = vmul.f32 %v2179_v54, %v2620_v4 }
 0x23e   : > { %2190 = vrsqrt.f32 %v1450_v18  ;;  %v1424_v0 = vmul.f32 0.0078125, %v1375_v58  ;;  %v1626_v16 = vmul.f32 %v2803_v9, %v1587_v33  ;;  %v1546_v30 = vmul.f32 %v2791_v11, %v1507_v10 }
 0x23f   : > { %v2181_v43 = vpop.eup %2180  ;;  %v1451_v19 = vadd.f32 1e-05, %v1419_v32  ;;  %v1623_v40 = vmul.f32 %v2803_v9, %v1584_v61  ;;  %v1551_v2 = vmul.f32 %v2791_v11, %v1512_v37 }
 0x240   : > { %v2183_v63 = vpop.eup %2182  ;;  %v1456_v5 = vadd.f32 1e-05, %v1424_v0  ;;  %1661 = vadd.xlane.f32.xlu1 %v1626_v16  ;;  %v1377_v41 = vpop.xlane.xlu1 %1376  ;;  %v1585_v36 = vadd.f32 %v2797_v8, %v1546_v30  ;;  %v1513_v4 = vmul.f32 %v2181_v43, %v2624_v6 }
 0x241   : > { %2192 = vrsqrt.f32 %v1451_v19  ;;  %v1425_v39 = vmul.f32 0.0078125, %v1377_v41  ;;  %1655 = vadd.xlane.f32.xlu0 %v1623_v40  ;;  %v1371_v44 = vpop.xlane.xlu0 %1370  ;;  %v1590_v45 = vadd.f32 %v2797_v8, %v1551_v2  ;;  %v1510_v42 = vmul.f32 %v2183_v63, %v2632_v22 }
 0x242   : > { %2194 = vrsqrt.f32 %v1456_v5  ;;  %v1422_v29 = vmul.f32 0.0078125, %v1371_v44  ;;  %v1624_v25 = vmul.f32 %v2803_v9, %v1585_v36  ;;  %v1552_v15 = vmul.f32 %v2791_v11, %v1513_v4 }
 0x243   : > { %v2185_v21 = vpop.eup %2184  ;;  %v1457_v47 = vadd.f32 1e-05, %v1425_v39  ;;  %v1629_v57 = vmul.f32 %v2803_v9, %v1590_v45  ;;  %v1549_v6 = vmul.f32 %v2791_v11, %v1510_v42 }
 0x244   : > { %v2187_v14 = vpop.eup %2186  ;;  %v1454_v51 = vadd.f32 1e-05, %v1422_v29  ;;  %1657 = vadd.xlane.f32.xlu1 %v1624_v25  ;;  %v1373_v59 = vpop.xlane.xlu1 %1372  ;;  %v1591_v54 = vadd.f32 %v2797_v8, %v1552_v15  ;;  %v1511_v22 = vmul.f32 %v2185_v21, %v2636_v26 }
 0x245   : > { %2196 = vrsqrt.f32 %v1457_v47  ;;  %v1423_v18 = vmul.f32 0.0078125, %v1373_v59  ;;  %1667 = vadd.xlane.f32.xlu0 %v1629_v57  ;;  %v1383_v38 = vpop.xlane.xlu0 %1382  ;;  %v1588_v33 = vadd.f32 %v2797_v8, %v1549_v6  ;;  %v1516_v10 = vmul.f32 %v2187_v14, %v2644_v28 }
 0x246   : > { %2198 = vrsqrt.f32 %v1454_v51  ;;  %v1428_v32 = vmul.f32 0.0078125, %v1383_v38  ;;  %v1630_v58 = vmul.f32 %v2803_v9, %v1591_v54  ;;  %v1550_v61 = vmul.f32 %v2791_v11, %v1511_v22 }
 0x247   : > { %v2189_v37 = vpop.eup %2188  ;;  %v1455_v0 = vadd.f32 1e-05, %v1423_v18  ;;  %v1627_v16 = vmul.f32 %v2803_v9, %v1588_v33  ;;  %v1555_v26 = vmul.f32 %v2791_v11, %v1516_v10 }
 0x248   : > { %v2191_v30 = vpop.eup %2190  ;;  %v1460_v43 = vadd.f32 1e-05, %v1428_v32  ;;  %1669 = vadd.xlane.f32.xlu1 %v1630_v58  ;;  %v1385_v19 = vpop.xlane.xlu1 %1384  ;;  %v1589_v40 = vadd.f32 %v2797_v8, %v1550_v61  ;;  %v1517_v28 = vmul.f32 %v2189_v37, %v2648_v31 }
 0x249   : > { %2200 = vrsqrt.f32 %v1455_v0  ;;  %v1429_v2 = vmul.f32 0.0078125, %v1385_v19  ;;  %1663 = vadd.xlane.f32.xlu0 %v1627_v16  ;;  %v1379_v63 = vpop.xlane.xlu0 %1378  ;;  %v1594_v5 = vadd.f32 %v2797_v8, %v1555_v26  ;;  %v1514_v41 = vmul.f32 %v2191_v30, %v2656_v46 }
 0x24a   : > { %2202 = vrsqrt.f32 %v1460_v43  ;;  %v1426_v36 = vmul.f32 0.0078125, %v1379_v63  ;;  %v1628_v4 = vmul.f32 %v2803_v9, %v1589_v40  ;;  %v1556_v39 = vmul.f32 %v2791_v11, %v1517_v28 }
 0x24b   : > { %v2193_v44 = vpop.eup %2192  ;;  %v1461_v45 = vadd.f32 1e-05, %v1429_v2  ;;  %v1633_v42 = vmul.f32 %v2803_v9, %v1594_v5  ;;  %v1553_v31 = vmul.f32 %v2791_v11, %v1514_v41 }
 0x24c   : > { %v2195_v29 = vpop.eup %2194  ;;  %v1458_v25 = vadd.f32 1e-05, %v1426_v36  ;;  %1665 = vadd.xlane.f32.xlu1 %v1628_v4  ;;  %v1381_v15 = vpop.xlane.xlu1 %1380  ;;  %v1595_v21 = vadd.f32 %v2797_v8, %v1556_v39  ;;  %v1515_v46 = vmul.f32 %v2193_v44, %v2660_v50 }
 0x24d   : > { %2204 = vrsqrt.f32 %v1461_v45  ;;  %v1427_v47 = vmul.f32 0.0078125, %v1381_v15  ;;  %1675 = vadd.xlane.f32.xlu0 %v1633_v42  ;;  %v1391_v57 = vpop.xlane.xlu0 %1390  ;;  %v1592_v6 = vadd.f32 %v2797_v8, %v1553_v31  ;;  %v1520_v14 = vmul.f32 %v2195_v29, %v2668_v52 }
 0x24e   : > { %2206 = vrsqrt.f32 %v1458_v25  ;;  %v1432_v51 = vmul.f32 0.0078125, %v1391_v57  ;;  %v1634_v59 = vmul.f32 %v2803_v9, %v1595_v21  ;;  %v1554_v54 = vmul.f32 %v2791_v11, %v1515_v46 }
 0x24f   : > { %v2197_v22 = vpop.eup %2196  ;;  %v1459_v18 = vadd.f32 1e-05, %v1427_v47  ;;  %v1631_v38 = vmul.f32 %v2803_v9, %v1592_v6  ;;  %v1559_v50 = vmul.f32 %v2791_v11, %v1520_v14 }
 0x250   : > { %v2199_v33 = vpop.eup %2198  ;;  %v1464_v10 = vadd.f32 1e-05, %v1432_v51  ;;  %1677 = vadd.xlane.f32.xlu1 %v1634_v59  ;;  %v1393_v32 = vpop.xlane.xlu1 %1392  ;;  %v1593_v58 = vadd.f32 %v2797_v8, %v1554_v54  ;;  %v1521_v52 = vmul.f32 %v2197_v22, %v2672_v55 }
 0x251   : > { %2208 = vrsqrt.f32 %v1459_v18  ;;  %v1433_v61 = vmul.f32 0.0078125, %v1393_v32  ;;  %1671 = vadd.xlane.f32.xlu0 %v1631_v38  ;;  %v1387_v37 = vpop.xlane.xlu0 %1386  ;;  %v1598_v0 = vadd.f32 %v2797_v8, %v1559_v50  ;;  %v1518_v16 = vmul.f32 %v2199_v33, %v2680_v12 }
 0x252   : > { %2210 = vrsqrt.f32 %v1464_v10  ;;  %v1430_v26 = vmul.f32 0.0078125, %v1387_v37  ;;  %v1632_v30 = vmul.f32 %v2803_v9, %v1593_v58  ;;  %v1560_v43 = vmul.f32 %v2791_v11, %v1521_v52 }
 0x253   : > { %v2201_v19 = vpop.eup %2200  ;;  %v1465_v40 = vadd.f32 1e-05, %v1433_v61  ;;  %v1637_v28 = vmul.f32 %v2803_v9, %v1598_v0  ;;  %v1557_v55 = vmul.f32 %v2791_v11, %v1518_v16 }
 0x254   : > { %v2203_v2 = vpop.eup %2202  ;;  %v1462_v63 = vadd.f32 1e-05, %v1430_v26  ;;  %1673 = vadd.xlane.f32.xlu1 %v1632_v30  ;;  %v1389_v5 = vpop.xlane.xlu1 %1388  ;;  %v1599_v41 = vadd.f32 %v2797_v8, %v1560_v43  ;;  %v1519_v12 = vmul.f32 %v2201_v19, %v2684_v17 }
 0x255   : > { %2212 = vrsqrt.f32 %v1465_v40  ;;  %v1431_v36 = vmul.f32 0.0078125, %v1389_v5  ;;  %1683 = vadd.xlane.f32.xlu0 %v1637_v28  ;;  %v1399_v4 = vpop.xlane.xlu0 %1398  ;;  %v1596_v39 = vadd.f32 %v2797_v8, %v1557_v55  ;;  %v1524_v44 = vmul.f32 %v2203_v2, %v2692_v20 }
 0x256   : > { %2214 = vrsqrt.f32 %v1462_v63  ;;  %v1436_v45 = vmul.f32 0.0078125, %v1399_v4  ;;  %v1638_v42 = vmul.f32 %v2803_v9, %v1599_v41  ;;  %v1558_v31 = vmul.f32 %v2791_v11, %v1519_v12 }
 0x257   : > { %v2205_v29 = vpop.eup %2204  ;;  %v1463_v25 = vadd.f32 1e-05, %v1431_v36  ;;  %v1635_v15 = vmul.f32 %v2803_v9, %v1596_v39  ;;  %v1563_v17 = vmul.f32 %v2791_v11, %v1524_v44 }
 0x258   : > { %v2207_v21 = vpop.eup %2206  ;;  %v1468_v46 = vadd.f32 1e-05, %v1436_v45  ;;  %1685 = vadd.xlane.f32.xlu1 %v1638_v42  ;;  %v1401_v47 = vpop.xlane.xlu1 %1400  ;;  %v1597_v57 = vadd.f32 %v2797_v8, %v1558_v31  ;;  %v1525_v20 = vmul.f32 %v2205_v29, %v2696_v24 }
 0x259   : > { %2216 = vrsqrt.f32 %v1463_v25  ;;  %v1437_v6 = vmul.f32 0.0078125, %v1401_v47  ;;  %1679 = vadd.xlane.f32.xlu0 %v1635_v15  ;;  %v1395_v14 = vpop.xlane.xlu0 %1394  ;;  %v1602_v51 = vadd.f32 %v2797_v8, %v1563_v17  ;;  %v1522_v59 = vmul.f32 %v2207_v21, %v2704_v56 }
 0x25a   : > { %2218 = vrsqrt.f32 %v1468_v46  ;;  %v1434_v54 = vmul.f32 0.0078125, %v1395_v14  ;;  %v1636_v22 = vmul.f32 %v2803_v9, %v1597_v57  ;;  %v1564_v18 = vmul.f32 %v2791_v11, %v1525_v20 }
 0x25b   : > { %v2209_v38 = vpop.eup %2208  ;;  %v1469_v50 = vadd.f32 1e-05, %v1437_v6  ;;  %v1641_v33 = vmul.f32 %v2803_v9, %v1602_v51  ;;  %v1561_v24 = vmul.f32 %v2791_v11, %v1522_v59 }
 0x25c   : > { %v2211_v10 = vpop.eup %2210  ;;  %v1466_v32 = vadd.f32 1e-05, %v1434_v54  ;;  %1681 = vadd.xlane.f32.xlu1 %v1636_v22  ;;  %v1397_v58 = vpop.xlane.xlu1 %1396  ;;  %v1603_v52 = vadd.f32 %v2797_v8, %v1564_v18  ;;  %v1523_v56 = vmul.f32 %v2209_v38, %v2708_v60 }
 0x25d   : > { %2220 = vrsqrt.f32 %v1469_v50  ;;  %v1435_v61 = vmul.f32 0.0078125, %v1397_v58  ;;  %1691 = vadd.xlane.f32.xlu0 %v1641_v33  ;;  %v1403_v37 = vpop.xlane.xlu0 %1402  ;;  %v1600_v0 = vadd.f32 %v2797_v8, %v1561_v24  ;;  %v1528_v16 = vmul.f32 %v2211_v10, %v2716_v48 }
 0x25e   : > { %2222 = vrsqrt.f32 %v1466_v32  ;;  %v1438_v26 = vmul.f32 0.0078125, %v1403_v37  ;;  %v1642_v30 = vmul.f32 %v2803_v9, %v1603_v52  ;;  %v1562_v43 = vmul.f32 %v2791_v11, %v1523_v56 }
 0x25f   : > { %v2213_v19 = vpop.eup %2212  ;;  %v1467_v40 = vadd.f32 1e-05, %v1435_v61  ;;  %v1639_v28 = vmul.f32 %v2803_v9, %v1600_v0  ;;  %v1567_v60 = vmul.f32 %v2791_v11, %v1528_v16 }
 0x260   : > { %v2215_v55 = vpop.eup %2214  ;;  %v1470_v2 = vadd.f32 1e-05, %v1438_v26  ;;  %1693 = vadd.xlane.f32.xlu1 %v1642_v30  ;;  %v1405_v63 = vpop.xlane.xlu1 %1404  ;;  %v1601_v5 = vadd.f32 %v2797_v8, %v1562_v43  ;;  %v1529_v48 = vmul.f32 %v2213_v19, %v2720_v7 }
 0x261   : > { %2224 = vrsqrt.f32 %v1467_v40  ;;  %v1439_v41 = vmul.f32 0.0078125, %v1405_v63  ;;  %1687 = vadd.xlane.f32.xlu0 %v1639_v28  ;;  %v1407_v12 = vpop.xlane.xlu0 %1406  ;;  %v1606_v36 = vadd.f32 %v2797_v8, %v1567_v60  ;;  %v1526_v4 = vmul.f32 %v2215_v55, %v2728_v23 }
 0x262   : > { %2226 = vrsqrt.f32 %v1470_v2  ;;  %v1440_v39 = vmul.f32 0.0078125, %v1407_v12  ;;  %v1640_v44 = vmul.f32 %v2803_v9, %v1601_v5  ;;  %v1568_v45 = vmul.f32 %v2791_v11, %v1529_v48 }
 0x263   : > { %v2217_v42 = vpop.eup %2216  ;;  %v1471_v31 = vadd.f32 1e-05, %v1439_v41  ;;  %v1645_v29 = vmul.f32 %v2803_v9, %v1606_v36  ;;  %v1565_v7 = vmul.f32 %v2791_v11, %v1526_v4  ;;  %v2931_v4 = vld [vmem:[#allocation2] ss:$0 sm:$0xff] }
 0x264   : > { %v2219_v25 = vpop.eup %2218  ;;  %v1472_v15 = vadd.f32 1e-05, %v1440_v39  ;;  %1689 = vadd.xlane.f32.xlu1 %v1640_v44  ;;  %v1409_v17 = vpop.xlane.xlu1 %1408  ;;  %v1607_v21 = vadd.f32 %v2797_v8, %v1568_v45  ;;  %v1527_v23 = vmul.f32 %v2217_v42, %v2732_v3 }
 0x265   : > { %2228 = vrsqrt.f32 %v1471_v31  ;;  %v1441_v46 = vmul.f32 0.0078125, %v1409_v17  ;;  %1699 = vadd.xlane.f32.xlu0 %v1645_v29  ;;  %v1604_v47 = vadd.f32 %v2797_v8, %v1565_v7  ;;  %v1532_v57 = vmul.f32 %v2219_v25, %v2740_v53 }
 0x266   : > { %2230 = vrsqrt.f32 %v1472_v15  ;;  %v1646_v20 = vmul.f32 %v2803_v9, %v1607_v21  ;;  %v1566_v6 = vmul.f32 %v2791_v11, %v1527_v23 }
 0x267   : > { %v2221_v14 = vpop.eup %2220  ;;  %v1473_v51 = vadd.f32 1e-05, %v1441_v46  ;;  %v1643_v59 = vmul.f32 %v2803_v9, %v1604_v47  ;;  %v1571_v54 = vmul.f32 %v2791_v11, %v1532_v57 }
 0x268   : > { %v2223_v22 = vpop.eup %2222  ;;  %1701 = vadd.xlane.f32.xlu1 %v1646_v20  ;;  %v1605_v3 = vadd.f32 %v2797_v8, %v1566_v6  ;;  %v1533_v18 = vmul.f32 %v2221_v14, %v2744_v49 }
 0x269   : > { %2232 = vrsqrt.f32 %v1473_v51  ;;  %1695 = vadd.xlane.f32.xlu0 %v1643_v59  ;;  %v1610_v53 = vadd.f32 %v2797_v8, %v1571_v54  ;;  %v1530_v38 = vmul.f32 %v2223_v22, %v2752_v35 }
 0x26a   : > { %v1644_v50 = vmul.f32 %v2803_v9, %v1605_v3  ;;  %v1572_v33 = vmul.f32 %v2791_v11, %v1533_v18 }
 0x26b   : > { %v2225_v24 = vpop.eup %2224  ;;  %v1649_v10 = vmul.f32 %v2803_v9, %v1610_v53  ;;  %v1569_v32 = vmul.f32 %v2791_v11, %v1530_v38 }
 0x26c   : > { %v2227_v58 = vpop.eup %2226  ;;  %1697 = vadd.xlane.f32.xlu1 %v1644_v50  ;;  %v1611_v52 = vadd.f32 %v2797_v8, %v1572_v33  ;;  %v1531_v49 = vmul.f32 %v2225_v24, %v2756_v62 }
 0x26d   : > { %1707 = vadd.xlane.f32.xlu0 %v1649_v10  ;;  %v1608_v56 = vadd.f32 %v2797_v8, %v1569_v32  ;;  %v1534_v35 = vmul.f32 %v2227_v58, %v2764_v1 }
 0x26e   : > { %v1650_v61 = vmul.f32 %v2803_v9, %v1611_v52  ;;  %v1570_v37 = vmul.f32 %v2791_v11, %v1531_v49 }
 0x26f   : > { %v2229_v0 = vpop.eup %2228  ;;  %v1647_v16 = vmul.f32 %v2803_v9, %v1608_v56  ;;  %v1573_v26 = vmul.f32 %v2791_v11, %v1534_v35 }
 0x270   : > { %v2231_v30 = vpop.eup %2230  ;;  %1709 = vadd.xlane.f32.xlu1 %v1650_v61  ;;  %v1609_v43 = vadd.f32 %v2797_v8, %v1570_v37  ;;  %v1535_v62 = vmul.f32 %v2229_v0, %v2770_v27 }
 0x271   : > { %1703 = vadd.xlane.f32.xlu0 %v1647_v16  ;;  %v1612_v19 = vadd.f32 %v2797_v8, %v1573_v26  ;;  %v1536_v1 = vmul.f32 %v2231_v30, %v2776_v34 }
 0x272   : > { %v1648_v40 = vmul.f32 %v2803_v9, %v1609_v43  ;;  %v1574_v28 = vmul.f32 %v2791_v11, %v1535_v62 }
 0x273   : > { %v2233_v60 = vpop.eup %2232  ;;  %v1651_v55 = vmul.f32 %v2803_v9, %v1612_v19  ;;  %v1575_v2 = vmul.f32 %v2791_v11, %v1536_v1 }
 0x274   : > { %1705 = vadd.xlane.f32.xlu1 %v1648_v40  ;;  %v1613_v63 = vadd.f32 %v2797_v8, %v1574_v28  ;;  %v1537_v27 = vmul.f32 %v2233_v60, %v2782_v13 }
 0x275   : > { %1711 = vadd.xlane.f32.xlu0 %v1651_v55  ;;  %v1614_v5 = vadd.f32 %v2797_v8, %v1575_v2 }
 0x276   : > { %v1652_v34 = vmul.f32 %v2803_v9, %v1613_v63  ;;  %v1576_v48 = vmul.f32 %v2791_v11, %v1537_v27 }
 0x277   : > { %v1653_v41 = vmul.f32 %v2803_v9, %v1614_v5 }
 0x278   : > { %1713 = vadd.xlane.f32.xlu1 %v1652_v34  ;;  %v1615_v12 = vadd.f32 %v2797_v8, %v1576_v48 }
 0x279   : > { %1715 = vadd.xlane.f32.xlu0 %v1653_v41 }
 0x27a   : > { %v1654_v36 = vmul.f32 %v2803_v9, %v1615_v12 }
 0x27c   : > { %1717 = vadd.xlane.f32.xlu1 %v1654_v36 }
 0x2c9   : > { %v1660_v13 = vpop.xlane.xlu0 %1659 }
 0x2ca   : > { %v1728_v11 = vadd.f32 %v2931_v4, %v1660_v13 }
 0x2cc   : > { %1761 = vst.msk [vmem:[%s2938_s24 + $0x10] sm:$0xff] %vm1758_vm0, %v1728_v11 }
 0x2cd   : > { %v1662_v8 = vpop.xlane.xlu1 %1661 }
 0x2ce   : > { %v1729_v9 = vadd.f32 %v2931_v4, %v1662_v8  ;;  %v1656_v39 = vpop.xlane.xlu0 %1655 }
 0x2cf   : > { %v1726_v44 = vadd.f32 %v2931_v4, %v1656_v39 }
 0x2d0   : > { %1762 = vst.msk [vmem:[%s2938_s24 + $0x18] sm:$0xff] %vm1758_vm0, %v1729_v9 }
 0x2d1   : > { %1759 = vst.msk [vmem:[%s2938_s24] sm:$0xff] %vm1758_vm0, %v1726_v44  ;;  %v1658_v45 = vpop.xlane.xlu1 %1657 }
 0x2d2   : > { %v1727_v42 = vadd.f32 %v2931_v4, %v1658_v45  ;;  %v1668_v31 = vpop.xlane.xlu0 %1667 }
 0x2d3   : > { %v1732_v29 = vadd.f32 %v2931_v4, %v1668_v31 }
 0x2d4   : > { %1760 = vst.msk [vmem:[%s2938_s24 + $0x8] sm:$0xff] %vm1758_vm0, %v1727_v42 }
 0x2d5   : > { %1765 = vst.msk [vmem:[%s2938_s24 + $0x30] sm:$0xff] %vm1758_vm0, %v1732_v29  ;;  %v1670_v7 = vpop.xlane.xlu1 %1669 }
 0x2d6   : > { %v1733_v25 = vadd.f32 %v2931_v4, %v1670_v7  ;;  %v1664_v15 = vpop.xlane.xlu0 %1663 }
 0x2d7   : > { %v1730_v17 = vadd.f32 %v2931_v4, %v1664_v15 }
 0x2d8   : > { %1766 = vst.msk [vmem:[%s2938_s24 + $0x38] sm:$0xff] %vm1758_vm0, %v1733_v25 }
 0x2d9   : > { %1763 = vst.msk [vmem:[%s2938_s24 + $0x20] sm:$0xff] %vm1758_vm0, %v1730_v17  ;;  %v1666_v21 = vpop.xlane.xlu1 %1665 }
 0x2da   : > { %v1731_v23 = vadd.f32 %v2931_v4, %v1666_v21  ;;  %v1676_v46 = vpop.xlane.xlu0 %1675 }
 0x2db   : > { %v1736_v47 = vadd.f32 %v2931_v4, %v1676_v46 }
 0x2dc   : > { %1764 = vst.msk [vmem:[%s2938_s24 + $0x28] sm:$0xff] %vm1758_vm0, %v1731_v23 }
 0x2dd   : > { %1769 = vst.msk [vmem:[%s2938_s24 + $0x50] sm:$0xff] %vm1758_vm0, %v1736_v47  ;;  %v1678_v57 = vpop.xlane.xlu1 %1677 }
 0x2de   : > { %v1737_v20 = vadd.f32 %v2931_v4, %v1678_v57  ;;  %v1672_v6 = vpop.xlane.xlu0 %1671 }
 0x2df   : > { %v1734_v14 = vadd.f32 %v2931_v4, %v1672_v6 }
 0x2e0   : > { %1770 = vst.msk [vmem:[%s2938_s24 + $0x58] sm:$0xff] %vm1758_vm0, %v1737_v20 }
 0x2e1   : > { %1767 = vst.msk [vmem:[%s2938_s24 + $0x40] sm:$0xff] %vm1758_vm0, %v1734_v14  ;;  %v1674_v51 = vpop.xlane.xlu1 %1673 }
 0x2e2   : > { %v1735_v59 = vadd.f32 %v2931_v4, %v1674_v51  ;;  %v1684_v54 = vpop.xlane.xlu0 %1683 }
 0x2e3   : > { %v1740_v22 = vadd.f32 %v2931_v4, %v1684_v54 }
 0x2e4   : > { %1768 = vst.msk [vmem:[%s2938_s24 + $0x48] sm:$0xff] %vm1758_vm0, %v1735_v59 }
 0x2e5   : > { %1773 = vst.msk [vmem:[%s2938_s24 + $0x70] sm:$0xff] %vm1758_vm0, %v1740_v22  ;;  %v1686_v3 = vpop.xlane.xlu1 %1685 }
 0x2e6   : > { %v1741_v18 = vadd.f32 %v2931_v4, %v1686_v3  ;;  %v1680_v53 = vpop.xlane.xlu0 %1679 }
 0x2e7   : > { %v1738_v38 = vadd.f32 %v2931_v4, %v1680_v53 }
 0x2e8   : > { %1774 = vst.msk [vmem:[%s2938_s24 + $0x78] sm:$0xff] %vm1758_vm0, %v1741_v18 }
 0x2e9   : > { %1771 = vst.msk [vmem:[%s2938_s24 + $0x60] sm:$0xff] %vm1758_vm0, %v1738_v38  ;;  %v1682_v50 = vpop.xlane.xlu1 %1681 }
 0x2ea   : > { %v1739_v33 = vadd.f32 %v2931_v4, %v1682_v50  ;;  %v1692_v24 = vpop.xlane.xlu0 %1691 }
 0x2eb   : > { %v1744_v10 = vadd.f32 %v2931_v4, %v1692_v24 }
 0x2ec   : > { %1772 = vst.msk [vmem:[%s2938_s24 + $0x68] sm:$0xff] %vm1758_vm0, %v1739_v33 }
 0x2ed   : > { %1777 = vst.msk [vmem:[%s2938_s24 + $0x90] sm:$0xff] %vm1758_vm0, %v1744_v10  ;;  %v1694_v32 = vpop.xlane.xlu1 %1693 }
 0x2ee   : > { %v1745_v58 = vadd.f32 %v2931_v4, %v1694_v32  ;;  %v1688_v52 = vpop.xlane.xlu0 %1687 }
 0x2ef   : > { %v1742_v49 = vadd.f32 %v2931_v4, %v1688_v52 }
 0x2f0   : > { %1778 = vst.msk [vmem:[%s2938_s24 + $0x98] sm:$0xff] %vm1758_vm0, %v1745_v58 }
 0x2f1   : > { %1775 = vst.msk [vmem:[%s2938_s24 + $0x80] sm:$0xff] %vm1758_vm0, %v1742_v49  ;;  %v1690_v56 = vpop.xlane.xlu1 %1689 }
 0x2f2   : > { %v1743_v35 = vadd.f32 %v2931_v4, %v1690_v56  ;;  %v1700_v61 = vpop.xlane.xlu0 %1699 }
 0x2f3   : > { %v1748_v37 = vadd.f32 %v2931_v4, %v1700_v61 }
 0x2f4   : > { %1776 = vst.msk [vmem:[%s2938_s24 + $0x88] sm:$0xff] %vm1758_vm0, %v1743_v35 }
 0x2f5   : > { %1781 = vst.msk [vmem:[%s2938_s24 + $0xb0] sm:$0xff] %vm1758_vm0, %v1748_v37  ;;  %v1702_v0 = vpop.xlane.xlu1 %1701 }
 0x2f6   : > { %v1749_v16 = vadd.f32 %v2931_v4, %v1702_v0  ;;  %v1696_v26 = vpop.xlane.xlu0 %1695 }
 0x2f7   : > { %v1746_v30 = vadd.f32 %v2931_v4, %v1696_v26 }
 0x2f8   : > { %1782 = vst.msk [vmem:[%s2938_s24 + $0xb8] sm:$0xff] %vm1758_vm0, %v1749_v16 }
 0x2f9   : > { %1779 = vst.msk [vmem:[%s2938_s24 + $0xa0] sm:$0xff] %vm1758_vm0, %v1746_v30  ;;  %v1698_v43 = vpop.xlane.xlu1 %1697 }
 0x2fa   : > { %v1747_v62 = vadd.f32 %v2931_v4, %v1698_v43  ;;  %v1708_v19 = vpop.xlane.xlu0 %1707 }
 0x2fb   : > { %v1752_v1 = vadd.f32 %v2931_v4, %v1708_v19 }
 0x2fc   : > { %1780 = vst.msk [vmem:[%s2938_s24 + $0xa8] sm:$0xff] %vm1758_vm0, %v1747_v62 }
 0x2fd   : > { %1785 = vst.msk [vmem:[%s2938_s24 + $0xd0] sm:$0xff] %vm1758_vm0, %v1752_v1  ;;  %v1710_v40 = vpop.xlane.xlu1 %1709 }
 0x2fe   : > { %v1753_v28 = vadd.f32 %v2931_v4, %v1710_v40  ;;  %v1704_v60 = vpop.xlane.xlu0 %1703 }
 0x2ff   : > { %v1750_v55 = vadd.f32 %v2931_v4, %v1704_v60 }
 0x300   : > { %1786 = vst.msk [vmem:[%s2938_s24 + $0xd8] sm:$0xff] %vm1758_vm0, %v1753_v28 }
 0x301   : > { %1783 = vst.msk [vmem:[%s2938_s24 + $0xc0] sm:$0xff] %vm1758_vm0, %v1750_v55  ;;  %v1706_v2 = vpop.xlane.xlu1 %1705 }
 0x302   : > { %v1751_v63 = vadd.f32 %v2931_v4, %v1706_v2  ;;  %v1712_v27 = vpop.xlane.xlu0 %1711 }
 0x303   : > { %v1754_v5 = vadd.f32 %v2931_v4, %v1712_v27 }
 0x304   : > { %1784 = vst.msk [vmem:[%s2938_s24 + $0xc8] sm:$0xff] %vm1758_vm0, %v1751_v63 }
 0x305   : > { %1787 = vst.msk [vmem:[%s2938_s24 + $0xe0] sm:$0xff] %vm1758_vm0, %v1754_v5  ;;  %v1714_v34 = vpop.xlane.xlu1 %1713 }
 0x306   : > { %v1755_v48 = vadd.f32 %v2931_v4, %v1714_v34  ;;  %v1716_v41 = vpop.xlane.xlu0 %1715 }
 0x307   : > { %v1756_v12 = vadd.f32 %v2931_v4, %v1716_v41 }
 0x308   : > { %1788 = vst.msk [vmem:[%s2938_s24 + $0xe8] sm:$0xff] %vm1758_vm0, %v1755_v48 }
 0x309   : > { %1789 = vst.msk [vmem:[%s2938_s24 + $0xf0] sm:$0xff] %vm1758_vm0, %v1756_v12  ;;  %v1718_v36 = vpop.xlane.xlu1 %1717 }
 0x30a   : > { %v1757_v13 = vadd.f32 %v2931_v4, %v1718_v36 }
 0x30c   : > { %1790 = vst.msk [vmem:[%s2938_s24 + $0xf8] sm:$0xff] %vm1758_vm0, %v1757_v13 }
 0x30d PF: > { %s21_s11 = sadd.s32 1, %s2240_s11  }
 0x30e   : > { %p18_p4 = scmp.ge.s32.totalorder %s21_s11, 4  }
 0x310   :  { %20 = sbr.rel (!%p18_p4) target bundleno = 3 (0x3), region = 92 }

// kernel: piano_svsep_forward.2
= control target key start
LH: loop header
LB: loop body
LE: loop exit
PB: predicated region body
PF: predicated region fallthrough
CT: control target
= control target key end

     0   :  { %vm5539_vm1 = vcmask 15360   ;;  %s10895_s5 = inlined_call_operand.vmem [shape: bf16[128,128], index: 5, kind: input, shape index: {}]   ;;  %s10896_s0 = inlined_call_operand.vmem [shape: bf16[256,128], index: 0, kind: input, shape index: {}]   ;;  %s10897_s6 = inlined_call_operand.vmem [shape: f32[1,128], index: 6, kind: input, shape index: {}]   ;;  %s10898_s1 = inlined_call_operand.vmem [shape: bf16[256,256], index: 1, kind: input, shape index: {}]   ;;  %s10899_s2 = inlined_call_operand.vmem [shape: bf16[256,256], index: 2, kind: input, shape index: {}]   ;;  %s10900_s4 = inlined_call_operand.vmem [shape: f32[256,1], index: 4, kind: input, shape index: {}]   ;;  %s10901_s7 = inlined_call_operand.vmem [shape: f32[1,128], index: 7, kind: input, shape index: {}]   ;;  %s10902_s8 = inlined_call_operand.vmem [shape: f32[1,128], index: 8, kind: input, shape index: {}]   ;;  %s10903_s3 = inlined_call_operand.vmem [shape: f32[256,1], index: 3, kind: input, shape index: {}]   ;;  %s10904_s10 = inlined_call_operand.vmem [shape: bf16[128,128], index: 10, kind: input, shape index: {}]   ;;  %s10905_s9 = inlined_call_operand.vmem [shape: bf16[128,128], index: 9, kind: input, shape index: {}]   ;;  %s10906_s11 = inlined_call_operand.vmem [shape: bf16[128,128], index: 11, kind: input, shape index: {}]   ;;  %s10907_s12 = inlined_call_operand.vmem [shape: f32[1,128], index: 12, kind: input, shape index: {}]   ;;  %s10908_s15 = inlined_call_operand.vmem [shape: f32[1,128], index: 15, kind: input, shape index: {}]   ;;  %s10909_s13 = inlined_call_operand.vmem [shape: f32[1,128], index: 13, kind: input, shape index: {}]   ;;  %s10910_s14 = inlined_call_operand.vmem [shape: f32[1,128], index: 14, kind: input, shape index: {}]   ;;  %s10911_s17 = inlined_call_operand.vmem [shape: bf16[128,128], index: 17, kind: input, shape index: {}]   ;;  %s10912_s16 = inlined_call_operand.vmem [shape: bf16[128,128], index: 16, kind: input, shape index: {}]   ;;  %s10913_s18 = inlined_call_operand.vmem [shape: bf16[128,128], index: 18, kind: input, shape index: {}]   ;;  %s10914_s20 = inlined_call_operand.vmem [shape: bf16[128,128], index: 20, kind: input, shape index: {}]   ;;  %s10915_s19 = inlined_call_operand.vmem [shape: f32[1,128], index: 19, kind: input, shape index: {}]   ;;  %s10916_s26 = inlined_call_operand.vmem [shape: f32[256,128], index: 26, kind: output, shape index: {0}]   ;;  %s10917_s21 = inlined_call_operand.vmem [shape: f32[1,128], index: 21, kind: input, shape index: {}]   ;;  %s10918_s22 = inlined_call_operand.vmem [shape: f32[1,128], index: 22, kind: input, shape index: {}]   ;;  %s10919_s24 = inlined_call_operand.vmem [shape: f32[2,128], index: 24, kind: input, shape index: {}]   ;;  %s10920_s23 = inlined_call_operand.vmem [shape: f32[1,128], index: 23, kind: input, shape index: {}]   ;;  %s10921_s25 = inlined_call_operand.vmem [shape: f32[1,2], index: 25, kind: input, shape index: {}]   ;;  %s10922_s27 = inlined_call_operand.vmem [shape: f32[256,2], index: 27, kind: output, shape index: {1}]  }
   0x1   :  { %11049 = sst [smem:[#allocation71_spill]] %s10895_s5 }
   0x2   :  { %11050 = sst [smem:[#allocation72_spill]] %s10896_s0 }
   0x3   :  { %11051 = sst [smem:[#allocation73_spill]] %s10897_s6  ;;  %s11061_s6 = sld [smem:[#allocation71_spill]] }
   0x4   :  { %11052 = sst [smem:[#allocation74_spill]] %s10898_s1  ;;  %s11063_s1 = sld [smem:[#allocation73_spill]] }
   0x5   :  { %11053 = sst [smem:[#allocation75_spill]] %s10899_s2  ;;  %s11075_s2 = sld [smem:[#allocation74_spill]] }
   0x6   :  { %11054 = sst [smem:[#allocation76_spill]] %s10900_s4 }
   0x7   :  { %11055 = sst [smem:[#allocation77_spill]] %s10901_s7  ;;  %s11062_s7 = sld [smem:[#allocation72_spill]] }
   0x8   :  { %11056 = sst [smem:[#allocation78_spill]] %s10902_s8 }
   0x9   :  { %11057 = sst [smem:[#allocation79_spill]] %s10903_s3  ;;  %v6922_v0 = vld [vmem:[%s11061_s6] sm:$0xff]   ;;  %v6923_v1 = vld [vmem:[%s11061_s6 + $0x8] sm:$0xff]   ;;  %v6924_v2 = vld [vmem:[%s11061_s6 + $0x10] sm:$0xff]   ;;  %s11076_s3 = sld [smem:[#allocation75_spill]] }
   0xa   :  { %11058 = sst [smem:[#allocation80_spill]] %s10904_s10  ;;  %6407 = vmatprep.subr.bf16.mxu0 %v6922_v0  ;;  %v6925_v3 = vld [vmem:[%s11061_s6 + $0x18] sm:$0xff]   ;;  %v6926_v5 = vld [vmem:[%s11061_s6 + $0x20] sm:$0xff]   ;;  %v6927_v6 = vld [vmem:[%s11061_s6 + $0x28] sm:$0xff]   ;;  %s11077_s10 = sld [smem:[#allocation76_spill]] }
   0xb   :  { %11059 = sst [smem:[#allocation81_spill]] %s10905_s9  ;;  %6408 = vmatpush3.bf16.msra.mxu0 %v6922_v0  ;;  %v6928_v7 = vld [vmem:[%s11061_s6 + $0x30] sm:$0xff]   ;;  %v6929_v8 = vld [vmem:[%s11061_s6 + $0x38] sm:$0xff]   ;;  %v7636_v24 = vld [vmem:[%s11063_s1] ss:$0 sm:$0xff]  ;;  %s11079_s28 = sld [smem:[#allocation78_spill]] }
   0xc   :  { %11060 = sst [smem:[#allocation82_spill]] %s10906_s11  ;;  %6409 = vmatprep.subr.bf16.mxu0 %v6923_v1  ;;  %s11113_s29 = sld [smem:[#allocation81_spill]] }
   0xd   :  { %v6930_v4 = vld [vmem:[%s11062_s7] sm:$0xff]   ;;  %v6931_v9 = vld [vmem:[%s11062_s7 + $0x8] sm:$0xff]   ;;  %v6932_v10 = vld [vmem:[%s11062_s7 + $0x10] sm:$0xff]   ;;  %s11129_s6 = sld [smem:[#allocation82_spill]] }
   0xe   :  { %6423 = vmatprep.mubr.bf16.mxu0 %v6930_v4  ;;  %v6933_v11 = vld [vmem:[%s11062_s7 + $0x18] sm:$0xff]   ;;  %v6934_v12 = vld [vmem:[%s11062_s7 + $0x20] sm:$0xff]   ;;  %v6935_v13 = vld [vmem:[%s11062_s7 + $0x28] sm:$0xff]  }
   0xf   :  { %6410 = vmatpush3.bf16.msra.mxu0 %v6923_v1  ;;  %v6936_v14 = vld [vmem:[%s11062_s7 + $0x30] sm:$0xff]   ;;  %v6937_v15 = vld [vmem:[%s11062_s7 + $0x38] sm:$0xff]   ;;  %v6938_v16 = vld [vmem:[%s11062_s7 + $0x40] sm:$0xff]  }
  0x10   :  { %6411 = vmatprep.subr.bf16.mxu0 %v6924_v2  ;;  %v6939_v17 = vld [vmem:[%s11062_s7 + $0x48] sm:$0xff]   ;;  %v6940_v18 = vld [vmem:[%s11062_s7 + $0x50] sm:$0xff]   ;;  %v6941_v19 = vld [vmem:[%s11062_s7 + $0x58] sm:$0xff]  }
  0x11   :  { %v6942_v20 = vld [vmem:[%s11062_s7 + $0x60] sm:$0xff]   ;;  %v6943_v21 = vld [vmem:[%s11062_s7 + $0x68] sm:$0xff]   ;;  %v6944_v22 = vld [vmem:[%s11062_s7 + $0x70] sm:$0xff]  }
  0x12   :  { %v6945_v23 = vld [vmem:[%s11062_s7 + $0x78] sm:$0xff]   ;;  %s11078_s7 = sld [smem:[#allocation77_spill]] }
  0x13   :  { %6412 = vmatpush3.bf16.msra.mxu0 %v6924_v2 }
  0x14   :  { %6413 = vmatprep.subr.bf16.mxu0 %v6925_v3 }
  0x17   :  { %6414 = vmatpush3.bf16.msra.mxu0 %v6925_v3 }
  0x18   :  { %6415 = vmatprep.subr.bf16.mxu0 %v6926_v5 }
  0x1b   :  { %6416 = vmatpush3.bf16.msra.mxu0 %v6926_v5 }
  0x1c   :  { %6417 = vmatprep.subr.bf16.mxu0 %v6927_v6 }
  0x1f   :  { %6418 = vmatpush3.bf16.msra.mxu0 %v6927_v6 }
  0x20   :  { %6419 = vmatprep.subr.bf16.mxu0 %v6928_v7 }
  0x23   :  { %6420 = vmatpush3.bf16.msra.mxu0 %v6928_v7 }
  0x24   :  { %6421 = vmatprep.subr.bf16.mxu0 %v6929_v8 }
  0x27   :  { %6422 = vmatpush3.bf16.msra.mxu0 %v6929_v8 }
  0x2a   :  { %6424 = vmatmul.mubr.bf16.vlgmr.msra.gmra.mrb[0].mxu0 %v6931_v9 }
  0x2b   :  { %6427 = vmatprep.mubr.bf16.mxu0 %v6932_v10 }
  0x32   :  { %6428 = vmatmul.mubr.bf16.gmra.mrb[4].mxu0 %v6933_v11 }
  0x33   :  { %6431 = vmatprep.mubr.bf16.mxu0 %v6934_v12 }
  0x3a   :  { %6432 = vmatmul.mubr.bf16.gmra.mrb[8].mxu0 %v6935_v13 }
  0x3b   :  { %6435 = vmatprep.mubr.bf16.mxu0 %v6936_v14 }
  0x42   :  { %6436 = vmatmul.mubr.bf16.gmra.mrb[12].mxu0 %v6937_v15 }
  0x43   :  { %6439 = vmatprep.mubr.bf16.mxu0 %v6938_v16 }
  0x4a   :  { %6440 = vmatmul.mubr.bf16.gmra.mrb[16].mxu0 %v6939_v17 }
  0x4b   :  { %6443 = vmatprep.mubr.bf16.mxu0 %v6940_v18 }
  0x52   :  { %6444 = vmatmul.mubr.bf16.gmra.mrb[20].mxu0 %v6941_v19 }
  0x53   :  { %6447 = vmatprep.mubr.bf16.mxu0 %v6942_v20 }
  0x5a   :  { %6448 = vmatmul.mubr.bf16.gmra.mrb[24].mxu0 %v6943_v21 }
  0x5b   :  { %6451 = vmatprep.mubr.bf16.mxu0 %v6944_v22 }
  0x62   :  { %6452 = vmatmul.mubr.bf16.gmra.mrb[28].mxu0 %v6945_v23 }
  0xfd   :  { %v6425_v25 = vpop.f32.mrb[0].mxu0 }
  0xfe   :  { %v7639_v26 = vadd.f32 %v6425_v25, %v7636_v24  ;;  %v319_v27 = vpop.f32.mrb[1].mxu0 }
  0xff   :  { %v7642_v28 = vadd.f32 %v7636_v24, %v319_v27  ;;  %v6426_v29 = vpop.f32.mrb[2].mxu0 }
 0x100   :  { %v448_v30 = vmax.f32 %v7639_v26, 0.0  ;;  %v322_v31 = vpop.f32.mrb[3].mxu0  ;;  %v7647_v33 = vadd.f32 %v6426_v29, %v7636_v24 }
 0x101   :  { %v446_v32 = vmax.f32 %v7642_v28, 0.0  ;;  %v7655_v35 = vadd.f32 %v7636_v24, %v322_v31 }
 0x102   :  { %484 = vadd.xlane.f32.xlu0 %v448_v30  ;;  %v449_v34 = vmax.f32 %v7647_v33, 0.0 }
 0x103   :  { %480 = vadd.xlane.f32.xlu1 %v446_v32  ;;  %v447_v43 = vmax.f32 %v7655_v35, 0.0 }
 0x105   :  { %v6429_v36 = vpop.f32.mrb[4].mxu0 }
 0x106   :  { %v7658_v37 = vadd.f32 %v6429_v36, %v7636_v24  ;;  %v335_v38 = vpop.f32.mrb[5].mxu0 }
 0x107   :  { %v6430_v39 = vpop.f32.mrb[6].mxu0  ;;  %486 = vadd.xlane.f32.xlu1 %v449_v34  ;;  %v7664_v41 = vadd.f32 %v7636_v24, %v335_v38 }
 0x108   :  { %v452_v40 = vmax.f32 %v7658_v37, 0.0  ;;  %v338_v42 = vpop.f32.mrb[7].mxu0  ;;  %v7668_v44 = vadd.f32 %v6430_v39, %v7636_v24 }
 0x109   :  { %v450_v45 = vmax.f32 %v7664_v41, 0.0  ;;  %v7677_v47 = vadd.f32 %v7636_v24, %v338_v42 }
 0x10a   :  { %492 = vadd.xlane.f32.xlu0 %v452_v40  ;;  %v453_v46 = vmax.f32 %v7668_v44, 0.0 }
 0x10b   :  { %482 = vadd.xlane.f32.xlu1 %v447_v43  ;;  %v451_v55 = vmax.f32 %v7677_v47, 0.0 }
 0x10d   :  { %v6433_v48 = vpop.f32.mrb[8].mxu0 }
 0x10e   :  { %v7680_v49 = vadd.f32 %v6433_v48, %v7636_v24  ;;  %v351_v50 = vpop.f32.mrb[9].mxu0  ;;  %488 = vadd.xlane.f32.xlu0 %v450_v45 }
 0x10f   :  { %v6434_v51 = vpop.f32.mrb[10].mxu0  ;;  %494 = vadd.xlane.f32.xlu1 %v453_v46  ;;  %v7688_v53 = vadd.f32 %v7636_v24, %v351_v50 }
 0x110   :  { %v456_v52 = vmax.f32 %v7680_v49, 0.0  ;;  %v354_v54 = vpop.f32.mrb[11].mxu0  ;;  %v7692_v56 = vadd.f32 %v6434_v51, %v7636_v24 }
 0x111   :  { %v454_v57 = vmax.f32 %v7688_v53, 0.0  ;;  %v7701_v59 = vadd.f32 %v7636_v24, %v354_v54 }
 0x112   :  { %500 = vadd.xlane.f32.xlu0 %v456_v52  ;;  %v457_v58 = vmax.f32 %v7692_v56, 0.0 }
 0x113   :  { %490 = vadd.xlane.f32.xlu1 %v451_v55  ;;  %v455_v2 = vmax.f32 %v7701_v59, 0.0 }
 0x115   :  { %v6437_v60 = vpop.f32.mrb[12].mxu0 }
 0x116   :  { %v7704_v61 = vadd.f32 %v6437_v60, %v7636_v24  ;;  %v367_v62 = vpop.f32.mrb[13].mxu0  ;;  %496 = vadd.xlane.f32.xlu0 %v454_v57 }
 0x117   :  { %v6438_v63 = vpop.f32.mrb[14].mxu0  ;;  %502 = vadd.xlane.f32.xlu1 %v457_v58 }
 0x118   :  { %v7711_v0 = vadd.f32 %v6438_v63, %v7636_v24  ;;  %v370_v1 = vpop.f32.mrb[15].mxu0 }
 0x11b   :  { %498 = vadd.xlane.f32.xlu1 %v455_v2 }
 0x11d   :  { %v6441_v3 = vpop.f32.mrb[16].mxu0 }
 0x11e   :  { %v7717_v4 = vadd.f32 %v6441_v3, %v7636_v24  ;;  %v383_v5 = vpop.f32.mrb[17].mxu0  ;;  %v7781_v3 = vadd.f32 %v7636_v24, %v370_v1 }
 0x11f   :  { %v6442_v6 = vpop.f32.mrb[18].mxu0  ;;  %v7721_v8 = vadd.f32 %v7636_v24, %v383_v5 }
 0x120   :  { %v464_v7 = vmax.f32 %v7717_v4, 0.0  ;;  %v7724_v9 = vadd.f32 %v6442_v6, %v7636_v24  ;;  %v386_v10 = vpop.f32.mrb[19].mxu0 }
 0x121   :  { %v462_v12 = vmax.f32 %v7721_v8, 0.0  ;;  %v7731_v13 = vadd.f32 %v7636_v24, %v386_v10 }
 0x122   :  { %v465_v11 = vmax.f32 %v7724_v9, 0.0  ;;  %516 = vadd.xlane.f32.xlu0 %v464_v7 }
 0x123   :  { %v463_v17 = vmax.f32 %v7731_v13, 0.0 }
 0x124   :  { %518 = vadd.xlane.f32.xlu1 %v465_v11 }
 0x125   :  { %v6445_v14 = vpop.f32.mrb[20].mxu0 }
 0x126   :  { %v399_v15 = vpop.f32.mrb[21].mxu0  ;;  %512 = vadd.xlane.f32.xlu0 %v462_v12  ;;  %v7739_v18 = vadd.f32 %v6445_v14, %v7636_v24 }
 0x127   :  { %v6446_v16 = vpop.f32.mrb[22].mxu0  ;;  %v7752_v25 = vadd.f32 %v7636_v24, %v399_v15 }
 0x128   :  { %v7742_v19 = vadd.f32 %v6446_v16, %v7636_v24  ;;  %v402_v20 = vpop.f32.mrb[23].mxu0  ;;  %v468_v23 = vmax.f32 %v7739_v18, 0.0  ;;  %v7793_v16 = vadd.f32 %v7636_v24, %v367_v62 }
 0x129   :  { %v7746_v22 = vadd.f32 %v7636_v24, %v402_v20  ;;  %v466_v38 = vmax.f32 %v7752_v25, 0.0 }
 0x12a   :  { %v469_v21 = vmax.f32 %v7742_v19, 0.0  ;;  %514 = vadd.xlane.f32.xlu0 %v463_v17  ;;  %v10934_v62 = vmax.f32 %v7793_v16, 0.0 }
 0x12b   :  { %v467_v29 = vmax.f32 %v7746_v22, 0.0 }
 0x12c   :  { %526 = vadd.xlane.f32.xlu1 %v469_v21 }
 0x12d   :  { %v6449_v27 = vpop.f32.mrb[24].mxu0 }
 0x12e   :  { %v415_v31 = vpop.f32.mrb[25].mxu0  ;;  %524 = vadd.xlane.f32.xlu0 %v468_v23  ;;  %v7761_v39 = vadd.f32 %v6449_v27, %v7636_v24 }
 0x12f   :  { %v6450_v36 = vpop.f32.mrb[26].mxu0  ;;  %v7776_v60 = vadd.f32 %v7636_v24, %v415_v31 }
 0x130   :  { %v7764_v42 = vadd.f32 %v6450_v36, %v7636_v24  ;;  %v418_v48 = vpop.f32.mrb[27].mxu0  ;;  %522 = vadd.xlane.f32.xlu1 %v467_v29  ;;  %v10941_v54 = vmax.f32 %v7761_v39, 0.0  ;;  %v10935_v36 = vmax.f32 %v7781_v3, 0.0  ;;  %v11064_v25 = vmax.f32 %v7761_v39, 0.0 }
 0x131   :  { %v7770_v51 = vadd.f32 %v7636_v24, %v418_v48  ;;  %v10937_v20 = vmax.f32 %v7776_v60, 0.0  ;;  %v11066_v39 = vmax.f32 %v7776_v60, 0.0  ;;  %v11068_v60 = vmax.f32 %v7793_v16, 0.0 }
 0x132   :  { %v473_v50 = vmax.f32 %v7764_v42, 0.0  ;;  %520 = vadd.xlane.f32.xlu0 %v466_v38 }
 0x133   :  { %v10939_v5 = vmax.f32 %v7770_v51, 0.0  ;;  %v11065_v42 = vmax.f32 %v7770_v51, 0.0  ;;  %v11067_v51 = vmax.f32 %v7781_v3, 0.0 }
 0x134   :  { %534 = vadd.xlane.f32.xlu1 %v473_v50 }
 0x135   :  { %v6453_v63 = vpop.f32.mrb[28].mxu0 }
 0x136   :  { %532 = vadd.xlane.f32.xlu0 %v10941_v54  ;;  %v7787_v6 = vadd.f32 %v6453_v63, %v7636_v24  ;;  %v431_v10 = vpop.f32.mrb[29].mxu0 }
 0x137   :  { %v7790_v14 = vadd.f32 %v7636_v24, %v431_v10  ;;  %v6454_v15 = vpop.f32.mrb[30].mxu0 }
 0x138   :  { %530 = vadd.xlane.f32.xlu1 %v10939_v5  ;;  %v7799_v1 = vadd.f32 %v6454_v15, %v7636_v24  ;;  %v434_v27 = vpop.f32.mrb[31].mxu0  ;;  %v10938_v10 = vmax.f32 %v7787_v6, 0.0  ;;  %v10940_v15 = vmax.f32 %v7711_v0, 0.0 }
 0x139   :  { %v7802_v31 = vadd.f32 %v7636_v24, %v434_v27  ;;  %v10933_v63 = vmax.f32 %v7790_v14, 0.0  ;;  %v10942_v27 = vmax.f32 %v7704_v61, 0.0  ;;  %v11070_v16 = vmax.f32 %v7790_v14, 0.0 }
 0x13a   :  { %528 = vadd.xlane.f32.xlu0 %v10937_v20  ;;  %v10936_v24 = vmax.f32 %v7799_v1, 0.0  ;;  %v11072_v14 = vmax.f32 %v7787_v6, 0.0 }
 0x13b   :  { %v10932_v48 = vmax.f32 %v7802_v31, 0.0  ;;  %v11069_v3 = vmax.f32 %v7802_v31, 0.0  ;;  %v11071_v31 = vmax.f32 %v7799_v1, 0.0  ;;  %v11073_v1 = vmax.f32 %v7711_v0, 0.0  ;;  %v6948_v0 = vld [vmem:[%s11075_s2 + $0x4] ss:$8 sps:$4 sm:$0xff]  }
 0x13c   :  { %506 = vadd.xlane.f32.xlu1 %v10935_v36  ;;  %1294 = vmatprep.mubr.bf16.mxu1 %v6948_v0 }
 0x13e   :  { %504 = vadd.xlane.f32.xlu0 %v10934_v62 }
 0x140   :  { %538 = vadd.xlane.f32.xlu1 %v10932_v48 }
 0x142   :  { %536 = vadd.xlane.f32.xlu0 %v10933_v63 }
 0x144   :  { %542 = vadd.xlane.f32.xlu1 %v10936_v24 }
 0x146   :  { %540 = vadd.xlane.f32.xlu0 %v10938_v10 }
 0x148   :  { %510 = vadd.xlane.f32.xlu1 %v10940_v15 }
 0x14a   :  { %508 = vadd.xlane.f32.xlu0 %v10942_v27 }
 0x18f   :  { %v485_v48 = vpop.xlane.xlu0 %484 }
 0x190   :  { %v547_v63 = vmul.f32 0.0078125, %v485_v48  ;;  %v481_v62 = vpop.xlane.xlu1 %480 }
 0x191   :  { %v545_v36 = vmul.f32 0.0078125, %v481_v62 }
 0x192   :  { %v7832_v24 = vsub.f32 %v448_v30, %v547_v63 }
 0x193   :  { %v7838_v5 = vsub.f32 %v446_v32, %v545_v36 }
 0x194   :  { %v487_v20 = vpop.xlane.xlu1 %486  ;;  %v611_v10 = vmul.f32 %v7832_v24, %v7832_v24 }
 0x195   :  { %v548_v15 = vmul.f32 0.0078125, %v487_v20  ;;  %v609_v26 = vmul.f32 %v7838_v5, %v7838_v5 }
 0x196   :  { %645 = vadd.xlane.f32.xlu0 %v611_v10 }
 0x197   :  { %v493_v54 = vpop.xlane.xlu0 %492  ;;  %v7842_v48 = vsub.f32 %v449_v34, %v548_v15 }
 0x198   :  { %v551_v62 = vmul.f32 0.0078125, %v493_v54  ;;  %v483_v27 = vpop.xlane.xlu1 %482 }
 0x199   :  { %v546_v30 = vmul.f32 0.0078125, %v483_v27  ;;  %v612_v63 = vmul.f32 %v7842_v48, %v7842_v48 }
 0x19a   :  { %641 = vadd.xlane.f32.xlu0 %v609_v26  ;;  %v7850_v28 = vsub.f32 %v452_v40, %v551_v62 }
 0x19b   :  { %v489_v32 = vpop.xlane.xlu0 %488  ;;  %647 = vadd.xlane.f32.xlu1 %v612_v63  ;;  %v7854_v33 = vsub.f32 %v447_v43, %v546_v30 }
 0x19c   :  { %v549_v34 = vmul.f32 0.0078125, %v489_v32  ;;  %v495_v54 = vpop.xlane.xlu1 %494  ;;  %v615_v20 = vmul.f32 %v7850_v28, %v7850_v28 }
 0x19d   :  { %v552_v36 = vmul.f32 0.0078125, %v495_v54  ;;  %v610_v10 = vmul.f32 %v7854_v33, %v7854_v33 }
 0x19e   :  { %653 = vadd.xlane.f32.xlu0 %v615_v20  ;;  %v7862_v37 = vsub.f32 %v450_v45, %v549_v34 }
 0x19f   :  { %v501_v40 = vpop.xlane.xlu0 %500  ;;  %643 = vadd.xlane.f32.xlu1 %v610_v10  ;;  %v7866_v35 = vsub.f32 %v453_v46, %v552_v36 }
 0x1a0   :  { %v555_v43 = vmul.f32 0.0078125, %v501_v40  ;;  %v491_v15 = vpop.xlane.xlu1 %490  ;;  %v613_v27 = vmul.f32 %v7862_v37, %v7862_v37 }
 0x1a1   :  { %v550_v62 = vmul.f32 0.0078125, %v491_v15  ;;  %v616_v26 = vmul.f32 %v7866_v35, %v7866_v35 }
 0x1a2   :  { %649 = vadd.xlane.f32.xlu0 %v613_v27  ;;  %v7874_v41 = vsub.f32 %v456_v52, %v555_v43 }
 0x1a3   :  { %v497_v45 = vpop.xlane.xlu0 %496  ;;  %655 = vadd.xlane.f32.xlu1 %v616_v26  ;;  %v7878_v44 = vsub.f32 %v451_v55, %v550_v62 }
 0x1a4   :  { %v553_v46 = vmul.f32 0.0078125, %v497_v45  ;;  %v503_v30 = vpop.xlane.xlu1 %502  ;;  %v619_v63 = vmul.f32 %v7874_v41, %v7874_v41 }
 0x1a5   :  { %v556_v32 = vmul.f32 0.0078125, %v503_v30  ;;  %v614_v34 = vmul.f32 %v7878_v44, %v7878_v44 }
 0x1a6   :  { %661 = vadd.xlane.f32.xlu0 %v619_v63  ;;  %v7886_v49 = vsub.f32 %v454_v57, %v553_v46 }
 0x1a7   :  { %651 = vadd.xlane.f32.xlu1 %v614_v34  ;;  %v7890_v47 = vsub.f32 %v457_v58, %v556_v32 }
 0x1a8   :  { %v499_v52 = vpop.xlane.xlu1 %498  ;;  %v617_v55 = vmul.f32 %v7886_v49, %v7886_v49 }
 0x1a9   :  { %v554_v54 = vmul.f32 0.0078125, %v499_v52  ;;  %v620_v20 = vmul.f32 %v7890_v47, %v7890_v47 }
 0x1aa   :  { %657 = vadd.xlane.f32.xlu0 %v617_v55 }
 0x1ab   :  { %663 = vadd.xlane.f32.xlu1 %v620_v20  ;;  %v7898_v53 = vsub.f32 %v455_v2, %v554_v54 }
 0x1ad   :  { %v618_v57 = vmul.f32 %v7898_v53, %v7898_v53 }
 0x1af   :  { %v517_v56 = vpop.xlane.xlu0 %516  ;;  %659 = vadd.xlane.f32.xlu1 %v618_v57 }
 0x1b0   :  { %v563_v58 = vmul.f32 0.0078125, %v517_v56 }
 0x1b1   :  { %v519_v36 = vpop.xlane.xlu1 %518 }
 0x1b2   :  { %v564_v10 = vmul.f32 0.0078125, %v519_v36  ;;  %v7904_v40 = vsub.f32 %v464_v7, %v563_v58 }
 0x1b3   :  { %v513_v43 = vpop.xlane.xlu0 %512 }
 0x1b4   :  { %v561_v15 = vmul.f32 0.0078125, %v513_v43  ;;  %v627_v27 = vmul.f32 %v7904_v40, %v7904_v40  ;;  %v7910_v59 = vsub.f32 %v465_v11, %v564_v10 }
 0x1b6   :  { %677 = vadd.xlane.f32.xlu0 %v627_v27  ;;  %v628_v2 = vmul.f32 %v7910_v59, %v7910_v59  ;;  %v7916_v62 = vsub.f32 %v462_v12, %v561_v15 }
 0x1b7   :  { %v515_v4 = vpop.xlane.xlu0 %514 }
 0x1b8   :  { %v562_v7 = vmul.f32 0.0078125, %v515_v4  ;;  %679 = vadd.xlane.f32.xlu1 %v628_v2  ;;  %v625_v26 = vmul.f32 %v7916_v62, %v7916_v62 }
 0x1b9   :  { %v527_v45 = vpop.xlane.xlu1 %526 }
 0x1ba   :  { %v568_v46 = vmul.f32 0.0078125, %v527_v45  ;;  %673 = vadd.xlane.f32.xlu0 %v625_v26  ;;  %v7922_v9 = vsub.f32 %v463_v17, %v562_v7 }
 0x1bb   :  { %v525_v11 = vpop.xlane.xlu0 %524 }
 0x1bc   :  { %v567_v30 = vmul.f32 0.0078125, %v525_v11  ;;  %v626_v8 = vmul.f32 %v7922_v9, %v7922_v9  ;;  %v7928_v12 = vsub.f32 %v469_v21, %v568_v46 }
 0x1bd   :  { %v523_v63 = vpop.xlane.xlu1 %522 }
 0x1be   :  { %v566_v32 = vmul.f32 0.0078125, %v523_v63  ;;  %675 = vadd.xlane.f32.xlu1 %v626_v8  ;;  %v7932_v34 = vsub.f32 %v468_v23, %v567_v30  ;;  %v632_v55 = vmul.f32 %v7928_v12, %v7928_v12 }
 0x1bf   :  { %v521_v52 = vpop.xlane.xlu0 %520 }
 0x1c0   :  { %v565_v13 = vmul.f32 0.0078125, %v521_v52  ;;  %v631_v17 = vmul.f32 %v7932_v34, %v7932_v34  ;;  %v7940_v19 = vsub.f32 %v467_v29, %v566_v32 }
 0x1c1   :  { %v535_v21 = vpop.xlane.xlu1 %534 }
 0x1c2   :  { %v572_v54 = vmul.f32 0.0078125, %v535_v21  ;;  %685 = vadd.xlane.f32.xlu0 %v631_v17  ;;  %687 = vadd.xlane.f32.xlu1 %v632_v55  ;;  %v7944_v18 = vsub.f32 %v466_v38, %v565_v13  ;;  %v630_v56 = vmul.f32 %v7940_v19, %v7940_v19 }
 0x1c3   :  { %v533_v23 = vpop.xlane.xlu0 %532 }
 0x1c4   :  { %v571_v20 = vmul.f32 0.0078125, %v533_v23  ;;  %v629_v57 = vmul.f32 %v7944_v18, %v7944_v18  ;;  %v7952_v22 = vsub.f32 %v473_v50, %v572_v54 }
 0x1c5   :  { %v531_v29 = vpop.xlane.xlu1 %530 }
 0x1c6   :  { %v570_v58 = vmul.f32 0.0078125, %v531_v29  ;;  %681 = vadd.xlane.f32.xlu0 %v629_v57  ;;  %683 = vadd.xlane.f32.xlu1 %v630_v56  ;;  %v7956_v38 = vsub.f32 %v11064_v25, %v571_v20  ;;  %v636_v15 = vmul.f32 %v7952_v22, %v7952_v22 }
 0x1c7   :  { %v529_v36 = vpop.xlane.xlu0 %528 }
 0x1c8   :  { %v569_v10 = vmul.f32 0.0078125, %v529_v36  ;;  %v635_v43 = vmul.f32 %v7956_v38, %v7956_v38  ;;  %v7964_v50 = vsub.f32 %v11065_v42, %v570_v58 }
 0x1c9   :  { %v507_v27 = vpop.xlane.xlu1 %506 }
 0x1ca   :  { %v558_v2 = vmul.f32 0.0078125, %v507_v27  ;;  %693 = vadd.xlane.f32.xlu0 %v635_v43  ;;  %695 = vadd.xlane.f32.xlu1 %v636_v15  ;;  %v7968_v4 = vsub.f32 %v11066_v39, %v569_v10  ;;  %v634_v46 = vmul.f32 %v7964_v50, %v7964_v50  ;;  %v11074_v39 = vmax.f32 %v7704_v61, 0.0  ;;  %v6951_v61 = vld [vmem:[%s11076_s3 + $0x4] ss:$8 sps:$4 sm:$0xff]  }
 0x1cb   :  { %v505_v7 = vpop.xlane.xlu0 %504  ;;  %1823 = vmatprep.mubr.bf16.mxu0 %v6951_v61  ;;  %v1025_v61 = vld [vmem:[%s11077_s10 + $0xa0] sm:$0xff] }
 0x1cc   :  { %v557_v26 = vmul.f32 0.0078125, %v505_v7  ;;  %v633_v45 = vmul.f32 %v7968_v4, %v7968_v4  ;;  %v7976_v11 = vsub.f32 %v11067_v51, %v558_v2  ;;  %v1007_v51 = vld [vmem:[%s11077_s10 + $0x10] sm:$0xff] }
 0x1cd   :  { %v539_v30 = vpop.xlane.xlu1 %538 }
 0x1ce   :  { %v574_v8 = vmul.f32 0.0078125, %v539_v30  ;;  %689 = vadd.xlane.f32.xlu0 %v633_v45  ;;  %691 = vadd.xlane.f32.xlu1 %v634_v46  ;;  %v7980_v63 = vsub.f32 %v11068_v60, %v557_v26  ;;  %v622_v17 = vmul.f32 %v7976_v11, %v7976_v11  ;;  %v7420_v45 = vmov 0   ;;  %v1006_v46 = vld [vmem:[%s11077_s10 + $0x8] sm:$0xff]  ;;  %v1008_v30 = vld [vmem:[%s11077_s10 + $0x18] sm:$0xff] }
 0x1cf   :  { %v537_v32 = vpop.xlane.xlu0 %536  ;;  %6921 = vset.pattern.permute.xlu1 %v7420_v45  ;;  %6920 = vset.pattern.permute.xlu0 %v7420_v45  ;;  %v1010_v60 = vld [vmem:[%s11077_s10 + $0x28] sm:$0xff]  ;;  %v1020_v45 = vld [vmem:[%s11077_s10 + $0x78] sm:$0xff] }
 0x1d0   :  { %v573_v52 = vmul.f32 0.0078125, %v537_v32  ;;  %v621_v13 = vmul.f32 %v7980_v63, %v7980_v63  ;;  %v7988_v55 = vsub.f32 %v11069_v3, %v574_v8  ;;  %v1009_v8 = vld [vmem:[%s11077_s10 + $0x20] sm:$0xff]  ;;  %v1011_v32 = vld [vmem:[%s11077_s10 + $0x30] sm:$0xff] }
 0x1d1   :  { %v543_v21 = vpop.xlane.xlu1 %542 }
 0x1d2   :  { %v576_v54 = vmul.f32 0.0078125, %v543_v21  ;;  %665 = vadd.xlane.f32.xlu0 %v621_v13  ;;  %667 = vadd.xlane.f32.xlu1 %v622_v17  ;;  %v7992_v23 = vsub.f32 %v11070_v16, %v573_v52  ;;  %v638_v29 = vmul.f32 %v7988_v55, %v7988_v55  ;;  %v1012_v52 = vld [vmem:[%s11077_s10 + $0x38] sm:$0xff]  ;;  %v1013_v13 = vld [vmem:[%s11077_s10 + $0x40] sm:$0xff]  ;;  %v1015_v21 = vld [vmem:[%s11077_s10 + $0x50] sm:$0xff] }
 0x1d3   :  { %v541_v20 = vpop.xlane.xlu0 %540  ;;  %v1005_v16 = vld [vmem:[%s11077_s10] sm:$0xff] }
 0x1d4   :  { %v575_v57 = vmul.f32 0.0078125, %v541_v20  ;;  %v637_v56 = vmul.f32 %v7992_v23, %v7992_v23  ;;  %v8000_v58 = vsub.f32 %v11071_v31, %v576_v54  ;;  %v1017_v20 = vld [vmem:[%s11077_s10 + $0x60] sm:$0xff]  ;;  %v1014_v31 = vld [vmem:[%s11077_s10 + $0x48] sm:$0xff] }
 0x1d5   :  { %v511_v25 = vpop.xlane.xlu1 %510 }
 0x1d6   :  { %v560_v36 = vmul.f32 0.0078125, %v511_v25  ;;  %697 = vadd.xlane.f32.xlu0 %v637_v56  ;;  %699 = vadd.xlane.f32.xlu1 %v638_v29  ;;  %v8004_v10 = vsub.f32 %v11072_v14, %v575_v57  ;;  %v640_v27 = vmul.f32 %v8000_v58, %v8000_v58  ;;  %v1019_v29 = vld [vmem:[%s11077_s10 + $0x70] sm:$0xff]  ;;  %v1021_v14 = vld [vmem:[%s11077_s10 + $0x80] sm:$0xff] }
 0x1d7   :  { %v509_v43 = vpop.xlane.xlu0 %508 }
 0x1d8   :  { %v559_v15 = vmul.f32 0.0078125, %v509_v43  ;;  %v639_v42 = vmul.f32 %v8004_v10, %v8004_v10  ;;  %v8012_v2 = vsub.f32 %v11073_v1, %v560_v36  ;;  %v1016_v36 = vld [vmem:[%s11077_s10 + $0x58] sm:$0xff]  ;;  %v1018_v1 = vld [vmem:[%s11077_s10 + $0x68] sm:$0xff] }
 0x1da   :  { %701 = vadd.xlane.f32.xlu0 %v639_v42  ;;  %703 = vadd.xlane.f32.xlu1 %v640_v27  ;;  %v8016_v7 = vsub.f32 %v11074_v39, %v559_v15  ;;  %v624_v26 = vmul.f32 %v8012_v2, %v8012_v2  ;;  %v1023_v27 = vld [vmem:[%s11077_s10 + $0x90] sm:$0xff] }
 0x1dc   :  { %v623_v6 = vmul.f32 %v8016_v7, %v8016_v7 }
 0x1de   :  { %669 = vadd.xlane.f32.xlu0 %v623_v6  ;;  %671 = vadd.xlane.f32.xlu1 %v624_v26 }
 0x1ef   :  { %1959 = vperm.xlu1 %6921, %v1006_v46  }
 0x1f3   :  { %1964 = vperm.xlu1 %6921, %v1007_v51  }
 0x1f4   :  { %1954 = vperm.xlu0 %6920, %v1005_v16  }
 0x1f7   :  { %1969 = vperm.xlu1 %6921, %v1008_v30  }
 0x1f8   :  { %1999 = vperm.xlu0 %6920, %v1014_v31  }
 0x1fb   :  { %1974 = vperm.xlu1 %6921, %v1009_v8  }
 0x1fc   :  { %2009 = vperm.xlu0 %6920, %v1016_v36  }
 0x1ff   :  { %1979 = vperm.xlu1 %6921, %v1010_v60  }
 0x200   :  { %2019 = vperm.xlu0 %6920, %v1018_v1  }
 0x203   :  { %1984 = vperm.xlu1 %6921, %v1011_v32  }
 0x204   :  { %2029 = vperm.xlu0 %6920, %v1020_v45   ;;  %v1026_v45 = vld [vmem:[%s11077_s10 + $0xa8] sm:$0xff] }
 0x207   :  { %1989 = vperm.xlu1 %6921, %v1012_v52  }
 0x20b   :  { %1994 = vperm.xlu1 %6921, %v1013_v13  }
 0x20f   :  { %2004 = vperm.xlu1 %6921, %v1015_v21   ;;  %v1022_v21 = vld [vmem:[%s11077_s10 + $0x88] sm:$0xff] }
 0x210   :  { %2039 = vperm.xlu0 %6920, %v1022_v21  }
 0x213   :  { %2014 = vperm.xlu1 %6921, %v1017_v20   ;;  %v1024_v20 = vld [vmem:[%s11077_s10 + $0x98] sm:$0xff] }
 0x214   :  { %2049 = vperm.xlu0 %6920, %v1024_v20  }
 0x217   :  { %2024 = vperm.xlu1 %6921, %v1019_v29  }
 0x218   :  { %2059 = vperm.xlu0 %6920, %v1026_v45  }
 0x21b   :  { %2034 = vperm.xlu1 %6921, %v1021_v14  }
 0x21f   :  { %2044 = vperm.xlu1 %6921, %v1023_v27  }
 0x223   :  { %v646_v17 = vpop.xlane.xlu0 %645  ;;  %2054 = vperm.xlu1 %6921, %v1025_v61  }
 0x224   :  { %v707_v15 = vmul.f32 0.0078125, %v646_v17  ;;  %v1027_v17 = vld [vmem:[%s11077_s10 + $0xb0] sm:$0xff] }
 0x226   :  { %v739_v39 = vadd.f32 1e-05, %v707_v15 }
 0x227   :  { %v642_v3 = vpop.xlane.xlu0 %641  ;;  %2064 = vperm.xlu1 %6921, %v1027_v17  }
 0x228   :  { %v648_v54 = vpop.xlane.xlu1 %647  ;;  %v705_v46 = vmul.f32 0.0078125, %v642_v3  ;;  %7098 = vrsqrt.f32 %v739_v39 }
 0x229   :  { %v708_v6 = vmul.f32 0.0078125, %v648_v54 }
 0x22a   :  { %v737_v32 = vadd.f32 1e-05, %v705_v46 }
 0x22b   :  { %v654_v56 = vpop.xlane.xlu0 %653  ;;  %v740_v30 = vadd.f32 1e-05, %v708_v6  ;;  %v1031_v6 = vld [vmem:[%s11077_s10 + $0xd0] sm:$0xff] }
 0x22c   :  { %v644_v57 = vpop.xlane.xlu1 %643  ;;  %v711_v8 = vmul.f32 0.0078125, %v654_v56 }
 0x22d   :  { %v706_v0 = vmul.f32 0.0078125, %v644_v57  ;;  %7100 = vrsqrt.f32 %v740_v30  ;;  %v1029_v57 = vld [vmem:[%s11077_s10 + $0xc0] sm:$0xff] }
 0x22e   :  { %v743_v3 = vadd.f32 1e-05, %v711_v8  ;;  %2074 = vperm.xlu1 %6921, %v1029_v57  }
 0x22f   :  { %v650_v43 = vpop.xlane.xlu0 %649  ;;  %v738_v60 = vadd.f32 1e-05, %v706_v0 }
 0x230   :  { %v656_v25 = vpop.xlane.xlu1 %655  ;;  %v709_v52 = vmul.f32 0.0078125, %v650_v43 }
 0x231   :  { %v712_v54 = vmul.f32 0.0078125, %v656_v25  ;;  %7102 = vrsqrt.f32 %v738_v60 }
 0x232   :  { %7104 = vrsqrt.f32 %v737_v32  ;;  %v741_v56 = vadd.f32 1e-05, %v709_v52  ;;  %v7099_v14 = vpop.eup %7098  ;;  %2084 = vperm.xlu1 %6921, %v1031_v6   ;;  %v1033_v32 = vld [vmem:[%s11077_s10 + $0xe0] sm:$0xff] }
 0x233   :  { %v662_v26 = vpop.xlane.xlu0 %661  ;;  %7106 = vrsqrt.f32 %v743_v3  ;;  %v744_v31 = vadd.f32 1e-05, %v712_v54 }
 0x234   :  { %v652_v42 = vpop.xlane.xlu1 %651  ;;  %v715_v43 = vmul.f32 0.0078125, %v662_v26  ;;  %7108 = vrsqrt.f32 %v741_v56  ;;  %v803_v26 = vmul.f32 %v7099_v14, %v7832_v24  ;;  %v8113_v24 = vld [vmem:[%s11078_s7] ss:$0 sm:$0xff]  ;;  %s11080_s7 = sld [smem:[#allocation79_spill]] }
 0x235   :  { %v710_v1 = vmul.f32 0.0078125, %v652_v42  ;;  %7110 = vrsqrt.f32 %v744_v31  ;;  %v1028_v42 = vld [vmem:[%s11077_s10 + $0xb8] sm:$0xff] }
 0x236   :  { %v747_v30 = vadd.f32 1e-05, %v715_v43  ;;  %2069 = vperm.xlu0 %6920, %v1028_v42   ;;  %2094 = vperm.xlu1 %6921, %v1033_v32  }
 0x237   :  { %v658_v13 = vpop.xlane.xlu0 %657  ;;  %v7101_v46 = vpop.eup %7100  ;;  %v742_v52 = vadd.f32 1e-05, %v710_v1 }
 0x238   :  { %v664_v51 = vpop.xlane.xlu1 %663  ;;  %v713_v8 = vmul.f32 0.0078125, %v658_v13  ;;  %v804_v13 = vmul.f32 %v7101_v46, %v7842_v48  ;;  %v1030_v48 = vld [vmem:[%s11077_s10 + $0xc8] sm:$0xff] }
 0x239   :  { %v716_v17 = vmul.f32 0.0078125, %v664_v51  ;;  %v841_v51 = vmul.f32 %v8113_v24, %v803_v26 }
 0x23a   :  { %v745_v56 = vadd.f32 1e-05, %v713_v8  ;;  %2079 = vperm.xlu0 %6920, %v1030_v48   ;;  %v842_v6 = vmul.f32 %v8113_v24, %v804_v13  ;;  %v973_v46 = vld [vmem:[%s11080_s7] sm:$0xff]  ;;  %v1034_v48 = vld [vmem:[%s11077_s10 + $0xe8] sm:$0xff] }
 0x23b   :  { %v7103_v3 = vpop.eup %7102  ;;  %v748_v31 = vadd.f32 1e-05, %v716_v17 }
 0x23c   :  { %v660_v16 = vpop.xlane.xlu1 %659  ;;  %v7105_v20 = vpop.eup %7104  ;;  %v802_v43 = vmul.f32 %v7103_v3, %v7854_v33 }
 0x23d   :  { %v7107_v57 = vpop.eup %7106  ;;  %v801_v33 = vmul.f32 %v7105_v20, %v7838_v5 }
 0x23e   :  { %v807_v45 = vmul.f32 %v7107_v57, %v7850_v28  ;;  %v840_v28 = vmul.f32 %v8113_v24, %v802_v43 }
 0x240   :  { %v845_v13 = vmul.f32 %v8113_v24, %v807_v45 }
 0x243   :  { %v678_v29 = vpop.xlane.xlu0 %677 }
 0x244   :  { %v723_v36 = vmul.f32 0.0078125, %v678_v29 }
 0x245   :  { %v680_v25 = vpop.xlane.xlu1 %679 }
 0x246   :  { %v755_v15 = vadd.f32 1e-05, %v723_v36  ;;  %v724_v27 = vmul.f32 0.0078125, %v680_v25  ;;  %v714_v36 = vmul.f32 0.0078125, %v660_v16  ;;  %v7109_v16 = vpop.eup %7108 }
 0x247   :  { %v674_v39 = vpop.xlane.xlu0 %673  ;;  %v805_v3 = vmul.f32 %v7109_v16, %v7862_v37 }
 0x248   :  { %v756_v0 = vadd.f32 1e-05, %v724_v27  ;;  %v721_v61 = vmul.f32 0.0078125, %v674_v39  ;;  %7112 = vrsqrt.f32 %v755_v15  ;;  %v1035_v15 = vld [vmem:[%s11077_s10 + $0xf0] sm:$0xff]  ;;  %v8127_v39 = vld [vmem:[%s11079_s28] ss:$0 sm:$0xff] }
 0x249   :  { %2104 = vperm.xlu1 %6921, %v1035_v15   ;;  %v746_v5 = vadd.f32 1e-05, %v714_v36  ;;  %v879_v32 = vadd.f32 %v8127_v39, %v841_v51  ;;  %v880_v20 = vadd.f32 %v8127_v39, %v842_v6  ;;  %v975_v15 = vld [vmem:[%s11080_s7 + $0x10] sm:$0xff]  ;;  %v1036_v6 = vld [vmem:[%s11077_s10 + $0xf8] sm:$0xff]  ;;  %s11087_s28 = sld [smem:[#allocation80_spill]] }
 0x24a   :  { %7114 = vrsqrt.f32 %v756_v0  ;;  %v753_v60 = vadd.f32 1e-05, %v721_v61  ;;  %v1032_v0 = vld [vmem:[%s11077_s10 + $0xd8] sm:$0xff]  ;;  %v7111_v61 = vpop.eup %7110 }
 0x24b   :  { %v676_v21 = vpop.xlane.xlu1 %675  ;;  %2089 = vperm.xlu0 %6920, %v1032_v0  }
 0x24c   :  { %7116 = vrsqrt.f32 %v753_v60  ;;  %v722_v54 = vmul.f32 0.0078125, %v676_v21 }
 0x24d   :  { %7118 = vrsqrt.f32 %v747_v30  ;;  %1425 = vperm.xlu1 %6921, %v973_v46   ;;  %v977_v46 = vld [vmem:[%s11080_s7 + $0x20] sm:$0xff] }
 0x24e   :  { %v754_v29 = vadd.f32 1e-05, %v722_v54  ;;  %7120 = vrsqrt.f32 %v742_v52  ;;  %v839_v54 = vmul.f32 %v8113_v24, %v801_v33  ;;  %v883_v33 = vadd.f32 %v8127_v39, %v845_v13 }
 0x24f   :  { %v686_v25 = vpop.xlane.xlu0 %685  ;;  %v688_v14 = vpop.xlane.xlu1 %687  ;;  %2099 = vperm.xlu0 %6920, %v1034_v48   ;;  %v974_v48 = vld [vmem:[%s11080_s7 + $0x8] sm:$0xff] }
 0x250   :  { %7122 = vrsqrt.f32 %v754_v29  ;;  %v727_v27 = vmul.f32 0.0078125, %v686_v25  ;;  %v728_v1 = vmul.f32 0.0078125, %v688_v14  ;;  %v878_v14 = vadd.f32 %v8127_v39, %v840_v28 }
 0x251   :  { %7124 = vrsqrt.f32 %v745_v56  ;;  %v877_v16 = vadd.f32 %v8127_v39, %v839_v54  ;;  %1435 = vperm.xlu1 %6921, %v975_v15  }
 0x252   :  { %v759_v26 = vadd.f32 1e-05, %v727_v27  ;;  %v760_v42 = vadd.f32 1e-05, %v728_v1  ;;  %v7113_v30 = vpop.eup %7112  ;;  %7126 = vrsqrt.f32 %v748_v31  ;;  %v808_v31 = vmul.f32 %v7111_v61, %v7866_v35 }
 0x253   :  { %v682_v8 = vpop.xlane.xlu0 %681  ;;  %v684_v60 = vpop.xlane.xlu1 %683  ;;  %v819_v43 = vmul.f32 %v7113_v30, %v7904_v40  ;;  %v843_v1 = vmul.f32 %v8113_v24, %v805_v3  ;;  %v8157_v40 = vpack.c.bf16 %v880_v20, %v879_v32  ;;  %v8170_v28 = vpack.c.bf16 %v878_v14, %v877_v16  ;;  %2109 = vperm.xlu0 %6920, %v1036_v6  }
 0x254   :  { %v7115_v52 = vpop.eup %7114  ;;  %7128 = vrsqrt.f32 %v759_v26  ;;  %v725_v17 = vmul.f32 0.0078125, %v682_v8  ;;  %v726_v21 = vmul.f32 0.0078125, %v684_v60 }
 0x255   :  { %7130 = vrsqrt.f32 %v760_v42  ;;  %v820_v51 = vmul.f32 %v7115_v52, %v7910_v59  ;;  %v846_v42 = vmul.f32 %v8113_v24, %v808_v31  ;;  %v857_v32 = vmul.f32 %v8113_v24, %v819_v43  ;;  %1445 = vperm.xlu1 %6921, %v977_v46  }
 0x256   :  { %v7117_v57 = vpop.eup %7116  ;;  %v757_v56 = vadd.f32 1e-05, %v725_v17  ;;  %v758_v29 = vadd.f32 1e-05, %v726_v21  ;;  %7132 = vrsqrt.f32 %v746_v5  ;;  %v8176_v3 = vadd.f32 %v8127_v39, %v843_v1 }
 0x257   :  { %v694_v36 = vpop.xlane.xlu0 %693  ;;  %v696_v25 = vpop.xlane.xlu1 %695  ;;  %v817_v37 = vmul.f32 %v7117_v57, %v7916_v62  ;;  %v858_v26 = vmul.f32 %v8113_v24, %v820_v51  ;;  %v884_v31 = vadd.f32 %v8127_v39, %v846_v42  ;;  %v895_v15 = vadd.f32 %v8127_v39, %v857_v32  ;;  %1430 = vperm.xlu0 %6920, %v974_v48  }
 0x258   :  { %v7119_v59 = vpop.eup %7118  ;;  %7134 = vrsqrt.f32 %v757_v56  ;;  %v731_v35 = vmul.f32 0.0078125, %v694_v36  ;;  %v732_v27 = vmul.f32 0.0078125, %v696_v25 }
 0x259   :  { %v7121_v62 = vpop.eup %7120  ;;  %7136 = vrsqrt.f32 %v758_v29  ;;  %v855_v60 = vmul.f32 %v8113_v24, %v817_v37  ;;  %v811_v13 = vmul.f32 %v7119_v59, %v7874_v41  ;;  %v896_v51 = vadd.f32 %v8127_v39, %v858_v26  ;;  %v979_v41 = vld [vmem:[%s11080_s7 + $0x30] sm:$0xff] }
 0x25a   :  { %v7123_v45 = vpop.eup %7122  ;;  %v763_v0 = vadd.f32 1e-05, %v731_v35  ;;  %v764_v61 = vadd.f32 1e-05, %v732_v27  ;;  %v806_v20 = vmul.f32 %v7121_v62, %v7878_v44  ;;  %1455 = vperm.xlu1 %6921, %v979_v41   ;;  %v8204_v26 = vpack.c.bf16 %v884_v31, %v883_v33  ;;  %v976_v33 = vld [vmem:[%s11080_s7 + $0x18] sm:$0xff] }
 0x25b   :  { %v690_v30 = vpop.xlane.xlu0 %689  ;;  %v692_v5 = vpop.xlane.xlu1 %691  ;;  %v818_v8 = vmul.f32 %v7123_v45, %v7922_v9  ;;  %v893_v14 = vadd.f32 %v8127_v39, %v855_v60  ;;  %v8200_v16 = vmul.f32 %v8113_v24, %v811_v13  ;;  %v981_v60 = vld [vmem:[%s11080_s7 + $0x40] sm:$0xff]  ;;  %1440 = vperm.xlu0 %6920, %v976_v33  }
 0x25c   :  { %v8173_v52 = vpop.eup %7124  ;;  %7138 = vrsqrt.f32 %v763_v0  ;;  %v729_v17 = vmul.f32 0.0078125, %v690_v30  ;;  %v730_v21 = vmul.f32 0.0078125, %v692_v5 }
 0x25d   :  { %v8178_v54 = vpop.eup %7126  ;;  %7140 = vrsqrt.f32 %v764_v61  ;;  %v856_v9 = vmul.f32 %v8113_v24, %v818_v8  ;;  %v8202_v61 = vpack.c.bf16 %v896_v51, %v895_v15 }
 0x25e   :  { %v7129_v57 = vpop.eup %7128  ;;  %v761_v56 = vadd.f32 1e-05, %v729_v17  ;;  %v762_v29 = vadd.f32 1e-05, %v730_v21  ;;  %1465 = vperm.xlu1 %6921, %v981_v60   ;;  %v812_v48 = vmul.f32 %v8178_v54, %v7890_v47 }
 0x25f   :  { %v7131_v36 = vpop.eup %7130  ;;  %v666_v25 = vpop.xlane.xlu0 %665  ;;  %v894_v43 = vadd.f32 %v8127_v39, %v856_v9  ;;  %v823_v44 = vmul.f32 %v7129_v57, %v7932_v34  ;;  %v844_v34 = vmul.f32 %v8113_v24, %v806_v20  ;;  %v809_v20 = vmul.f32 %v8173_v52, %v7886_v49  ;;  %v983_v52 = vld [vmem:[%s11080_s7 + $0x50] sm:$0xff] }
 0x260   :  { %v668_v37 = vpop.xlane.xlu1 %667  ;;  %7142 = vrsqrt.f32 %v761_v56  ;;  %v717_v59 = vmul.f32 0.0078125, %v666_v25  ;;  %v824_v27 = vmul.f32 %v7131_v36, %v7928_v12  ;;  %v7133_v1 = vpop.eup %7132  ;;  %v850_v60 = vmul.f32 %v8113_v24, %v812_v48 }
 0x261   :  { %v718_v35 = vmul.f32 0.0078125, %v668_v37  ;;  %7144 = vrsqrt.f32 %v762_v29  ;;  %v8196_v62 = vpack.c.bf16 %v894_v43, %v893_v14  ;;  %v861_v5 = vmul.f32 %v8113_v24, %v823_v44 }
 0x262   :  { %v7135_v6 = vpop.eup %7134  ;;  %v749_v45 = vadd.f32 1e-05, %v717_v59  ;;  %v862_v8 = vmul.f32 %v8113_v24, %v824_v27  ;;  %v882_v9 = vadd.f32 %v8127_v39, %v844_v34  ;;  %v810_v51 = vmul.f32 %v7133_v1, %v7898_v53  ;;  %v978_v53 = vld [vmem:[%s11080_s7 + $0x28] sm:$0xff]  ;;  %1475 = vperm.xlu1 %6921, %v983_v52  }
 0x263   :  { %v750_v0 = vadd.f32 1e-05, %v718_v35  ;;  %v7137_v42 = vpop.eup %7136  ;;  %v698_v12 = vpop.xlane.xlu0 %697  ;;  %5791 = vmatprep.subr.bf16.mxu1 %v8196_v62  ;;  %5903 = vmatprep.subr.bf16.mxu0 %v8196_v62  ;;  %v821_v30 = vmul.f32 %v7135_v6, %v7944_v18  ;;  %v899_v37 = vadd.f32 %v8127_v39, %v861_v5 }
 0x264   :  { %v700_v46 = vpop.xlane.xlu1 %699  ;;  %7146 = vrsqrt.f32 %v749_v45  ;;  %v733_v32 = vmul.f32 0.0078125, %v698_v12  ;;  %5792 = vmatpush3.bf16.msra.mxu1 %v8170_v28  ;;  %5904 = vmatpush3.bf16.msra.mxu0 %v8170_v28  ;;  %v822_v18 = vmul.f32 %v7137_v42, %v7940_v19  ;;  %v900_v14 = vadd.f32 %v8127_v39, %v862_v8 }
 0x265   :  { %v734_v17 = vmul.f32 0.0078125, %v700_v46  ;;  %7148 = vrsqrt.f32 %v750_v0  ;;  %5793 = vmatprep.subr.bf16.mxu1 %v8202_v61  ;;  %5905 = vmatprep.subr.bf16.mxu0 %v8202_v61  ;;  %v859_v21 = vmul.f32 %v8113_v24, %v821_v30  ;;  %v848_v34 = vmul.f32 %v8113_v24, %v810_v51  ;;  %v985_v30 = vld [vmem:[%s11080_s7 + $0x60] sm:$0xff]  ;;  %v987_v51 = vld [vmem:[%s11080_s7 + $0x70] sm:$0xff] }
 0x266   :  { %v7139_v13 = vpop.eup %7138  ;;  %v765_v57 = vadd.f32 1e-05, %v733_v32  ;;  %v860_v29 = vmul.f32 %v8113_v24, %v822_v18  ;;  %1450 = vperm.xlu0 %6920, %v978_v53   ;;  %v8250_v42 = vpack.c.bf16 %v900_v14, %v899_v37  ;;  %v847_v8 = vmul.f32 %v8113_v24, %v809_v20  ;;  %1485 = vperm.xlu1 %6921, %v985_v30  }
 0x267   :  { %v766_v56 = vadd.f32 1e-05, %v734_v17  ;;  %v7141_v19 = vpop.eup %7140  ;;  %v702_v31 = vpop.xlane.xlu0 %701  ;;  %v897_v25 = vadd.f32 %v8127_v39, %v859_v21  ;;  %v827_v49 = vmul.f32 %v7139_v13, %v7956_v38  ;;  %v8242_v38 = vpack.c.bf16 %v882_v9, %v8176_v3 }
 0x268   :  { %v704_v36 = vpop.xlane.xlu1 %703  ;;  %7150 = vrsqrt.f32 %v765_v57  ;;  %v735_v43 = vmul.f32 0.0078125, %v702_v31  ;;  %5794 = vmatpush3.bf16.msra.mxu1 %v8157_v40  ;;  %5906 = vmatpush3.bf16.msra.mxu0 %v8157_v40  ;;  %v898_v44 = vadd.f32 %v8127_v39, %v860_v29  ;;  %v828_v41 = vmul.f32 %v7141_v19, %v7952_v22  ;;  %11082 = vst [vmem:[#allocation3_spill] sm:$0xff] %v8250_v42  ;;  %v982_v19 = vld [vmem:[%s11080_s7 + $0x48] sm:$0xff] }
 0x269   :  { %v736_v15 = vmul.f32 0.0078125, %v704_v36  ;;  %7152 = vrsqrt.f32 %v766_v56  ;;  %v865_v22 = vmul.f32 %v8113_v24, %v827_v49  ;;  %v886_v18 = vadd.f32 %v8127_v39, %v848_v34 }
 0x26a   :  { %v7143_v59 = vpop.eup %7142  ;;  %v767_v35 = vadd.f32 1e-05, %v735_v43  ;;  %v8247_v1 = vpack.c.bf16 %v898_v44, %v897_v25  ;;  %v866_v47 = vmul.f32 %v8113_v24, %v828_v41  ;;  %1495 = vperm.xlu1 %6921, %v987_v51   ;;  %v887_v43 = vadd.f32 %v8127_v39, %v8200_v16  ;;  %v989_v44 = vld [vmem:[%s11080_s7 + $0x80] sm:$0xff]  ;;  %v7043_v51 = vld [vmem:[%s11087_s28 + $0x8] sm:$0xff]  }
 0x26b   :  { %v768_v27 = vadd.f32 1e-05, %v736_v15  ;;  %v7145_v6 = vpop.eup %7144  ;;  %v670_v45 = vpop.xlane.xlu0 %669  ;;  %v825_v3 = vmul.f32 %v7143_v59, %v7968_v4  ;;  %v980_v4 = vld [vmem:[%s11080_s7 + $0x38] sm:$0xff]  ;;  %v903_v13 = vadd.f32 %v8127_v39, %v865_v22  ;;  %v986_v22 = vld [vmem:[%s11080_s7 + $0x68] sm:$0xff] }
 0x26c   :  { %11081 = vst [vmem:[#allocation2_spill] sm:$0xff] %v8247_v1  ;;  %v672_v0 = vpop.xlane.xlu1 %671  ;;  %7154 = vrsqrt.f32 %v767_v35  ;;  %v719_v54 = vmul.f32 0.0078125, %v670_v45  ;;  %5795 = vmatprep.subr.bf16.mxu1 %v8247_v1  ;;  %5907 = vmatprep.subr.bf16.mxu0 %v8247_v1  ;;  %v826_v46 = vmul.f32 %v7145_v6, %v7964_v50  ;;  %v904_v56 = vadd.f32 %v8127_v39, %v866_v47 }
 0x26d   :  { %v720_v12 = vmul.f32 0.0078125, %v672_v0  ;;  %7156 = vrsqrt.f32 %v768_v27  ;;  %5796 = vmatpush3.bf16.msra.mxu1 %v8242_v38  ;;  %5908 = vmatpush3.bf16.msra.mxu0 %v8242_v38  ;;  %v863_v5 = vmul.f32 %v8113_v24, %v825_v3  ;;  %v991_v3 = vld [vmem:[%s11080_s7 + $0x90] sm:$0xff] }
 0x26e   :  { %v7147_v50 = vpop.eup %7146  ;;  %v751_v33 = vadd.f32 1e-05, %v719_v54  ;;  %5797 = vmatprep.subr.bf16.mxu1 %v8250_v42  ;;  %5909 = vmatprep.subr.bf16.mxu0 %v8250_v42  ;;  %v864_v17 = vmul.f32 %v8113_v24, %v826_v46  ;;  %v8298_v53 = vpack.c.bf16 %v904_v56, %v903_v13  ;;  %v6949_v13 = vld [vmem:[%s11076_s3] ss:$8 sps:$4 sm:$0xff]  }
 0x26f   :  { %v752_v32 = vadd.f32 1e-05, %v720_v12  ;;  %v7149_v21 = vpop.eup %7148  ;;  %v901_v9 = vadd.f32 %v8127_v39, %v863_v5  ;;  %v813_v20 = vmul.f32 %v7147_v50, %v7980_v63  ;;  %1460 = vperm.xlu0 %6920, %v980_v4   ;;  %v885_v63 = vadd.f32 %v8127_v39, %v847_v8  ;;  %1505 = vperm.xlu1 %6921, %v989_v44   ;;  %v988_v50 = vld [vmem:[%s11080_s7 + $0x78] sm:$0xff]  ;;  %v997_v56 = vld [vmem:[%s11080_s7 + $0xc0] sm:$0xff]  ;;  %v1003_v44 = vld [vmem:[%s11080_s7 + $0xf0] sm:$0xff] }
 0x270   :  { %7158 = vrsqrt.f32 %v751_v33  ;;  %v902_v57 = vadd.f32 %v8127_v39, %v864_v17  ;;  %v814_v29 = vmul.f32 %v7149_v21, %v7976_v11  ;;  %v888_v11 = vadd.f32 %v8127_v39, %v850_v60  ;;  %11084 = vst [vmem:[#allocation5_spill] sm:$0xff] %v8298_v53  ;;  %v993_v60 = vld [vmem:[%s11080_s7 + $0xa0] sm:$0xff]  ;;  %v990_v21 = vld [vmem:[%s11080_s7 + $0x88] sm:$0xff] }
 0x271   :  { %7160 = vrsqrt.f32 %v752_v32  ;;  %5798 = vmatpush3.bf16.msra.mxu1 %v8204_v26  ;;  %5910 = vmatpush3.bf16.msra.mxu0 %v8204_v26  ;;  %v851_v25 = vmul.f32 %v8113_v24, %v813_v20  ;;  %v8292_v14 = vpack.c.bf16 %v886_v18, %v885_v63  ;;  %v995_v18 = vld [vmem:[%s11080_s7 + $0xb0] sm:$0xff]  ;;  %v994_v63 = vld [vmem:[%s11080_s7 + $0xa8] sm:$0xff] }
 0x272   :  { %v7151_v31 = vpop.eup %7150  ;;  %v8288_v36 = vpack.c.bf16 %v902_v57, %v901_v9  ;;  %v852_v52 = vmul.f32 %v8113_v24, %v814_v29  ;;  %v6954_v20 = vld [vmem:[%s11076_s3 + $0x14] ss:$8 sps:$4 sm:$0xff]   ;;  %v7042_v57 = vld [vmem:[%s11087_s28] sm:$0xff]  }
 0x273   :  { %v7153_v37 = vpop.eup %7152  ;;  %v829_v49 = vmul.f32 %v7151_v31, %v7992_v23  ;;  %1470 = vperm.xlu0 %6920, %v982_v19   ;;  %v984_v23 = vld [vmem:[%s11080_s7 + $0x58] sm:$0xff]  ;;  %v889_v59 = vadd.f32 %v8127_v39, %v851_v25  ;;  %1515 = vperm.xlu1 %6921, %v991_v3   ;;  %v999_v19 = vld [vmem:[%s11080_s7 + $0xd0] sm:$0xff]  ;;  %v6958_v25 = vld [vmem:[%s11075_s2 + $0x24] ss:$8 sps:$4 sm:$0xff]  }
 0x274   :  { %11083 = vst [vmem:[#allocation4_spill] sm:$0xff] %v8288_v36  ;;  %5799 = vmatprep.subr.bf16.mxu1 %v8288_v36  ;;  %5911 = vmatprep.subr.bf16.mxu0 %v8288_v36  ;;  %v830_v15 = vmul.f32 %v7153_v37, %v7988_v55  ;;  %v8314_v55 = vpack.c.bf16 %v888_v11, %v887_v43  ;;  %v992_v29 = vld [vmem:[%s11080_s7 + $0x98] sm:$0xff]  ;;  %v6960_v37 = vld [vmem:[%s11076_s3 + $0x24] ss:$8 sps:$4 sm:$0xff]   ;;  %v7044_v43 = vld [vmem:[%s11087_s28 + $0x10] sm:$0xff]  }
 0x275   :  { %5800 = vmatpush3.bf16.msra.mxu1 %v8292_v14  ;;  %5912 = vmatpush3.bf16.msra.mxu0 %v8292_v14  ;;  %v867_v41 = vmul.f32 %v8113_v24, %v829_v49  ;;  %v890_v34 = vadd.f32 %v8127_v39, %v852_v52  ;;  %v6956_v31 = vld [vmem:[%s11075_s2 + $0x10] ss:$8 sps:$4 sm:$0xff]   ;;  %v1001_v49 = vld [vmem:[%s11080_s7 + $0xe0] sm:$0xff] }
 0x276   :  { %v7155_v48 = vpop.eup %7154  ;;  %5801 = vmatprep.subr.bf16.mxu1 %v8298_v53  ;;  %5913 = vmatprep.subr.bf16.mxu0 %v8298_v53  ;;  %v868_v16 = vmul.f32 %v8113_v24, %v830_v15  ;;  %v6957_v11 = vld [vmem:[%s11076_s3 + $0x10] ss:$8 sps:$4 sm:$0xff]  }
 0x277   :  { %v7157_v35 = vpop.eup %7156  ;;  %v905_v27 = vadd.f32 %v8127_v39, %v867_v41  ;;  %v831_v6 = vmul.f32 %v7155_v48, %v8004_v10  ;;  %1480 = vperm.xlu0 %6920, %v984_v23   ;;  %v8335_v46 = vpack.c.bf16 %v890_v34, %v889_v59  ;;  %1525 = vperm.xlu1 %6921, %v993_v60   ;;  %v996_v52 = vld [vmem:[%s11080_s7 + $0xb8] sm:$0xff]  ;;  %v998_v23 = vld [vmem:[%s11080_s7 + $0xc8] sm:$0xff] }
 0x278   :  { %v906_v45 = vadd.f32 %v8127_v39, %v868_v16  ;;  %v832_v0 = vmul.f32 %v7157_v35, %v8000_v58  ;;  %v7045_v15 = vld [vmem:[%s11087_s28 + $0x18] sm:$0xff]   ;;  %v6962_v41 = vld [vmem:[%s11075_s2 + $0x20] ss:$8 sps:$4 sm:$0xff]  }
 0x279   :  { %5802 = vmatpush3.bf16.msra.mxu1 %v8314_v55  ;;  %5914 = vmatpush3.bf16.msra.mxu0 %v8314_v55  ;;  %v869_v10 = vmul.f32 %v8113_v24, %v831_v6  ;;  %v6963_v48 = vld [vmem:[%s11076_s3 + $0x20] ss:$8 sps:$4 sm:$0xff]   ;;  %v6964_v16 = vld [vmem:[%s11075_s2 + $0x34] ss:$8 sps:$4 sm:$0xff]   ;;  %v6968_v34 = vld [vmem:[%s11075_s2 + $0x30] ss:$8 sps:$4 sm:$0xff]  }
 0x27a   :  { %v7159_v47 = vpop.eup %7158  ;;  %v8332_v54 = vpack.c.bf16 %v906_v45, %v905_v27  ;;  %v870_v12 = vmul.f32 %v8113_v24, %v832_v0  ;;  %v6966_v59 = vld [vmem:[%s11076_s3 + $0x34] ss:$8 sps:$4 sm:$0xff]   ;;  %v1002_v27 = vld [vmem:[%s11080_s7 + $0xe8] sm:$0xff]  ;;  %v6969_v6 = vld [vmem:[%s11076_s3 + $0x30] ss:$8 sps:$4 sm:$0xff]  }
 0x27b   :  { %v7161_v58 = vpop.eup %7160  ;;  %v907_v30 = vadd.f32 %v8127_v39, %v869_v10  ;;  %v815_v4 = vmul.f32 %v7159_v47, %v8016_v7  ;;  %1490 = vperm.xlu0 %6920, %v986_v22   ;;  %1535 = vperm.xlu1 %6921, %v995_v18   ;;  %v1000_v35 = vld [vmem:[%s11080_s7 + $0xd8] sm:$0xff]  ;;  %v6970_v45 = vld [vmem:[%s11075_s2 + $0x44] ss:$8 sps:$4 sm:$0xff]   ;;  %v6974_v22 = vld [vmem:[%s11075_s2 + $0x40] ss:$8 sps:$4 sm:$0xff]  }
 0x27c   :  { %11085 = vst [vmem:[#allocation6_spill] sm:$0xff] %v8332_v54  ;;  %5803 = vmatprep.subr.bf16.mxu1 %v8332_v54  ;;  %5915 = vmatprep.subr.bf16.mxu0 %v8332_v54  ;;  %v908_v5 = vadd.f32 %v8127_v39, %v870_v12  ;;  %v816_v8 = vmul.f32 %v7161_v58, %v8012_v2  ;;  %v6972_v0 = vld [vmem:[%s11076_s3 + $0x44] ss:$8 sps:$4 sm:$0xff]   ;;  %v1004_v3 = vld [vmem:[%s11080_s7 + $0xf8] sm:$0xff]  ;;  %v6975_v10 = vld [vmem:[%s11076_s3 + $0x40] ss:$8 sps:$4 sm:$0xff]  }
 0x27d   :  { %5804 = vmatpush3.bf16.msra.mxu1 %v8335_v46  ;;  %5916 = vmatpush3.bf16.msra.mxu0 %v8335_v46  ;;  %v853_v7 = vmul.f32 %v8113_v24, %v815_v4  ;;  %v6976_v47 = vld [vmem:[%s11075_s2 + $0x54] ss:$8 sps:$4 sm:$0xff]   ;;  %v6980_v58 = vld [vmem:[%s11075_s2 + $0x50] ss:$8 sps:$4 sm:$0xff]   ;;  %v6982_v4 = vld [vmem:[%s11075_s2 + $0x64] ss:$8 sps:$4 sm:$0xff]  }
 0x27e   :  { %v8352_v33 = vpack.c.bf16 %v908_v5, %v907_v30  ;;  %v854_v32 = vmul.f32 %v8113_v24, %v816_v8  ;;  %v6946_v24 = vld [vmem:[%s11075_s2] ss:$8 sps:$4 sm:$0xff]   ;;  %v6978_v12 = vld [vmem:[%s11076_s3 + $0x54] ss:$8 sps:$4 sm:$0xff]   ;;  %v6981_v30 = vld [vmem:[%s11076_s3 + $0x50] ss:$8 sps:$4 sm:$0xff]  }
 0x27f   :  { %v891_v2 = vadd.f32 %v8127_v39, %v853_v7  ;;  %1500 = vperm.xlu0 %6920, %v988_v50   ;;  %1545 = vperm.xlu1 %6921, %v997_v56   ;;  %v6984_v5 = vld [vmem:[%s11076_s3 + $0x64] ss:$8 sps:$4 sm:$0xff]   ;;  %v6986_v8 = vld [vmem:[%s11075_s2 + $0x60] ss:$8 sps:$4 sm:$0xff]   ;;  %v6988_v50 = vld [vmem:[%s11075_s2 + $0x74] ss:$8 sps:$4 sm:$0xff]  }
 0x280   :  { %11086 = vst [vmem:[#allocation7_spill] sm:$0xff] %v8352_v33  ;;  %5805 = vmatprep.subr.bf16.mxu1 %v8352_v33  ;;  %5917 = vmatprep.subr.bf16.mxu0 %v8352_v33  ;;  %v892_v17 = vadd.f32 %v8127_v39, %v854_v32  ;;  %v6952_v39 = vld [vmem:[%s11075_s2 + $0x14] ss:$8 sps:$4 sm:$0xff]   ;;  %v6987_v60 = vld [vmem:[%s11076_s3 + $0x60] ss:$8 sps:$4 sm:$0xff]  }
 0x281   :  { %v6990_v7 = vld [vmem:[%s11076_s3 + $0x74] ss:$8 sps:$4 sm:$0xff]   ;;  %v6992_v32 = vld [vmem:[%s11075_s2 + $0x70] ss:$8 sps:$4 sm:$0xff]   ;;  %v6996_v18 = vld [vmem:[%s11076_s3 + $0x84] ss:$8 sps:$4 sm:$0xff]  }
 0x282   :  { %v8365_v9 = vpack.c.bf16 %v892_v17, %v891_v2  ;;  %v6993_v2 = vld [vmem:[%s11076_s3 + $0x70] ss:$8 sps:$4 sm:$0xff]   ;;  %v6994_v17 = vld [vmem:[%s11075_s2 + $0x84] ss:$8 sps:$4 sm:$0xff]  }
 0x283   :  { %1510 = vperm.xlu0 %6920, %v990_v21   ;;  %1555 = vperm.xlu1 %6921, %v999_v19   ;;  %v6998_v21 = vld [vmem:[%s11075_s2 + $0x80] ss:$8 sps:$4 sm:$0xff]   ;;  %v7006_v56 = vld [vmem:[%s11075_s2 + $0xa4] ss:$8 sps:$4 sm:$0xff]  }
 0x284   :  { %5806 = vmatpush3.bf16.msra.mxu1 %v8365_v9  ;;  %5918 = vmatpush3.bf16.msra.mxu0 %v8365_v9  ;;  %v7011_v19 = vld [vmem:[%s11076_s3 + $0xa0] ss:$8 sps:$4 sm:$0xff]  }
 0x285   :  { %6455 = vmatprep.subr.bf16.mxu1 %v7042_v57 }
 0x287   :  { %1295 = vmatmul.mubr.bf16.vlgmr.msra.gmra.mrb[0].mxu1 %v6946_v24  ;;  %1824 = vmatmul.mubr.bf16.vlgmr.msra.gmra.mrb[32].mxu0 %v6949_v13  ;;  %v6999_v24 = vld [vmem:[%s11076_s3 + $0x80] ss:$8 sps:$4 sm:$0xff]   ;;  %v7000_v13 = vld [vmem:[%s11075_s2 + $0x94] ss:$8 sps:$4 sm:$0xff]  }
 0x288   :  { %1302 = vmatprep.mubr.bf16.mxu1 %v6952_v39  ;;  %1831 = vmatprep.mubr.bf16.mxu0 %v6954_v20  ;;  %v7002_v39 = vld [vmem:[%s11076_s3 + $0x94] ss:$8 sps:$4 sm:$0xff]   ;;  %v7004_v20 = vld [vmem:[%s11075_s2 + $0x90] ss:$8 sps:$4 sm:$0xff]  }
 0x289   :  { %1520 = vperm.xlu0 %6920, %v992_v29   ;;  %6456 = vmatpush3.bf16.msra.mxu1 %v7042_v57  ;;  %v7005_v57 = vld [vmem:[%s11076_s3 + $0x90] ss:$8 sps:$4 sm:$0xff]   ;;  %v7008_v29 = vld [vmem:[%s11076_s3 + $0xa4] ss:$8 sps:$4 sm:$0xff]  }
 0x28a   :  { %6457 = vmatprep.subr.bf16.mxu1 %v7043_v51  ;;  %1565 = vperm.xlu1 %6921, %v1001_v49   ;;  %v7018_v49 = vld [vmem:[%s11075_s2 + $0xc4] ss:$8 sps:$4 sm:$0xff]  }
 0x28d   :  { %1530 = vperm.xlu0 %6920, %v994_v63   ;;  %6458 = vmatpush3.bf16.msra.mxu1 %v7043_v51  ;;  %v7010_v51 = vld [vmem:[%s11075_s2 + $0xa0] ss:$8 sps:$4 sm:$0xff]   ;;  %v7012_v63 = vld [vmem:[%s11075_s2 + $0xb4] ss:$8 sps:$4 sm:$0xff]  }
 0x28e   :  { %6459 = vmatprep.subr.bf16.mxu1 %v7044_v43  ;;  %1575 = vperm.xlu1 %6921, %v1003_v44   ;;  %v7023_v44 = vld [vmem:[%s11076_s3 + $0xc0] ss:$8 sps:$4 sm:$0xff]  }
 0x28f   :  { %1303 = vmatmul.mubr.bf16.gmra.mrb[4].mxu1 %v6956_v31  ;;  %1832 = vmatmul.mubr.bf16.gmra.mrb[36].mxu0 %v6957_v11  ;;  %v7014_v31 = vld [vmem:[%s11076_s3 + $0xb4] ss:$8 sps:$4 sm:$0xff]   ;;  %v7016_v11 = vld [vmem:[%s11075_s2 + $0xb0] ss:$8 sps:$4 sm:$0xff]  }
 0x290   :  { %1310 = vmatprep.mubr.bf16.mxu1 %v6958_v25  ;;  %1839 = vmatprep.mubr.bf16.mxu0 %v6960_v37  ;;  %v7017_v25 = vld [vmem:[%s11076_s3 + $0xb0] ss:$8 sps:$4 sm:$0xff]   ;;  %v7046_v37 = vld [vmem:[%s11087_s28 + $0x20] sm:$0xff]  }
 0x291   :  { %1540 = vperm.xlu0 %6920, %v996_v52   ;;  %6460 = vmatpush3.bf16.msra.mxu1 %v7044_v43  ;;  %v7020_v52 = vld [vmem:[%s11076_s3 + $0xc4] ss:$8 sps:$4 sm:$0xff]  }
 0x292   :  { %6461 = vmatprep.subr.bf16.mxu1 %v7045_v15  ;;  %v7047_v43 = vld [vmem:[%s11087_s28 + $0x28] sm:$0xff]  }
 0x295   :  { %1550 = vperm.xlu0 %6920, %v998_v23   ;;  %6462 = vmatpush3.bf16.msra.mxu1 %v7045_v15  ;;  %v7022_v15 = vld [vmem:[%s11075_s2 + $0xc0] ss:$8 sps:$4 sm:$0xff]   ;;  %v7048_v23 = vld [vmem:[%s11087_s28 + $0x30] sm:$0xff]  }
 0x296   :  { %6463 = vmatprep.subr.bf16.mxu1 %v7046_v37 }
 0x297   :  { %1311 = vmatmul.mubr.bf16.gmra.mrb[8].mxu1 %v6962_v41  ;;  %1840 = vmatmul.mubr.bf16.gmra.mrb[40].mxu0 %v6963_v48  ;;  %v7024_v41 = vld [vmem:[%s11075_s2 + $0xd4] ss:$8 sps:$4 sm:$0xff]  }
 0x298   :  { %1318 = vmatprep.mubr.bf16.mxu1 %v6964_v16  ;;  %1847 = vmatprep.mubr.bf16.mxu0 %v6966_v59  ;;  %v7026_v48 = vld [vmem:[%s11076_s3 + $0xd4] ss:$8 sps:$4 sm:$0xff]   ;;  %v8579_v16 = vpop.permute.xlu1 %1959 }
 0x299   :  { %1560 = vperm.xlu0 %6920, %v1000_v35   ;;  %6464 = vmatpush3.bf16.msra.mxu1 %v7046_v37  ;;  %11088 = vst [vmem:[#allocation8_spill] sm:$0xff] %v8579_v16  ;;  %v7049_v59 = vld [vmem:[%s11087_s28 + $0x38] sm:$0xff]  }
 0x29a   :  { %6465 = vmatprep.subr.bf16.mxu1 %v7047_v43  ;;  %v7028_v35 = vld [vmem:[%s11075_s2 + $0xd0] ss:$8 sps:$4 sm:$0xff]  }
 0x29d   :  { %1570 = vperm.xlu0 %6920, %v1002_v27   ;;  %6466 = vmatpush3.bf16.msra.mxu1 %v7047_v43  ;;  %v7029_v27 = vld [vmem:[%s11076_s3 + $0xd0] ss:$8 sps:$4 sm:$0xff]  }
 0x29e   :  { %6467 = vmatprep.subr.bf16.mxu1 %v7048_v23 }
 0x29f   :  { %1319 = vmatmul.mubr.bf16.gmra.mrb[12].mxu1 %v6968_v34  ;;  %1848 = vmatmul.mubr.bf16.gmra.mrb[44].mxu0 %v6969_v6  ;;  %v7030_v34 = vld [vmem:[%s11075_s2 + $0xe4] ss:$8 sps:$4 sm:$0xff]  }
 0x2a0   :  { %1326 = vmatprep.mubr.bf16.mxu1 %v6970_v45  ;;  %1855 = vmatprep.mubr.bf16.mxu0 %v6972_v0  ;;  %v7032_v6 = vld [vmem:[%s11076_s3 + $0xe4] ss:$8 sps:$4 sm:$0xff]   ;;  %v8596_v45 = vpop.permute.xlu1 %1964  ;;  %v7034_v0 = vld [vmem:[%s11075_s2 + $0xe0] ss:$8 sps:$4 sm:$0xff]  }
 0x2a1   :  { %1580 = vperm.xlu0 %6920, %v1004_v3   ;;  %6468 = vmatpush3.bf16.msra.mxu1 %v7048_v23  ;;  %11089 = vst [vmem:[#allocation9_spill] sm:$0xff] %v8596_v45  ;;  %v7035_v3 = vld [vmem:[%s11076_s3 + $0xe0] ss:$8 sps:$4 sm:$0xff]  }
 0x2a2   :  { %6469 = vmatprep.subr.bf16.mxu1 %v7049_v59 }
 0x2a5   :  { %6470 = vmatpush3.bf16.msra.mxu1 %v7049_v59 }
 0x2a7   :  { %1327 = vmatmul.mubr.bf16.gmra.mrb[16].mxu1 %v6974_v22  ;;  %1856 = vmatmul.mubr.bf16.gmra.mrb[48].mxu0 %v6975_v10  ;;  %v8604_v22 = vpop.permute.xlu1 %1969  ;;  %v7036_v10 = vld [vmem:[%s11075_s2 + $0xf4] ss:$8 sps:$4 sm:$0xff]  }
 0x2a8   :  { %1334 = vmatprep.mubr.bf16.mxu1 %v6976_v47  ;;  %1863 = vmatprep.mubr.bf16.mxu0 %v6978_v12  ;;  %11090 = vst [vmem:[#allocation10_spill] sm:$0xff] %v8604_v22  ;;  %v7038_v47 = vld [vmem:[%s11076_s3 + $0xf4] ss:$8 sps:$4 sm:$0xff]  }
 0x2ab   :  { %v8612_v12 = vpop.permute.xlu1 %1974 }
 0x2ac   :  { %11091 = vst [vmem:[#allocation11_spill] sm:$0xff] %v8612_v12 }
 0x2af   :  { %1335 = vmatmul.mubr.bf16.gmra.mrb[20].mxu1 %v6980_v58  ;;  %1864 = vmatmul.mubr.bf16.gmra.mrb[52].mxu0 %v6981_v30  ;;  %v7040_v58 = vld [vmem:[%s11075_s2 + $0xf0] ss:$8 sps:$4 sm:$0xff]  }
 0x2b0   :  { %1342 = vmatprep.mubr.bf16.mxu1 %v6982_v4  ;;  %1871 = vmatprep.mubr.bf16.mxu0 %v6984_v5  ;;  %v7041_v30 = vld [vmem:[%s11076_s3 + $0xf0] ss:$8 sps:$4 sm:$0xff]   ;;  %v8620_v4 = vpop.permute.xlu1 %1979  ;;  %v7356_v5 = vld [vmem:[%s11075_s2 + $0x4] ss:$8 sps:$4 sm:$0xff]  }
 0x2b1   :  { %11092 = vst [vmem:[#allocation12_spill] sm:$0xff] %v8620_v4 }
 0x2b7   :  { %1343 = vmatmul.mubr.bf16.gmra.mrb[24].mxu1 %v6986_v8  ;;  %1872 = vmatmul.mubr.bf16.gmra.mrb[56].mxu0 %v6987_v60  ;;  %v8625_v8 = vpop.permute.xlu1 %1984 }
 0x2b8   :  { %1350 = vmatprep.mubr.bf16.mxu1 %v6988_v50  ;;  %1879 = vmatprep.mubr.bf16.mxu0 %v6990_v7  ;;  %11093 = vst [vmem:[#allocation13_spill] sm:$0xff] %v8625_v8  ;;  %v8631_v7 = vpop.permute.xlu0 %1954 }
 0x2b9   :  { %11096 = vst [vmem:[#allocation16_spill] sm:$0xff] %v8631_v7 }
 0x2bb   :  { %v8627_v60 = vpop.permute.xlu1 %1989 }
 0x2bc   :  { %11094 = vst [vmem:[#allocation14_spill] sm:$0xff] %v8627_v60 }
 0x2bf   :  { %1351 = vmatmul.mubr.bf16.gmra.mrb[28].mxu1 %v6992_v32  ;;  %1880 = vmatmul.mubr.bf16.gmra.mrb[60].mxu0 %v6993_v2  ;;  %v8629_v50 = vpop.permute.xlu1 %1994  ;;  %v8635_v2 = vpop.permute.xlu0 %1999 }
 0x2c0   :  { %1358 = vmatprep.mubr.bf16.mxu1 %v6994_v17  ;;  %1887 = vmatprep.mubr.bf16.mxu0 %v6996_v18  ;;  %11095 = vst [vmem:[#allocation15_spill] sm:$0xff] %v8629_v50  ;;  %11098 = vst [vmem:[#allocation18_spill] sm:$0xff] %v8635_v2 }
 0x2c3   :  { %v8633_v32 = vpop.permute.xlu1 %2004  ;;  %v8639_v18 = vpop.permute.xlu0 %2009 }
 0x2c4   :  { %11097 = vst [vmem:[#allocation17_spill] sm:$0xff] %v8633_v32  ;;  %11100 = vst [vmem:[#allocation20_spill] sm:$0xff] %v8639_v18 }
 0x2c7   :  { %1359 = vmatmul.mubr.bf16.gmra.mrb[32].mxu1 %v6998_v21  ;;  %1888 = vmatmul.mubr.bf16.gmra.mrb[64].mxu0 %v6999_v24  ;;  %v8637_v17 = vpop.permute.xlu1 %2014  ;;  %v8643_v24 = vpop.permute.xlu0 %2019 }
 0x2c8   :  { %1366 = vmatprep.mubr.bf16.mxu1 %v7000_v13  ;;  %1895 = vmatprep.mubr.bf16.mxu0 %v7002_v39  ;;  %11099 = vst [vmem:[#allocation19_spill] sm:$0xff] %v8637_v17  ;;  %11102 = vst [vmem:[#allocation22_spill] sm:$0xff] %v8643_v24 }
 0x2cb   :  { %v8641_v21 = vpop.permute.xlu1 %2024  ;;  %v8647_v39 = vpop.permute.xlu0 %2029 }
 0x2cc   :  { %11101 = vst [vmem:[#allocation21_spill] sm:$0xff] %v8641_v21  ;;  %11104 = vst [vmem:[#allocation24_spill] sm:$0xff] %v8647_v39 }
 0x2cf   :  { %1367 = vmatmul.mubr.bf16.gmra.mrb[36].mxu1 %v7004_v20  ;;  %1896 = vmatmul.mubr.bf16.gmra.mrb[68].mxu0 %v7005_v57  ;;  %v8645_v13 = vpop.permute.xlu1 %2034  ;;  %v8651_v57 = vpop.permute.xlu0 %2039 }
 0x2d0   :  { %1374 = vmatprep.mubr.bf16.mxu1 %v7006_v56  ;;  %1903 = vmatprep.mubr.bf16.mxu0 %v7008_v29  ;;  %11103 = vst [vmem:[#allocation23_spill] sm:$0xff] %v8645_v13  ;;  %11106 = vst [vmem:[#allocation26_spill] sm:$0xff] %v8651_v57 }
 0x2d3   :  { %v8649_v20 = vpop.permute.xlu1 %2044  ;;  %v8655_v29 = vpop.permute.xlu0 %2049 }
 0x2d4   :  { %11105 = vst [vmem:[#allocation25_spill] sm:$0xff] %v8649_v20  ;;  %11108 = vst [vmem:[#allocation28_spill] sm:$0xff] %v8655_v29 }
 0x2d7   :  { %1375 = vmatmul.mubr.bf16.gmra.mrb[40].mxu1 %v7010_v51  ;;  %1904 = vmatmul.mubr.bf16.gmra.mrb[72].mxu0 %v7011_v19  ;;  %v8653_v56 = vpop.permute.xlu1 %2054  ;;  %v8659_v19 = vpop.permute.xlu0 %2059 }
 0x2d8   :  { %1382 = vmatprep.mubr.bf16.mxu1 %v7012_v63  ;;  %1911 = vmatprep.mubr.bf16.mxu0 %v7014_v31  ;;  %11107 = vst [vmem:[#allocation27_spill] sm:$0xff] %v8653_v56  ;;  %11110 = vst [vmem:[#allocation30_spill] sm:$0xff] %v8659_v19 }
 0x2db   :  { %v8657_v51 = vpop.permute.xlu1 %2064  ;;  %v8663_v31 = vpop.permute.xlu0 %2069 }
 0x2dc   :  { %11109 = vst [vmem:[#allocation29_spill] sm:$0xff] %v8657_v51  ;;  %11112 = vst [vmem:[#allocation32_spill] sm:$0xff] %v8663_v31 }
 0x2df   :  { %1383 = vmatmul.mubr.bf16.gmra.mrb[44].mxu1 %v7016_v11  ;;  %1912 = vmatmul.mubr.bf16.gmra.mrb[76].mxu0 %v7017_v25  ;;  %v8661_v63 = vpop.permute.xlu1 %2074  ;;  %v7050_v11 = vld [vmem:[%s11113_s29] sm:$0xff]   ;;  %v8670_v37 = vpop.permute.xlu0 %2079 }
 0x2e0   :  { %1390 = vmatprep.mubr.bf16.mxu1 %v7018_v49  ;;  %1919 = vmatprep.mubr.bf16.mxu0 %v7020_v52  ;;  %11111 = vst [vmem:[#allocation31_spill] sm:$0xff] %v8661_v63  ;;  %11115 = vst [vmem:[#allocation34_spill] sm:$0xff] %v8670_v37 }
 0x2e1   :  { %6503 = vmatprep.subr.bf16.mxu1 %v7050_v11 }
 0x2e3   :  { %v8668_v25 = vpop.permute.xlu1 %2084  ;;  %v8674_v52 = vpop.permute.xlu0 %2089 }
 0x2e4   :  { %11114 = vst [vmem:[#allocation33_spill] sm:$0xff] %v8668_v25  ;;  %11117 = vst [vmem:[#allocation36_spill] sm:$0xff] %v8674_v52 }
 0x2e7   :  { %1391 = vmatmul.mubr.bf16.gmra.mrb[48].mxu1 %v7022_v15  ;;  %1920 = vmatmul.mubr.bf16.gmra.mrb[80].mxu0 %v7023_v44  ;;  %v8672_v49 = vpop.permute.xlu1 %2094  ;;  %v8678_v15 = vpop.permute.xlu0 %2099 }
 0x2e8   :  { %1398 = vmatprep.mubr.bf16.mxu1 %v7024_v41  ;;  %1927 = vmatprep.mubr.bf16.mxu0 %v7026_v48  ;;  %11116 = vst [vmem:[#allocation35_spill] sm:$0xff] %v8672_v49 }
 0x2eb   :  { %v8676_v43 = vpop.permute.xlu1 %2104  ;;  %v8682_v23 = vpop.permute.xlu0 %2109 }
 0x2ef   :  { %1399 = vmatmul.mubr.bf16.gmra.mrb[52].mxu1 %v7028_v35  ;;  %1928 = vmatmul.mubr.bf16.gmra.mrb[84].mxu0 %v7029_v27  ;;  %v8680_v44 = vpop.permute.xlu1 %1425 }
 0x2f0   :  { %1406 = vmatprep.mubr.bf16.mxu1 %v7030_v34  ;;  %1935 = vmatprep.mubr.bf16.mxu0 %v7032_v6  ;;  %11118 = vst [vmem:[#allocation37_spill] sm:$0xff] %v8680_v44 }
 0x2f7   :  { %1407 = vmatmul.mubr.bf16.gmra.mrb[56].mxu1 %v7034_v0  ;;  %1936 = vmatmul.mubr.bf16.gmra.mrb[88].mxu0 %v7035_v3 }
 0x2f8   :  { %1414 = vmatprep.mubr.bf16.mxu1 %v7036_v10  ;;  %1943 = vmatprep.mubr.bf16.mxu0 %v7038_v47 }
 0x2ff   :  { %1415 = vmatmul.mubr.bf16.gmra.mrb[60].mxu1 %v7040_v58  ;;  %1944 = vmatmul.mubr.bf16.gmra.mrb[92].mxu0 %v7041_v30 }
 0x300   :  { %3247 = vmatprep.mubr.bf16.mxu0 %v7356_v5  ;;  %v8687_v5 = vpop.permute.xlu0 %1430 }
 0x301   :  { %11119 = vst [vmem:[#allocation38_spill] sm:$0xff] %v8687_v5 }
 0x304   :  { %v8701_v36 = vpop.permute.xlu0 %1440 }
 0x305   :  { %11121 = vst [vmem:[#allocation40_spill] sm:$0xff] %v8701_v36 }
 0x35a   :  { %v5919_v41 = vpop.f32.mrb[32].mxu0  ;;  %v5807_v48 = vpop.f32.mrb[0].mxu1 }
 0x35b   :  { %v5920_v59 = vpop.f32.mrb[33].mxu0  ;;  %v5808_v35 = vpop.f32.mrb[1].mxu1 }
 0x35c   :  { %v5921_v27 = vadd.f32 %v5920_v59, %v5919_v41  ;;  %v5922_v34 = vpop.f32.mrb[34].mxu0  ;;  %v5809_v6 = vadd.f32 %v5808_v35, %v5807_v48  ;;  %v5810_v0 = vpop.f32.mrb[2].mxu1 }
 0x35d   :  { %v5923_v3 = vpop.f32.mrb[35].mxu0  ;;  %v5811_v10 = vpop.f32.mrb[3].mxu1 }
 0x35e   :  { %v5924_v47 = vadd.f32 %v5923_v3, %v5922_v34  ;;  %v8685_v58 = vmul.f32 %v5809_v6, %v8680_v44  ;;  %v5812_v30 = vadd.f32 %v5811_v10, %v5810_v0  ;;  %v2112_v33 = vmul.f32 %v5921_v27, %v8631_v7  ;;  %v8694_v41 = vpop.permute.xlu1 %1435 }
 0x35f   :  { %11120 = vst [vmem:[#allocation39_spill] sm:$0xff] %v8694_v41 }
 0x360   :  { %v2113_v54 = vmul.f32 %v5924_v47, %v8579_v16  ;;  %v8692_v53 = vmul.f32 %v5812_v30, %v8687_v5 }
 0x362   :  { %v5925_v48 = vpop.f32.mrb[36].mxu0  ;;  %v2144_v59 = vpack.c.bf16 %v2113_v54, %v2112_v33  ;;  %v5813_v35 = vpop.f32.mrb[4].mxu1 }
 0x363   :  { %v5926_v6 = vpop.f32.mrb[37].mxu0  ;;  %v5814_v3 = vpop.f32.mrb[5].mxu1 }
 0x364   :  { %v5927_v0 = vadd.f32 %v5926_v6, %v5925_v48  ;;  %v5928_v10 = vpop.f32.mrb[38].mxu0  ;;  %6471 = vmatprep.mubr.bf16.mxu1 %v2144_v59  ;;  %v5815_v44 = vadd.f32 %v5814_v3, %v5813_v35  ;;  %v5816_v27 = vpop.f32.mrb[6].mxu1 }
 0x365   :  { %v5929_v7 = vpop.f32.mrb[39].mxu0  ;;  %v5817_v47 = vpop.f32.mrb[7].mxu1 }
 0x366   :  { %v5930_v16 = vadd.f32 %v5929_v7, %v5928_v10  ;;  %v8699_v30 = vmul.f32 %v5815_v44, %v8694_v41  ;;  %v5818_v5 = vadd.f32 %v5817_v47, %v5816_v27  ;;  %v2114_v54 = vmul.f32 %v5927_v0, %v8596_v45  ;;  %v8708_v48 = vpop.permute.xlu1 %1445  ;;  %v7051_v44 = vld [vmem:[%s11113_s29 + $0x8] sm:$0xff]   ;;  %v7052_v45 = vld [vmem:[%s11113_s29 + $0x10] sm:$0xff]  }
 0x367   :  { %11122 = vst [vmem:[#allocation41_spill] sm:$0xff] %v8708_v48 }
 0x368   :  { %v2115_v33 = vmul.f32 %v5930_v16, %v8604_v22  ;;  %v8706_v34 = vmul.f32 %v5818_v5, %v8701_v36  ;;  %v8721_v36 = vpop.permute.xlu0 %1450 }
 0x369   :  { %11123 = vst [vmem:[#allocation42_spill] sm:$0xff] %v8721_v36 }
 0x36a   :  { %v2145_v59 = vpack.c.bf16 %v2115_v33, %v2114_v54  ;;  %v5931_v35 = vpop.f32.mrb[40].mxu0  ;;  %v5819_v6 = vpop.f32.mrb[8].mxu1 }
 0x36b   :  { %v5932_v3 = vpop.f32.mrb[41].mxu0  ;;  %v5820_v10 = vpop.f32.mrb[9].mxu1 }
 0x36c   :  { %v5933_v0 = vadd.f32 %v5932_v3, %v5931_v35  ;;  %v5934_v27 = vpop.f32.mrb[42].mxu0  ;;  %6472 = vmatmul.mubr.bf16.vlgmr.msra.gmra.mrb[64].mxu1 %v2145_v59  ;;  %v5821_v16 = vadd.f32 %v5820_v10, %v5819_v6  ;;  %v5822_v5 = vpop.f32.mrb[10].mxu1 }
 0x36d   :  { %v5935_v47 = vpop.f32.mrb[43].mxu0  ;;  %v5823_v22 = vpop.f32.mrb[11].mxu1  ;;  %6504 = vmatpush3.bf16.msra.mxu1 %v7050_v11 }
 0x36e   :  { %v5936_v54 = vadd.f32 %v5935_v47, %v5934_v27  ;;  %v8716_v33 = vmul.f32 %v5821_v16, %v8708_v48  ;;  %v5824_v7 = vadd.f32 %v5823_v22, %v5822_v5  ;;  %6505 = vmatprep.subr.bf16.mxu1 %v7051_v44  ;;  %v2116_v35 = vmul.f32 %v5933_v0, %v8612_v12  ;;  %v8728_v11 = vpop.permute.xlu1 %1455  ;;  %v7053_v27 = vld [vmem:[%s11113_s29 + $0x18] sm:$0xff]   ;;  %v7054_v16 = vld [vmem:[%s11113_s29 + $0x20] sm:$0xff]   ;;  %v8741_v48 = vpop.permute.xlu0 %1460 }
 0x36f   :  { %11124 = vst [vmem:[#allocation43_spill] sm:$0xff] %v8728_v11  ;;  %11125 = vst [vmem:[#allocation44_spill] sm:$0xff] %v8741_v48 }
 0x370   :  { %v2117_v59 = vmul.f32 %v5936_v54, %v8620_v4  ;;  %v8726_v6 = vmul.f32 %v5824_v7, %v8721_v36 }
 0x371   :  { %6506 = vmatpush3.bf16.msra.mxu1 %v7051_v44 }
 0x372   :  { %v5937_v3 = vpop.f32.mrb[44].mxu0  ;;  %v2146_v10 = vpack.c.bf16 %v2117_v59, %v2116_v35  ;;  %v5825_v22 = vpop.f32.mrb[12].mxu1  ;;  %6507 = vmatprep.subr.bf16.mxu1 %v7052_v45 }
 0x373   :  { %v5938_v0 = vpop.f32.mrb[45].mxu0  ;;  %v5826_v5 = vpop.f32.mrb[13].mxu1 }
 0x374   :  { %v5939_v47 = vadd.f32 %v5938_v0, %v5937_v3  ;;  %v5940_v54 = vpop.f32.mrb[46].mxu0  ;;  %6475 = vmatprep.mubr.bf16.mxu1 %v2146_v10  ;;  %v5827_v7 = vadd.f32 %v5826_v5, %v5825_v22  ;;  %v5828_v4 = vpop.f32.mrb[14].mxu1  ;;  %v7055_v5 = vld [vmem:[%s11113_s29 + $0x28] sm:$0xff]  }
 0x375   :  { %v5941_v12 = vpop.f32.mrb[47].mxu0  ;;  %v5829_v44 = vpop.f32.mrb[15].mxu1  ;;  %6508 = vmatpush3.bf16.msra.mxu1 %v7052_v45 }
 0x376   :  { %v5942_v35 = vadd.f32 %v5941_v12, %v5940_v54  ;;  %v8736_v59 = vmul.f32 %v5827_v7, %v8728_v11  ;;  %v5830_v36 = vadd.f32 %v5829_v44, %v5828_v4  ;;  %6509 = vmatprep.subr.bf16.mxu1 %v7053_v27  ;;  %v2118_v3 = vmul.f32 %v5939_v47, %v8625_v8  ;;  %v8748_v45 = vpop.permute.xlu1 %1465  ;;  %v7056_v54 = vld [vmem:[%s11113_s29 + $0x30] sm:$0xff]   ;;  %v8761_v11 = vpop.permute.xlu0 %1470 }
 0x377   :  { %11126 = vst [vmem:[#allocation45_spill] sm:$0xff] %v8748_v45  ;;  %11127 = vst [vmem:[#allocation46_spill] sm:$0xff] %v8761_v11 }
 0x378   :  { %v2119_v10 = vmul.f32 %v5942_v35, %v8627_v60  ;;  %v8746_v22 = vmul.f32 %v5830_v36, %v8741_v48 }
 0x379   :  { %6510 = vmatpush3.bf16.msra.mxu1 %v7053_v27 }
 0x37a   :  { %v5943_v12 = vpop.f32.mrb[48].mxu0  ;;  %v2147_v0 = vpack.c.bf16 %v2119_v10, %v2118_v3  ;;  %v5831_v4 = vpop.f32.mrb[16].mxu1  ;;  %6511 = vmatprep.subr.bf16.mxu1 %v7054_v16 }
 0x37b   :  { %v5944_v47 = vpop.f32.mrb[49].mxu0  ;;  %v5832_v7 = vpop.f32.mrb[17].mxu1 }
 0x37c   :  { %v5945_v44 = vadd.f32 %v5944_v47, %v5943_v12  ;;  %v5946_v35 = vpop.f32.mrb[50].mxu0  ;;  %6476 = vmatmul.mubr.bf16.gmra.mrb[68].mxu1 %v2147_v0  ;;  %v5833_v36 = vadd.f32 %v5832_v7, %v5831_v4  ;;  %v5834_v60 = vpop.f32.mrb[18].mxu1  ;;  %v7057_v7 = vld [vmem:[%s11113_s29 + $0x38] sm:$0xff]  }
 0x37d   :  { %v5947_v8 = vpop.f32.mrb[51].mxu0  ;;  %v5835_v27 = vpop.f32.mrb[19].mxu1  ;;  %6512 = vmatpush3.bf16.msra.mxu1 %v7054_v16 }
 0x37e   :  { %v5948_v3 = vadd.f32 %v5947_v8, %v5946_v35  ;;  %v8756_v10 = vmul.f32 %v5833_v36, %v8748_v45  ;;  %v5836_v48 = vadd.f32 %v5835_v27, %v5834_v60  ;;  %6513 = vmatprep.subr.bf16.mxu1 %v7055_v5  ;;  %v2120_v12 = vmul.f32 %v5945_v44, %v8629_v50  ;;  %v8768_v16 = vpop.permute.xlu1 %1475  ;;  %v8783_v45 = vpop.permute.xlu0 %1480 }
 0x37f   :  { %11128 = vst [vmem:[#allocation47_spill] sm:$0xff] %v8768_v16  ;;  %11130 = vst [vmem:[#allocation48_spill] sm:$0xff] %v8783_v45 }
 0x380   :  { %v2121_v0 = vmul.f32 %v5948_v3, %v8635_v2  ;;  %v8766_v4 = vmul.f32 %v5836_v48, %v8761_v11 }
 0x381   :  { %6514 = vmatpush3.bf16.msra.mxu1 %v7055_v5 }
 0x382   :  { %v5949_v8 = vpop.f32.mrb[52].mxu0  ;;  %v2148_v47 = vpack.c.bf16 %v2121_v0, %v2120_v12  ;;  %v5837_v60 = vpop.f32.mrb[20].mxu1  ;;  %6515 = vmatprep.subr.bf16.mxu1 %v7056_v54  ;;  %v8778_v12 = vld [vmem:[%s11129_s6] sm:$0xff]  }
 0x383   :  { %v5950_v44 = vpop.f32.mrb[53].mxu0  ;;  %v5838_v36 = vpop.f32.mrb[21].mxu1 }
 0x384   :  { %v5951_v27 = vadd.f32 %v5950_v44, %v5949_v8  ;;  %v5952_v3 = vpop.f32.mrb[54].mxu0  ;;  %6479 = vmatprep.mubr.bf16.mxu1 %v2148_v47  ;;  %v5839_v48 = vadd.f32 %v5838_v36, %v5837_v60  ;;  %v5840_v2 = vpop.f32.mrb[22].mxu1 }
 0x385   :  { %v5953_v50 = vpop.f32.mrb[55].mxu0  ;;  %v5841_v5 = vpop.f32.mrb[23].mxu1  ;;  %6516 = vmatpush3.bf16.msra.mxu1 %v7056_v54 }
 0x386   :  { %v5954_v0 = vadd.f32 %v5953_v50, %v5952_v3  ;;  %v8781_v11 = vmul.f32 %v5839_v48, %v8768_v16  ;;  %v5842_v35 = vadd.f32 %v5841_v5, %v5840_v2  ;;  %6517 = vmatprep.subr.bf16.mxu1 %v7057_v7  ;;  %v2122_v8 = vmul.f32 %v5951_v27, %v8633_v32  ;;  %v8790_v54 = vpop.permute.xlu1 %1485 }
 0x387   :  { %11131 = vst [vmem:[#allocation49_spill] sm:$0xff] %v8790_v54 }
 0x388   :  { %v2123_v47 = vmul.f32 %v5954_v0, %v8639_v18  ;;  %v8788_v60 = vmul.f32 %v5842_v35, %v8783_v45 }
 0x389   :  { %6518 = vmatpush3.bf16.msra.mxu1 %v7057_v7 }
 0x38a   :  { %v5843_v44 = vpop.f32.mrb[24].mxu1  ;;  %v5955_v36 = vpop.f32.mrb[56].mxu0  ;;  %v2149_v50 = vpack.c.bf16 %v2123_v47, %v2122_v8  ;;  %6551 = vmatprep.subr.bf16.mxu1 %v8778_v12 }
 0x38b   :  { %v5844_v2 = vpop.f32.mrb[25].mxu1  ;;  %v5956_v48 = vpop.f32.mrb[57].mxu0 }
 0x38c   :  { %v5845_v5 = vadd.f32 %v5844_v2, %v5843_v44  ;;  %v5957_v27 = vadd.f32 %v5956_v48, %v5955_v36  ;;  %v5846_v32 = vpop.f32.mrb[26].mxu1  ;;  %v5958_v0 = vpop.f32.mrb[58].mxu0  ;;  %6480 = vmatmul.mubr.bf16.gmra.mrb[72].mxu1 %v2149_v50 }
 0x38d   :  { %v5847_v35 = vpop.f32.mrb[27].mxu1  ;;  %v5959_v18 = vpop.f32.mrb[59].mxu0 }
 0x38e   :  { %v8796_v45 = vmul.f32 %v5845_v5, %v8790_v54  ;;  %v5848_v7 = vadd.f32 %v5847_v35, %v5846_v32  ;;  %v5960_v16 = vadd.f32 %v5959_v18, %v5958_v0  ;;  %v8798_v8 = vpop.permute.xlu0 %1490  ;;  %v2124_v47 = vmul.f32 %v5957_v27, %v8637_v17 }
 0x38f   :  { %11132 = vst [vmem:[#allocation50_spill] sm:$0xff] %v8798_v8 }
 0x390   :  { %v8802_v3 = vmul.f32 %v5848_v7, %v8798_v8  ;;  %v2125_v44 = vmul.f32 %v5960_v16, %v8643_v24  ;;  %v8807_v8 = vpop.permute.xlu1 %1495 }
 0x391   :  { %11133 = vst [vmem:[#allocation51_spill] sm:$0xff] %v8807_v8 }
 0x392   :  { %v5849_v36 = vpop.f32.mrb[28].mxu1  ;;  %v5961_v2 = vpop.f32.mrb[60].mxu0  ;;  %v2150_v48 = vpack.c.bf16 %v2125_v44, %v2124_v47 }
 0x393   :  { %v5850_v41 = vpop.f32.mrb[29].mxu1  ;;  %v5962_v5 = vpop.f32.mrb[61].mxu0 }
 0x394   :  { %v5851_v54 = vadd.f32 %v5850_v41, %v5849_v36  ;;  %v5963_v32 = vadd.f32 %v5962_v5, %v5961_v2  ;;  %v5852_v18 = vpop.f32.mrb[30].mxu1  ;;  %v5964_v0 = vpop.f32.mrb[62].mxu0  ;;  %6483 = vmatprep.mubr.bf16.mxu1 %v2150_v48 }
 0x395   :  { %v5853_v35 = vpop.f32.mrb[31].mxu1  ;;  %v5965_v27 = vpop.f32.mrb[63].mxu0 }
 0x396   :  { %v5854_v17 = vadd.f32 %v5853_v35, %v5852_v18  ;;  %v5966_v7 = vadd.f32 %v5965_v27, %v5964_v0  ;;  %v8809_v16 = vpop.permute.xlu0 %1500  ;;  %v8812_v47 = vmul.f32 %v5851_v54, %v8807_v8  ;;  %v2126_v44 = vmul.f32 %v5963_v32, %v8641_v21 }
 0x397   :  { %11134 = vst [vmem:[#allocation52_spill] sm:$0xff] %v8809_v16 }
 0x398   :  { %v8816_v50 = vmul.f32 %v5854_v17, %v8809_v16  ;;  %v2127_v41 = vmul.f32 %v5966_v7, %v8647_v39  ;;  %v8821_v16 = vpop.permute.xlu1 %1505 }
 0x399   :  { %11135 = vst [vmem:[#allocation53_spill] sm:$0xff] %v8821_v16 }
 0x39a   :  { %v5855_v36 = vpop.f32.mrb[32].mxu1  ;;  %v5967_v2 = vpop.f32.mrb[64].mxu0  ;;  %v2151_v48 = vpack.c.bf16 %v2127_v41, %v2126_v44 }
 0x39b   :  { %v5856_v18 = vpop.f32.mrb[33].mxu1  ;;  %v5968_v0 = vpop.f32.mrb[65].mxu0 }
 0x39c   :  { %v5857_v35 = vadd.f32 %v5856_v18, %v5855_v36  ;;  %v5969_v27 = vadd.f32 %v5968_v0, %v5967_v2  ;;  %v5858_v24 = vpop.f32.mrb[34].mxu1  ;;  %v5970_v54 = vpop.f32.mrb[66].mxu0  ;;  %6484 = vmatmul.mubr.bf16.gmra.mrb[76].mxu1 %v2151_v48 }
 0x39d   :  { %v5859_v8 = vpop.f32.mrb[35].mxu1  ;;  %v5971_v32 = vpop.f32.mrb[67].mxu0 }
 0x39e   :  { %v5860_v21 = vadd.f32 %v5859_v8, %v5858_v24  ;;  %v5972_v17 = vadd.f32 %v5971_v32, %v5970_v54  ;;  %v8823_v7 = vpop.permute.xlu0 %1510  ;;  %v8826_v44 = vmul.f32 %v5857_v35, %v8821_v16  ;;  %v2128_v41 = vmul.f32 %v5969_v27, %v8645_v13 }
 0x39f   :  { %11136 = vst [vmem:[#allocation54_spill] sm:$0xff] %v8823_v7 }
 0x3a0   :  { %v8830_v5 = vmul.f32 %v5860_v21, %v8823_v7  ;;  %v2129_v36 = vmul.f32 %v5972_v17, %v8651_v57  ;;  %v8835_v7 = vpop.permute.xlu1 %1515 }
 0x3a1   :  { %11137 = vst [vmem:[#allocation55_spill] sm:$0xff] %v8835_v7 }
 0x3a2   :  { %v5861_v2 = vpop.f32.mrb[36].mxu1  ;;  %v5973_v48 = vpop.f32.mrb[68].mxu0  ;;  %v2152_v18 = vpack.c.bf16 %v2129_v36, %v2128_v41 }
 0x3a3   :  { %v5862_v8 = vpop.f32.mrb[37].mxu1  ;;  %v5974_v0 = vpop.f32.mrb[69].mxu0 }
 0x3a4   :  { %v5863_v54 = vadd.f32 %v5862_v8, %v5861_v2  ;;  %v5975_v32 = vadd.f32 %v5974_v0, %v5973_v48  ;;  %v5864_v39 = vpop.f32.mrb[38].mxu1  ;;  %v5976_v35 = vpop.f32.mrb[70].mxu0  ;;  %6487 = vmatprep.mubr.bf16.mxu1 %v2152_v18 }
 0x3a5   :  { %v5865_v16 = vpop.f32.mrb[39].mxu1  ;;  %v5977_v27 = vpop.f32.mrb[71].mxu0 }
 0x3a6   :  { %v5866_v13 = vadd.f32 %v5865_v16, %v5864_v39  ;;  %v5978_v21 = vadd.f32 %v5977_v27, %v5976_v35  ;;  %v8837_v17 = vpop.permute.xlu0 %1520  ;;  %v8840_v41 = vmul.f32 %v5863_v54, %v8835_v7  ;;  %v2130_v36 = vmul.f32 %v5975_v32, %v8649_v20 }
 0x3a7   :  { %11138 = vst [vmem:[#allocation56_spill] sm:$0xff] %v8837_v17 }
 0x3a8   :  { %v8844_v24 = vmul.f32 %v5866_v13, %v8837_v17  ;;  %v2131_v2 = vmul.f32 %v5978_v21, %v8655_v29  ;;  %v8849_v17 = vpop.permute.xlu1 %1525 }
 0x3a9   :  { %11139 = vst [vmem:[#allocation57_spill] sm:$0xff] %v8849_v17 }
 0x3aa   :  { %v5867_v48 = vpop.f32.mrb[40].mxu1  ;;  %v5979_v18 = vpop.f32.mrb[72].mxu0  ;;  %v2153_v8 = vpack.c.bf16 %v2131_v2, %v2130_v36 }
 0x3ab   :  { %v5868_v16 = vpop.f32.mrb[41].mxu1  ;;  %v5980_v0 = vpop.f32.mrb[73].mxu0 }
 0x3ac   :  { %v5869_v35 = vadd.f32 %v5868_v16, %v5867_v48  ;;  %v5981_v27 = vadd.f32 %v5980_v0, %v5979_v18  ;;  %v5870_v57 = vpop.f32.mrb[42].mxu1  ;;  %v5982_v54 = vpop.f32.mrb[74].mxu0  ;;  %6488 = vmatmul.mubr.bf16.gmra.mrb[80].mxu1 %v2153_v8 }
 0x3ad   :  { %v5871_v7 = vpop.f32.mrb[43].mxu1  ;;  %v5983_v32 = vpop.f32.mrb[75].mxu0 }
 0x3ae   :  { %v5872_v20 = vadd.f32 %v5871_v7, %v5870_v57  ;;  %v5984_v13 = vadd.f32 %v5983_v32, %v5982_v54  ;;  %v8851_v21 = vpop.permute.xlu0 %1530  ;;  %v8854_v36 = vmul.f32 %v5869_v35, %v8849_v17  ;;  %v2132_v2 = vmul.f32 %v5981_v27, %v8653_v56 }
 0x3af   :  { %11140 = vst [vmem:[#allocation58_spill] sm:$0xff] %v8851_v21 }
 0x3b0   :  { %v8858_v39 = vmul.f32 %v5872_v20, %v8851_v21  ;;  %v2133_v48 = vmul.f32 %v5984_v13, %v8659_v19  ;;  %v8863_v21 = vpop.permute.xlu1 %1535 }
 0x3b1   :  { %11141 = vst [vmem:[#allocation59_spill] sm:$0xff] %v8863_v21 }
 0x3b2   :  { %v5873_v18 = vpop.f32.mrb[44].mxu1  ;;  %v5985_v8 = vpop.f32.mrb[76].mxu0  ;;  %v2154_v16 = vpack.c.bf16 %v2133_v48, %v2132_v2 }
 0x3b3   :  { %v5874_v7 = vpop.f32.mrb[45].mxu1  ;;  %v5986_v0 = vpop.f32.mrb[77].mxu0 }
 0x3b4   :  { %v5875_v54 = vadd.f32 %v5874_v7, %v5873_v18  ;;  %v5987_v32 = vadd.f32 %v5986_v0, %v5985_v8  ;;  %v5876_v29 = vpop.f32.mrb[46].mxu1  ;;  %v5988_v35 = vpop.f32.mrb[78].mxu0  ;;  %6491 = vmatprep.mubr.bf16.mxu1 %v2154_v16 }
 0x3b5   :  { %v5877_v17 = vpop.f32.mrb[47].mxu1  ;;  %v5989_v27 = vpop.f32.mrb[79].mxu0 }
 0x3b6   :  { %v5878_v56 = vadd.f32 %v5877_v17, %v5876_v29  ;;  %v5990_v20 = vadd.f32 %v5989_v27, %v5988_v35  ;;  %v8865_v13 = vpop.permute.xlu0 %1540  ;;  %v8868_v2 = vmul.f32 %v5875_v54, %v8863_v21  ;;  %v2134_v48 = vmul.f32 %v5987_v32, %v8657_v51 }
 0x3b7   :  { %11142 = vst [vmem:[#allocation60_spill] sm:$0xff] %v8865_v13 }
 0x3b8   :  { %v8872_v57 = vmul.f32 %v5878_v56, %v8865_v13  ;;  %v2135_v18 = vmul.f32 %v5990_v20, %v8663_v31  ;;  %v8877_v13 = vpop.permute.xlu1 %1545 }
 0x3b9   :  { %11143 = vst [vmem:[#allocation61_spill] sm:$0xff] %v8877_v13 }
 0x3ba   :  { %v5879_v8 = vpop.f32.mrb[48].mxu1  ;;  %v5991_v16 = vpop.f32.mrb[80].mxu0  ;;  %v2155_v7 = vpack.c.bf16 %v2135_v18, %v2134_v48 }
 0x3bb   :  { %v5880_v17 = vpop.f32.mrb[49].mxu1  ;;  %v5992_v0 = vpop.f32.mrb[81].mxu0 }
 0x3bc   :  { %v5881_v35 = vadd.f32 %v5880_v17, %v5879_v8  ;;  %v5993_v27 = vadd.f32 %v5992_v0, %v5991_v16  ;;  %v5882_v19 = vpop.f32.mrb[50].mxu1  ;;  %v5994_v54 = vpop.f32.mrb[82].mxu0  ;;  %6492 = vmatmul.mubr.bf16.gmra.mrb[84].mxu1 %v2155_v7 }
 0x3bd   :  { %v5883_v21 = vpop.f32.mrb[51].mxu1  ;;  %v5995_v32 = vpop.f32.mrb[83].mxu0 }
 0x3be   :  { %v5884_v51 = vadd.f32 %v5883_v21, %v5882_v19  ;;  %v5996_v56 = vadd.f32 %v5995_v32, %v5994_v54  ;;  %v8879_v20 = vpop.permute.xlu0 %1550  ;;  %v8882_v48 = vmul.f32 %v5881_v35, %v8877_v13  ;;  %v2136_v18 = vmul.f32 %v5993_v27, %v8661_v63 }
 0x3bf   :  { %11144 = vst [vmem:[#allocation62_spill] sm:$0xff] %v8879_v20 }
 0x3c0   :  { %v8886_v29 = vmul.f32 %v5884_v51, %v8879_v20  ;;  %v2137_v8 = vmul.f32 %v5996_v56, %v8670_v37  ;;  %v8891_v20 = vpop.permute.xlu1 %1555 }
 0x3c1   :  { %11145 = vst [vmem:[#allocation63_spill] sm:$0xff] %v8891_v20 }
 0x3c2   :  { %v5885_v16 = vpop.f32.mrb[52].mxu1  ;;  %v5997_v7 = vpop.f32.mrb[84].mxu0  ;;  %v2156_v17 = vpack.c.bf16 %v2137_v8, %v2136_v18 }
 0x3c3   :  { %v5886_v21 = vpop.f32.mrb[53].mxu1  ;;  %v5998_v0 = vpop.f32.mrb[85].mxu0 }
 0x3c4   :  { %v5887_v54 = vadd.f32 %v5886_v21, %v5885_v16  ;;  %v5999_v32 = vadd.f32 %v5998_v0, %v5997_v7  ;;  %v5888_v31 = vpop.f32.mrb[54].mxu1  ;;  %v6000_v35 = vpop.f32.mrb[86].mxu0  ;;  %6495 = vmatprep.mubr.bf16.mxu1 %v2156_v17 }
 0x3c5   :  { %v5889_v13 = vpop.f32.mrb[55].mxu1  ;;  %v6001_v27 = vpop.f32.mrb[87].mxu0 }
 0x3c6   :  { %v5890_v63 = vadd.f32 %v5889_v13, %v5888_v31  ;;  %v6002_v51 = vadd.f32 %v6001_v27, %v6000_v35  ;;  %v8893_v56 = vpop.permute.xlu0 %1560  ;;  %v8896_v18 = vmul.f32 %v5887_v54, %v8891_v20  ;;  %v2138_v8 = vmul.f32 %v5999_v32, %v8668_v25 }
 0x3c7   :  { %11146 = vst [vmem:[#allocation64_spill] sm:$0xff] %v8893_v56 }
 0x3c8   :  { %v8900_v19 = vmul.f32 %v5890_v63, %v8893_v56  ;;  %v2139_v16 = vmul.f32 %v6002_v51, %v8674_v52  ;;  %v8905_v56 = vpop.permute.xlu1 %1565 }
 0x3c9   :  { %11147 = vst [vmem:[#allocation65_spill] sm:$0xff] %v8905_v56 }
 0x3ca   :  { %v5891_v7 = vpop.f32.mrb[56].mxu1  ;;  %v6003_v17 = vpop.f32.mrb[88].mxu0  ;;  %v2157_v21 = vpack.c.bf16 %v2139_v16, %v2138_v8 }
 0x3cb   :  { %v5892_v13 = vpop.f32.mrb[57].mxu1  ;;  %v6004_v0 = vpop.f32.mrb[89].mxu0 }
 0x3cc   :  { %v5893_v35 = vadd.f32 %v5892_v13, %v5891_v7  ;;  %v6005_v27 = vadd.f32 %v6004_v0, %v6003_v17  ;;  %v5894_v37 = vpop.f32.mrb[58].mxu1  ;;  %v6006_v54 = vpop.f32.mrb[90].mxu0  ;;  %6496 = vmatmul.mubr.bf16.gmra.mrb[88].mxu1 %v2157_v21 }
 0x3cd   :  { %v5895_v20 = vpop.f32.mrb[59].mxu1  ;;  %v6007_v32 = vpop.f32.mrb[91].mxu0 }
 0x3ce   :  { %v5896_v25 = vadd.f32 %v5895_v20, %v5894_v37  ;;  %v6008_v63 = vadd.f32 %v6007_v32, %v6006_v54  ;;  %v8907_v51 = vpop.permute.xlu0 %1570  ;;  %v8910_v8 = vmul.f32 %v5893_v35, %v8905_v56  ;;  %v2140_v16 = vmul.f32 %v6005_v27, %v8672_v49  ;;  %v8916_v49 = vpop.permute.xlu1 %1575 }
 0x3d0   :  { %v1612_v31 = vmul.f32 %v5896_v25, %v8907_v51  ;;  %v2141_v7 = vmul.f32 %v6008_v63, %v8678_v15 }
 0x3d2   :  { %v5897_v17 = vpop.f32.mrb[60].mxu1  ;;  %v6009_v13 = vpop.f32.mrb[92].mxu0  ;;  %v2158_v21 = vpack.c.bf16 %v2141_v7, %v2140_v16  ;;  %v1629_v0 = vpack.c.bf16 %v1612_v31, %v8910_v8 }
 0x3d3   :  { %v5898_v37 = vpop.f32.mrb[61].mxu1  ;;  %v6010_v20 = vpop.f32.mrb[93].mxu0 }
 0x3d4   :  { %v5899_v54 = vadd.f32 %v5898_v37, %v5897_v17  ;;  %v6011_v32 = vadd.f32 %v6010_v20, %v6009_v13  ;;  %v5900_v52 = vpop.f32.mrb[62].mxu1  ;;  %v6012_v42 = vpop.f32.mrb[94].mxu0  ;;  %6499 = vmatprep.mubr.bf16.mxu1 %v2158_v21  ;;  %v11148_v13 = vpack.c.bf16 %v8692_v53, %v8685_v58  ;;  %v7060_v53 = vld [vmem:[%s11129_s6 + $0x10] sm:$0xff]   ;;  %v7061_v58 = vld [vmem:[%s11129_s6 + $0x18] sm:$0xff]  }
 0x3d5   :  { %v5901_v35 = vpop.f32.mrb[63].mxu1  ;;  %v6013_v56 = vpop.f32.mrb[95].mxu0 }
 0x3d6   :  { %v5902_v1 = vadd.f32 %v5901_v35, %v5900_v52  ;;  %v6014_v27 = vadd.f32 %v6013_v56, %v6012_v42  ;;  %v8918_v25 = vpop.permute.xlu0 %1580  ;;  %v1613_v63 = vmul.f32 %v5899_v54, %v8916_v49  ;;  %v2142_v16 = vmul.f32 %v6011_v32, %v8676_v43  ;;  %v7059_v42 = vld [vmem:[%s11129_s6 + $0x8] sm:$0xff]  }
 0x3d7   :  { %v11149_v52 = vpack.c.bf16 %v8706_v34, %v8699_v30  ;;  %v11151_v34 = vpack.c.bf16 %v8746_v22, %v8736_v59  ;;  %v11152_v30 = vpack.c.bf16 %v8766_v4, %v8756_v10  ;;  %v11153_v59 = vpack.c.bf16 %v8788_v60, %v8781_v11  ;;  %v7064_v10 = vld [vmem:[%s11129_s6 + $0x30] sm:$0xff]   ;;  %v7065_v4 = vld [vmem:[%s11129_s6 + $0x38] sm:$0xff]  }
 0x3d8   :  { %v1614_v31 = vmul.f32 %v5902_v1, %v8918_v25  ;;  %v2143_v8 = vmul.f32 %v6014_v27, %v8682_v23  ;;  %v11150_v1 = vpack.c.bf16 %v8726_v6, %v8716_v33  ;;  %v7062_v33 = vld [vmem:[%s11129_s6 + $0x20] sm:$0xff]   ;;  %v7063_v6 = vld [vmem:[%s11129_s6 + $0x28] sm:$0xff]   ;;  %v11154_v22 = vpack.c.bf16 %v8802_v3, %v8796_v45 }
 0x3d9   :  { %v11155_v11 = vpack.c.bf16 %v8816_v50, %v8812_v47  ;;  %v11156_v45 = vpack.c.bf16 %v8830_v5, %v8826_v44  ;;  %v11158_v60 = vpack.c.bf16 %v8858_v39, %v8854_v36  ;;  %v11159_v3 = vpack.c.bf16 %v8872_v57, %v8868_v2  ;;  %v11162_v5 = vld [vmem:[#allocation2_spill] sm:$0xff] }
 0x3da   :  { %v2159_v7 = vpack.c.bf16 %v2143_v8, %v2142_v16  ;;  %v1630_v17 = vpack.c.bf16 %v1614_v31, %v1613_v63  ;;  %v11160_v50 = vpack.c.bf16 %v8886_v29, %v8882_v48  ;;  %v11161_v47 = vpack.c.bf16 %v8900_v19, %v8896_v18 }
 0x3dc   :  { %6500 = vmatmul.mubr.bf16.gmra.mrb[92].mxu1 %v2159_v7 }
 0x3dd   :  { %6519 = vmatprep.mubr.bf16.mxu1 %v11148_v13 }
 0x3e4   :  { %6520 = vmatmul.mubr.bf16.vlgmr.msra.gmra.mrb[64].mxu1 %v11149_v52 }
 0x3e5   :  { %6523 = vmatprep.mubr.bf16.mxu1 %v11150_v1  ;;  %6552 = vmatpush3.bf16.msra.mxu1 %v8778_v12  ;;  %v11157_v12 = vpack.c.bf16 %v8844_v24, %v8840_v41 }
 0x3e6   :  { %6553 = vmatprep.subr.bf16.mxu1 %v7059_v42 }
 0x3e9   :  { %6554 = vmatpush3.bf16.msra.mxu1 %v7059_v42 }
 0x3ea   :  { %6555 = vmatprep.subr.bf16.mxu1 %v7060_v53 }
 0x3ec   :  { %6524 = vmatmul.mubr.bf16.gmra.mrb[68].mxu1 %v11151_v34 }
 0x3ed   :  { %6527 = vmatprep.mubr.bf16.mxu1 %v11152_v30  ;;  %6556 = vmatpush3.bf16.msra.mxu1 %v7060_v53 }
 0x3ee   :  { %6557 = vmatprep.subr.bf16.mxu1 %v7061_v58 }
 0x3f1   :  { %6558 = vmatpush3.bf16.msra.mxu1 %v7061_v58 }
 0x3f2   :  { %6559 = vmatprep.subr.bf16.mxu1 %v7062_v33 }
 0x3f4   :  { %6528 = vmatmul.mubr.bf16.gmra.mrb[72].mxu1 %v11153_v59 }
 0x3f5   :  { %6531 = vmatprep.mubr.bf16.mxu1 %v11154_v22  ;;  %6560 = vmatpush3.bf16.msra.mxu1 %v7062_v33 }
 0x3f6   :  { %6561 = vmatprep.subr.bf16.mxu1 %v7063_v6 }
 0x3f9   :  { %6562 = vmatpush3.bf16.msra.mxu1 %v7063_v6 }
 0x3fa   :  { %6563 = vmatprep.subr.bf16.mxu1 %v7064_v10 }
 0x3fc   :  { %6532 = vmatmul.mubr.bf16.gmra.mrb[76].mxu1 %v11155_v11 }
 0x3fd   :  { %6535 = vmatprep.mubr.bf16.mxu1 %v11156_v45  ;;  %6564 = vmatpush3.bf16.msra.mxu1 %v7064_v10 }
 0x3fe   :  { %6565 = vmatprep.subr.bf16.mxu1 %v7065_v4 }
 0x401   :  { %6566 = vmatpush3.bf16.msra.mxu1 %v7065_v4 }
 0x404   :  { %6536 = vmatmul.mubr.bf16.gmra.mrb[80].mxu1 %v11157_v12 }
 0x405   :  { %6539 = vmatprep.mubr.bf16.mxu1 %v11158_v60 }
 0x40c   :  { %6540 = vmatmul.mubr.bf16.gmra.mrb[84].mxu1 %v11159_v3 }
 0x40d   :  { %6543 = vmatprep.mubr.bf16.mxu1 %v11160_v50 }
 0x414   :  { %6544 = vmatmul.mubr.bf16.gmra.mrb[88].mxu1 %v11161_v47 }
 0x415   :  { %6547 = vmatprep.mubr.bf16.mxu1 %v1629_v0 }
 0x41c   :  { %6548 = vmatmul.mubr.bf16.gmra.mrb[92].mxu1 %v1630_v17 }
 0x41d   :  { %6567 = vmatprep.mubr.bf16.mxu1 %v8170_v28  ;;  %v11163_v28 = vld [vmem:[#allocation3_spill] sm:$0xff] }
 0x424   :  { %6568 = vmatmul.mubr.bf16.vlgmr.msra.gmra.mrb[64].mxu1 %v8157_v40  ;;  %v11164_v40 = vld [vmem:[#allocation4_spill] sm:$0xff] }
 0x425   :  { %6571 = vmatprep.mubr.bf16.mxu1 %v8242_v38  ;;  %v11165_v38 = vld [vmem:[#allocation5_spill] sm:$0xff] }
 0x42c   :  { %6572 = vmatmul.mubr.bf16.gmra.mrb[68].mxu1 %v8204_v26  ;;  %v11166_v26 = vld [vmem:[#allocation6_spill] sm:$0xff] }
 0x42d   :  { %6575 = vmatprep.mubr.bf16.mxu1 %v8292_v14  ;;  %v11167_v14 = vld [vmem:[#allocation7_spill] sm:$0xff] }
 0x434   :  { %6576 = vmatmul.mubr.bf16.gmra.mrb[72].mxu1 %v8314_v55  ;;  %v9007_v55 = vld [vmem:[%s10907_s12] ss:$0 sm:$0xff] }
 0x435   :  { %6579 = vmatprep.mubr.bf16.mxu1 %v8335_v46 }
 0x43c   :  { %6580 = vmatmul.mubr.bf16.gmra.mrb[76].mxu1 %v8365_v9 }
 0x43d   :  { %6583 = vmatprep.mubr.bf16.mxu1 %v8196_v62 }
 0x444   :  { %6584 = vmatmul.mubr.bf16.gmra.mrb[80].mxu1 %v8202_v61 }
 0x445   :  { %6587 = vmatprep.mubr.bf16.mxu1 %v11162_v5 }
 0x44c   :  { %6588 = vmatmul.mubr.bf16.gmra.mrb[84].mxu1 %v11163_v28 }
 0x44d   :  { %6591 = vmatprep.mubr.bf16.mxu1 %v11164_v40 }
 0x454   :  { %6592 = vmatmul.mubr.bf16.gmra.mrb[88].mxu1 %v11165_v38 }
 0x455   :  { %6595 = vmatprep.mubr.bf16.mxu1 %v11166_v26 }
 0x45c   :  { %6596 = vmatmul.mubr.bf16.gmra.mrb[92].mxu1 %v11167_v14 }
 0x4f7   :  { %v6569_v62 = vpop.f32.mrb[64].mxu1 }
 0x4f8   :  { %v2660_v46 = vpop.f32.mrb[65].mxu1  ;;  %v9013_v24 = vadd.f32 %v6569_v62, %v9007_v55 }
 0x4f9   :  { %v9010_v61 = vadd.f32 %v9007_v55, %v2660_v46  ;;  %v6570_v9 = vpop.f32.mrb[66].mxu1 }
 0x4fa   :  { %v2663_v44 = vpop.f32.mrb[67].mxu1  ;;  %v9020_v36 = vadd.f32 %v6570_v9, %v9007_v55  ;;  %v11014_v2 = vmax.f32 %v9013_v24, 0.0 }
 0x4fb   :  { %v9016_v41 = vadd.f32 %v9007_v55, %v2663_v44  ;;  %v11016_v39 = vmax.f32 %v9010_v61, 0.0 }
 0x4fc   :  { %v11013_v56 = vmax.f32 %v9020_v36, 0.0 }
 0x4fd   :  { %v11015_v57 = vmax.f32 %v9016_v41, 0.0 }
 0x4ff   :  { %v2889_v29 = vadd.f32 %v11015_v57, %v11016_v39  ;;  %v6573_v48 = vpop.f32.mrb[68].mxu1 }
 0x500   :  { %v2676_v19 = vpop.f32.mrb[69].mxu1  ;;  %v9035_v20 = vadd.f32 %v6573_v48, %v9007_v55 }
 0x501   :  { %v2890_v18 = vadd.f32 %v2889_v29, %v11014_v2  ;;  %v9032_v21 = vadd.f32 %v9007_v55, %v2676_v19  ;;  %v6574_v0 = vpop.f32.mrb[70].mxu1 }
 0x502   :  { %v2679_v37 = vpop.f32.mrb[71].mxu1  ;;  %v9046_v63 = vadd.f32 %v6574_v0, %v9007_v55  ;;  %v11010_v31 = vmax.f32 %v9035_v20, 0.0 }
 0x503   :  { %v11012_v54 = vmax.f32 %v9032_v21, 0.0  ;;  %v2891_v32 = vadd.f32 %v2890_v18, %v11013_v56  ;;  %v9041_v35 = vadd.f32 %v9007_v55, %v2679_v37 }
 0x504   :  { %v11009_v13 = vmax.f32 %v9046_v63, 0.0 }
 0x505   :  { %v2892_v27 = vadd.f32 %v2891_v32, %v11012_v54  ;;  %v11011_v16 = vmax.f32 %v9041_v35, 0.0 }
 0x507   :  { %v2893_v8 = vadd.f32 %v2892_v27, %v11011_v16  ;;  %v6577_v7 = vpop.f32.mrb[72].mxu1 }
 0x508   :  { %v2692_v17 = vpop.f32.mrb[73].mxu1  ;;  %v9059_v58 = vadd.f32 %v6577_v7, %v9007_v55 }
 0x509   :  { %v2894_v42 = vadd.f32 %v2893_v8, %v11010_v31  ;;  %v9056_v52 = vadd.f32 %v9007_v55, %v2692_v17  ;;  %v6578_v1 = vpop.f32.mrb[74].mxu1 }
 0x50a   :  { %v2695_v53 = vpop.f32.mrb[75].mxu1  ;;  %v9070_v59 = vadd.f32 %v6578_v1, %v9007_v55  ;;  %v2867_v10 = vmax.f32 %v9059_v58, 0.0 }
 0x50b   :  { %v11008_v34 = vmax.f32 %v9056_v52, 0.0  ;;  %v2895_v30 = vadd.f32 %v2894_v42, %v11009_v13  ;;  %v9065_v33 = vadd.f32 %v9007_v55, %v2695_v53 }
 0x50c   :  { %v2868_v12 = vmax.f32 %v9070_v59, 0.0 }
 0x50d   :  { %v2896_v6 = vadd.f32 %v2895_v30, %v11008_v34  ;;  %v11007_v22 = vmax.f32 %v9065_v33, 0.0 }
 0x50f   :  { %v2897_v4 = vadd.f32 %v2896_v6, %v11007_v22  ;;  %v6581_v11 = vpop.f32.mrb[76].mxu1 }
 0x510   :  { %v2708_v45 = vpop.f32.mrb[77].mxu1  ;;  %v9083_v5 = vadd.f32 %v6581_v11, %v9007_v55 }
 0x511   :  { %v2898_v60 = vadd.f32 %v2897_v4, %v2867_v10  ;;  %v9080_v3 = vadd.f32 %v9007_v55, %v2708_v45  ;;  %v6582_v50 = vpop.f32.mrb[78].mxu1 }
 0x512   :  { %v2711_v47 = vpop.f32.mrb[79].mxu1  ;;  %v9094_v14 = vadd.f32 %v6582_v50, %v9007_v55  ;;  %v2871_v46 = vmax.f32 %v9083_v5, 0.0 }
 0x513   :  { %v2869_v28 = vmax.f32 %v9080_v3, 0.0  ;;  %v2899_v40 = vadd.f32 %v2898_v60, %v2868_v12  ;;  %v9089_v38 = vadd.f32 %v9007_v55, %v2711_v47 }
 0x514   :  { %v2872_v48 = vmax.f32 %v9094_v14, 0.0 }
 0x515   :  { %v2900_v26 = vadd.f32 %v2899_v40, %v2869_v28  ;;  %v2870_v62 = vmax.f32 %v9089_v38, 0.0 }
 0x517   :  { %v2901_v9 = vadd.f32 %v2900_v26, %v2870_v62  ;;  %v6585_v44 = vpop.f32.mrb[80].mxu1 }
 0x518   :  { %v2724_v29 = vpop.f32.mrb[81].mxu1  ;;  %v9107_v32 = vadd.f32 %v6585_v44, %v9007_v55 }
 0x519   :  { %v2902_v19 = vadd.f32 %v2901_v9, %v2871_v46  ;;  %v9104_v18 = vadd.f32 %v9007_v55, %v2724_v29  ;;  %v6586_v0 = vpop.f32.mrb[82].mxu1 }
 0x51a   :  { %v2727_v37 = vpop.f32.mrb[83].mxu1  ;;  %v9118_v42 = vadd.f32 %v6586_v0, %v9007_v55  ;;  %v11021_v53 = vmax.f32 %v9107_v32, 0.0 }
 0x51b   :  { %v11023_v27 = vmax.f32 %v9104_v18, 0.0  ;;  %v2903_v8 = vadd.f32 %v2902_v19, %v2872_v48  ;;  %v9113_v7 = vadd.f32 %v9007_v55, %v2727_v37  ;;  %v11169_v59 = vmax.f32 %v9104_v18, 0.0 }
 0x51c   :  { %v11020_v11 = vmax.f32 %v9118_v42, 0.0  ;;  %v11172_v5 = vmax.f32 %v9118_v42, 0.0 }
 0x51d   :  { %v2904_v17 = vadd.f32 %v2903_v8, %v11023_v27  ;;  %v11022_v1 = vmax.f32 %v9113_v7, 0.0 }
 0x51f   :  { %v2905_v30 = vadd.f32 %v2904_v17, %v11022_v1  ;;  %v6589_v6 = vpop.f32.mrb[84].mxu1 }
 0x520   :  { %v2740_v4 = vpop.f32.mrb[85].mxu1  ;;  %v9131_v40 = vadd.f32 %v6589_v6, %v9007_v55 }
 0x521   :  { %v2906_v45 = vadd.f32 %v2905_v30, %v11021_v53  ;;  %v9128_v60 = vadd.f32 %v9007_v55, %v2740_v4  ;;  %v6590_v50 = vpop.f32.mrb[86].mxu1  ;;  %v11024_v53 = vlaneseq }
 0x522   :  { %v2743_v47 = vpop.f32.mrb[87].mxu1  ;;  %v9142_v19 = vadd.f32 %v6590_v50, %v9007_v55  ;;  %v11017_v37 = vmax.f32 %v9131_v40, 0.0 }
 0x523   :  { %v11019_v26 = vmax.f32 %v9128_v60, 0.0  ;;  %v2907_v9 = vadd.f32 %v2906_v45, %v11020_v11  ;;  %v9137_v44 = vadd.f32 %v9007_v55, %v2743_v47  ;;  %v11173_v14 = vmax.f32 %v9128_v60, 0.0 }
 0x524   :  { %v2880_v6 = vmax.f32 %v9142_v19, 0.0 }
 0x525   :  { %v2908_v29 = vadd.f32 %v2907_v9, %v11019_v26  ;;  %v11018_v0 = vmax.f32 %v9137_v44, 0.0 }
 0x527   :  { %v2909_v8 = vadd.f32 %v2908_v29, %v11018_v0  ;;  %v6593_v17 = vpop.f32.mrb[88].mxu1 }
 0x528   :  { %v2756_v30 = vpop.f32.mrb[89].mxu1  ;;  %v2851_v50 = vadd.f32 %v6593_v17, %v9007_v55 }
 0x529   :  { %v2910_v4 = vadd.f32 %v2909_v8, %v11017_v37  ;;  %v2849_v45 = vadd.f32 %v9007_v55, %v2756_v30  ;;  %v6594_v47 = vpop.f32.mrb[90].mxu1 }
 0x52a   :  { %v2759_v9 = vpop.f32.mrb[91].mxu1  ;;  %v2852_v29 = vadd.f32 %v6594_v47, %v9007_v55  ;;  %v2883_v54 = vmax.f32 %v2851_v50, 0.0 }
 0x52b   :  { %v2881_v22 = vmax.f32 %v2849_v45, 0.0  ;;  %v2911_v34 = vadd.f32 %v2910_v4, %v2880_v6  ;;  %v2850_v13 = vadd.f32 %v9007_v55, %v2759_v9 }
 0x52c   :  { %v2884_v57 = vmax.f32 %v2852_v29, 0.0 }
 0x52d   :  { %v2912_v31 = vadd.f32 %v2911_v34, %v2881_v22  ;;  %v2882_v16 = vmax.f32 %v2850_v13, 0.0 }
 0x52f   :  { %v2913_v56 = vadd.f32 %v2912_v31, %v2882_v16  ;;  %v6597_v19 = vpop.f32.mrb[92].mxu1 }
 0x530   :  { %v2772_v2 = vpop.f32.mrb[93].mxu1  ;;  %v2855_v17 = vadd.f32 %v6597_v19, %v9007_v55  ;;  %v9160_v19 = vshrl.u32 %v11024_v53, 7 }
 0x531   :  { %v2914_v8 = vadd.f32 %v2913_v56, %v2883_v54  ;;  %v2853_v30 = vadd.f32 %v9007_v55, %v2772_v2  ;;  %v6598_v39 = vpop.f32.mrb[94].mxu1 }
 0x532   :  { %v2775_v37 = vpop.f32.mrb[95].mxu1  ;;  %v2856_v47 = vadd.f32 %v6598_v39, %v9007_v55  ;;  %v2887_v50 = vmax.f32 %v2855_v17, 0.0  ;;  %11168 = vst [vmem:[#allocation2_spill] sm:$0xff] %v9160_v19 }
 0x533   :  { %v2885_v45 = vmax.f32 %v2853_v30, 0.0  ;;  %v2915_v4 = vadd.f32 %v2914_v8, %v2884_v57  ;;  %v2854_v9 = vadd.f32 %v9007_v55, %v2775_v37  ;;  %v2928_v55 = vld [vmem:[%s10908_s15] sm:$0x1]  ;;  %v11025_v37 = vsub.s32 0, %v9160_v19 }
 0x534   :  { %v2888_v0 = vmax.f32 %v2856_v47, 0.0 }
 0x535   :  { %v2916_v34 = vadd.f32 %v2915_v4, %v2885_v45  ;;  %v2886_v13 = vmax.f32 %v2854_v9, 0.0 }
 0x537   :  { %v2917_v31 = vadd.f32 %v2916_v34, %v2886_v13 }
 0x539   :  { %v2918_v26 = vadd.f32 %v2917_v31, %v2887_v50 }
 0x53b   :  { %v2919_v29 = vadd.f32 %v2918_v26, %v2888_v0 }
 0x53d   :  { %v2920_v56 = vrot.slane %v2919_v29, 4 }
 0x53f   :  { %v2921_v11 = vadd.f32 %v2920_v56, %v2919_v29 }
 0x541   :  { %v2922_v2 = vrot.slane %v2921_v11, 2 }
 0x543   :  { %v2923_v1 = vadd.f32 %v2922_v2, %v2921_v11 }
 0x545   :  { %v2924_v27 = vrot.slane %v2923_v1, 1 }
 0x547   :  { %v2925_v8 = vadd.f32 %v2924_v27, %v2923_v1 }
 0x549   :  { %v2927_v39 = vmul.f32 0.00390625, %v2925_v8  ;;  %v11181_v8 = vmax.f32 %v9041_v35, 0.0 }
 0x54b   :  { %v2929_v30 = vmul.f32 %v2928_v55, %v2927_v39 }
 0x54d   :  { %v2934_v26 = vrot.slane %v2929_v30, %v11025_v37 }
 0x54f   :  { %v9170_v17 = vsub.f32 %v2867_v10, %v2934_v26  ;;  %v9174_v11 = vsub.f32 %v2868_v12, %v2934_v26  ;;  %v9178_v27 = vsub.f32 %v2869_v28, %v2934_v26  ;;  %v9182_v1 = vsub.f32 %v2870_v62, %v2934_v26 }
 0x550   :  { %v9186_v4 = vsub.f32 %v2871_v46, %v2934_v26  ;;  %v9190_v58 = vsub.f32 %v2872_v48, %v2934_v26  ;;  %v9194_v10 = vsub.f32 %v11169_v59, %v2934_v26  ;;  %v11170_v12 = vmax.f32 %v9113_v7, 0.0 }
 0x551   :  { %v11171_v28 = vmax.f32 %v9107_v32, 0.0  ;;  %v9206_v62 = vsub.f32 %v11172_v5, %v2934_v26  ;;  %v9210_v46 = vsub.f32 %v11173_v14, %v2934_v26  ;;  %v11174_v48 = vmax.f32 %v9137_v44, 0.0 }
 0x552   :  { %v9198_v3 = vsub.f32 %v11170_v12, %v2934_v26  ;;  %v11175_v7 = vmax.f32 %v9131_v40, 0.0  ;;  %v9220_v34 = vsub.f32 %v2880_v6, %v2934_v26  ;;  %v9222_v32 = vsub.f32 %v2881_v22, %v2934_v26 }
 0x553   :  { %v9202_v38 = vsub.f32 %v11171_v28, %v2934_v26  ;;  %v9214_v18 = vsub.f32 %v11174_v48, %v2934_v26  ;;  %v9224_v47 = vsub.f32 %v2882_v16, %v2934_v26  ;;  %v9226_v42 = vsub.f32 %v2883_v54, %v2934_v26 }
 0x554   :  { %v9218_v9 = vsub.f32 %v11175_v7, %v2934_v26  ;;  %v9228_v31 = vsub.f32 %v2884_v57, %v2934_v26  ;;  %v9230_v60 = vsub.f32 %v2885_v45, %v2934_v26  ;;  %v9232_v29 = vsub.f32 %v2886_v13, %v2934_v26 }
 0x555   :  { %v9234_v44 = vsub.f32 %v2887_v50, %v2934_v26  ;;  %v9236_v56 = vsub.f32 %v2888_v0, %v2934_v26  ;;  %v11176_v40 = vmax.f32 %v9010_v61, 0.0  ;;  %v11177_v22 = vmax.f32 %v9016_v41, 0.0 }
 0x556   :  { %v11178_v54 = vmax.f32 %v9013_v24, 0.0  ;;  %v11179_v0 = vmax.f32 %v9020_v36, 0.0  ;;  %v11180_v61 = vmax.f32 %v9032_v21, 0.0  ;;  %v9266_v55 = vsub.f32 %v11181_v8, %v2934_v26 }
 0x557   :  { %v9240_v6 = vsub.f32 %v11176_v40, %v2934_v26  ;;  %v9244_v16 = vsub.f32 %v11177_v22, %v2934_v26  ;;  %v11182_v36 = vmax.f32 %v9035_v20, 0.0  ;;  %v11183_v28 = vmax.f32 %v9046_v63, 0.0 }
 0x558   :  { %v9248_v57 = vsub.f32 %v11178_v54, %v2934_v26  ;;  %v9256_v50 = vsub.f32 %v11179_v0, %v2934_v26  ;;  %v9260_v2 = vsub.f32 %v11180_v61, %v2934_v26  ;;  %v2973_v35 = vmul.f32 %v9266_v55, %v9266_v55 }
 0x559   :  { %v2968_v45 = vmul.f32 %v9240_v6, %v9240_v6  ;;  %v2969_v13 = vmul.f32 %v9244_v16, %v9244_v16  ;;  %v9272_v59 = vsub.f32 %v11182_v36, %v2934_v26  ;;  %v9278_v5 = vsub.f32 %v11183_v28, %v2934_v26 }
 0x55a   :  { %v2970_v41 = vmul.f32 %v9248_v57, %v9248_v57  ;;  %v2971_v39 = vmul.f32 %v9256_v50, %v9256_v50  ;;  %v2972_v21 = vmul.f32 %v9260_v2, %v9260_v2  ;;  %v11184_v48 = vmax.f32 %v9056_v52, 0.0 }
 0x55b   :  { %v3000_v24 = vadd.f32 %v2969_v13, %v2968_v45  ;;  %v2974_v20 = vmul.f32 %v9272_v59, %v9272_v59  ;;  %v11185_v22 = vmax.f32 %v9065_v33, 0.0  ;;  %v2975_v63 = vmul.f32 %v9278_v5, %v9278_v5 }
 0x55c   :  { %v9284_v7 = vsub.f32 %v11184_v48, %v2934_v26  ;;  %v2979_v33 = vmul.f32 %v9174_v11, %v9174_v11  ;;  %v2980_v8 = vmul.f32 %v9178_v27, %v9178_v27  ;;  %v2983_v28 = vmul.f32 %v9190_v58, %v9190_v58 }
 0x55d   :  { %v3001_v30 = vadd.f32 %v3000_v24, %v2970_v41  ;;  %v9290_v54 = vsub.f32 %v11185_v22, %v2934_v26  ;;  %v2978_v41 = vmul.f32 %v9170_v17, %v9170_v17  ;;  %v2986_v22 = vmul.f32 %v9202_v38, %v9202_v38 }
 0x55e   :  { %v2976_v13 = vmul.f32 %v9284_v7, %v9284_v7 }
 0x55f   :  { %v3002_v12 = vadd.f32 %v3001_v30, %v2971_v39  ;;  %v2977_v52 = vmul.f32 %v9290_v54, %v9290_v54  ;;  %v2981_v30 = vmul.f32 %v9182_v1, %v9182_v1 }
 0x561   :  { %v3003_v14 = vadd.f32 %v3002_v12, %v2972_v21  ;;  %v2982_v21 = vmul.f32 %v9186_v4, %v9186_v4 }
 0x563   :  { %v3004_v40 = vadd.f32 %v3003_v14, %v2973_v35  ;;  %v2984_v14 = vmul.f32 %v9194_v10, %v9194_v10 }
 0x565   :  { %v3005_v45 = vadd.f32 %v3004_v40, %v2974_v20  ;;  %v2985_v20 = vmul.f32 %v9198_v3, %v9198_v3 }
 0x567   :  { %v3006_v0 = vadd.f32 %v3005_v45, %v2975_v63  ;;  %v2987_v45 = vmul.f32 %v9206_v62, %v9206_v62 }
 0x569   :  { %v3007_v61 = vadd.f32 %v3006_v0, %v2976_v13  ;;  %v2988_v0 = vmul.f32 %v9210_v46, %v9210_v46 }
 0x56b   :  { %v3008_v24 = vadd.f32 %v3007_v61, %v2977_v52  ;;  %v2989_v61 = vmul.f32 %v9214_v18, %v9214_v18 }
 0x56d   :  { %v3009_v26 = vadd.f32 %v3008_v24, %v2978_v41  ;;  %v2990_v24 = vmul.f32 %v9218_v9, %v9218_v9 }
 0x56f   :  { %v3010_v39 = vadd.f32 %v3009_v26, %v2979_v33  ;;  %v2991_v26 = vmul.f32 %v9220_v34, %v9220_v34 }
 0x571   :  { %v3011_v36 = vadd.f32 %v3010_v39, %v2980_v8  ;;  %v2992_v39 = vmul.f32 %v9222_v32, %v9222_v32 }
 0x573   :  { %v3012_v12 = vadd.f32 %v3011_v36, %v2981_v30  ;;  %v2993_v36 = vmul.f32 %v9224_v47, %v9224_v47 }
 0x575   :  { %v3013_v35 = vadd.f32 %v3012_v12, %v2982_v21  ;;  %v2994_v12 = vmul.f32 %v9226_v42, %v9226_v42 }
 0x577   :  { %v3014_v48 = vadd.f32 %v3013_v35, %v2983_v28  ;;  %v2995_v35 = vmul.f32 %v9228_v31, %v9228_v31 }
 0x579   :  { %v3015_v40 = vadd.f32 %v3014_v48, %v2984_v14  ;;  %v2996_v48 = vmul.f32 %v9230_v60, %v9230_v60 }
 0x57b   :  { %v3016_v63 = vadd.f32 %v3015_v40, %v2985_v20  ;;  %v2997_v40 = vmul.f32 %v9232_v29, %v9232_v29 }
 0x57d   :  { %v3017_v13 = vadd.f32 %v3016_v63, %v2986_v22  ;;  %v2998_v63 = vmul.f32 %v9234_v44, %v9234_v44 }
 0x57f   :  { %v3018_v52 = vadd.f32 %v3017_v13, %v2987_v45  ;;  %v2999_v13 = vmul.f32 %v9236_v56, %v9236_v56 }
 0x581   :  { %v3019_v41 = vadd.f32 %v3018_v52, %v2988_v0 }
 0x583   :  { %v3020_v33 = vadd.f32 %v3019_v41, %v2989_v61 }
 0x585   :  { %v3021_v8 = vadd.f32 %v3020_v33, %v2990_v24 }
 0x587   :  { %v3022_v30 = vadd.f32 %v3021_v8, %v2991_v26 }
 0x589   :  { %v3023_v21 = vadd.f32 %v3022_v30, %v2992_v39 }
 0x58b   :  { %v3024_v28 = vadd.f32 %v3023_v21, %v2993_v36  ;;  %v5696_v36 = vld [vmem:[%s10909_s13] ss:$0 sm:$0xff] }
 0x58c   :  { %v3074_v21 = vmul.f32 %v5696_v36, %v9232_v29  ;;  %v3054_v29 = vmul.f32 %v5696_v36, %v9290_v54  ;;  %v3064_v54 = vmul.f32 %v5696_v36, %v9206_v62  ;;  %v3075_v62 = vmul.f32 %v5696_v36, %v9234_v44 }
 0x58d   :  { %v3025_v14 = vadd.f32 %v3024_v28, %v2994_v12  ;;  %v3045_v12 = vmul.f32 %v5696_v36, %v9240_v6  ;;  %v3046_v28 = vmul.f32 %v5696_v36, %v9244_v16  ;;  %v3055_v6 = vmul.f32 %v5696_v36, %v9170_v17 }
 0x58e   :  { %v3056_v16 = vmul.f32 %v5696_v36, %v9174_v11  ;;  %v3065_v17 = vmul.f32 %v5696_v36, %v9210_v46  ;;  %v3066_v11 = vmul.f32 %v5696_v36, %v9214_v18  ;;  %v3076_v46 = vmul.f32 %v5696_v36, %v9236_v56 }
 0x58f   :  { %v3026_v20 = vadd.f32 %v3025_v14, %v2995_v35  ;;  %v3047_v35 = vmul.f32 %v5696_v36, %v9248_v57  ;;  %v3048_v14 = vmul.f32 %v5696_v36, %v9256_v50  ;;  %v3057_v57 = vmul.f32 %v5696_v36, %v9178_v27 }
 0x590   :  { %v3058_v50 = vmul.f32 %v5696_v36, %v9182_v1  ;;  %v3067_v27 = vmul.f32 %v5696_v36, %v9218_v9  ;;  %v3068_v1 = vmul.f32 %v5696_v36, %v9220_v34 }
 0x591   :  { %v3027_v22 = vadd.f32 %v3026_v20, %v2996_v48  ;;  %v3049_v48 = vmul.f32 %v5696_v36, %v9260_v2  ;;  %v3050_v20 = vmul.f32 %v5696_v36, %v9266_v55  ;;  %v3059_v2 = vmul.f32 %v5696_v36, %v9186_v4 }
 0x592   :  { %v3060_v55 = vmul.f32 %v5696_v36, %v9190_v58  ;;  %v3069_v4 = vmul.f32 %v5696_v36, %v9222_v32  ;;  %v3070_v58 = vmul.f32 %v5696_v36, %v9224_v47 }
 0x593   :  { %v3028_v45 = vadd.f32 %v3027_v22, %v2997_v40  ;;  %v3051_v40 = vmul.f32 %v5696_v36, %v9272_v59  ;;  %v3052_v22 = vmul.f32 %v5696_v36, %v9278_v5  ;;  %v3061_v59 = vmul.f32 %v5696_v36, %v9194_v10 }
 0x594   :  { %v3062_v5 = vmul.f32 %v5696_v36, %v9198_v3  ;;  %v3071_v10 = vmul.f32 %v5696_v36, %v9226_v42  ;;  %v3072_v3 = vmul.f32 %v5696_v36, %v9228_v31 }
 0x595   :  { %v3029_v0 = vadd.f32 %v3028_v45, %v2998_v63  ;;  %v3053_v63 = vmul.f32 %v5696_v36, %v9284_v7  ;;  %v3063_v7 = vmul.f32 %v5696_v36, %v9202_v38  ;;  %v3073_v38 = vmul.f32 %v5696_v36, %v9230_v60 }
 0x597   :  { %v3030_v52 = vadd.f32 %v3029_v0, %v2999_v13 }
 0x599   :  { %v3031_v61 = vrot.slane %v3030_v52, 4 }
 0x59b   :  { %v3032_v41 = vadd.f32 %v3031_v61, %v3030_v52 }
 0x59d   :  { %v3033_v24 = vrot.slane %v3032_v41, 2 }
 0x59f   :  { %v3034_v33 = vadd.f32 %v3033_v24, %v3032_v41 }
 0x5a1   :  { %v3035_v26 = vrot.slane %v3034_v33, 1 }
 0x5a3   :  { %v3036_v8 = vadd.f32 %v3035_v26, %v3034_v33 }
 0x5a5   :  { %v3037_v39 = vmul.f32 0.00390625, %v3036_v8 }
 0x5a7   :  { %v3077_v30 = vadd.f32 1e-05, %v3037_v39 }
 0x5a9   :  { %7162 = vrsqrt.f32 %v3077_v30  ;;  %v5697_v30 = vld [vmem:[%s10910_s14] ss:$0 sm:$0xff] }
 0x5b3   :  { %v7163_v45 = vpop.eup %7162 }
 0x5b4   :  { %v9377_v18 = vmul.f32 %v7163_v45, %v3074_v21  ;;  %v3079_v9 = vmul.f32 %v7163_v45, %v3045_v12  ;;  %v3080_v13 = vmul.f32 %v7163_v45, %v3046_v28  ;;  %v3081_v34 = vmul.f32 %v7163_v45, %v3047_v35 }
 0x5b5   :  { %v3082_v0 = vmul.f32 %v7163_v45, %v3048_v14  ;;  %v3083_v32 = vmul.f32 %v7163_v45, %v3049_v48  ;;  %v3084_v52 = vmul.f32 %v7163_v45, %v3050_v20  ;;  %v3085_v47 = vmul.f32 %v7163_v45, %v3051_v40 }
 0x5b6   :  { %v3086_v61 = vmul.f32 %v7163_v45, %v3052_v22  ;;  %v3087_v42 = vmul.f32 %v7163_v45, %v3053_v63  ;;  %v3088_v41 = vmul.f32 %v7163_v45, %v3054_v29  ;;  %v3089_v24 = vmul.f32 %v7163_v45, %v3055_v6 }
 0x5b7   :  { %v3090_v31 = vmul.f32 %v7163_v45, %v3056_v16  ;;  %v3091_v33 = vmul.f32 %v7163_v45, %v3057_v57  ;;  %v3092_v60 = vmul.f32 %v7163_v45, %v3058_v50  ;;  %v3093_v26 = vmul.f32 %v7163_v45, %v3059_v2 }
 0x5b8   :  { %v3094_v44 = vmul.f32 %v7163_v45, %v3060_v55  ;;  %v3095_v8 = vmul.f32 %v7163_v45, %v3061_v59  ;;  %v3096_v56 = vmul.f32 %v7163_v45, %v3062_v5  ;;  %v3097_v39 = vmul.f32 %v7163_v45, %v3063_v7 }
 0x5b9   :  { %v3098_v36 = vmul.f32 %v7163_v45, %v3064_v54  ;;  %v3099_v21 = vmul.f32 %v7163_v45, %v3065_v17  ;;  %v3100_v12 = vmul.f32 %v7163_v45, %v3066_v11  ;;  %v3101_v28 = vmul.f32 %v7163_v45, %v3067_v27 }
 0x5ba   :  { %v3102_v35 = vmul.f32 %v7163_v45, %v3068_v1  ;;  %v3103_v14 = vmul.f32 %v7163_v45, %v3069_v4  ;;  %v3104_v48 = vmul.f32 %v7163_v45, %v3070_v58  ;;  %v3105_v20 = vmul.f32 %v7163_v45, %v3071_v10 }
 0x5bb   :  { %v3106_v40 = vmul.f32 %v7163_v45, %v3072_v3  ;;  %v3107_v22 = vmul.f32 %v7163_v45, %v3073_v38  ;;  %v3109_v63 = vmul.f32 %v7163_v45, %v3075_v62  ;;  %v3110_v29 = vmul.f32 %v7163_v45, %v3076_v46 }
 0x5bc   :  { %v3118_v6 = vadd.f32 %v5697_v30, %v3079_v9  ;;  %v3119_v16 = vadd.f32 %v5697_v30, %v3080_v13  ;;  %v3120_v57 = vadd.f32 %v5697_v30, %v3081_v34  ;;  %v3121_v50 = vadd.f32 %v5697_v30, %v3082_v0 }
 0x5bd   :  { %v3122_v2 = vadd.f32 %v5697_v30, %v3083_v32  ;;  %v3123_v55 = vadd.f32 %v5697_v30, %v3084_v52  ;;  %v3124_v59 = vadd.f32 %v5697_v30, %v3085_v47  ;;  %v3125_v5 = vadd.f32 %v5697_v30, %v3086_v61 }
 0x5be   :  { %v3126_v7 = vadd.f32 %v5697_v30, %v3087_v42  ;;  %v3127_v54 = vadd.f32 %v5697_v30, %v3088_v41  ;;  %v3128_v17 = vadd.f32 %v5697_v30, %v3089_v24  ;;  %v3129_v11 = vadd.f32 %v5697_v30, %v3090_v31 }
 0x5bf   :  { %v3130_v27 = vadd.f32 %v5697_v30, %v3091_v33  ;;  %v3131_v1 = vadd.f32 %v5697_v30, %v3092_v60  ;;  %v3132_v4 = vadd.f32 %v5697_v30, %v3093_v26  ;;  %v3133_v58 = vadd.f32 %v5697_v30, %v3094_v44 }
 0x5c0   :  { %v3134_v10 = vadd.f32 %v5697_v30, %v3095_v8  ;;  %v3135_v3 = vadd.f32 %v5697_v30, %v3096_v56  ;;  %v9382_v38 = vpack.c.bf16 %v3119_v16, %v3118_v6  ;;  %v3136_v45 = vadd.f32 %v5697_v30, %v3097_v39  ;;  %v7364_v6 = vld [vmem:[%s11075_s2 + $0x44] ss:$8 sps:$4 sm:$0xff]   ;;  %v7365_v16 = vld [vmem:[%s11075_s2 + $0x40] ss:$8 sps:$4 sm:$0xff]  }
 0x5c1   :  { %v3137_v62 = vadd.f32 %v5697_v30, %v3098_v36  ;;  %v9384_v46 = vpack.c.bf16 %v3121_v50, %v3120_v57  ;;  %v3138_v9 = vadd.f32 %v5697_v30, %v3099_v21  ;;  %v3139_v13 = vadd.f32 %v5697_v30, %v3100_v12  ;;  %v7366_v57 = vld [vmem:[%s11075_s2 + $0x54] ss:$8 sps:$4 sm:$0xff]   ;;  %v7367_v50 = vld [vmem:[%s11075_s2 + $0x50] ss:$8 sps:$4 sm:$0xff]  }
 0x5c2   :  { %v9386_v34 = vpack.c.bf16 %v3135_v3, %v3134_v10  ;;  %v9388_v0 = vpack.c.bf16 %v3123_v55, %v3122_v2  ;;  %v3140_v32 = vadd.f32 %v5697_v30, %v3101_v28  ;;  %v3141_v52 = vadd.f32 %v5697_v30, %v3102_v35  ;;  %v7368_v2 = vld [vmem:[%s11075_s2 + $0x64] ss:$8 sps:$4 sm:$0xff]   ;;  %v7369_v55 = vld [vmem:[%s11075_s2 + $0x60] ss:$8 sps:$4 sm:$0xff]  }
 0x5c3   :  { %v9390_v47 = vpack.c.bf16 %v3137_v62, %v3136_v45  ;;  %v9392_v61 = vpack.c.bf16 %v3139_v13, %v3138_v9  ;;  %v9394_v42 = vpack.c.bf16 %v3125_v5, %v3124_v59  ;;  %v3142_v41 = vadd.f32 %v5697_v30, %v3103_v14  ;;  %v7370_v59 = vld [vmem:[%s11075_s2 + $0x74] ss:$8 sps:$4 sm:$0xff]   ;;  %v7371_v5 = vld [vmem:[%s11075_s2 + $0x70] ss:$8 sps:$4 sm:$0xff]   ;;  %v7380_v10 = vld [vmem:[%s11075_s2 + $0xc4] ss:$8 sps:$4 sm:$0xff]  }
 0x5c4   :  { %11186 = vst [vmem:[#allocation3_spill] sm:$0xff] %v9386_v34  ;;  %6087 = vmatprep.subr.bf16.mxu0 %v9386_v34  ;;  %v9397_v24 = vpack.c.bf16 %v3141_v52, %v3140_v32  ;;  %v3143_v31 = vadd.f32 %v5697_v30, %v3104_v48  ;;  %v9399_v33 = vpack.c.bf16 %v3127_v54, %v3126_v7  ;;  %v7372_v7 = vld [vmem:[%s11075_s2 + $0x84] ss:$8 sps:$4 sm:$0xff]   ;;  %v7373_v54 = vld [vmem:[%s11075_s2 + $0x80] ss:$8 sps:$4 sm:$0xff]  }
 0x5c5   :  { %11187 = vst [vmem:[#allocation4_spill] sm:$0xff] %v9390_v47  ;;  %11188 = vst [vmem:[#allocation5_spill] sm:$0xff] %v9392_v61  ;;  %v3144_v60 = vadd.f32 %v5697_v30, %v3105_v20  ;;  %6088 = vmatpush3.bf16.msra.mxu0 %v9382_v38  ;;  %v3145_v26 = vadd.f32 %v5697_v30, %v3106_v40  ;;  %v9402_v44 = vpack.c.bf16 %v3129_v11, %v3128_v17  ;;  %v7359_v20 = vld [vmem:[%s11075_s2 + $0x10] ss:$8 sps:$4 sm:$0xff]   ;;  %v7360_v40 = vld [vmem:[%s11075_s2 + $0x24] ss:$8 sps:$4 sm:$0xff]  }
 0x5c6   :  { %11189 = vst [vmem:[#allocation6_spill] sm:$0xff] %v9397_v24  ;;  %v3146_v8 = vadd.f32 %v5697_v30, %v3107_v22  ;;  %v3147_v56 = vadd.f32 %v5697_v30, %v9377_v18  ;;  %6089 = vmatprep.subr.bf16.mxu0 %v9390_v47  ;;  %v9406_v39 = vpack.c.bf16 %v3143_v31, %v3142_v41  ;;  %v7357_v18 = vld [vmem:[%s11075_s2] ss:$8 sps:$4 sm:$0xff]   ;;  %v7374_v17 = vld [vmem:[%s11075_s2 + $0x94] ss:$8 sps:$4 sm:$0xff]  }
 0x5c7   :  { %v9408_v36 = vpack.c.bf16 %v3131_v1, %v3130_v27  ;;  %v3148_v21 = vadd.f32 %v5697_v30, %v3109_v63  ;;  %v3149_v12 = vadd.f32 %v5697_v30, %v3110_v29  ;;  %v9410_v28 = vpack.c.bf16 %v3145_v26, %v3144_v60  ;;  %v7358_v30 = vld [vmem:[%s11075_s2 + $0x14] ss:$8 sps:$4 sm:$0xff]   ;;  %v7361_v22 = vld [vmem:[%s11075_s2 + $0x20] ss:$8 sps:$4 sm:$0xff]   ;;  %v7363_v29 = vld [vmem:[%s11075_s2 + $0x30] ss:$8 sps:$4 sm:$0xff]  }
 0x5c8   :  { %11190 = vst [vmem:[#allocation7_spill] sm:$0xff] %v9406_v39  ;;  %v9412_v35 = vpack.c.bf16 %v3147_v56, %v3146_v8  ;;  %v9414_v14 = vpack.c.bf16 %v3133_v58, %v3132_v4  ;;  %v7362_v63 = vld [vmem:[%s11075_s2 + $0x34] ss:$8 sps:$4 sm:$0xff]   ;;  %v7375_v11 = vld [vmem:[%s11075_s2 + $0x90] ss:$8 sps:$4 sm:$0xff]  }
 0x5c9   :  { %11191 = vst [vmem:[#allocation66_spill] sm:$0xff] %v9408_v36  ;;  %11192 = vst [vmem:[#allocation67_spill] sm:$0xff] %v9410_v28  ;;  %v9416_v48 = vpack.c.bf16 %v3149_v12, %v3148_v21  ;;  %6090 = vmatpush3.bf16.msra.mxu0 %v9384_v46  ;;  %v7376_v27 = vld [vmem:[%s11075_s2 + $0xa4] ss:$8 sps:$4 sm:$0xff]   ;;  %v7377_v1 = vld [vmem:[%s11075_s2 + $0xa0] ss:$8 sps:$4 sm:$0xff]  }
 0x5ca   :  { %11193 = vst [vmem:[#allocation68_spill] sm:$0xff] %v9412_v35  ;;  %11194 = vst [vmem:[#allocation69_spill] sm:$0xff] %v9414_v14  ;;  %6091 = vmatprep.subr.bf16.mxu0 %v9392_v61  ;;  %v7378_v4 = vld [vmem:[%s11075_s2 + $0xb4] ss:$8 sps:$4 sm:$0xff]   ;;  %v7379_v58 = vld [vmem:[%s11075_s2 + $0xb0] ss:$8 sps:$4 sm:$0xff]  }
 0x5cb   :  { %11195 = vst [vmem:[#allocation70_spill] sm:$0xff] %v9416_v48  ;;  %v7381_v3 = vld [vmem:[%s11075_s2 + $0xc0] ss:$8 sps:$4 sm:$0xff]   ;;  %v7382_v45 = vld [vmem:[%s11075_s2 + $0xd4] ss:$8 sps:$4 sm:$0xff]  }
 0x5cc   :  { %v7383_v62 = vld [vmem:[%s11075_s2 + $0xd0] ss:$8 sps:$4 sm:$0xff]   ;;  %v7384_v9 = vld [vmem:[%s11075_s2 + $0xe4] ss:$8 sps:$4 sm:$0xff]   ;;  %v7385_v13 = vld [vmem:[%s11075_s2 + $0xe0] ss:$8 sps:$4 sm:$0xff]  }
 0x5cd   :  { %6092 = vmatpush3.bf16.msra.mxu0 %v9388_v0  ;;  %v7386_v32 = vld [vmem:[%s11075_s2 + $0xf4] ss:$8 sps:$4 sm:$0xff]   ;;  %v7387_v52 = vld [vmem:[%s11075_s2 + $0xf0] ss:$8 sps:$4 sm:$0xff]   ;;  %v7388_v41 = vld [vmem:[%s11076_s3 + $0x4] ss:$8 sps:$4 sm:$0xff]  }
 0x5ce   :  { %6093 = vmatprep.subr.bf16.mxu0 %v9397_v24  ;;  %v7389_v31 = vld [vmem:[%s11076_s3] ss:$8 sps:$4 sm:$0xff]   ;;  %v7390_v60 = vld [vmem:[%s11076_s3 + $0x14] ss:$8 sps:$4 sm:$0xff]   ;;  %v7391_v26 = vld [vmem:[%s11076_s3 + $0x10] ss:$8 sps:$4 sm:$0xff]  }
 0x5cf   :  { %v7392_v8 = vld [vmem:[%s11076_s3 + $0x24] ss:$8 sps:$4 sm:$0xff]   ;;  %v7393_v56 = vld [vmem:[%s11076_s3 + $0x20] ss:$8 sps:$4 sm:$0xff]   ;;  %v7394_v21 = vld [vmem:[%s11076_s3 + $0x34] ss:$8 sps:$4 sm:$0xff]  }
 0x5d0   :  { %v7395_v12 = vld [vmem:[%s11076_s3 + $0x30] ss:$8 sps:$4 sm:$0xff]  }
 0x5d1   :  { %6094 = vmatpush3.bf16.msra.mxu0 %v9394_v42 }
 0x5d2   :  { %6095 = vmatprep.subr.bf16.mxu0 %v9406_v39 }
 0x5d5   :  { %6096 = vmatpush3.bf16.msra.mxu0 %v9399_v33 }
 0x5d6   :  { %6097 = vmatprep.subr.bf16.mxu0 %v9410_v28 }
 0x5d9   :  { %6098 = vmatpush3.bf16.msra.mxu0 %v9402_v44 }
 0x5da   :  { %6099 = vmatprep.subr.bf16.mxu0 %v9412_v35 }
 0x5dd   :  { %6100 = vmatpush3.bf16.msra.mxu0 %v9408_v36 }
 0x5de   :  { %6101 = vmatprep.subr.bf16.mxu0 %v9416_v48 }
 0x5e1   :  { %6102 = vmatpush3.bf16.msra.mxu0 %v9414_v14 }
 0x5e2   :  { %6199 = vmatprep.subr.bf16.mxu0 %v9386_v34 }
 0x5e4   :  { %3248 = vmatmul.mubr.bf16.vlgmr.msra.gmra.mrb[96].mxu0 %v7357_v18  ;;  %v7396_v18 = vld [vmem:[%s11076_s3 + $0x44] ss:$8 sps:$4 sm:$0xff]  }
 0x5e5   :  { %6200 = vmatpush3.bf16.msra.mxu0 %v9382_v38  ;;  %3255 = vmatprep.mubr.bf16.mxu0 %v7358_v30  ;;  %v7397_v30 = vld [vmem:[%s11076_s3 + $0x40] ss:$8 sps:$4 sm:$0xff]  }
 0x5e6   :  { %6201 = vmatprep.subr.bf16.mxu0 %v9390_v47  ;;  %v11227_v47 = vld [vmem:[#allocation9_spill] sm:$0xff] }
 0x5e9   :  { %6202 = vmatpush3.bf16.msra.mxu0 %v9384_v46 }
 0x5ea   :  { %6203 = vmatprep.subr.bf16.mxu0 %v9392_v61 }
 0x5ec   :  { %3256 = vmatmul.mubr.bf16.gmra.mrb[100].mxu0 %v7359_v20  ;;  %v7398_v20 = vld [vmem:[%s11076_s3 + $0x54] ss:$8 sps:$4 sm:$0xff]  }
 0x5ed   :  { %6204 = vmatpush3.bf16.msra.mxu0 %v9388_v0  ;;  %3263 = vmatprep.mubr.bf16.mxu0 %v7360_v40  ;;  %v7399_v40 = vld [vmem:[%s11076_s3 + $0x50] ss:$8 sps:$4 sm:$0xff]  }
 0x5ee   :  { %6205 = vmatprep.subr.bf16.mxu0 %v9397_v24 }
 0x5f1   :  { %6206 = vmatpush3.bf16.msra.mxu0 %v9394_v42 }
 0x5f2   :  { %6207 = vmatprep.subr.bf16.mxu0 %v9406_v39  ;;  %v11225_v39 = vld [vmem:[#allocation16_spill] sm:$0xff] }
 0x5f4   :  { %3264 = vmatmul.mubr.bf16.gmra.mrb[104].mxu0 %v7361_v22  ;;  %v7400_v22 = vld [vmem:[%s11076_s3 + $0x64] ss:$8 sps:$4 sm:$0xff]  }
 0x5f5   :  { %6208 = vmatpush3.bf16.msra.mxu0 %v9399_v33  ;;  %3271 = vmatprep.mubr.bf16.mxu0 %v7362_v63  ;;  %v7401_v63 = vld [vmem:[%s11076_s3 + $0x60] ss:$8 sps:$4 sm:$0xff]  }
 0x5f6   :  { %6209 = vmatprep.subr.bf16.mxu0 %v9410_v28 }
 0x5f9   :  { %6210 = vmatpush3.bf16.msra.mxu0 %v9402_v44 }
 0x5fa   :  { %6211 = vmatprep.subr.bf16.mxu0 %v9412_v35 }
 0x5fc   :  { %3272 = vmatmul.mubr.bf16.gmra.mrb[108].mxu0 %v7363_v29  ;;  %v7402_v29 = vld [vmem:[%s11076_s3 + $0x74] ss:$8 sps:$4 sm:$0xff]  }
 0x5fd   :  { %6212 = vmatpush3.bf16.msra.mxu0 %v9408_v36  ;;  %3279 = vmatprep.mubr.bf16.mxu0 %v7364_v6  ;;  %v7403_v6 = vld [vmem:[%s11076_s3 + $0x70] ss:$8 sps:$4 sm:$0xff]  }
 0x5fe   :  { %6213 = vmatprep.subr.bf16.mxu0 %v9416_v48 }
 0x601   :  { %6214 = vmatpush3.bf16.msra.mxu0 %v9414_v14 }
 0x604   :  { %3280 = vmatmul.mubr.bf16.gmra.mrb[112].mxu0 %v7365_v16  ;;  %v7404_v16 = vld [vmem:[%s11076_s3 + $0x84] ss:$8 sps:$4 sm:$0xff]  }
 0x605   :  { %3287 = vmatprep.mubr.bf16.mxu0 %v7366_v57  ;;  %v7405_v57 = vld [vmem:[%s11076_s3 + $0x80] ss:$8 sps:$4 sm:$0xff]  }
 0x60c   :  { %3288 = vmatmul.mubr.bf16.gmra.mrb[116].mxu0 %v7367_v50  ;;  %v7406_v50 = vld [vmem:[%s11076_s3 + $0x94] ss:$8 sps:$4 sm:$0xff]  }
 0x60d   :  { %3295 = vmatprep.mubr.bf16.mxu0 %v7368_v2  ;;  %v7407_v2 = vld [vmem:[%s11076_s3 + $0x90] ss:$8 sps:$4 sm:$0xff]  }
 0x614   :  { %3296 = vmatmul.mubr.bf16.gmra.mrb[120].mxu0 %v7369_v55  ;;  %v7066_v55 = vld [vmem:[%s10911_s17] sm:$0xff]  }
 0x615   :  { %3303 = vmatprep.mubr.bf16.mxu0 %v7370_v59  ;;  %v7408_v59 = vld [vmem:[%s11076_s3 + $0xa4] ss:$8 sps:$4 sm:$0xff]   ;;  %6599 = vmatprep.subr.bf16.mxu1 %v7066_v55 }
 0x616   :  { %6600 = vmatpush3.bf16.msra.mxu1 %v7066_v55 }
 0x61c   :  { %3304 = vmatmul.mubr.bf16.gmra.mrb[124].mxu0 %v7371_v5  ;;  %v7067_v5 = vld [vmem:[%s10911_s17 + $0x8] sm:$0xff]  }
 0x61d   :  { %3311 = vmatprep.mubr.bf16.mxu0 %v7372_v7  ;;  %6601 = vmatprep.subr.bf16.mxu1 %v7067_v5  ;;  %v7068_v7 = vld [vmem:[%s10911_s17 + $0x10] sm:$0xff]  }
 0x61e   :  { %6602 = vmatpush3.bf16.msra.mxu1 %v7067_v5 }
 0x61f   :  { %6603 = vmatprep.subr.bf16.mxu1 %v7068_v7 }
 0x622   :  { %6604 = vmatpush3.bf16.msra.mxu1 %v7068_v7 }
 0x624   :  { %3312 = vmatmul.mubr.bf16.gmra.mrb[128].mxu0 %v7373_v54  ;;  %v7409_v54 = vld [vmem:[%s11076_s3 + $0xa0] ss:$8 sps:$4 sm:$0xff]  }
 0x625   :  { %3319 = vmatprep.mubr.bf16.mxu0 %v7374_v17  ;;  %v7410_v17 = vld [vmem:[%s11076_s3 + $0xb4] ss:$8 sps:$4 sm:$0xff]  }
 0x62c   :  { %3320 = vmatmul.mubr.bf16.gmra.mrb[132].mxu0 %v7375_v11  ;;  %v7069_v11 = vld [vmem:[%s10911_s17 + $0x18] sm:$0xff]  }
 0x62d   :  { %3327 = vmatprep.mubr.bf16.mxu0 %v7376_v27  ;;  %6605 = vmatprep.subr.bf16.mxu1 %v7069_v11 }
 0x62e   :  { %6606 = vmatpush3.bf16.msra.mxu1 %v7069_v11 }
 0x634   :  { %3328 = vmatmul.mubr.bf16.gmra.mrb[136].mxu0 %v7377_v1 }
 0x635   :  { %3335 = vmatprep.mubr.bf16.mxu0 %v7378_v4 }
 0x63c   :  { %3336 = vmatmul.mubr.bf16.gmra.mrb[140].mxu0 %v7379_v58 }
 0x63d   :  { %3343 = vmatprep.mubr.bf16.mxu0 %v7380_v10 }
 0x644   :  { %3344 = vmatmul.mubr.bf16.gmra.mrb[144].mxu0 %v7381_v3 }
 0x645   :  { %3351 = vmatprep.mubr.bf16.mxu0 %v7382_v45  ;;  %v7070_v45 = vld [vmem:[%s10911_s17 + $0x20] sm:$0xff]  }
 0x646   :  { %6607 = vmatprep.subr.bf16.mxu1 %v7070_v45 }
 0x647   :  { %6608 = vmatpush3.bf16.msra.mxu1 %v7070_v45 }
 0x64c   :  { %3352 = vmatmul.mubr.bf16.gmra.mrb[148].mxu0 %v7383_v62  ;;  %v7411_v62 = vld [vmem:[%s11076_s3 + $0xb0] ss:$8 sps:$4 sm:$0xff]  }
 0x64d   :  { %3359 = vmatprep.mubr.bf16.mxu0 %v7384_v9  ;;  %v11196_v9 = vld [vmem:[#allocation37_spill] sm:$0xff] }
 0x654   :  { %3360 = vmatmul.mubr.bf16.gmra.mrb[152].mxu0 %v7385_v13 }
 0x655   :  { %3367 = vmatprep.mubr.bf16.mxu0 %v7386_v32  ;;  %v11197_v32 = vld [vmem:[#allocation38_spill] sm:$0xff] }
 0x65c   :  { %3368 = vmatmul.mubr.bf16.gmra.mrb[156].mxu0 %v7387_v52 }
 0x65d   :  { %3456 = vmatprep.mubr.bf16.mxu0 %v7388_v41  ;;  %v7412_v41 = vld [vmem:[%s11076_s3 + $0xc4] ss:$8 sps:$4 sm:$0xff]  }
 0x664   :  { %3457 = vmatmul.mubr.bf16.vlgmr.msra.gmra.mrb[160].mxu0 %v7389_v31  ;;  %v7071_v31 = vld [vmem:[%s10911_s17 + $0x28] sm:$0xff]  }
 0x665   :  { %3464 = vmatprep.mubr.bf16.mxu0 %v7390_v60  ;;  %6609 = vmatprep.subr.bf16.mxu1 %v7071_v31 }
 0x666   :  { %6610 = vmatpush3.bf16.msra.mxu1 %v7071_v31  ;;  %v11202_v31 = vld [vmem:[#allocation43_spill] sm:$0xff] }
 0x66c   :  { %3465 = vmatmul.mubr.bf16.gmra.mrb[164].mxu0 %v7391_v26 }
 0x66d   :  { %3472 = vmatprep.mubr.bf16.mxu0 %v7392_v8 }
 0x674   :  { %3473 = vmatmul.mubr.bf16.gmra.mrb[168].mxu0 %v7393_v56 }
 0x675   :  { %3480 = vmatprep.mubr.bf16.mxu0 %v7394_v21 }
 0x67c   :  { %3481 = vmatmul.mubr.bf16.gmra.mrb[172].mxu0 %v7395_v12 }
 0x67d   :  { %3488 = vmatprep.mubr.bf16.mxu0 %v7396_v18 }
 0x684   :  { %3489 = vmatmul.mubr.bf16.gmra.mrb[176].mxu0 %v7397_v30  ;;  %v7072_v30 = vld [vmem:[%s10911_s17 + $0x30] sm:$0xff]  }
 0x685   :  { %3496 = vmatprep.mubr.bf16.mxu0 %v7398_v20  ;;  %v7413_v20 = vld [vmem:[%s11076_s3 + $0xc0] ss:$8 sps:$4 sm:$0xff]   ;;  %6611 = vmatprep.subr.bf16.mxu1 %v7072_v30 }
 0x686   :  { %6612 = vmatpush3.bf16.msra.mxu1 %v7072_v30 }
 0x68c   :  { %3497 = vmatmul.mubr.bf16.gmra.mrb[180].mxu0 %v7399_v40  ;;  %v11198_v40 = vld [vmem:[#allocation39_spill] sm:$0xff] }
 0x68d   :  { %3504 = vmatprep.mubr.bf16.mxu0 %v7400_v22 }
 0x694   :  { %3505 = vmatmul.mubr.bf16.gmra.mrb[184].mxu0 %v7401_v63  ;;  %v11199_v63 = vld [vmem:[#allocation40_spill] sm:$0xff] }
 0x695   :  { %3512 = vmatprep.mubr.bf16.mxu0 %v7402_v29 }
 0x69c   :  { %3513 = vmatmul.mubr.bf16.gmra.mrb[188].mxu0 %v7403_v6  ;;  %v7414_v6 = vld [vmem:[%s11076_s3 + $0xd4] ss:$8 sps:$4 sm:$0xff]  }
 0x69d   :  { %3520 = vmatprep.mubr.bf16.mxu0 %v7404_v16  ;;  %v11220_v16 = vld [vmem:[#allocation61_spill] sm:$0xff] }
 0x6a4   :  { %3521 = vmatmul.mubr.bf16.gmra.mrb[192].mxu0 %v7405_v57 }
 0x6a5   :  { %3528 = vmatprep.mubr.bf16.mxu0 %v7406_v50  ;;  %v7073_v50 = vld [vmem:[%s10911_s17 + $0x38] sm:$0xff]  }
 0x6a6   :  { %6613 = vmatprep.subr.bf16.mxu1 %v7073_v50 }
 0x6a7   :  { %6614 = vmatpush3.bf16.msra.mxu1 %v7073_v50  ;;  %v11204_v50 = vld [vmem:[#allocation45_spill] sm:$0xff] }
 0x6ac   :  { %3529 = vmatmul.mubr.bf16.gmra.mrb[196].mxu0 %v7407_v2 }
 0x6ad   :  { %3536 = vmatprep.mubr.bf16.mxu0 %v7408_v59 }
 0x6b4   :  { %3537 = vmatmul.mubr.bf16.gmra.mrb[200].mxu0 %v7409_v54  ;;  %v7415_v54 = vld [vmem:[%s11076_s3 + $0xd0] ss:$8 sps:$4 sm:$0xff]  }
 0x6b5   :  { %3544 = vmatprep.mubr.bf16.mxu0 %v7410_v17  ;;  %v11200_v17 = vld [vmem:[#allocation41_spill] sm:$0xff] }
 0x6b7   :  { %v6103_v27 = vpop.f32.mrb[96].mxu0 }
 0x6b8   :  { %v6104_v1 = vpop.f32.mrb[97].mxu0 }
 0x6b9   :  { %v6105_v4 = vadd.f32 %v6104_v1, %v6103_v27  ;;  %v6106_v58 = vpop.f32.mrb[98].mxu0  ;;  %v11201_v27 = vld [vmem:[#allocation42_spill] sm:$0xff] }
 0x6ba   :  { %v6107_v10 = vpop.f32.mrb[99].mxu0 }
 0x6bb   :  { %v6108_v3 = vadd.f32 %v6107_v10, %v6106_v58  ;;  %v9628_v13 = vmul.f32 %v6105_v4, %v11196_v9  ;;  %v7416_v4 = vld [vmem:[%s11076_s3 + $0xe4] ss:$8 sps:$4 sm:$0xff]  }
 0x6bc   :  { %3545 = vmatmul.mubr.bf16.gmra.mrb[204].mxu0 %v7411_v62 }
 0x6bd   :  { %v9631_v52 = vmul.f32 %v6108_v3, %v11197_v32  ;;  %3552 = vmatprep.mubr.bf16.mxu0 %v7412_v41  ;;  %v7417_v41 = vld [vmem:[%s11076_s3 + $0xe0] ss:$8 sps:$4 sm:$0xff]  }
 0x6bf   :  { %v6109_v60 = vpop.f32.mrb[100].mxu0 }
 0x6c0   :  { %v6110_v8 = vpop.f32.mrb[101].mxu0 }
 0x6c1   :  { %v6111_v56 = vadd.f32 %v6110_v8, %v6109_v60  ;;  %v6112_v21 = vpop.f32.mrb[102].mxu0  ;;  %v11203_v8 = vld [vmem:[#allocation44_spill] sm:$0xff] }
 0x6c2   :  { %v6113_v12 = vpop.f32.mrb[103].mxu0 }
 0x6c3   :  { %v6114_v18 = vadd.f32 %v6113_v12, %v6112_v21  ;;  %v9648_v22 = vmul.f32 %v6111_v56, %v11198_v40  ;;  %v7418_v21 = vld [vmem:[%s11076_s3 + $0xf4] ss:$8 sps:$4 sm:$0xff]  }
 0x6c4   :  { %3553 = vmatmul.mubr.bf16.gmra.mrb[208].mxu0 %v7413_v20 }
 0x6c5   :  { %v9651_v29 = vmul.f32 %v6114_v18, %v11199_v63  ;;  %3560 = vmatprep.mubr.bf16.mxu0 %v7414_v6  ;;  %v11218_v18 = vld [vmem:[#allocation59_spill] sm:$0xff] }
 0x6c7   :  { %v6115_v57 = vpop.f32.mrb[104].mxu0 }
 0x6c8   :  { %v6116_v2 = vpop.f32.mrb[105].mxu0 }
 0x6c9   :  { %v6117_v55 = vadd.f32 %v6116_v2, %v6115_v57  ;;  %v6118_v59 = vpop.f32.mrb[106].mxu0  ;;  %v7419_v57 = vld [vmem:[%s11076_s3 + $0xf0] ss:$8 sps:$4 sm:$0xff]  }
 0x6ca   :  { %v6119_v5 = vpop.f32.mrb[107].mxu0 }
 0x6cb   :  { %v6120_v7 = vadd.f32 %v6119_v5, %v6118_v59  ;;  %v9665_v11 = vmul.f32 %v6117_v55, %v11200_v17  ;;  %v11205_v55 = vld [vmem:[#allocation46_spill] sm:$0xff] }
 0x6cc   :  { %3561 = vmatmul.mubr.bf16.gmra.mrb[212].mxu0 %v7415_v54 }
 0x6cd   :  { %v9668_v1 = vmul.f32 %v6120_v7, %v11201_v27  ;;  %3568 = vmatprep.mubr.bf16.mxu0 %v7416_v4 }
 0x6cf   :  { %v6121_v58 = vpop.f32.mrb[108].mxu0 }
 0x6d0   :  { %v6122_v3 = vpop.f32.mrb[109].mxu0 }
 0x6d1   :  { %v6123_v45 = vadd.f32 %v6122_v3, %v6121_v58  ;;  %v6124_v62 = vpop.f32.mrb[110].mxu0  ;;  %v11206_v3 = vld [vmem:[#allocation47_spill] sm:$0xff] }
 0x6d2   :  { %v6125_v9 = vpop.f32.mrb[111].mxu0 }
 0x6d3   :  { %v6126_v32 = vadd.f32 %v6125_v9, %v6124_v62  ;;  %v9679_v60 = vmul.f32 %v6123_v45, %v11202_v31  ;;  %v11207_v62 = vld [vmem:[#allocation48_spill] sm:$0xff] }
 0x6d4   :  { %3569 = vmatmul.mubr.bf16.gmra.mrb[216].mxu0 %v7417_v41  ;;  %v11216_v41 = vld [vmem:[#allocation57_spill] sm:$0xff] }
 0x6d5   :  { %v9682_v56 = vmul.f32 %v6126_v32, %v11203_v8  ;;  %3576 = vmatprep.mubr.bf16.mxu0 %v7418_v21 }
 0x6d7   :  { %v6127_v12 = vpop.f32.mrb[112].mxu0 }
 0x6d8   :  { %v6128_v30 = vpop.f32.mrb[113].mxu0 }
 0x6d9   :  { %v6129_v20 = vadd.f32 %v6128_v30, %v6127_v12  ;;  %v6130_v40 = vpop.f32.mrb[114].mxu0 }
 0x6da   :  { %v6131_v63 = vpop.f32.mrb[115].mxu0 }
 0x6db   :  { %v6132_v6 = vadd.f32 %v6131_v63, %v6130_v40  ;;  %v9693_v2 = vmul.f32 %v6129_v20, %v11204_v50  ;;  %v11208_v20 = vld [vmem:[#allocation49_spill] sm:$0xff]  ;;  %v11209_v63 = vld [vmem:[#allocation50_spill] sm:$0xff] }
 0x6dc   :  { %3577 = vmatmul.mubr.bf16.gmra.mrb[220].mxu0 %v7419_v57 }
 0x6dd   :  { %v9696_v59 = vmul.f32 %v6132_v6, %v11205_v55 }
 0x6df   :  { %v6133_v5 = vpop.f32.mrb[116].mxu0 }
 0x6e0   :  { %v6134_v54 = vpop.f32.mrb[117].mxu0 }
 0x6e1   :  { %v6135_v17 = vadd.f32 %v6134_v54, %v6133_v5  ;;  %v6136_v27 = vpop.f32.mrb[118].mxu0 }
 0x6e2   :  { %v6137_v4 = vpop.f32.mrb[119].mxu0 }
 0x6e3   :  { %v6138_v58 = vadd.f32 %v6137_v4, %v6136_v27  ;;  %v9701_v45 = vmul.f32 %v6135_v17, %v11206_v3  ;;  %v11210_v4 = vld [vmem:[#allocation51_spill] sm:$0xff]  ;;  %v11211_v3 = vld [vmem:[#allocation52_spill] sm:$0xff] }
 0x6e5   :  { %v9704_v9 = vmul.f32 %v6138_v58, %v11207_v62 }
 0x6e7   :  { %v6139_v32 = vpop.f32.mrb[120].mxu0 }
 0x6e8   :  { %v6140_v31 = vpop.f32.mrb[121].mxu0 }
 0x6e9   :  { %v6141_v8 = vadd.f32 %v6140_v31, %v6139_v32  ;;  %v6142_v21 = vpop.f32.mrb[122].mxu0  ;;  %v11214_v31 = vld [vmem:[#allocation55_spill] sm:$0xff] }
 0x6ea   :  { %v6143_v12 = vpop.f32.mrb[123].mxu0 }
 0x6eb   :  { %v6144_v30 = vadd.f32 %v6143_v12, %v6142_v21  ;;  %v9709_v40 = vmul.f32 %v6141_v8, %v11208_v20 }
 0x6ed   :  { %v9712_v6 = vmul.f32 %v6144_v30, %v11209_v63  ;;  %v11212_v63 = vld [vmem:[#allocation53_spill] sm:$0xff] }
 0x6ef   :  { %v6145_v57 = vpop.f32.mrb[124].mxu0 }
 0x6f0   :  { %v6146_v55 = vpop.f32.mrb[125].mxu0 }
 0x6f1   :  { %v6147_v5 = vadd.f32 %v6146_v55, %v6145_v57  ;;  %v6148_v54 = vpop.f32.mrb[126].mxu0  ;;  %v11213_v55 = vld [vmem:[#allocation54_spill] sm:$0xff] }
 0x6f2   :  { %v6149_v17 = vpop.f32.mrb[127].mxu0 }
 0x6f3   :  { %v6150_v27 = vadd.f32 %v6149_v17, %v6148_v54  ;;  %v9717_v58 = vmul.f32 %v6147_v5, %v11210_v4 }
 0x6f5   :  { %v9720_v62 = vmul.f32 %v6150_v27, %v11211_v3 }
 0x6f7   :  { %v6151_v32 = vpop.f32.mrb[128].mxu0 }
 0x6f8   :  { %v6152_v8 = vpop.f32.mrb[129].mxu0 }
 0x6f9   :  { %v6153_v21 = vadd.f32 %v6152_v8, %v6151_v32  ;;  %v6154_v12 = vpop.f32.mrb[130].mxu0  ;;  %v11215_v8 = vld [vmem:[#allocation56_spill] sm:$0xff] }
 0x6fa   :  { %v6155_v30 = vpop.f32.mrb[131].mxu0 }
 0x6fb   :  { %v6156_v20 = vadd.f32 %v6155_v30, %v6154_v12  ;;  %v9725_v57 = vmul.f32 %v6153_v21, %v11212_v63 }
 0x6fd   :  { %v9728_v54 = vmul.f32 %v6156_v20, %v11213_v55 }
 0x6ff   :  { %v6157_v5 = vpop.f32.mrb[132].mxu0 }
 0x700   :  { %v6158_v27 = vpop.f32.mrb[133].mxu0 }
 0x701   :  { %v6159_v4 = vadd.f32 %v6158_v27, %v6157_v5  ;;  %v6160_v3 = vpop.f32.mrb[134].mxu0  ;;  %v11217_v27 = vld [vmem:[#allocation58_spill] sm:$0xff] }
 0x702   :  { %v6161_v53 = vpop.f32.mrb[135].mxu0 }
 0x703   :  { %v6162_v37 = vadd.f32 %v6161_v53, %v6160_v3  ;;  %v9733_v32 = vmul.f32 %v6159_v4, %v11214_v31 }
 0x705   :  { %v9736_v12 = vmul.f32 %v6162_v37, %v11215_v8 }
 0x707   :  { %v6163_v21 = vpop.f32.mrb[136].mxu0 }
 0x708   :  { %v6164_v20 = vpop.f32.mrb[137].mxu0 }
 0x709   :  { %v6165_v63 = vadd.f32 %v6164_v20, %v6163_v21  ;;  %v6166_v55 = vpop.f32.mrb[138].mxu0  ;;  %v11219_v20 = vld [vmem:[#allocation60_spill] sm:$0xff] }
 0x70a   :  { %v6167_v50 = vpop.f32.mrb[139].mxu0 }
 0x70b   :  { %v6168_v17 = vadd.f32 %v6167_v50, %v6166_v55  ;;  %v9741_v5 = vmul.f32 %v6165_v63, %v11216_v41 }
 0x70d   :  { %v9744_v53 = vmul.f32 %v6168_v17, %v11217_v27 }
 0x70f   :  { %v6169_v31 = vpop.f32.mrb[140].mxu0 }
 0x710   :  { %v6170_v4 = vpop.f32.mrb[141].mxu0 }
 0x711   :  { %v6171_v3 = vadd.f32 %v6170_v4, %v6169_v31  ;;  %v6172_v8 = vpop.f32.mrb[142].mxu0  ;;  %v11221_v4 = vld [vmem:[#allocation62_spill] sm:$0xff] }
 0x712   :  { %v6173_v7 = vpop.f32.mrb[143].mxu0 }
 0x713   :  { %v6174_v30 = vadd.f32 %v6173_v7, %v6172_v8  ;;  %v9749_v21 = vmul.f32 %v6171_v3, %v11218_v18 }
 0x715   :  { %v9752_v50 = vmul.f32 %v6174_v30, %v11219_v20 }
 0x717   :  { %v6175_v41 = vpop.f32.mrb[144].mxu0 }
 0x718   :  { %v6176_v63 = vpop.f32.mrb[145].mxu0 }
 0x719   :  { %v6177_v55 = vadd.f32 %v6176_v63, %v6175_v41  ;;  %v6178_v27 = vpop.f32.mrb[146].mxu0  ;;  %v7074_v41 = vld [vmem:[%s10912_s16] sm:$0xff]  }
 0x71a   :  { %v6179_v10 = vpop.f32.mrb[147].mxu0  ;;  %6647 = vmatprep.subr.bf16.mxu1 %v7074_v41 }
 0x71b   :  { %v6180_v37 = vadd.f32 %v6179_v10, %v6178_v27  ;;  %v9757_v31 = vmul.f32 %v6177_v55, %v11220_v16  ;;  %v11222_v10 = vld [vmem:[#allocation63_spill] sm:$0xff]  ;;  %v11223_v16 = vld [vmem:[#allocation64_spill] sm:$0xff] }
 0x71d   :  { %v9760_v7 = vmul.f32 %v6180_v37, %v11221_v4 }
 0x71f   :  { %v6181_v18 = vpop.f32.mrb[148].mxu0 }
 0x720   :  { %v6182_v3 = vpop.f32.mrb[149].mxu0 }
 0x721   :  { %v6183_v8 = vadd.f32 %v6182_v3, %v6181_v18  ;;  %v6184_v20 = vpop.f32.mrb[150].mxu0 }
 0x722   :  { %v6185_v26 = vpop.f32.mrb[151].mxu0 }
 0x723   :  { %v6186_v17 = vadd.f32 %v6185_v26, %v6184_v20  ;;  %v9768_v63 = vmul.f32 %v6183_v8, %v11222_v10  ;;  %v11224_v20 = vld [vmem:[#allocation65_spill] sm:$0xff] }
 0x725   :  { %v9771_v55 = vmul.f32 %v6186_v17, %v11223_v16 }
 0x727   :  { %v6187_v37 = vpop.f32.mrb[152].mxu0 }
 0x728   :  { %v6188_v4 = vpop.f32.mrb[153].mxu0 }
 0x729   :  { %v6189_v18 = vadd.f32 %v6188_v4, %v6187_v37  ;;  %v6190_v3 = vpop.f32.mrb[154].mxu0 }
 0x72a   :  { %v6191_v30 = vpop.f32.mrb[155].mxu0 }
 0x72b   :  { %v6192_v26 = vadd.f32 %v6191_v30, %v6190_v3  ;;  %v9776_v19 = vmul.f32 %v6189_v18, %v11224_v20 }
 0x72d   :  { %v9779_v48 = vmul.f32 %v6192_v26, %v8907_v51  ;;  %v11228_v51 = vld [vmem:[#allocation10_spill] sm:$0xff] }
 0x72f   :  { %v6193_v8 = vpop.f32.mrb[156].mxu0 }
 0x730   :  { %v6194_v10 = vpop.f32.mrb[157].mxu0 }
 0x731   :  { %v6195_v16 = vadd.f32 %v6194_v10, %v6193_v8  ;;  %v6196_v35 = vpop.f32.mrb[158].mxu0  ;;  %v11226_v10 = vld [vmem:[#allocation8_spill] sm:$0xff] }
 0x732   :  { %v6197_v28 = vpop.f32.mrb[159].mxu0 }
 0x733   :  { %v6198_v27 = vadd.f32 %v6197_v28, %v6196_v35  ;;  %v9784_v37 = vmul.f32 %v6195_v16, %v8916_v49 }
 0x735   :  { %v9787_v30 = vmul.f32 %v6198_v27, %v8918_v25 }
 0x737   :  { %v6215_v4 = vpop.f32.mrb[160].mxu0 }
 0x738   :  { %v6216_v18 = vpop.f32.mrb[161].mxu0 }
 0x739   :  { %v6217_v3 = vadd.f32 %v6216_v18, %v6215_v4  ;;  %v6218_v26 = vpop.f32.mrb[162].mxu0 }
 0x73a   :  { %v6219_v20 = vpop.f32.mrb[163].mxu0 }
 0x73b   :  { %v6220_v17 = vadd.f32 %v6219_v20, %v6218_v26  ;;  %v3585_v8 = vmul.f32 %v6217_v3, %v11225_v39  ;;  %v7075_v39 = vld [vmem:[%s10912_s16 + $0x8] sm:$0xff]  }
 0x73d   :  { %v3586_v24 = vmul.f32 %v6220_v17, %v11226_v10 }
 0x73f   :  { %v6221_v28 = vpop.f32.mrb[164].mxu0  ;;  %v3617_v35 = vpack.c.bf16 %v3586_v24, %v3585_v8 }
 0x740   :  { %v6222_v49 = vpop.f32.mrb[165].mxu0 }
 0x741   :  { %v6223_v16 = vadd.f32 %v6222_v49, %v6221_v28  ;;  %v6224_v61 = vpop.f32.mrb[166].mxu0  ;;  %6615 = vmatprep.mubr.bf16.mxu1 %v3617_v35  ;;  %v7077_v28 = vld [vmem:[%s10912_s16 + $0x18] sm:$0xff]  }
 0x742   :  { %v6225_v25 = vpop.f32.mrb[167].mxu0 }
 0x743   :  { %v6226_v27 = vadd.f32 %v6225_v25, %v6224_v61  ;;  %v3587_v34 = vmul.f32 %v6223_v16, %v11227_v47  ;;  %v7076_v47 = vld [vmem:[%s10912_s16 + $0x10] sm:$0xff]  }
 0x744   :  { %v11229_v61 = vld [vmem:[#allocation11_spill] sm:$0xff] }
 0x745   :  { %v3588_v14 = vmul.f32 %v6226_v27, %v11228_v51  ;;  %v7078_v27 = vld [vmem:[%s10912_s16 + $0x20] sm:$0xff]  }
 0x747   :  { %v3618_v4 = vpack.c.bf16 %v3588_v14, %v3587_v34  ;;  %v6227_v18 = vpop.f32.mrb[168].mxu0  ;;  %v11230_v34 = vld [vmem:[#allocation12_spill] sm:$0xff] }
 0x748   :  { %v6228_v3 = vpop.f32.mrb[169].mxu0 }
 0x749   :  { %v6229_v17 = vadd.f32 %v6228_v3, %v6227_v18  ;;  %v6230_v26 = vpop.f32.mrb[170].mxu0  ;;  %6616 = vmatmul.mubr.bf16.vlgmr.msra.gmra.mrb[96].mxu1 %v3618_v4  ;;  %v11231_v4 = vld [vmem:[#allocation13_spill] sm:$0xff] }
 0x74a   :  { %v6231_v24 = vpop.f32.mrb[171].mxu0  ;;  %6648 = vmatpush3.bf16.msra.mxu1 %v7074_v41 }
 0x74b   :  { %v6232_v20 = vadd.f32 %v6231_v24, %v6230_v26  ;;  %6649 = vmatprep.subr.bf16.mxu1 %v7075_v39  ;;  %v3589_v51 = vmul.f32 %v6229_v17, %v11229_v61  ;;  %v7079_v24 = vld [vmem:[%s10912_s16 + $0x28] sm:$0xff]  }
 0x74d   :  { %v3590_v14 = vmul.f32 %v6232_v20, %v11230_v34 }
 0x74e   :  { %6650 = vmatpush3.bf16.msra.mxu1 %v7075_v39  ;;  %v11232_v39 = vld [vmem:[#allocation14_spill] sm:$0xff] }
 0x74f   :  { %v6233_v8 = vpop.f32.mrb[172].mxu0  ;;  %v3619_v10 = vpack.c.bf16 %v3590_v14, %v3589_v51  ;;  %6651 = vmatprep.subr.bf16.mxu1 %v7076_v47  ;;  %v7080_v14 = vld [vmem:[%s10912_s16 + $0x30] sm:$0xff]  }
 0x750   :  { %v6234_v35 = vpop.f32.mrb[173].mxu0 }
 0x751   :  { %v6235_v41 = vadd.f32 %v6234_v35, %v6233_v8  ;;  %v6236_v49 = vpop.f32.mrb[174].mxu0  ;;  %6619 = vmatprep.mubr.bf16.mxu1 %v3619_v10  ;;  %v11233_v8 = vld [vmem:[#allocation15_spill] sm:$0xff] }
 0x752   :  { %v6237_v16 = vpop.f32.mrb[175].mxu0  ;;  %6652 = vmatpush3.bf16.msra.mxu1 %v7076_v47 }
 0x753   :  { %v6238_v25 = vadd.f32 %v6237_v16, %v6236_v49  ;;  %6653 = vmatprep.subr.bf16.mxu1 %v7077_v28  ;;  %v3591_v18 = vmul.f32 %v6235_v41, %v11231_v4  ;;  %v7081_v16 = vld [vmem:[%s10912_s16 + $0x38] sm:$0xff]  }
 0x755   :  { %v3592_v3 = vmul.f32 %v6238_v25, %v11232_v39 }
 0x756   :  { %6654 = vmatpush3.bf16.msra.mxu1 %v7077_v28  ;;  %v11234_v28 = vld [vmem:[#allocation18_spill] sm:$0xff] }
 0x757   :  { %v6239_v17 = vpop.f32.mrb[176].mxu0  ;;  %v3620_v26 = vpack.c.bf16 %v3592_v3, %v3591_v18  ;;  %6655 = vmatprep.subr.bf16.mxu1 %v7078_v27  ;;  %v9825_v3 = vld [vmem:[%s10913_s18] sm:$0xff]  }
 0x758   :  { %v6240_v20 = vpop.f32.mrb[177].mxu0 }
 0x759   :  { %v6241_v47 = vadd.f32 %v6240_v20, %v6239_v17  ;;  %v6242_v61 = vpop.f32.mrb[178].mxu0  ;;  %6620 = vmatmul.mubr.bf16.gmra.mrb[100].mxu1 %v3620_v26  ;;  %v11235_v17 = vld [vmem:[#allocation17_spill] sm:$0xff] }
 0x75a   :  { %v6243_v51 = vpop.f32.mrb[179].mxu0  ;;  %6656 = vmatpush3.bf16.msra.mxu1 %v7078_v27 }
 0x75b   :  { %v6244_v34 = vadd.f32 %v6243_v51, %v6242_v61  ;;  %6657 = vmatprep.subr.bf16.mxu1 %v7079_v24  ;;  %v3593_v10 = vmul.f32 %v6241_v47, %v11233_v8 }
 0x75d   :  { %v3594_v35 = vmul.f32 %v6244_v34, %v11234_v28  ;;  %v11237_v28 = vld [vmem:[#allocation19_spill] sm:$0xff] }
 0x75e   :  { %6658 = vmatpush3.bf16.msra.mxu1 %v7079_v24  ;;  %v11236_v24 = vld [vmem:[#allocation20_spill] sm:$0xff] }
 0x75f   :  { %v6245_v41 = vpop.f32.mrb[180].mxu0  ;;  %v3621_v49 = vpack.c.bf16 %v3594_v35, %v3593_v10  ;;  %6659 = vmatprep.subr.bf16.mxu1 %v7080_v14 }
 0x760   :  { %v6246_v25 = vpop.f32.mrb[181].mxu0 }
 0x761   :  { %v6247_v27 = vadd.f32 %v6246_v25, %v6245_v41  ;;  %v6248_v4 = vpop.f32.mrb[182].mxu0  ;;  %6623 = vmatprep.mubr.bf16.mxu1 %v3621_v49  ;;  %v11238_v41 = vld [vmem:[#allocation22_spill] sm:$0xff] }
 0x762   :  { %v6249_v18 = vpop.f32.mrb[183].mxu0  ;;  %6660 = vmatpush3.bf16.msra.mxu1 %v7080_v14 }
 0x763   :  { %v6250_v39 = vadd.f32 %v6249_v18, %v6248_v4  ;;  %6661 = vmatprep.subr.bf16.mxu1 %v7081_v16  ;;  %v3595_v26 = vmul.f32 %v6247_v27, %v11235_v17 }
 0x765   :  { %v3596_v20 = vmul.f32 %v6250_v39, %v11236_v24 }
 0x766   :  { %6662 = vmatpush3.bf16.msra.mxu1 %v7081_v16 }
 0x767   :  { %v6251_v47 = vpop.f32.mrb[184].mxu0  ;;  %v3622_v61 = vpack.c.bf16 %v3596_v20, %v3595_v26  ;;  %6695 = vmatprep.subr.bf16.mxu1 %v9825_v3  ;;  %v11239_v26 = vld [vmem:[#allocation21_spill] sm:$0xff]  ;;  %v11240_v20 = vld [vmem:[#allocation24_spill] sm:$0xff] }
 0x768   :  { %v6252_v51 = vpop.f32.mrb[185].mxu0 }
 0x769   :  { %v6253_v34 = vadd.f32 %v6252_v51, %v6251_v47  ;;  %v6254_v8 = vpop.f32.mrb[186].mxu0  ;;  %6624 = vmatmul.mubr.bf16.gmra.mrb[104].mxu1 %v3622_v61 }
 0x76a   :  { %v6255_v14 = vpop.f32.mrb[187].mxu0 }
 0x76b   :  { %v6256_v10 = vadd.f32 %v6255_v14, %v6254_v8  ;;  %v3597_v35 = vmul.f32 %v6253_v34, %v11237_v28  ;;  %v11241_v28 = vld [vmem:[#allocation23_spill] sm:$0xff] }
 0x76d   :  { %v3598_v49 = vmul.f32 %v6256_v10, %v11238_v41  ;;  %v11242_v41 = vld [vmem:[#allocation26_spill] sm:$0xff] }
 0x76f   :  { %v6257_v25 = vpop.f32.mrb[188].mxu0  ;;  %v3623_v4 = vpack.c.bf16 %v3598_v49, %v3597_v35 }
 0x770   :  { %v6258_v27 = vpop.f32.mrb[189].mxu0 }
 0x771   :  { %v6259_v18 = vadd.f32 %v6258_v27, %v6257_v25  ;;  %v6260_v39 = vpop.f32.mrb[190].mxu0  ;;  %6627 = vmatprep.mubr.bf16.mxu1 %v3623_v4 }
 0x772   :  { %v6261_v16 = vpop.f32.mrb[191].mxu0 }
 0x773   :  { %v6262_v17 = vadd.f32 %v6261_v16, %v6260_v39  ;;  %v3599_v24 = vmul.f32 %v6259_v18, %v11239_v26  ;;  %v11243_v26 = vld [vmem:[#allocation25_spill] sm:$0xff] }
 0x775   :  { %v3600_v47 = vmul.f32 %v6262_v17, %v11240_v20  ;;  %v11244_v20 = vld [vmem:[#allocation28_spill] sm:$0xff] }
 0x777   :  { %v6263_v51 = vpop.f32.mrb[192].mxu0  ;;  %v3624_v61 = vpack.c.bf16 %v3600_v47, %v3599_v24 }
 0x778   :  { %v6264_v36 = vpop.f32.mrb[193].mxu0 }
 0x779   :  { %v6265_v8 = vadd.f32 %v6264_v36, %v6263_v51  ;;  %v6266_v14 = vpop.f32.mrb[194].mxu0  ;;  %6628 = vmatmul.mubr.bf16.gmra.mrb[108].mxu1 %v3624_v61 }
 0x77a   :  { %v6267_v34 = vpop.f32.mrb[195].mxu0 }
 0x77b   :  { %v6268_v10 = vadd.f32 %v6267_v34, %v6266_v14  ;;  %v3601_v35 = vmul.f32 %v6265_v8, %v11241_v28  ;;  %v11245_v28 = vld [vmem:[#allocation27_spill] sm:$0xff] }
 0x77d   :  { %v3602_v49 = vmul.f32 %v6268_v10, %v11242_v41  ;;  %v11246_v41 = vld [vmem:[#allocation30_spill] sm:$0xff] }
 0x77f   :  { %v6269_v25 = vpop.f32.mrb[196].mxu0  ;;  %v3625_v4 = vpack.c.bf16 %v3602_v49, %v3601_v35 }
 0x780   :  { %v6270_v27 = vpop.f32.mrb[197].mxu0 }
 0x781   :  { %v6271_v39 = vadd.f32 %v6270_v27, %v6269_v25  ;;  %v6272_v16 = vpop.f32.mrb[198].mxu0  ;;  %6631 = vmatprep.mubr.bf16.mxu1 %v3625_v4 }
 0x782   :  { %v6273_v18 = vpop.f32.mrb[199].mxu0 }
 0x783   :  { %v6274_v17 = vadd.f32 %v6273_v18, %v6272_v16  ;;  %v3603_v24 = vmul.f32 %v6271_v39, %v11243_v26  ;;  %v11247_v26 = vld [vmem:[#allocation29_spill] sm:$0xff] }
 0x785   :  { %v3604_v36 = vmul.f32 %v6274_v17, %v11244_v20  ;;  %v11248_v20 = vld [vmem:[#allocation32_spill] sm:$0xff] }
 0x787   :  { %v6275_v47 = vpop.f32.mrb[200].mxu0  ;;  %v3626_v51 = vpack.c.bf16 %v3604_v36, %v3603_v24 }
 0x788   :  { %v6276_v61 = vpop.f32.mrb[201].mxu0 }
 0x789   :  { %v6277_v14 = vadd.f32 %v6276_v61, %v6275_v47  ;;  %v6278_v34 = vpop.f32.mrb[202].mxu0  ;;  %6632 = vmatmul.mubr.bf16.gmra.mrb[112].mxu1 %v3626_v51 }
 0x78a   :  { %v6279_v8 = vpop.f32.mrb[203].mxu0 }
 0x78b   :  { %v6280_v10 = vadd.f32 %v6279_v8, %v6278_v34  ;;  %v3605_v35 = vmul.f32 %v6277_v14, %v11245_v28  ;;  %v11249_v28 = vld [vmem:[#allocation31_spill] sm:$0xff] }
 0x78d   :  { %v3606_v49 = vmul.f32 %v6280_v10, %v11246_v41  ;;  %v11250_v41 = vld [vmem:[#allocation34_spill] sm:$0xff] }
 0x78f   :  { %v6281_v25 = vpop.f32.mrb[204].mxu0  ;;  %v3627_v4 = vpack.c.bf16 %v3606_v49, %v3605_v35 }
 0x790   :  { %v6282_v27 = vpop.f32.mrb[205].mxu0 }
 0x791   :  { %v6283_v16 = vadd.f32 %v6282_v27, %v6281_v25  ;;  %v6284_v18 = vpop.f32.mrb[206].mxu0  ;;  %6635 = vmatprep.mubr.bf16.mxu1 %v3627_v4 }
 0x792   :  { %v6285_v39 = vpop.f32.mrb[207].mxu0 }
 0x793   :  { %v6286_v17 = vadd.f32 %v6285_v39, %v6284_v18  ;;  %v3607_v24 = vmul.f32 %v6283_v16, %v11247_v26  ;;  %v11251_v26 = vld [vmem:[#allocation33_spill] sm:$0xff] }
 0x795   :  { %v3608_v36 = vmul.f32 %v6286_v17, %v11248_v20  ;;  %v11252_v20 = vld [vmem:[#allocation36_spill] sm:$0xff] }
 0x797   :  { %v6287_v47 = vpop.f32.mrb[208].mxu0  ;;  %v3628_v51 = vpack.c.bf16 %v3608_v36, %v3607_v24 }
 0x798   :  { %v6288_v61 = vpop.f32.mrb[209].mxu0 }
 0x799   :  { %v6289_v34 = vadd.f32 %v6288_v61, %v6287_v47  ;;  %v6290_v8 = vpop.f32.mrb[210].mxu0  ;;  %6636 = vmatmul.mubr.bf16.gmra.mrb[116].mxu1 %v3628_v51 }
 0x79a   :  { %v6291_v14 = vpop.f32.mrb[211].mxu0 }
 0x79b   :  { %v6292_v10 = vadd.f32 %v6291_v14, %v6290_v8  ;;  %v3609_v35 = vmul.f32 %v6289_v34, %v11249_v28  ;;  %v11253_v28 = vld [vmem:[#allocation35_spill] sm:$0xff] }
 0x79d   :  { %v3610_v49 = vmul.f32 %v6292_v10, %v11250_v41 }
 0x79f   :  { %v6293_v25 = vpop.f32.mrb[212].mxu0  ;;  %v3629_v4 = vpack.c.bf16 %v3610_v49, %v3609_v35 }
 0x7a0   :  { %v6294_v27 = vpop.f32.mrb[213].mxu0 }
 0x7a1   :  { %v6295_v18 = vadd.f32 %v6294_v27, %v6293_v25  ;;  %v6296_v39 = vpop.f32.mrb[214].mxu0  ;;  %6639 = vmatprep.mubr.bf16.mxu1 %v3629_v4 }
 0x7a2   :  { %v6297_v16 = vpop.f32.mrb[215].mxu0 }
 0x7a3   :  { %v6298_v17 = vadd.f32 %v6297_v16, %v6296_v39  ;;  %v3611_v24 = vmul.f32 %v6295_v18, %v11251_v26 }
 0x7a5   :  { %v3612_v36 = vmul.f32 %v6298_v17, %v11252_v20  ;;  %v11254_v20 = vpack.c.bf16 %v9631_v52, %v9628_v13  ;;  %v11255_v13 = vpack.c.bf16 %v9651_v29, %v9648_v22  ;;  %v11256_v52 = vpack.c.bf16 %v9668_v1, %v9665_v11  ;;  %v7085_v22 = vld [vmem:[%s10913_s18 + $0x18] sm:$0xff]   ;;  %v7094_v29 = vld [vmem:[%s10914_s20 + $0x20] sm:$0xff]  }
 0x7a6   :  { %v11257_v11 = vpack.c.bf16 %v9682_v56, %v9679_v60  ;;  %v11258_v1 = vpack.c.bf16 %v9696_v59, %v9693_v2  ;;  %v7087_v60 = vld [vmem:[%s10913_s18 + $0x28] sm:$0xff]   ;;  %v11259_v56 = vpack.c.bf16 %v9704_v9, %v9701_v45  ;;  %v11260_v2 = vpack.c.bf16 %v9712_v6, %v9709_v40  ;;  %v7088_v59 = vld [vmem:[%s10913_s18 + $0x30] sm:$0xff]  }
 0x7a7   :  { %v6299_v47 = vpop.f32.mrb[216].mxu0  ;;  %v3630_v51 = vpack.c.bf16 %v3612_v36, %v3611_v24  ;;  %v7091_v36 = vld [vmem:[%s10914_s20 + $0x8] sm:$0xff]   ;;  %v11261_v45 = vpack.c.bf16 %v9720_v62, %v9717_v58  ;;  %v11262_v9 = vpack.c.bf16 %v9728_v54, %v9725_v57  ;;  %v11263_v40 = vpack.c.bf16 %v9736_v12, %v9733_v32  ;;  %v11273_v12 = vld [vmem:[#allocation4_spill] sm:$0xff] }
 0x7a8   :  { %v6300_v61 = vpop.f32.mrb[217].mxu0  ;;  %v11264_v6 = vpack.c.bf16 %v9744_v53, %v9741_v5  ;;  %v11266_v58 = vpack.c.bf16 %v9760_v7, %v9757_v31  ;;  %v11267_v62 = vpack.c.bf16 %v9771_v55, %v9768_v63  ;;  %v11268_v57 = vpack.c.bf16 %v9779_v48, %v9776_v19  ;;  %v11270_v32 = vld [vmem:[#allocation66_spill] sm:$0xff]  ;;  %v11271_v19 = vld [vmem:[#allocation69_spill] sm:$0xff]  ;;  %v11272_v48 = vld [vmem:[#allocation3_spill] sm:$0xff] }
 0x7a9   :  { %v6301_v8 = vadd.f32 %v6300_v61, %v6299_v47  ;;  %v6302_v14 = vpop.f32.mrb[218].mxu0  ;;  %6640 = vmatmul.mubr.bf16.gmra.mrb[120].mxu1 %v3630_v51  ;;  %v7093_v47 = vld [vmem:[%s10914_s20 + $0x18] sm:$0xff]   ;;  %v7084_v51 = vld [vmem:[%s10913_s18 + $0x10] sm:$0xff]   ;;  %v7086_v61 = vld [vmem:[%s10913_s18 + $0x20] sm:$0xff]   ;;  %v11269_v54 = vpack.c.bf16 %v9787_v30, %v9784_v37 }
 0x7aa   :  { %v6303_v34 = vpop.f32.mrb[219].mxu0  ;;  %v11274_v5 = vld [vmem:[#allocation5_spill] sm:$0xff]  ;;  %v7097_v53 = vld [vmem:[%s10914_s20 + $0x38] sm:$0xff]  }
 0x7ab   :  { %v6304_v10 = vadd.f32 %v6303_v34, %v6302_v14  ;;  %v3613_v35 = vmul.f32 %v6301_v8, %v11253_v28  ;;  %v7089_v8 = vld [vmem:[%s10913_s18 + $0x38] sm:$0xff]   ;;  %v11265_v14 = vpack.c.bf16 %v9752_v50, %v9749_v21  ;;  %v9963_v21 = vld [vmem:[%s10915_s19] ss:$0 sm:$0xff] }
 0x7ad   :  { %v3614_v41 = vmul.f32 %v6304_v10, %v8678_v15  ;;  %v7090_v15 = vld [vmem:[%s10914_s20] sm:$0xff]  }
 0x7ae   :  { %6743 = vmatprep.subr.bf16.mxu0 %v7090_v15 }
 0x7af   :  { %v6305_v49 = vpop.f32.mrb[220].mxu0  ;;  %v3631_v25 = vpack.c.bf16 %v3614_v41, %v3613_v35  ;;  %6744 = vmatpush3.bf16.msra.mxu0 %v7090_v15 }
 0x7b0   :  { %v6306_v4 = vpop.f32.mrb[221].mxu0  ;;  %6745 = vmatprep.subr.bf16.mxu0 %v7091_v36 }
 0x7b1   :  { %v6307_v27 = vadd.f32 %v6306_v4, %v6305_v49  ;;  %v6308_v39 = vpop.f32.mrb[222].mxu0  ;;  %6643 = vmatprep.mubr.bf16.mxu1 %v3631_v25 }
 0x7b2   :  { %v6309_v18 = vpop.f32.mrb[223].mxu0 }
 0x7b3   :  { %v6310_v16 = vadd.f32 %v6309_v18, %v6308_v39  ;;  %v3615_v17 = vmul.f32 %v6307_v27, %v8676_v43  ;;  %v7083_v43 = vld [vmem:[%s10913_s18 + $0x8] sm:$0xff]   ;;  %6746 = vmatpush3.bf16.msra.mxu0 %v7091_v36 }
 0x7b5   :  { %v3616_v26 = vmul.f32 %v6310_v16, %v8682_v23  ;;  %v7092_v23 = vld [vmem:[%s10914_s20 + $0x10] sm:$0xff]  }
 0x7b6   :  { %6747 = vmatprep.subr.bf16.mxu0 %v7092_v23 }
 0x7b7   :  { %v3632_v24 = vpack.c.bf16 %v3616_v26, %v3615_v17  ;;  %6748 = vmatpush3.bf16.msra.mxu0 %v7092_v23 }
 0x7b8   :  { %6749 = vmatprep.subr.bf16.mxu0 %v7093_v47 }
 0x7b9   :  { %6644 = vmatmul.mubr.bf16.gmra.mrb[124].mxu1 %v3632_v24 }
 0x7ba   :  { %6663 = vmatprep.mubr.bf16.mxu1 %v11254_v20 }
 0x7bb   :  { %6750 = vmatpush3.bf16.msra.mxu0 %v7093_v47 }
 0x7bc   :  { %6751 = vmatprep.subr.bf16.mxu0 %v7094_v29 }
 0x7bf   :  { %6752 = vmatpush3.bf16.msra.mxu0 %v7094_v29 }
 0x7c1   :  { %6664 = vmatmul.mubr.bf16.vlgmr.msra.gmra.mrb[96].mxu1 %v11255_v13 }
 0x7c2   :  { %6667 = vmatprep.mubr.bf16.mxu1 %v11256_v52  ;;  %6696 = vmatpush3.bf16.msra.mxu1 %v9825_v3  ;;  %v7095_v3 = vld [vmem:[%s10914_s20 + $0x28] sm:$0xff]  }
 0x7c3   :  { %6697 = vmatprep.subr.bf16.mxu1 %v7083_v43  ;;  %6753 = vmatprep.subr.bf16.mxu0 %v7095_v3 }
 0x7c4   :  { %6754 = vmatpush3.bf16.msra.mxu0 %v7095_v3 }
 0x7c6   :  { %6698 = vmatpush3.bf16.msra.mxu1 %v7083_v43 }
 0x7c7   :  { %6699 = vmatprep.subr.bf16.mxu1 %v7084_v51 }
 0x7c9   :  { %6668 = vmatmul.mubr.bf16.gmra.mrb[100].mxu1 %v11257_v11 }
 0x7ca   :  { %6671 = vmatprep.mubr.bf16.mxu1 %v11258_v1  ;;  %6700 = vmatpush3.bf16.msra.mxu1 %v7084_v51 }
 0x7cb   :  { %6701 = vmatprep.subr.bf16.mxu1 %v7085_v22 }
 0x7ce   :  { %6702 = vmatpush3.bf16.msra.mxu1 %v7085_v22 }
 0x7cf   :  { %6703 = vmatprep.subr.bf16.mxu1 %v7086_v61 }
 0x7d1   :  { %6672 = vmatmul.mubr.bf16.gmra.mrb[104].mxu1 %v11259_v56 }
 0x7d2   :  { %6675 = vmatprep.mubr.bf16.mxu1 %v11260_v2  ;;  %6704 = vmatpush3.bf16.msra.mxu1 %v7086_v61 }
 0x7d3   :  { %6705 = vmatprep.subr.bf16.mxu1 %v7087_v60 }
 0x7d6   :  { %6706 = vmatpush3.bf16.msra.mxu1 %v7087_v60 }
 0x7d7   :  { %6707 = vmatprep.subr.bf16.mxu1 %v7088_v59 }
 0x7d9   :  { %6676 = vmatmul.mubr.bf16.gmra.mrb[108].mxu1 %v11261_v45 }
 0x7da   :  { %6679 = vmatprep.mubr.bf16.mxu1 %v11262_v9  ;;  %6708 = vmatpush3.bf16.msra.mxu1 %v7088_v59 }
 0x7db   :  { %6709 = vmatprep.subr.bf16.mxu1 %v7089_v8 }
 0x7de   :  { %6710 = vmatpush3.bf16.msra.mxu1 %v7089_v8 }
 0x7e1   :  { %6680 = vmatmul.mubr.bf16.gmra.mrb[112].mxu1 %v11263_v40 }
 0x7e2   :  { %6683 = vmatprep.mubr.bf16.mxu1 %v11264_v6 }
 0x7e9   :  { %6684 = vmatmul.mubr.bf16.gmra.mrb[116].mxu1 %v11265_v14 }
 0x7ea   :  { %6687 = vmatprep.mubr.bf16.mxu1 %v11266_v58 }
 0x7f1   :  { %6688 = vmatmul.mubr.bf16.gmra.mrb[120].mxu1 %v11267_v62 }
 0x7f2   :  { %6691 = vmatprep.mubr.bf16.mxu1 %v11268_v57 }
 0x7f9   :  { %6692 = vmatmul.mubr.bf16.gmra.mrb[124].mxu1 %v11269_v54 }
 0x7fa   :  { %6711 = vmatprep.mubr.bf16.mxu1 %v9382_v38  ;;  %v11275_v38 = vld [vmem:[#allocation6_spill] sm:$0xff] }
 0x801   :  { %6712 = vmatmul.mubr.bf16.vlgmr.msra.gmra.mrb[96].mxu1 %v9384_v46  ;;  %v11276_v46 = vld [vmem:[#allocation7_spill] sm:$0xff] }
 0x802   :  { %6715 = vmatprep.mubr.bf16.mxu1 %v9388_v0  ;;  %v11277_v0 = vld [vmem:[#allocation67_spill] sm:$0xff] }
 0x809   :  { %6716 = vmatmul.mubr.bf16.gmra.mrb[100].mxu1 %v9394_v42  ;;  %v11278_v42 = vld [vmem:[#allocation68_spill] sm:$0xff] }
 0x80a   :  { %6719 = vmatprep.mubr.bf16.mxu1 %v9399_v33  ;;  %v11279_v33 = vld [vmem:[#allocation70_spill] sm:$0xff] }
 0x811   :  { %6720 = vmatmul.mubr.bf16.gmra.mrb[104].mxu1 %v9402_v44  ;;  %v7096_v44 = vld [vmem:[%s10914_s20 + $0x30] sm:$0xff]  }
 0x812   :  { %6723 = vmatprep.mubr.bf16.mxu1 %v11270_v32  ;;  %6755 = vmatprep.subr.bf16.mxu0 %v7096_v44 }
 0x813   :  { %6756 = vmatpush3.bf16.msra.mxu0 %v7096_v44 }
 0x814   :  { %6757 = vmatprep.subr.bf16.mxu0 %v7097_v53 }
 0x817   :  { %6758 = vmatpush3.bf16.msra.mxu0 %v7097_v53 }
 0x819   :  { %6724 = vmatmul.mubr.bf16.gmra.mrb[108].mxu1 %v11271_v19 }
 0x81a   :  { %6727 = vmatprep.mubr.bf16.mxu1 %v11272_v48 }
 0x821   :  { %6728 = vmatmul.mubr.bf16.gmra.mrb[112].mxu1 %v11273_v12 }
 0x822   :  { %6731 = vmatprep.mubr.bf16.mxu1 %v11274_v5 }
 0x829   :  { %6732 = vmatmul.mubr.bf16.gmra.mrb[116].mxu1 %v11275_v38 }
 0x82a   :  { %6735 = vmatprep.mubr.bf16.mxu1 %v11276_v46 }
 0x831   :  { %6736 = vmatmul.mubr.bf16.gmra.mrb[120].mxu1 %v11277_v0 }
 0x832   :  { %6739 = vmatprep.mubr.bf16.mxu1 %v11278_v42 }
 0x839   :  { %6740 = vmatmul.mubr.bf16.gmra.mrb[124].mxu1 %v11279_v33 }
 0x8d4   :  { %v6713_v50 = vpop.f32.mrb[96].mxu1 }
 0x8d5   :  { %v4300_v31 = vadd.f32 %v6713_v50, %v9963_v21  ;;  %v4133_v7 = vpop.f32.mrb[97].mxu1 }
 0x8d6   :  { %v4298_v63 = vadd.f32 %v9963_v21, %v4133_v7  ;;  %v6714_v55 = vpop.f32.mrb[98].mxu1 }
 0x8d7   :  { %4332 = vst [vmem:[%s10916_s26 + $0x10] sm:$0xff] %v4300_v31  ;;  %v4301_v37 = vadd.f32 %v6714_v55, %v9963_v21  ;;  %v4136_v30 = vpop.f32.mrb[99].mxu1 }
 0x8d8   :  { %4330 = vst [vmem:[%s10916_s26] sm:$0xff] %v4298_v63  ;;  %v4299_v34 = vadd.f32 %v9963_v21, %v4136_v30 }
 0x8d9   :  { %4333 = vst [vmem:[%s10916_s26 + $0x18] sm:$0xff] %v4301_v37  ;;  %v4363_v10 = vpack.c.bf16 %v4301_v37, %v4300_v31 }
 0x8da   :  { %4331 = vst [vmem:[%s10916_s26 + $0x8] sm:$0xff] %v4299_v34  ;;  %v4362_v28 = vpack.c.bf16 %v4299_v34, %v4298_v63 }
 0x8dc   :  { %v6717_v35 = vpop.f32.mrb[100].mxu1  ;;  %6759 = vmatprep.mubr.bf16.mxu0 %v4362_v28 }
 0x8dd   :  { %v4304_v41 = vadd.f32 %v6717_v35, %v9963_v21  ;;  %v4149_v49 = vpop.f32.mrb[101].mxu1  ;;  %6760 = vmatmul.mubr.bf16.vlgmr.msra.gmra.mrb[224].mxu0 %v4363_v10 }
 0x8de   :  { %v4302_v25 = vadd.f32 %v9963_v21, %v4149_v49  ;;  %v6718_v4 = vpop.f32.mrb[102].mxu1 }
 0x8df   :  { %4336 = vst [vmem:[%s10916_s26 + $0x30] sm:$0xff] %v4304_v41  ;;  %v4305_v27 = vadd.f32 %v6718_v4, %v9963_v21  ;;  %v4152_v39 = vpop.f32.mrb[103].mxu1 }
 0x8e0   :  { %4334 = vst [vmem:[%s10916_s26 + $0x20] sm:$0xff] %v4302_v25  ;;  %v4303_v18 = vadd.f32 %v9963_v21, %v4152_v39 }
 0x8e1   :  { %4337 = vst [vmem:[%s10916_s26 + $0x38] sm:$0xff] %v4305_v27  ;;  %v4365_v16 = vpack.c.bf16 %v4305_v27, %v4304_v41 }
 0x8e2   :  { %4335 = vst [vmem:[%s10916_s26 + $0x28] sm:$0xff] %v4303_v18  ;;  %v4364_v17 = vpack.c.bf16 %v4303_v18, %v4302_v25  ;;  %v10096_v18 = vld [vmem:[%s10917_s21] ss:$0 sm:$0xff] }
 0x8e4   :  { %v6721_v26 = vpop.f32.mrb[104].mxu1  ;;  %6763 = vmatprep.mubr.bf16.mxu0 %v4364_v17 }
 0x8e5   :  { %v4308_v24 = vadd.f32 %v6721_v26, %v9963_v21  ;;  %v4165_v20 = vpop.f32.mrb[105].mxu1  ;;  %6764 = vmatmul.mubr.bf16.gmra.mrb[228].mxu0 %v4365_v16 }
 0x8e6   :  { %v4306_v15 = vadd.f32 %v9963_v21, %v4165_v20  ;;  %v6722_v36 = vpop.f32.mrb[106].mxu1 }
 0x8e7   :  { %4340 = vst [vmem:[%s10916_s26 + $0x50] sm:$0xff] %v4308_v24  ;;  %v4309_v43 = vadd.f32 %v6722_v36, %v9963_v21  ;;  %v4168_v23 = vpop.f32.mrb[107].mxu1 }
 0x8e8   :  { %4338 = vst [vmem:[%s10916_s26 + $0x40] sm:$0xff] %v4306_v15  ;;  %v4307_v13 = vadd.f32 %v9963_v21, %v4168_v23 }
 0x8e9   :  { %4341 = vst [vmem:[%s10916_s26 + $0x58] sm:$0xff] %v4309_v43  ;;  %v4367_v52 = vpack.c.bf16 %v4309_v43, %v4308_v24 }
 0x8ea   :  { %4339 = vst [vmem:[%s10916_s26 + $0x48] sm:$0xff] %v4307_v13  ;;  %v4366_v47 = vpack.c.bf16 %v4307_v13, %v4306_v15 }
 0x8ec   :  { %v6725_v51 = vpop.f32.mrb[108].mxu1  ;;  %6767 = vmatprep.mubr.bf16.mxu0 %v4366_v47 }
 0x8ed   :  { %v4312_v22 = vadd.f32 %v6725_v51, %v9963_v21  ;;  %v4181_v29 = vpop.f32.mrb[109].mxu1  ;;  %6768 = vmatmul.mubr.bf16.gmra.mrb[232].mxu0 %v4367_v52 }
 0x8ee   :  { %v4310_v11 = vadd.f32 %v9963_v21, %v4181_v29  ;;  %v6726_v1 = vpop.f32.mrb[110].mxu1 }
 0x8ef   :  { %4344 = vst [vmem:[%s10916_s26 + $0x70] sm:$0xff] %v4312_v22  ;;  %v4313_v3 = vadd.f32 %v6726_v1, %v9963_v21  ;;  %v4184_v61 = vpop.f32.mrb[111].mxu1 }
 0x8f0   :  { %4342 = vst [vmem:[%s10916_s26 + $0x60] sm:$0xff] %v4310_v11  ;;  %v4311_v60 = vadd.f32 %v9963_v21, %v4184_v61 }
 0x8f1   :  { %4345 = vst [vmem:[%s10916_s26 + $0x78] sm:$0xff] %v4313_v3  ;;  %v4369_v56 = vpack.c.bf16 %v4313_v3, %v4312_v22 }
 0x8f2   :  { %4343 = vst [vmem:[%s10916_s26 + $0x68] sm:$0xff] %v4311_v60  ;;  %v4368_v2 = vpack.c.bf16 %v4311_v60, %v4310_v11 }
 0x8f4   :  { %v6729_v59 = vpop.f32.mrb[112].mxu1  ;;  %6771 = vmatprep.mubr.bf16.mxu0 %v4368_v2 }
 0x8f5   :  { %v4316_v8 = vadd.f32 %v6729_v59, %v9963_v21  ;;  %v4197_v45 = vpop.f32.mrb[113].mxu1  ;;  %6772 = vmatmul.mubr.bf16.gmra.mrb[236].mxu0 %v4369_v56 }
 0x8f6   :  { %v4314_v9 = vadd.f32 %v9963_v21, %v4197_v45  ;;  %v6730_v40 = vpop.f32.mrb[114].mxu1 }
 0x8f7   :  { %4348 = vst [vmem:[%s10916_s26 + $0x90] sm:$0xff] %v4316_v8  ;;  %v4317_v6 = vadd.f32 %v6730_v40, %v9963_v21  ;;  %v4200_v14 = vpop.f32.mrb[115].mxu1 }
 0x8f8   :  { %4346 = vst [vmem:[%s10916_s26 + $0x80] sm:$0xff] %v4314_v9  ;;  %v4315_v58 = vadd.f32 %v9963_v21, %v4200_v14 }
 0x8f9   :  { %4349 = vst [vmem:[%s10916_s26 + $0x98] sm:$0xff] %v4317_v6  ;;  %v4371_v62 = vpack.c.bf16 %v4317_v6, %v4316_v8 }
 0x8fa   :  { %4347 = vst [vmem:[%s10916_s26 + $0x88] sm:$0xff] %v4315_v58  ;;  %v4370_v57 = vpack.c.bf16 %v4315_v58, %v4314_v9 }
 0x8fc   :  { %v6733_v54 = vpop.f32.mrb[116].mxu1  ;;  %6775 = vmatprep.mubr.bf16.mxu0 %v4370_v57 }
 0x8fd   :  { %v4320_v32 = vadd.f32 %v6733_v54, %v9963_v21  ;;  %v4213_v19 = vpop.f32.mrb[117].mxu1  ;;  %6776 = vmatmul.mubr.bf16.gmra.mrb[240].mxu0 %v4371_v62 }
 0x8fe   :  { %v4318_v48 = vadd.f32 %v9963_v21, %v4213_v19  ;;  %v6734_v12 = vpop.f32.mrb[118].mxu1 }
 0x8ff   :  { %4352 = vst [vmem:[%s10916_s26 + $0xb0] sm:$0xff] %v4320_v32  ;;  %v4321_v5 = vadd.f32 %v6734_v12, %v9963_v21  ;;  %v4216_v38 = vpop.f32.mrb[119].mxu1 }
 0x900   :  { %4350 = vst [vmem:[%s10916_s26 + $0xa0] sm:$0xff] %v4318_v48  ;;  %v4319_v46 = vadd.f32 %v9963_v21, %v4216_v38 }
 0x901   :  { %4353 = vst [vmem:[%s10916_s26 + $0xb8] sm:$0xff] %v4321_v5  ;;  %v4373_v0 = vpack.c.bf16 %v4321_v5, %v4320_v32 }
 0x902   :  { %4351 = vst [vmem:[%s10916_s26 + $0xa8] sm:$0xff] %v4319_v46  ;;  %v4372_v42 = vpack.c.bf16 %v4319_v46, %v4318_v48 }
 0x904   :  { %v6737_v33 = vpop.f32.mrb[120].mxu1  ;;  %6779 = vmatprep.mubr.bf16.mxu0 %v4372_v42 }
 0x905   :  { %v4324_v44 = vadd.f32 %v6737_v33, %v9963_v21  ;;  %v4229_v53 = vpop.f32.mrb[121].mxu1  ;;  %6780 = vmatmul.mubr.bf16.gmra.mrb[244].mxu0 %v4373_v0 }
 0x906   :  { %v4322_v50 = vadd.f32 %v9963_v21, %v4229_v53  ;;  %v6738_v31 = vpop.f32.mrb[122].mxu1 }
 0x907   :  { %4356 = vst [vmem:[%s10916_s26 + $0xd0] sm:$0xff] %v4324_v44  ;;  %v4325_v7 = vadd.f32 %v6738_v31, %v9963_v21  ;;  %v4232_v63 = vpop.f32.mrb[123].mxu1 }
 0x908   :  { %4354 = vst [vmem:[%s10916_s26 + $0xc0] sm:$0xff] %v4322_v50  ;;  %v4323_v55 = vadd.f32 %v9963_v21, %v4232_v63 }
 0x909   :  { %4357 = vst [vmem:[%s10916_s26 + $0xd8] sm:$0xff] %v4325_v7  ;;  %v4375_v37 = vpack.c.bf16 %v4325_v7, %v4324_v44 }
 0x90a   :  { %4355 = vst [vmem:[%s10916_s26 + $0xc8] sm:$0xff] %v4323_v55  ;;  %v4374_v30 = vpack.c.bf16 %v4323_v55, %v4322_v50 }
 0x90c   :  { %v6741_v34 = vpop.f32.mrb[124].mxu1  ;;  %6783 = vmatprep.mubr.bf16.mxu0 %v4374_v30 }
 0x90d   :  { %v4328_v10 = vadd.f32 %v6741_v34, %v9963_v21  ;;  %v4245_v28 = vpop.f32.mrb[125].mxu1  ;;  %6784 = vmatmul.mubr.bf16.gmra.mrb[248].mxu0 %v4375_v37 }
 0x90e   :  { %v4326_v35 = vadd.f32 %v9963_v21, %v4245_v28  ;;  %v6742_v41 = vpop.f32.mrb[126].mxu1 }
 0x90f   :  { %4360 = vst [vmem:[%s10916_s26 + $0xf0] sm:$0xff] %v4328_v10  ;;  %v4329_v49 = vadd.f32 %v6742_v41, %v9963_v21  ;;  %v4248_v25 = vpop.f32.mrb[127].mxu1 }
 0x910   :  { %4358 = vst [vmem:[%s10916_s26 + $0xe0] sm:$0xff] %v4326_v35  ;;  %v4327_v4 = vadd.f32 %v9963_v21, %v4248_v25 }
 0x911   :  { %4361 = vst [vmem:[%s10916_s26 + $0xf8] sm:$0xff] %v4329_v49  ;;  %v4377_v27 = vpack.c.bf16 %v4329_v49, %v4328_v10 }
 0x912   :  { %4359 = vst [vmem:[%s10916_s26 + $0xe8] sm:$0xff] %v4327_v4  ;;  %v4376_v39 = vpack.c.bf16 %v4327_v4, %v4326_v35 }
 0x914   :  { %6787 = vmatprep.mubr.bf16.mxu0 %v4376_v39 }
 0x915   :  { %6788 = vmatmul.mubr.bf16.gmra.mrb[252].mxu0 %v4377_v27 }
 0x9b0   :  { %v6761_v16 = vpop.f32.mrb[224].mxu0 }
 0x9b1   :  { %v10099_v21 = vadd.f32 %v6761_v16, %v10096_v18  ;;  %v4483_v17 = vpop.f32.mrb[225].mxu0 }
 0x9b2   :  { %v10102_v26 = vadd.f32 %v10096_v18, %v4483_v17  ;;  %v6762_v24 = vpop.f32.mrb[226].mxu0 }
 0x9b3   :  { %v4612_v20 = vmax.f32 %v10099_v21, 0.0  ;;  %v4486_v15 = vpop.f32.mrb[227].mxu0  ;;  %v10107_v43 = vadd.f32 %v6762_v24, %v10096_v18 }
 0x9b4   :  { %v4610_v36 = vmax.f32 %v10102_v26, 0.0  ;;  %v10110_v23 = vadd.f32 %v10096_v18, %v4486_v15 }
 0x9b5   :  { %4648 = vadd.xlane.f32.xlu0 %v4612_v20  ;;  %v4613_v52 = vmax.f32 %v10107_v43, 0.0 }
 0x9b6   :  { %v4611_v13 = vmax.f32 %v10110_v23, 0.0  ;;  %4644 = vadd.xlane.f32.xlu1 %v4610_v36 }
 0x9b8   :  { %v6765_v47 = vpop.f32.mrb[228].mxu0 }
 0x9b9   :  { %v10119_v51 = vadd.f32 %v6765_v47, %v10096_v18  ;;  %4646 = vadd.xlane.f32.xlu0 %v4611_v13  ;;  %v4499_v22 = vpop.f32.mrb[229].mxu0 }
 0x9ba   :  { %4650 = vadd.xlane.f32.xlu1 %v4613_v52  ;;  %v6766_v29 = vpop.f32.mrb[230].mxu0  ;;  %v10127_v1 = vadd.f32 %v10096_v18, %v4499_v22 }
 0x9bb   :  { %v4616_v11 = vmax.f32 %v10119_v51, 0.0  ;;  %v10130_v3 = vadd.f32 %v6766_v29, %v10096_v18  ;;  %v4502_v61 = vpop.f32.mrb[231].mxu0 }
 0x9bc   :  { %v10134_v56 = vadd.f32 %v10096_v18, %v4502_v61  ;;  %v4614_v2 = vmax.f32 %v10127_v1, 0.0 }
 0x9bd   :  { %v4617_v60 = vmax.f32 %v10130_v3, 0.0  ;;  %4656 = vadd.xlane.f32.xlu0 %v4616_v11 }
 0x9be   :  { %v4615_v8 = vmax.f32 %v10134_v56, 0.0 }
 0x9bf   :  { %4658 = vadd.xlane.f32.xlu1 %v4617_v60 }
 0x9c0   :  { %v6769_v59 = vpop.f32.mrb[232].mxu0 }
 0x9c1   :  { %v10143_v45 = vadd.f32 %v6769_v59, %v10096_v18  ;;  %4652 = vadd.xlane.f32.xlu0 %v4614_v2  ;;  %v4515_v9 = vpop.f32.mrb[233].mxu0 }
 0x9c2   :  { %v6770_v40 = vpop.f32.mrb[234].mxu0  ;;  %v10149_v14 = vadd.f32 %v10096_v18, %v4515_v9 }
 0x9c3   :  { %v4620_v6 = vmax.f32 %v10143_v45, 0.0  ;;  %v10152_v58 = vadd.f32 %v6770_v40, %v10096_v18  ;;  %4654 = vadd.xlane.f32.xlu1 %v4615_v8  ;;  %v4518_v62 = vpop.f32.mrb[235].mxu0 }
 0x9c4   :  { %v10158_v54 = vadd.f32 %v10096_v18, %v4518_v62  ;;  %v4618_v32 = vmax.f32 %v10149_v14, 0.0 }
 0x9c5   :  { %v4621_v57 = vmax.f32 %v10152_v58, 0.0  ;;  %4664 = vadd.xlane.f32.xlu0 %v4620_v6 }
 0x9c6   :  { %v4619_v48 = vmax.f32 %v10158_v54, 0.0 }
 0x9c7   :  { %4666 = vadd.xlane.f32.xlu1 %v4621_v57 }
 0x9c8   :  { %v6773_v19 = vpop.f32.mrb[236].mxu0 }
 0x9c9   :  { %v10167_v12 = vadd.f32 %v6773_v19, %v10096_v18  ;;  %4660 = vadd.xlane.f32.xlu0 %v4618_v32  ;;  %v4531_v5 = vpop.f32.mrb[237].mxu0 }
 0x9ca   :  { %v6774_v38 = vpop.f32.mrb[238].mxu0  ;;  %v10173_v0 = vadd.f32 %v10096_v18, %v4531_v5 }
 0x9cb   :  { %v4624_v46 = vmax.f32 %v10167_v12, 0.0  ;;  %v10176_v42 = vadd.f32 %v6774_v38, %v10096_v18  ;;  %4662 = vadd.xlane.f32.xlu1 %v4619_v48  ;;  %v4534_v33 = vpop.f32.mrb[239].mxu0 }
 0x9cc   :  { %v10182_v53 = vadd.f32 %v10096_v18, %v4534_v33  ;;  %v4622_v50 = vmax.f32 %v10173_v0, 0.0 }
 0x9cd   :  { %v4625_v44 = vmax.f32 %v10176_v42, 0.0  ;;  %4672 = vadd.xlane.f32.xlu0 %v4624_v46 }
 0x9ce   :  { %v4623_v7 = vmax.f32 %v10182_v53, 0.0 }
 0x9cf   :  { %4674 = vadd.xlane.f32.xlu1 %v4625_v44 }
 0x9d0   :  { %v6777_v31 = vpop.f32.mrb[240].mxu0 }
 0x9d1   :  { %v10191_v63 = vadd.f32 %v6777_v31, %v10096_v18  ;;  %4668 = vadd.xlane.f32.xlu0 %v4622_v50  ;;  %v4547_v55 = vpop.f32.mrb[241].mxu0 }
 0x9d2   :  { %v6778_v37 = vpop.f32.mrb[242].mxu0  ;;  %v10197_v34 = vadd.f32 %v10096_v18, %v4547_v55 }
 0x9d3   :  { %v4628_v30 = vmax.f32 %v10191_v63, 0.0  ;;  %v10200_v10 = vadd.f32 %v6778_v37, %v10096_v18  ;;  %4670 = vadd.xlane.f32.xlu1 %v4623_v7  ;;  %v4550_v28 = vpop.f32.mrb[243].mxu0 }
 0x9d4   :  { %v10206_v41 = vadd.f32 %v10096_v18, %v4550_v28  ;;  %v4626_v49 = vmax.f32 %v10197_v34, 0.0 }
 0x9d5   :  { %v4629_v35 = vmax.f32 %v10200_v10, 0.0  ;;  %4680 = vadd.xlane.f32.xlu0 %v4628_v30 }
 0x9d6   :  { %v4627_v4 = vmax.f32 %v10206_v41, 0.0 }
 0x9d7   :  { %4682 = vadd.xlane.f32.xlu1 %v4629_v35 }
 0x9d8   :  { %v6781_v25 = vpop.f32.mrb[244].mxu0 }
 0x9d9   :  { %v10215_v27 = vadd.f32 %v6781_v25, %v10096_v18  ;;  %4676 = vadd.xlane.f32.xlu0 %v4626_v49  ;;  %v4563_v39 = vpop.f32.mrb[245].mxu0 }
 0x9da   :  { %v6782_v16 = vpop.f32.mrb[246].mxu0  ;;  %v10221_v24 = vadd.f32 %v10096_v18, %v4563_v39 }
 0x9db   :  { %v11048_v17 = vmax.f32 %v10215_v27, 0.0  ;;  %v10224_v15 = vadd.f32 %v6782_v16, %v10096_v18  ;;  %4678 = vadd.xlane.f32.xlu1 %v4627_v4  ;;  %v4566_v47 = vpop.f32.mrb[247].mxu0  ;;  %v11280_v34 = vmax.f32 %v10215_v27, 0.0 }
 0x9dc   :  { %v10230_v29 = vadd.f32 %v10096_v18, %v4566_v47  ;;  %v11045_v61 = vmax.f32 %v10221_v24, 0.0  ;;  %v11282_v27 = vmax.f32 %v10221_v24, 0.0 }
 0x9dd   :  { %v11047_v22 = vmax.f32 %v10224_v15, 0.0  ;;  %4688 = vadd.xlane.f32.xlu0 %v11048_v17  ;;  %v11281_v41 = vmax.f32 %v10224_v15, 0.0 }
 0x9de   :  { %v11043_v9 = vmax.f32 %v10230_v29, 0.0  ;;  %v11283_v15 = vmax.f32 %v10230_v29, 0.0 }
 0x9df   :  { %4690 = vadd.xlane.f32.xlu1 %v11047_v22 }
 0x9e0   :  { %v6785_v59 = vpop.f32.mrb[248].mxu0 }
 0x9e1   :  { %v10239_v40 = vadd.f32 %v6785_v59, %v10096_v18  ;;  %4684 = vadd.xlane.f32.xlu0 %v11045_v61  ;;  %v4579_v62 = vpop.f32.mrb[249].mxu0 }
 0x9e2   :  { %v6786_v19 = vpop.f32.mrb[250].mxu0  ;;  %v10245_v38 = vadd.f32 %v10096_v18, %v4579_v62 }
 0x9e3   :  { %v11039_v5 = vmax.f32 %v10239_v40, 0.0  ;;  %v10248_v33 = vadd.f32 %v6786_v19, %v10096_v18  ;;  %4686 = vadd.xlane.f32.xlu1 %v11043_v9  ;;  %v4582_v31 = vpop.f32.mrb[251].mxu0  ;;  %v11284_v24 = vmax.f32 %v10239_v40, 0.0 }
 0x9e4   :  { %v10254_v37 = vadd.f32 %v10096_v18, %v4582_v31  ;;  %v11040_v28 = vmax.f32 %v10245_v38, 0.0  ;;  %v11286_v40 = vmax.f32 %v10245_v38, 0.0 }
 0x9e5   :  { %v11038_v55 = vmax.f32 %v10248_v33, 0.0  ;;  %4696 = vadd.xlane.f32.xlu0 %v11039_v5  ;;  %v11285_v29 = vmax.f32 %v10248_v33, 0.0 }
 0x9e6   :  { %v11041_v39 = vmax.f32 %v10254_v37, 0.0  ;;  %v11287_v33 = vmax.f32 %v10254_v37, 0.0 }
 0x9e7   :  { %4698 = vadd.xlane.f32.xlu1 %v11038_v55 }
 0x9e8   :  { %v6789_v25 = vpop.f32.mrb[252].mxu0 }
 0x9e9   :  { %v10263_v16 = vadd.f32 %v6789_v25, %v10096_v18  ;;  %4692 = vadd.xlane.f32.xlu0 %v11040_v28  ;;  %v4595_v47 = vpop.f32.mrb[253].mxu0 }
 0x9ea   :  { %v6790_v59 = vpop.f32.mrb[254].mxu0  ;;  %v10269_v19 = vadd.f32 %v10096_v18, %v4595_v47 }
 0x9eb   :  { %v11042_v62 = vmax.f32 %v10263_v16, 0.0  ;;  %v10272_v31 = vadd.f32 %v6790_v59, %v10096_v18  ;;  %4694 = vadd.xlane.f32.xlu1 %v11041_v39  ;;  %v4598_v55 = vpop.f32.mrb[255].mxu0  ;;  %v11288_v38 = vmax.f32 %v10263_v16, 0.0 }
 0x9ec   :  { %v10278_v5 = vadd.f32 %v10096_v18, %v4598_v55  ;;  %v11046_v28 = vmax.f32 %v10269_v19, 0.0  ;;  %v11290_v16 = vmax.f32 %v10269_v19, 0.0 }
 0x9ed   :  { %v11044_v25 = vmax.f32 %v10272_v31, 0.0  ;;  %4704 = vadd.xlane.f32.xlu0 %v11042_v62  ;;  %v11289_v37 = vmax.f32 %v10272_v31, 0.0 }
 0x9ee   :  { %v4639_v47 = vmax.f32 %v10278_v5, 0.0 }
 0x9ef   :  { %4706 = vadd.xlane.f32.xlu1 %v11044_v25 }
 0x9f1   :  { %4700 = vadd.xlane.f32.xlu0 %v11046_v28 }
 0x9f3   :  { %4702 = vadd.xlane.f32.xlu1 %v4639_v47 }
 0xa42   :  { %v4649_v59 = vpop.xlane.xlu0 %4648 }
 0xa43   :  { %v4710_v39 = vmul.f32 0.0078125, %v4649_v59  ;;  %v4645_v18 = vpop.xlane.xlu1 %4644 }
 0xa44   :  { %v4708_v55 = vmul.f32 0.0078125, %v4645_v18 }
 0xa45   :  { %v10292_v62 = vsub.f32 %v4612_v20, %v4710_v39 }
 0xa46   :  { %v4647_v9 = vpop.xlane.xlu0 %4646  ;;  %v10296_v25 = vsub.f32 %v4610_v36, %v4708_v55 }
 0xa47   :  { %v4651_v61 = vpop.xlane.xlu1 %4650  ;;  %v4774_v28 = vmul.f32 %v10292_v62, %v10292_v62  ;;  %v4709_v22 = vmul.f32 0.0078125, %v4647_v9 }
 0xa48   :  { %v4711_v17 = vmul.f32 0.0078125, %v4651_v61  ;;  %v4772_v20 = vmul.f32 %v10296_v25, %v10296_v25 }
 0xa49   :  { %4808 = vadd.xlane.f32.xlu0 %v4774_v28  ;;  %v10308_v26 = vsub.f32 %v4611_v13, %v4709_v22 }
 0xa4a   :  { %v10302_v59 = vsub.f32 %v4613_v52, %v4711_v17  ;;  %v4657_v18 = vpop.xlane.xlu0 %4656 }
 0xa4b   :  { %v4714_v21 = vmul.f32 0.0078125, %v4657_v18  ;;  %v4773_v22 = vmul.f32 %v10308_v26, %v10308_v26 }
 0xa4c   :  { %v4659_v36 = vpop.xlane.xlu1 %4658  ;;  %v4775_v39 = vmul.f32 %v10302_v59, %v10302_v59 }
 0xa4d   :  { %v10314_v61 = vsub.f32 %v4616_v11, %v4714_v21  ;;  %v4715_v43 = vmul.f32 0.0078125, %v4659_v36  ;;  %4804 = vadd.xlane.f32.xlu0 %v4772_v20 }
 0xa4e   :  { %v4653_v52 = vpop.xlane.xlu0 %4652  ;;  %4810 = vadd.xlane.f32.xlu1 %v4775_v39 }
 0xa4f   :  { %v4712_v17 = vmul.f32 0.0078125, %v4653_v52  ;;  %v4778_v9 = vmul.f32 %v10314_v61, %v10314_v61  ;;  %v10320_v23 = vsub.f32 %v4617_v60, %v4715_v43 }
 0xa50   :  { %v4655_v13 = vpop.xlane.xlu1 %4654 }
 0xa51   :  { %v10326_v51 = vsub.f32 %v4614_v2, %v4712_v17  ;;  %v4713_v11 = vmul.f32 0.0078125, %v4655_v13  ;;  %4816 = vadd.xlane.f32.xlu0 %v4778_v9  ;;  %v4779_v21 = vmul.f32 %v10320_v23, %v10320_v23 }
 0xa52   :  { %v4665_v28 = vpop.xlane.xlu0 %4664  ;;  %4806 = vadd.xlane.f32.xlu1 %v4773_v22 }
 0xa53   :  { %v4718_v55 = vmul.f32 0.0078125, %v4665_v28  ;;  %v4776_v18 = vmul.f32 %v10326_v51, %v10326_v51  ;;  %v10332_v3 = vsub.f32 %v4615_v8, %v4713_v11 }
 0xa54   :  { %v4667_v60 = vpop.xlane.xlu1 %4666 }
 0xa55   :  { %v10338_v1 = vsub.f32 %v4620_v6, %v4718_v55  ;;  %v4719_v2 = vmul.f32 0.0078125, %v4667_v60  ;;  %4812 = vadd.xlane.f32.xlu0 %v4776_v18  ;;  %v4777_v43 = vmul.f32 %v10332_v3, %v10332_v3 }
 0xa56   :  { %v4661_v20 = vpop.xlane.xlu0 %4660  ;;  %4818 = vadd.xlane.f32.xlu1 %v4779_v21 }
 0xa57   :  { %v4716_v36 = vmul.f32 0.0078125, %v4661_v20  ;;  %v4782_v39 = vmul.f32 %v10338_v1, %v10338_v1  ;;  %v10344_v56 = vsub.f32 %v4621_v57, %v4719_v2 }
 0xa58   :  { %v4663_v8 = vpop.xlane.xlu1 %4662 }
 0xa59   :  { %v10350_v45 = vsub.f32 %v4618_v32, %v4716_v36  ;;  %v4717_v6 = vmul.f32 0.0078125, %v4663_v8  ;;  %4824 = vadd.xlane.f32.xlu0 %v4782_v39  ;;  %v4783_v13 = vmul.f32 %v10344_v56, %v10344_v56 }
 0xa5a   :  { %v4673_v52 = vpop.xlane.xlu0 %4672  ;;  %4814 = vadd.xlane.f32.xlu1 %v4777_v43 }
 0xa5b   :  { %v4722_v17 = vmul.f32 0.0078125, %v4673_v52  ;;  %v4780_v9 = vmul.f32 %v10350_v45, %v10350_v45  ;;  %v10356_v58 = vsub.f32 %v4619_v48, %v4717_v6 }
 0xa5c   :  { %v4675_v57 = vpop.xlane.xlu1 %4674 }
 0xa5d   :  { %v10362_v14 = vsub.f32 %v4624_v46, %v4722_v17  ;;  %v4723_v32 = vmul.f32 0.0078125, %v4675_v57  ;;  %4820 = vadd.xlane.f32.xlu0 %v4780_v9  ;;  %v4781_v55 = vmul.f32 %v10356_v58, %v10356_v58 }
 0xa5e   :  { %v4669_v22 = vpop.xlane.xlu0 %4668  ;;  %4826 = vadd.xlane.f32.xlu1 %v4783_v13 }
 0xa5f   :  { %v4720_v11 = vmul.f32 0.0078125, %v4669_v22  ;;  %v4786_v28 = vmul.f32 %v10362_v14, %v10362_v14  ;;  %v10368_v54 = vsub.f32 %v4625_v44, %v4723_v32 }
 0xa60   :  { %v4671_v48 = vpop.xlane.xlu1 %4670 }
 0xa61   :  { %v10374_v12 = vsub.f32 %v4622_v50, %v4720_v11  ;;  %v4721_v46 = vmul.f32 0.0078125, %v4671_v48  ;;  %4832 = vadd.xlane.f32.xlu0 %v4786_v28  ;;  %v4787_v2 = vmul.f32 %v10368_v54, %v10368_v54 }
 0xa62   :  { %v4681_v18 = vpop.xlane.xlu0 %4680  ;;  %4822 = vadd.xlane.f32.xlu1 %v4781_v55 }
 0xa63   :  { %v4726_v60 = vmul.f32 0.0078125, %v4681_v18  ;;  %v4784_v21 = vmul.f32 %v10374_v12, %v10374_v12  ;;  %v10380_v42 = vsub.f32 %v4623_v7, %v4721_v46 }
 0xa64   :  { %v4683_v44 = vpop.xlane.xlu1 %4682 }
 0xa65   :  { %v10386_v0 = vsub.f32 %v4628_v30, %v4726_v60  ;;  %v4727_v50 = vmul.f32 0.0078125, %v4683_v44  ;;  %4828 = vadd.xlane.f32.xlu0 %v4784_v21  ;;  %v4785_v8 = vmul.f32 %v10380_v42, %v10380_v42 }
 0xa66   :  { %v4677_v20 = vpop.xlane.xlu0 %4676  ;;  %4834 = vadd.xlane.f32.xlu1 %v4787_v2 }
 0xa67   :  { %v4724_v36 = vmul.f32 0.0078125, %v4677_v20  ;;  %v4790_v39 = vmul.f32 %v10386_v0, %v10386_v0  ;;  %v10392_v53 = vsub.f32 %v4629_v35, %v4727_v50 }
 0xa68   :  { %v4679_v7 = vpop.xlane.xlu1 %4678 }
 0xa69   :  { %v10398_v63 = vsub.f32 %v4626_v49, %v4724_v36  ;;  %v4725_v30 = vmul.f32 0.0078125, %v4679_v7  ;;  %4840 = vadd.xlane.f32.xlu0 %v4790_v39  ;;  %v4791_v17 = vmul.f32 %v10392_v53, %v10392_v53 }
 0xa6a   :  { %v4689_v43 = vpop.xlane.xlu0 %4688  ;;  %4830 = vadd.xlane.f32.xlu1 %v4785_v8 }
 0xa6b   :  { %v4730_v6 = vmul.f32 0.0078125, %v4689_v43  ;;  %v4788_v52 = vmul.f32 %v10398_v63, %v10398_v63  ;;  %v10404_v10 = vsub.f32 %v4627_v4, %v4725_v30 }
 0xa6c   :  { %v4691_v35 = vpop.xlane.xlu1 %4690 }
 0xa6d   :  { %v10410_v49 = vsub.f32 %v11280_v34, %v4730_v6  ;;  %v4731_v9 = vmul.f32 0.0078125, %v4691_v35  ;;  %4836 = vadd.xlane.f32.xlu0 %v4788_v52  ;;  %v4789_v11 = vmul.f32 %v10404_v10, %v10404_v10 }
 0xa6e   :  { %v4685_v57 = vpop.xlane.xlu0 %4684  ;;  %4842 = vadd.xlane.f32.xlu1 %v4791_v17 }
 0xa6f   :  { %v4728_v13 = vmul.f32 0.0078125, %v4685_v57  ;;  %v4794_v32 = vmul.f32 %v10410_v49, %v10410_v49  ;;  %v10416_v4 = vsub.f32 %v11281_v41, %v4731_v9 }
 0xa70   :  { %v4687_v22 = vpop.xlane.xlu1 %4686 }
 0xa71   :  { %v10422_v28 = vsub.f32 %v11282_v27, %v4728_v13  ;;  %v4729_v48 = vmul.f32 0.0078125, %v4687_v22  ;;  %4848 = vadd.xlane.f32.xlu0 %v4794_v32  ;;  %v4795_v44 = vmul.f32 %v10416_v4, %v10416_v4 }
 0xa72   :  { %v4697_v55 = vpop.xlane.xlu0 %4696  ;;  %4838 = vadd.xlane.f32.xlu1 %v4789_v11 }
 0xa73   :  { %v4734_v46 = vmul.f32 0.0078125, %v4697_v55  ;;  %v4792_v18 = vmul.f32 %v10422_v28, %v10422_v28  ;;  %v10428_v60 = vsub.f32 %v11283_v15, %v4729_v48 }
 0xa74   :  { %v4699_v21 = vpop.xlane.xlu1 %4698 }
 0xa75   :  { %v10434_v2 = vsub.f32 %v11284_v24, %v4734_v46  ;;  %v4735_v50 = vmul.f32 0.0078125, %v4699_v21  ;;  %4844 = vadd.xlane.f32.xlu0 %v4792_v18  ;;  %v4793_v30 = vmul.f32 %v10428_v60, %v10428_v60 }
 0xa76   :  { %v4693_v20 = vpop.xlane.xlu0 %4692  ;;  %4850 = vadd.xlane.f32.xlu1 %v4795_v44 }
 0xa77   :  { %v4732_v36 = vmul.f32 0.0078125, %v4693_v20  ;;  %v4798_v39 = vmul.f32 %v10434_v2, %v10434_v2  ;;  %v10440_v7 = vsub.f32 %v11285_v29, %v4735_v50 }
 0xa78   :  { %v4695_v8 = vpop.xlane.xlu1 %4694 }
 0xa79   :  { %v10446_v43 = vsub.f32 %v11286_v40, %v4732_v36  ;;  %v4733_v6 = vmul.f32 0.0078125, %v4695_v8  ;;  %4856 = vadd.xlane.f32.xlu0 %v4798_v39  ;;  %v4799_v57 = vmul.f32 %v10440_v7, %v10440_v7 }
 0xa7a   :  { %v4705_v52 = vpop.xlane.xlu0 %4704  ;;  %4846 = vadd.xlane.f32.xlu1 %v4793_v30 }
 0xa7b   :  { %v4738_v35 = vmul.f32 0.0078125, %v4705_v52  ;;  %v4796_v17 = vmul.f32 %v10446_v43, %v10446_v43  ;;  %v10452_v34 = vsub.f32 %v11287_v33, %v4733_v6 }
 0xa7c   :  { %v4707_v9 = vpop.xlane.xlu1 %4706 }
 0xa7d   :  { %v10458_v13 = vsub.f32 %v11288_v38, %v4738_v35  ;;  %v4739_v32 = vmul.f32 0.0078125, %v4707_v9  ;;  %4852 = vadd.xlane.f32.xlu0 %v4796_v17  ;;  %v4797_v55 = vmul.f32 %v10452_v34, %v10452_v34 }
 0xa7e   :  { %4858 = vadd.xlane.f32.xlu1 %v4799_v57  ;;  %v4701_v41 = vpop.xlane.xlu0 %4700 }
 0xa7f   :  { %v4736_v22 = vmul.f32 0.0078125, %v4701_v41  ;;  %v4802_v11 = vmul.f32 %v10458_v13, %v10458_v13  ;;  %v10464_v27 = vsub.f32 %v11289_v37, %v4739_v32  ;;  %v10485_v32 = vld [vmem:[%s10918_s22] ss:$0 sm:$0xff] }
 0xa80   :  { %v4703_v48 = vpop.xlane.xlu1 %4702  ;;  %v5072_v41 = vld [vmem:[%s10919_s24] sm:$0x3] }
 0xa81   :  { %v10470_v46 = vsub.f32 %v11290_v16, %v4736_v22  ;;  %v4737_v18 = vmul.f32 0.0078125, %v4703_v48  ;;  %4864 = vadd.xlane.f32.xlu0 %v4802_v11  ;;  %v4803_v31 = vmul.f32 %v10464_v27, %v10464_v27  ;;  %v11291_v16 = vld [vmem:[#allocation2_spill] sm:$0xff] }
 0xa82   :  { %4854 = vadd.xlane.f32.xlu1 %v4797_v55  ;;  %v10494_v55 = vld [vmem:[%s10920_s23] ss:$0 sm:$0xff] }
 0xa83   :  { %v4800_v15 = vmul.f32 %v10470_v46, %v10470_v46  ;;  %v10476_v21 = vsub.f32 %v4639_v47, %v4737_v18  ;;  %v5175_v18 = vsub.s32 1, %v11291_v16 }
 0xa85   :  { %4860 = vadd.xlane.f32.xlu0 %v4800_v15  ;;  %v4801_v19 = vmul.f32 %v10476_v21, %v10476_v21 }
 0xa86   :  { %4866 = vadd.xlane.f32.xlu1 %v4803_v31 }
 0xa8a   :  { %4862 = vadd.xlane.f32.xlu1 %v4801_v19 }
 0xad6   :  { %v4809_v44 = vpop.xlane.xlu0 %4808 }
 0xad7   :  { %v4870_v24 = vmul.f32 0.0078125, %v4809_v44  ;;  %v11292_v44 = vsub.s32 0, %v11291_v16 }
 0xad9   :  { %v4902_v50 = vadd.f32 1e-05, %v4870_v24  ;;  %v10500_v24 = vrot.slane %v5072_v41, %v11292_v44 }
 0xada   :  { %v4805_v20 = vpop.xlane.xlu0 %4804 }
 0xadb   :  { %7164 = vrsqrt.f32 %v4902_v50  ;;  %v4868_v36 = vmul.f32 0.0078125, %v4805_v20  ;;  %v4811_v39 = vpop.xlane.xlu1 %4810 }
 0xadc   :  { %v4871_v29 = vmul.f32 0.0078125, %v4811_v39 }
 0xadd   :  { %v4900_v5 = vadd.f32 1e-05, %v4868_v36 }
 0xade   :  { %v4903_v47 = vadd.f32 1e-05, %v4871_v29  ;;  %v4817_v8 = vpop.xlane.xlu0 %4816 }
 0xadf   :  { %7166 = vrsqrt.f32 %v4900_v5  ;;  %v4874_v30 = vmul.f32 0.0078125, %v4817_v8  ;;  %v4807_v40 = vpop.xlane.xlu1 %4806 }
 0xae0   :  { %7168 = vrsqrt.f32 %v4903_v47  ;;  %v4869_v6 = vmul.f32 0.0078125, %v4807_v40 }
 0xae1   :  { %v4906_v52 = vadd.f32 1e-05, %v4874_v30  ;;  %v10506_v30 = vrot.slane %v5072_v41, %v5175_v18 }
 0xae2   :  { %v4901_v35 = vadd.f32 1e-05, %v4869_v6  ;;  %v4813_v17 = vpop.xlane.xlu0 %4812 }
 0xae3   :  { %7170 = vrsqrt.f32 %v4906_v52  ;;  %v4872_v33 = vmul.f32 0.0078125, %v4813_v17  ;;  %v4819_v9 = vpop.xlane.xlu1 %4818 }
 0xae4   :  { %7172 = vrsqrt.f32 %v4901_v35  ;;  %v4875_v57 = vmul.f32 0.0078125, %v4819_v9 }
 0xae5   :  { %v7165_v38 = vpop.eup %7164  ;;  %v4904_v37 = vadd.f32 1e-05, %v4872_v33 }
 0xae6   :  { %v4907_v22 = vadd.f32 1e-05, %v4875_v57  ;;  %v4966_v11 = vmul.f32 %v7165_v38, %v10292_v62  ;;  %v4825_v15 = vpop.xlane.xlu0 %4824 }
 0xae7   :  { %v4815_v48 = vpop.xlane.xlu1 %4814  ;;  %v4878_v39 = vmul.f32 0.0078125, %v4825_v15 }
 0xae8   :  { %7174 = vrsqrt.f32 %v4907_v22  ;;  %v4873_v31 = vmul.f32 0.0078125, %v4815_v48  ;;  %v5004_v19 = vmul.f32 %v10485_v32, %v4966_v11 }
 0xae9   :  { %v7167_v50 = vpop.eup %7166  ;;  %7176 = vrsqrt.f32 %v4904_v37  ;;  %v4910_v17 = vadd.f32 1e-05, %v4878_v39 }
 0xaea   :  { %v7169_v62 = vpop.eup %7168  ;;  %v5042_v20 = vadd.f32 %v10494_v55, %v5004_v19  ;;  %v4964_v36 = vmul.f32 %v7167_v50, %v10296_v25  ;;  %v4905_v29 = vadd.f32 1e-05, %v4873_v31  ;;  %v4821_v9 = vpop.xlane.xlu0 %4820 }
 0xaeb   :  { %v4967_v5 = vmul.f32 %v7169_v62, %v10302_v59  ;;  %v4827_v47 = vpop.xlane.xlu1 %4826  ;;  %v4876_v48 = vmul.f32 0.0078125, %v4821_v9 }
 0xaec   :  { %v5079_v8 = vmul.f32 %v10500_v24, %v5042_v20  ;;  %v5002_v52 = vmul.f32 %v10485_v32, %v4964_v36  ;;  %7178 = vrsqrt.f32 %v4905_v29  ;;  %v4879_v25 = vmul.f32 0.0078125, %v4827_v47 }
 0xaed   :  { %v7171_v40 = vpop.eup %7170  ;;  %v5005_v6 = vmul.f32 %v10485_v32, %v4967_v5  ;;  %v5179_v59 = vmul.f32 %v10506_v30, %v5042_v20  ;;  %7180 = vrsqrt.f32 %v4910_v17  ;;  %v4908_v50 = vadd.f32 1e-05, %v4876_v48 }
 0xaee   :  { %v7173_v35 = vpop.eup %7172  ;;  %5113 = vadd.xlane.f32.xlu0 %v5079_v8  ;;  %v5040_v57 = vadd.f32 %v10494_v55, %v5002_v52  ;;  %v4970_v41 = vmul.f32 %v7171_v40, %v10314_v61  ;;  %v4911_v16 = vadd.f32 1e-05, %v4879_v25  ;;  %v4833_v62 = vpop.xlane.xlu0 %4832 }
 0xaef   :  { %v5043_v33 = vadd.f32 %v10494_v55, %v5005_v6  ;;  %v4965_v38 = vmul.f32 %v7173_v35, %v10308_v26  ;;  %v4823_v19 = vpop.xlane.xlu1 %4822 }
 0xaf0   :  { %v5077_v18 = vmul.f32 %v10500_v24, %v5040_v57  ;;  %v5008_v15 = vmul.f32 %v10485_v32, %v4970_v41  ;;  %7182 = vrsqrt.f32 %v4911_v16  ;;  %v4877_v20 = vmul.f32 0.0078125, %v4823_v19 }
 0xaf1   :  { %v5080_v22 = vmul.f32 %v10500_v24, %v5043_v33  ;;  %v5003_v37 = vmul.f32 %v10485_v32, %v4965_v38  ;;  %v5180_v26 = vmul.f32 %v10506_v30, %v5043_v33  ;;  %v5177_v36 = vmul.f32 %v10506_v30, %v5040_v57 }
 0xaf2   :  { %v7175_v11 = vpop.eup %7174  ;;  %5213 = vadd.xlane.f32.xlu0 %v5179_v59  ;;  %v5046_v39 = vadd.f32 %v10494_v55, %v5008_v15  ;;  %7184 = vrsqrt.f32 %v4908_v50  ;;  %v4909_v40 = vadd.f32 1e-05, %v4877_v20  ;;  %v4829_v57 = vpop.xlane.xlu0 %4828 }
 0xaf3   :  { %5115 = vadd.xlane.f32.xlu1 %v5080_v22  ;;  %v7177_v31 = vpop.eup %7176  ;;  %v5041_v61 = vadd.f32 %v10494_v55, %v5003_v37  ;;  %v4971_v44 = vmul.f32 %v7175_v11, %v10320_v23  ;;  %v4882_v23 = vmul.f32 0.0078125, %v4833_v62  ;;  %v4835_v6 = vpop.xlane.xlu1 %4834 }
 0xaf4   :  { %v4968_v29 = vmul.f32 %v7177_v31, %v10326_v51  ;;  %v5083_v52 = vmul.f32 %v10500_v24, %v5046_v39  ;;  %v4883_v59 = vmul.f32 0.0078125, %v4835_v6  ;;  %7186 = vrsqrt.f32 %v4909_v40 }
 0xaf5   :  { %v5078_v47 = vmul.f32 %v10500_v24, %v5041_v61  ;;  %v5009_v8 = vmul.f32 %v10485_v32, %v4971_v44  ;;  %v5178_v25 = vmul.f32 %v10506_v30, %v5041_v61  ;;  %v4914_v9 = vadd.f32 1e-05, %v4882_v23 }
 0xaf6   :  { %5109 = vadd.xlane.f32.xlu0 %v5077_v18  ;;  %v7179_v5 = vpop.eup %7178  ;;  %v5006_v35 = vmul.f32 %v10485_v32, %v4968_v29  ;;  %v5183_v38 = vmul.f32 %v10506_v30, %v5046_v39  ;;  %v4915_v16 = vadd.f32 1e-05, %v4883_v59  ;;  %v4841_v50 = vpop.xlane.xlu0 %4840 }
 0xaf7   :  { %5215 = vadd.xlane.f32.xlu1 %v5180_v26  ;;  %v7181_v17 = vpop.eup %7180  ;;  %v5047_v51 = vadd.f32 %v10494_v55, %v5009_v8  ;;  %v4969_v33 = vmul.f32 %v7179_v5, %v10332_v3  ;;  %7188 = vrsqrt.f32 %v4914_v9  ;;  %v4880_v3 = vmul.f32 0.0078125, %v4829_v57  ;;  %v4831_v19 = vpop.xlane.xlu1 %4830 }
 0xaf8   :  { %v5044_v41 = vadd.f32 %v10494_v55, %v5006_v35  ;;  %v4974_v22 = vmul.f32 %v7181_v17, %v10338_v1  ;;  %7190 = vrsqrt.f32 %v4915_v16  ;;  %v4881_v62 = vmul.f32 0.0078125, %v4831_v19 }
 0xaf9   :  { %v5084_v37 = vmul.f32 %v10500_v24, %v5047_v51  ;;  %v5007_v48 = vmul.f32 %v10485_v32, %v4969_v33  ;;  %v5184_v26 = vmul.f32 %v10506_v30, %v5047_v51  ;;  %v4912_v44 = vadd.f32 1e-05, %v4880_v3 }
 0xafa   :  { %5209 = vadd.xlane.f32.xlu0 %v5177_v36  ;;  %v7183_v11 = vpop.eup %7182  ;;  %v5081_v18 = vmul.f32 %v10500_v24, %v5044_v41  ;;  %v5012_v15 = vmul.f32 %v10485_v32, %v4974_v22  ;;  %v5181_v20 = vmul.f32 %v10506_v30, %v5044_v41  ;;  %v4913_v8 = vadd.f32 1e-05, %v4881_v62  ;;  %v4837_v33 = vpop.xlane.xlu0 %4836 }
 0xafb   :  { %5111 = vadd.xlane.f32.xlu1 %v5078_v47  ;;  %v5045_v1 = vadd.f32 %v10494_v55, %v5007_v48  ;;  %v4975_v61 = vmul.f32 %v7183_v11, %v10344_v56  ;;  %7192 = vrsqrt.f32 %v4912_v44  ;;  %v4886_v56 = vmul.f32 0.0078125, %v4841_v50  ;;  %v4843_v23 = vpop.xlane.xlu1 %4842 }
 0xafc   :  { %v7185_v31 = vpop.eup %7184  ;;  %v5050_v36 = vadd.f32 %v10494_v55, %v5012_v15  ;;  %v4887_v51 = vmul.f32 0.0078125, %v4843_v23  ;;  %7194 = vrsqrt.f32 %v4913_v8 }
 0xafd   :  { %v4972_v39 = vmul.f32 %v7185_v31, %v10350_v45  ;;  %v5082_v29 = vmul.f32 %v10500_v24, %v5045_v1  ;;  %v5013_v5 = vmul.f32 %v10485_v32, %v4975_v61  ;;  %v5182_v35 = vmul.f32 %v10506_v30, %v5045_v1 }
 0xafe   :  { %5121 = vadd.xlane.f32.xlu0 %v5083_v52  ;;  %v7187_v47 = vpop.eup %7186  ;;  %v5087_v40 = vmul.f32 %v10500_v24, %v5050_v36  ;;  %v5187_v9 = vmul.f32 %v10506_v30, %v5050_v36  ;;  %v4919_v11 = vadd.f32 1e-05, %v4887_v51  ;;  %v4849_v19 = vpop.xlane.xlu0 %4848 }
 0xaff   :  { %5211 = vadd.xlane.f32.xlu1 %v5178_v25  ;;  %v5010_v6 = vmul.f32 %v10485_v32, %v4972_v39  ;;  %v5051_v45 = vadd.f32 %v10494_v55, %v5013_v5  ;;  %v4973_v17 = vmul.f32 %v7187_v47, %v10356_v58  ;;  %v4918_v25 = vadd.f32 1e-05, %v4886_v56  ;;  %v4839_v16 = vpop.xlane.xlu1 %4838 }
 0xb00   :  { %v4884_v58 = vmul.f32 0.0078125, %v4837_v33 }
 0xb01   :  { %v7189_v52 = vpop.eup %7188  ;;  %v5048_v59 = vadd.f32 %v10494_v55, %v5010_v6  ;;  %v5088_v41 = vmul.f32 %v10500_v24, %v5051_v45  ;;  %v5011_v22 = vmul.f32 %v10485_v32, %v4973_v17  ;;  %7196 = vrsqrt.f32 %v4918_v25 }
 0xb02   :  { %5221 = vadd.xlane.f32.xlu0 %v5183_v38  ;;  %v4978_v57 = vmul.f32 %v7189_v52, %v10362_v14  ;;  %v7191_v38 = vpop.eup %7190  ;;  %v4916_v31 = vadd.f32 1e-05, %v4884_v58  ;;  %7198 = vrsqrt.f32 %v4919_v11  ;;  %v4845_v6 = vpop.xlane.xlu0 %4844 }
 0xb03   :  { %5123 = vadd.xlane.f32.xlu1 %v5084_v37  ;;  %v5085_v37 = vmul.f32 %v10500_v24, %v5048_v59  ;;  %v5049_v14 = vadd.f32 %v10494_v55, %v5011_v22  ;;  %v4979_v15 = vmul.f32 %v7191_v38, %v10368_v54  ;;  %v5185_v1 = vmul.f32 %v10506_v30, %v5048_v59  ;;  %v4851_v39 = vpop.xlane.xlu1 %4850 }
 0xb04   :  { %v5016_v48 = vmul.f32 %v10485_v32, %v4978_v57  ;;  %7200 = vrsqrt.f32 %v4916_v31  ;;  %v4890_v54 = vmul.f32 0.0078125, %v4849_v19 }
 0xb05   :  { %v7193_v3 = vpop.eup %7192  ;;  %v5086_v50 = vmul.f32 %v10500_v24, %v5049_v14  ;;  %v5017_v62 = vmul.f32 %v10485_v32, %v4979_v15  ;;  %v5186_v56 = vmul.f32 %v10506_v30, %v5049_v14 }
 0xb06   :  { %5117 = vadd.xlane.f32.xlu0 %v5081_v18  ;;  %v5188_v18 = vmul.f32 %v10506_v30, %v5051_v45  ;;  %v5054_v61 = vadd.f32 %v10494_v55, %v5016_v48  ;;  %v4976_v44 = vmul.f32 %v7193_v3, %v10374_v12  ;;  %v4922_v23 = vadd.f32 1e-05, %v4890_v54  ;;  %v4857_v11 = vpop.xlane.xlu0 %4856 }
 0xb07   :  { %5223 = vadd.xlane.f32.xlu1 %v5184_v26  ;;  %v4885_v26 = vmul.f32 0.0078125, %v4839_v16  ;;  %v5055_v12 = vadd.f32 %v10494_v55, %v5017_v62  ;;  %v4847_v38 = vpop.xlane.xlu1 %4846 }
 0xb08   :  { %v5014_v5 = vmul.f32 %v10485_v32, %v4976_v44  ;;  %v5191_v52 = vmul.f32 %v10506_v30, %v5054_v61 }
 0xb09   :  { %v4917_v36 = vadd.f32 1e-05, %v4885_v26  ;;  %v5092_v25 = vmul.f32 %v10500_v24, %v5055_v12 }
 0xb0a   :  { %5217 = vadd.xlane.f32.xlu0 %v5181_v20  ;;  %v7195_v20 = vpop.eup %7194 }
 0xb0b   :  { %5119 = vadd.xlane.f32.xlu1 %v5082_v29  ;;  %v5091_v29 = vmul.f32 %v10500_v24, %v5054_v61  ;;  %v7197_v47 = vpop.eup %7196  ;;  %v4977_v8 = vmul.f32 %v7195_v20, %v10380_v42  ;;  %7202 = vrsqrt.f32 %v4917_v36  ;;  %v4888_v42 = vmul.f32 0.0078125, %v4845_v6  ;;  %v4859_v19 = vpop.xlane.xlu1 %4858 }
 0xb0c   :  { %v4982_v45 = vmul.f32 %v7197_v47, %v10386_v0  ;;  %v7199_v17 = vpop.eup %7198  ;;  %7204 = vrsqrt.f32 %v4922_v23  ;;  %v4853_v20 = vpop.xlane.xlu0 %4852  ;;  %v4895_v54 = vmul.f32 0.0078125, %v4859_v19 }
 0xb0d   :  { %v5015_v51 = vmul.f32 %v10485_v32, %v4977_v8  ;;  %v4983_v22 = vmul.f32 %v7199_v17, %v10392_v53  ;;  %v4920_v58 = vadd.f32 1e-05, %v4888_v42  ;;  %v4894_v53 = vmul.f32 0.0078125, %v4857_v11 }
 0xb0e   :  { %5129 = vadd.xlane.f32.xlu0 %v5087_v40  ;;  %v4891_v40 = vmul.f32 0.0078125, %v4851_v39  ;;  %v5020_v59 = vmul.f32 %v10485_v32, %v4982_v45  ;;  %v7201_v57 = vpop.eup %7200 }
 0xb0f   :  { %5219 = vadd.xlane.f32.xlu1 %v5182_v35  ;;  %v5052_v35 = vadd.f32 %v10494_v55, %v5014_v5  ;;  %v5053_v0 = vadd.f32 %v10494_v55, %v5015_v51  ;;  %v4980_v16 = vmul.f32 %v7201_v57, %v10398_v63  ;;  %v5021_v14 = vmul.f32 %v10485_v32, %v4983_v22 }
 0xb10   :  { %v4923_v33 = vadd.f32 1e-05, %v4891_v40  ;;  %v5058_v3 = vadd.f32 %v10494_v55, %v5020_v59  ;;  %v4926_v62 = vadd.f32 1e-05, %v4894_v53  ;;  %v4865_v6 = vpop.xlane.xlu0 %4864 }
 0xb11   :  { %v5189_v48 = vmul.f32 %v10506_v30, %v5052_v35  ;;  %v5190_v44 = vmul.f32 %v10506_v30, %v5053_v0  ;;  %v5059_v63 = vadd.f32 %v10494_v55, %v5021_v14 }
 0xb12   :  { %5229 = vadd.xlane.f32.xlu0 %v5187_v9  ;;  %v5089_v9 = vmul.f32 %v10500_v24, %v5052_v35  ;;  %7206 = vrsqrt.f32 %v4923_v33  ;;  %v5095_v26 = vmul.f32 %v10500_v24, %v5058_v3  ;;  %v5195_v36 = vmul.f32 %v10506_v30, %v5058_v3 }
 0xb13   :  { %5131 = vadd.xlane.f32.xlu1 %v5088_v41  ;;  %v5192_v41 = vmul.f32 %v10506_v30, %v5055_v12  ;;  %7208 = vrsqrt.f32 %v4920_v58  ;;  %v5096_v47 = vmul.f32 %v10500_v24, %v5059_v63  ;;  %v4927_v12 = vadd.f32 1e-05, %v4895_v54 }
 0xb14   :  { %v5196_v35 = vmul.f32 %v10506_v30, %v5059_v63 }
 0xb15   :  { %v7203_v15 = vpop.eup %7202 }
 0xb16   :  { %5125 = vadd.xlane.f32.xlu0 %v5085_v37  ;;  %v4889_v37 = vmul.f32 0.0078125, %v4847_v38  ;;  %v7205_v61 = vpop.eup %7204  ;;  %v4898_v38 = vmul.f32 0.0078125, %v4865_v6 }
 0xb17   :  { %5231 = vadd.xlane.f32.xlu1 %v5188_v18  ;;  %v5090_v18 = vmul.f32 %v10500_v24, %v5053_v0 }
 0xb18   :  { %v4921_v31 = vadd.f32 1e-05, %v4889_v37 }
 0xb1a   :  { %5225 = vadd.xlane.f32.xlu0 %v5185_v1  ;;  %v5018_v1 = vmul.f32 %v10485_v32, %v4980_v16  ;;  %7210 = vrsqrt.f32 %v4921_v31  ;;  %v4930_v16 = vadd.f32 1e-05, %v4898_v38 }
 0xb1b   :  { %5127 = vadd.xlane.f32.xlu1 %v5086_v50  ;;  %v4981_v50 = vmul.f32 %v7203_v15, %v10404_v10  ;;  %7212 = vrsqrt.f32 %v4926_v62  ;;  %v4892_v10 = vmul.f32 0.0078125, %v4853_v20 }
 0xb1c   :  { %v5056_v39 = vadd.f32 %v10494_v55, %v5018_v1  ;;  %v7207_v5 = vpop.eup %7206  ;;  %7214 = vrsqrt.f32 %v4927_v12 }
 0xb1d   :  { %v7209_v40 = vpop.eup %7208  ;;  %v4987_v45 = vmul.f32 %v7207_v5, %v10416_v4  ;;  %v4924_v17 = vadd.f32 1e-05, %v4892_v10  ;;  %v4861_v4 = vpop.xlane.xlu0 %4860 }
 0xb1e   :  { %5137 = vadd.xlane.f32.xlu0 %v5091_v29  ;;  %v4986_v29 = vmul.f32 %v7205_v61, %v10410_v49  ;;  %v5093_v8 = vmul.f32 %v10500_v24, %v5056_v39  ;;  %v5193_v51 = vmul.f32 %v10506_v30, %v5056_v39  ;;  %v4984_v33 = vmul.f32 %v7209_v40, %v10422_v28 }
 0xb1f   :  { %5227 = vadd.xlane.f32.xlu1 %v5186_v56  ;;  %v5019_v56 = vmul.f32 %v10485_v32, %v4981_v50  ;;  %v5025_v59 = vmul.f32 %v10485_v32, %v4987_v45  ;;  %7216 = vrsqrt.f32 %v4924_v17  ;;  %v4896_v3 = vmul.f32 0.0078125, %v4861_v4 }
 0xb20   :  { %v5024_v23 = vmul.f32 %v10485_v32, %v4986_v29  ;;  %v5022_v58 = vmul.f32 %v10485_v32, %v4984_v33 }
 0xb21   :  { %v5057_v49 = vadd.f32 %v10494_v55, %v5019_v56  ;;  %v5063_v28 = vadd.f32 %v10494_v55, %v5025_v59  ;;  %v4928_v61 = vadd.f32 1e-05, %v4896_v3 }
 0xb22   :  { %5237 = vadd.xlane.f32.xlu0 %v5191_v52  ;;  %v4855_v52 = vpop.xlane.xlu1 %4854  ;;  %v5062_v42 = vadd.f32 %v10494_v55, %v5024_v23  ;;  %v5060_v15 = vadd.f32 %v10494_v55, %v5022_v58 }
 0xb23   :  { %5139 = vadd.xlane.f32.xlu1 %v5092_v25  ;;  %v4893_v25 = vmul.f32 0.0078125, %v4855_v52  ;;  %v5194_v37 = vmul.f32 %v10506_v30, %v5057_v49  ;;  %v5200_v20 = vmul.f32 %v10506_v30, %v5063_v28 }
 0xb24   :  { %v7211_v57 = vpop.eup %7210  ;;  %v5099_v22 = vmul.f32 %v10500_v24, %v5062_v42  ;;  %v5199_v14 = vmul.f32 %v10506_v30, %v5062_v42  ;;  %v5097_v63 = vmul.f32 %v10500_v24, %v5060_v15  ;;  %v5197_v39 = vmul.f32 %v10506_v30, %v5060_v15 }
 0xb25   :  { %v4925_v0 = vadd.f32 1e-05, %v4893_v25  ;;  %v7213_v11 = vpop.eup %7212  ;;  %v11293_v15 = vlaneseq }
 0xb26   :  { %5133 = vadd.xlane.f32.xlu0 %v5089_v9  ;;  %v5094_v9 = vmul.f32 %v10500_v24, %v5057_v49  ;;  %v4990_v53 = vmul.f32 %v7213_v11, %v10434_v2  ;;  %v7215_v31 = vpop.eup %7214 }
 0xb27   :  { %5239 = vadd.xlane.f32.xlu1 %v5192_v41  ;;  %v4867_v41 = vpop.xlane.xlu1 %4866  ;;  %7218 = vrsqrt.f32 %v4925_v0  ;;  %v4991_v54 = vmul.f32 %v7215_v31, %v10440_v7 }
 0xb28   :  { %7220 = vrsqrt.f32 %v4930_v16  ;;  %v5028_v50 = vmul.f32 %v10485_v32, %v4990_v53  ;;  %v10663_v53 = vand.u32 127, %v11293_v15 }
 0xb29   :  { %v7217_v62 = vpop.eup %7216  ;;  %7222 = vrsqrt.f32 %v4928_v61  ;;  %v5029_v56 = vmul.f32 %v10485_v32, %v4991_v54 }
 0xb2a   :  { %5233 = vadd.xlane.f32.xlu0 %v5189_v48  ;;  %v4985_v48 = vmul.f32 %v7211_v57, %v10428_v60  ;;  %v5066_v29 = vadd.f32 %v10494_v55, %v5028_v50  ;;  %v4988_v5 = vmul.f32 %v7217_v62, %v10446_v43  ;;  %vm5275_vm0 = vcmp.eq.s32.totalorder %v10663_v53, 0 }
 0xb2b   :  { %5135 = vadd.xlane.f32.xlu1 %v5090_v18  ;;  %v4899_v18 = vmul.f32 0.0078125, %v4867_v41  ;;  %v4863_v19 = vpop.xlane.xlu1 %4862  ;;  %v5067_v40 = vadd.f32 %v10494_v55, %v5029_v56 }
 0xb2c   :  { %v5023_v1 = vmul.f32 %v10485_v32, %v4985_v48  ;;  %v5103_v7 = vmul.f32 %v10500_v24, %v5066_v29  ;;  %v5026_v12 = vmul.f32 %v10485_v32, %v4988_v5  ;;  %v5203_v52 = vmul.f32 %v10506_v30, %v5066_v29 }
 0xb2d   :  { %v4931_v60 = vadd.f32 1e-05, %v4899_v18  ;;  %v5104_v17 = vmul.f32 %v10500_v24, %v5067_v40  ;;  %v5204_v33 = vmul.f32 %v10506_v30, %v5067_v40 }
 0xb2e   :  { %5145 = vadd.xlane.f32.xlu0 %v5095_v26  ;;  %v5100_v26 = vmul.f32 %v10500_v24, %v5063_v28  ;;  %v5061_v2 = vadd.f32 %v10494_v55, %v5023_v1 }
 0xb2f   :  { %5235 = vadd.xlane.f32.xlu1 %v5190_v44  ;;  %v4897_v44 = vmul.f32 0.0078125, %v4863_v19  ;;  %7224 = vrsqrt.f32 %v4931_v60 }
 0xb30   :  { %v5198_v23 = vmul.f32 %v10506_v30, %v5061_v2 }
 0xb31   :  { %v7219_v10 = vpop.eup %7218 }
 0xb32   :  { %5245 = vadd.xlane.f32.xlu0 %v5195_v36  ;;  %v4929_v36 = vadd.f32 1e-05, %v4897_v44  ;;  %v4989_v6 = vmul.f32 %v7219_v10, %v10452_v34 }
 0xb33   :  { %5147 = vadd.xlane.f32.xlu1 %v5096_v47  ;;  %v5098_v47 = vmul.f32 %v10500_v24, %v5061_v2 }
 0xb34   :  { %7226 = vrsqrt.f32 %v4929_v36  ;;  %v5027_v25 = vmul.f32 %v10485_v32, %v4989_v6 }
 0xb36   :  { %5141 = vadd.xlane.f32.xlu0 %v5093_v8  ;;  %v7221_v8 = vpop.eup %7220 }
 0xb37   :  { %5247 = vadd.xlane.f32.xlu1 %v5196_v35  ;;  %v7223_v43 = vpop.eup %7222  ;;  %v5064_v35 = vadd.f32 %v10494_v55, %v5026_v12  ;;  %v4994_v49 = vmul.f32 %v7221_v8, %v10458_v13 }
 0xb38   :  { %v4992_v42 = vmul.f32 %v7223_v43, %v10470_v46 }
 0xb39   :  { %v7225_v45 = vpop.eup %7224  ;;  %v5032_v34 = vmul.f32 %v10485_v32, %v4994_v49  ;;  %v5201_v57 = vmul.f32 %v10506_v30, %v5064_v35 }
 0xb3a   :  { %5241 = vadd.xlane.f32.xlu0 %v5193_v51  ;;  %v5101_v51 = vmul.f32 %v10500_v24, %v5064_v35  ;;  %v4995_v59 = vmul.f32 %v7225_v45, %v10464_v27  ;;  %v5030_v4 = vmul.f32 %v10485_v32, %v4992_v42 }
 0xb3b   :  { %5143 = vadd.xlane.f32.xlu1 %v5094_v9  ;;  %v5065_v9 = vadd.f32 %v10494_v55, %v5027_v25  ;;  %v5070_v38 = vadd.f32 %v10494_v55, %v5032_v34 }
 0xb3c   :  { %v5033_v0 = vmul.f32 %v10485_v32, %v4995_v59  ;;  %v5068_v27 = vadd.f32 %v10494_v55, %v5030_v4 }
 0xb3d   :  { %v5102_v41 = vmul.f32 %v10500_v24, %v5065_v9  ;;  %v5202_v58 = vmul.f32 %v10506_v30, %v5065_v9  ;;  %v5207_v18 = vmul.f32 %v10506_v30, %v5070_v38 }
 0xb3e   :  { %5153 = vadd.xlane.f32.xlu0 %v5099_v22  ;;  %v7227_v13 = vpop.eup %7226  ;;  %v5107_v22 = vmul.f32 %v10500_v24, %v5070_v38  ;;  %v5071_v11 = vadd.f32 %v10494_v55, %v5033_v0  ;;  %v5105_v28 = vmul.f32 %v10500_v24, %v5068_v27  ;;  %v5205_v3 = vmul.f32 %v10506_v30, %v5068_v27 }
 0xb3f   :  { %5243 = vadd.xlane.f32.xlu1 %v5194_v37  ;;  %v4993_v46 = vmul.f32 %v7227_v13, %v10476_v21 }
 0xb40   :  { %v5108_v48 = vmul.f32 %v10500_v24, %v5071_v11 }
 0xb41   :  { %v5031_v37 = vmul.f32 %v10485_v32, %v4993_v46 }
 0xb42   :  { %5253 = vadd.xlane.f32.xlu0 %v5199_v14  ;;  %v5208_v14 = vmul.f32 %v10506_v30, %v5071_v11 }
 0xb43   :  { %5155 = vadd.xlane.f32.xlu1 %v5100_v26  ;;  %v5069_v21 = vadd.f32 %v10494_v55, %v5031_v37 }
 0xb45   :  { %v5106_v16 = vmul.f32 %v10500_v24, %v5069_v21  ;;  %v5206_v32 = vmul.f32 %v10506_v30, %v5069_v21  ;;  %v10669_v24 = vld [vmem:[%s10921_s25] ss:$0 sm:$0xff] }
 0xb46   :  { %5149 = vadd.xlane.f32.xlu0 %v5097_v63 }
 0xb47   :  { %5255 = vadd.xlane.f32.xlu1 %v5200_v20 }
 0xb4a   :  { %5249 = vadd.xlane.f32.xlu0 %v5197_v39 }
 0xb4b   :  { %5151 = vadd.xlane.f32.xlu1 %v5098_v47 }
 0xb4e   :  { %5161 = vadd.xlane.f32.xlu0 %v5103_v7 }
 0xb4f   :  { %5251 = vadd.xlane.f32.xlu1 %v5198_v23 }
 0xb52   :  { %5261 = vadd.xlane.f32.xlu0 %v5203_v52 }
 0xb53   :  { %5163 = vadd.xlane.f32.xlu1 %v5104_v17 }
 0xb56   :  { %5157 = vadd.xlane.f32.xlu0 %v5101_v51 }
 0xb57   :  { %5263 = vadd.xlane.f32.xlu1 %v5204_v33 }
 0xb5a   :  { %5257 = vadd.xlane.f32.xlu0 %v5201_v57 }
 0xb5b   :  { %5159 = vadd.xlane.f32.xlu1 %v5102_v41 }
 0xb5e   :  { %5169 = vadd.xlane.f32.xlu0 %v5107_v22 }
 0xb5f   :  { %5259 = vadd.xlane.f32.xlu1 %v5202_v58 }
 0xb62   :  { %5165 = vadd.xlane.f32.xlu0 %v5105_v28 }
 0xb63   :  { %5171 = vadd.xlane.f32.xlu1 %v5108_v48 }
 0xb66   :  { %5265 = vadd.xlane.f32.xlu0 %v5205_v3 }
 0xb67   :  { %5167 = vadd.xlane.f32.xlu1 %v5106_v16 }
 0xb6a   :  { %5269 = vadd.xlane.f32.xlu0 %v5207_v18 }
 0xb6b   :  { %5267 = vadd.xlane.f32.xlu1 %v5206_v32 }
 0xb6f   :  { %5271 = vadd.xlane.f32.xlu1 %v5208_v14 }
 0xb7b   :  { %v5114_v55 = vpop.xlane.xlu0 %5113 }
 0xb7f   :  { %v5214_v31 = vpop.xlane.xlu0 %5213 }
 0xb80   :  { %v5278_v19 = vsel %vm5275_vm0, %v5114_v55, %v5214_v31  ;;  %v5116_v26 = vpop.xlane.xlu1 %5115 }
 0xb81   :  { %v5317_v1 = vadd.f32 %v10669_v24, %v5278_v19 }
 0xb83   :  { %v5737_v30 = vmul.f32 -1.442695, %v5317_v1  ;;  %v5110_v61 = vpop.xlane.xlu0 %5109 }
 0xb84   :  { %v5216_v60 = vpop.xlane.xlu1 %5215 }
 0xb85   :  { %7228 = vpow2.f32 %v5737_v30  ;;  %v5279_v44 = vsel %vm5275_vm0, %v5116_v26, %v5216_v60 }
 0xb86   :  { %v5318_v63 = vadd.f32 %v10669_v24, %v5279_v44 }
 0xb87   :  { %v5210_v50 = vpop.xlane.xlu0 %5209 }
 0xb88   :  { %v5738_v62 = vmul.f32 -1.442695, %v5318_v63  ;;  %v5276_v20 = vsel %vm5275_vm0, %v5110_v61, %v5210_v50  ;;  %v5112_v2 = vpop.xlane.xlu1 %5111 }
 0xb89   :  { %v5315_v54 = vadd.f32 %v10669_v24, %v5276_v20 }
 0xb8a   :  { %7230 = vpow2.f32 %v5738_v62 }
 0xb8b   :  { %v5735_v36 = vmul.f32 -1.442695, %v5315_v54  ;;  %v5122_v39 = vpop.xlane.xlu0 %5121 }
 0xb8c   :  { %v5212_v29 = vpop.xlane.xlu1 %5211 }
 0xb8d   :  { %7232 = vpow2.f32 %v5735_v36  ;;  %v5277_v5 = vsel %vm5275_vm0, %v5112_v2, %v5212_v29 }
 0xb8e   :  { %v5316_v47 = vadd.f32 %v10669_v24, %v5277_v5 }
 0xb8f   :  { %v7229_v56 = vpop.eup %7228  ;;  %v5222_v10 = vpop.xlane.xlu0 %5221 }
 0xb90   :  { %v5445_v7 = vadd.f32 1.0, %v7229_v56  ;;  %v5736_v12 = vmul.f32 -1.442695, %v5316_v47  ;;  %v5282_v8 = vsel %vm5275_vm0, %v5122_v39, %v5222_v10  ;;  %v5124_v23 = vpop.xlane.xlu1 %5123 }
 0xb91   :  { %v5321_v40 = vadd.f32 %v10669_v24, %v5282_v8 }
 0xb92   :  { %7234 = vrcp.f32 %v5445_v7 }
 0xb93   :  { %7236 = vpow2.f32 %v5736_v12  ;;  %v5741_v6 = vmul.f32 -1.442695, %v5321_v40  ;;  %v5118_v43 = vpop.xlane.xlu0 %5117 }
 0xb94   :  { %v7231_v52 = vpop.eup %7230  ;;  %v5224_v35 = vpop.xlane.xlu1 %5223 }
 0xb95   :  { %v5446_v49 = vadd.f32 1.0, %v7231_v52  ;;  %7238 = vpow2.f32 %v5741_v6  ;;  %v5283_v45 = vsel %vm5275_vm0, %v5124_v23, %v5224_v35 }
 0xb96   :  { %v5322_v17 = vadd.f32 %v10669_v24, %v5283_v45 }
 0xb97   :  { %v7233_v25 = vpop.eup %7232  ;;  %7240 = vrcp.f32 %v5446_v49  ;;  %v5218_v51 = vpop.xlane.xlu0 %5217 }
 0xb98   :  { %v5443_v34 = vadd.f32 1.0, %v7233_v25  ;;  %v5742_v42 = vmul.f32 -1.442695, %v5322_v17  ;;  %v5280_v33 = vsel %vm5275_vm0, %v5118_v43, %v5218_v51  ;;  %v5120_v9 = vpop.xlane.xlu1 %5119 }
 0xb99   :  { %v5319_v59 = vadd.f32 %v10669_v24, %v5280_v33 }
 0xb9a   :  { %7242 = vrcp.f32 %v5443_v34 }
 0xb9b   :  { %7244 = vpow2.f32 %v5742_v42  ;;  %v5739_v13 = vmul.f32 -1.442695, %v5319_v59  ;;  %v5130_v57 = vpop.xlane.xlu0 %5129 }
 0xb9c   :  { %v7235_v38 = vpop.eup %7234  ;;  %v5220_v4 = vpop.xlane.xlu1 %5219 }
 0xb9d   :  { %v7237_v41 = vpop.eup %7236  ;;  %5542 = vst.msk [vmem:[%s10922_s27 + $0x10] sm:$0xff] %vm5539_vm1, %v7235_v38  ;;  %7246 = vpow2.f32 %v5739_v13  ;;  %v5281_v0 = vsel %vm5275_vm0, %v5120_v9, %v5220_v4 }
 0xb9e   :  { %v5444_v46 = vadd.f32 1.0, %v7237_v41  ;;  %v5320_v22 = vadd.f32 %v10669_v24, %v5281_v0 }
 0xb9f   :  { %v7239_v27 = vpop.eup %7238  ;;  %v5230_v58 = vpop.xlane.xlu0 %5229 }
 0xba0   :  { %7248 = vrcp.f32 %v5444_v46  ;;  %v5449_v11 = vadd.f32 1.0, %v7239_v27  ;;  %v5740_v37 = vmul.f32 -1.442695, %v5320_v22  ;;  %v5286_v28 = vsel %vm5275_vm0, %v5130_v57, %v5230_v58  ;;  %v5132_v48 = vpop.xlane.xlu1 %5131 }
 0xba1   :  { %v7241_v21 = vpop.eup %7240  ;;  %v5325_v3 = vadd.f32 %v10669_v24, %v5286_v28 }
 0xba2   :  { %5543 = vst.msk [vmem:[%s10922_s27 + $0x18] sm:$0xff] %vm5539_vm1, %v7241_v21  ;;  %7250 = vrcp.f32 %v5449_v11 }
 0xba3   :  { %7252 = vpow2.f32 %v5740_v37  ;;  %v5745_v16 = vmul.f32 -1.442695, %v5325_v3  ;;  %v5126_v18 = vpop.xlane.xlu0 %5125 }
 0xba4   :  { %v7243_v32 = vpop.eup %7242  ;;  %v5232_v14 = vpop.xlane.xlu1 %5231 }
 0xba5   :  { %v7245_v15 = vpop.eup %7244  ;;  %5540 = vst.msk [vmem:[%s10922_s27] sm:$0xff] %vm5539_vm1, %v7243_v32  ;;  %7254 = vpow2.f32 %v5745_v16  ;;  %v5287_v55 = vsel %vm5275_vm0, %v5132_v48, %v5232_v14 }
 0xba6   :  { %v5450_v31 = vadd.f32 1.0, %v7245_v15  ;;  %v5326_v19 = vadd.f32 %v10669_v24, %v5287_v55 }
 0xba7   :  { %v7247_v26 = vpop.eup %7246  ;;  %v5226_v1 = vpop.xlane.xlu0 %5225 }
 0xba8   :  { %7256 = vrcp.f32 %v5450_v31  ;;  %v5447_v30 = vadd.f32 1.0, %v7247_v26  ;;  %v5746_v61 = vmul.f32 -1.442695, %v5326_v19  ;;  %v5284_v60 = vsel %vm5275_vm0, %v5126_v18, %v5226_v1  ;;  %v5128_v44 = vpop.xlane.xlu1 %5127 }
 0xba9   :  { %v5323_v63 = vadd.f32 %v10669_v24, %v5284_v60 }
 0xbaa   :  { %v7249_v50 = vpop.eup %7248  ;;  %7258 = vrcp.f32 %v5447_v30 }
 0xbab   :  { %5541 = vst.msk [vmem:[%s10922_s27 + $0x8] sm:$0xff] %vm5539_vm1, %v7249_v50  ;;  %7260 = vpow2.f32 %v5746_v61  ;;  %v5743_v62 = vmul.f32 -1.442695, %v5323_v63  ;;  %v5138_v20 = vpop.xlane.xlu0 %5137 }
 0xbac   :  { %v7251_v2 = vpop.eup %7250  ;;  %v5228_v54 = vpop.xlane.xlu1 %5227 }
 0xbad   :  { %v7253_v36 = vpop.eup %7252  ;;  %5546 = vst.msk [vmem:[%s10922_s27 + $0x30] sm:$0xff] %vm5539_vm1, %v7251_v2  ;;  %7262 = vpow2.f32 %v5743_v62  ;;  %v5285_v39 = vsel %vm5275_vm0, %v5128_v44, %v5228_v54 }
 0xbae   :  { %v5448_v29 = vadd.f32 1.0, %v7253_v36  ;;  %v5324_v5 = vadd.f32 %v10669_v24, %v5285_v39 }
 0xbaf   :  { %v7255_v47 = vpop.eup %7254  ;;  %v5238_v56 = vpop.xlane.xlu0 %5237 }
 0xbb0   :  { %7264 = vrcp.f32 %v5448_v29  ;;  %v5453_v10 = vadd.f32 1.0, %v7255_v47  ;;  %v5744_v7 = vmul.f32 -1.442695, %v5324_v5  ;;  %v5290_v12 = vsel %vm5275_vm0, %v5138_v20, %v5238_v56  ;;  %v5140_v8 = vpop.xlane.xlu1 %5139 }
 0xbb1   :  { %v5329_v23 = vadd.f32 %v10669_v24, %v5290_v12 }
 0xbb2   :  { %v7257_v40 = vpop.eup %7256  ;;  %7266 = vrcp.f32 %v5453_v10 }
 0xbb3   :  { %5547 = vst.msk [vmem:[%s10922_s27 + $0x38] sm:$0xff] %vm5539_vm1, %v7257_v40  ;;  %7268 = vpow2.f32 %v5744_v7  ;;  %v5749_v6 = vmul.f32 -1.442695, %v5329_v23  ;;  %v5134_v43 = vpop.xlane.xlu0 %5133 }
 0xbb4   :  { %v7259_v52 = vpop.eup %7258  ;;  %v5240_v35 = vpop.xlane.xlu1 %5239 }
 0xbb5   :  { %v7261_v49 = vpop.eup %7260  ;;  %5544 = vst.msk [vmem:[%s10922_s27 + $0x20] sm:$0xff] %vm5539_vm1, %v7259_v52  ;;  %7270 = vpow2.f32 %v5749_v6  ;;  %v5291_v45 = vsel %vm5275_vm0, %v5140_v8, %v5240_v35 }
 0xbb6   :  { %v5454_v17 = vadd.f32 1.0, %v7261_v49  ;;  %v5330_v25 = vadd.f32 %v10669_v24, %v5291_v45 }
 0xbb7   :  { %v7263_v51 = vpop.eup %7262  ;;  %v5234_v34 = vpop.xlane.xlu0 %5233 }
 0xbb8   :  { %7272 = vrcp.f32 %v5454_v17  ;;  %v5451_v42 = vadd.f32 1.0, %v7263_v51  ;;  %v5750_v33 = vmul.f32 -1.442695, %v5330_v25  ;;  %v5288_v9 = vsel %vm5275_vm0, %v5134_v43, %v5234_v34  ;;  %v5136_v59 = vpop.xlane.xlu1 %5135 }
 0xbb9   :  { %v5327_v13 = vadd.f32 %v10669_v24, %v5288_v9 }
 0xbba   :  { %v7265_v57 = vpop.eup %7264  ;;  %7274 = vrcp.f32 %v5451_v42 }
 0xbbb   :  { %5545 = vst.msk [vmem:[%s10922_s27 + $0x28] sm:$0xff] %vm5539_vm1, %v7265_v57  ;;  %7276 = vpow2.f32 %v5750_v33  ;;  %v5747_v38 = vmul.f32 -1.442695, %v5327_v13  ;;  %v5146_v4 = vpop.xlane.xlu0 %5145 }
 0xbbc   :  { %v7267_v41 = vpop.eup %7266  ;;  %v5236_v0 = vpop.xlane.xlu1 %5235 }
 0xbbd   :  { %v7269_v46 = vpop.eup %7268  ;;  %5550 = vst.msk [vmem:[%s10922_s27 + $0x50] sm:$0xff] %vm5539_vm1, %v7267_v41  ;;  %7278 = vpow2.f32 %v5747_v38  ;;  %v5289_v22 = vsel %vm5275_vm0, %v5136_v59, %v5236_v0 }
 0xbbe   :  { %v5452_v27 = vadd.f32 1.0, %v7269_v46  ;;  %v5328_v58 = vadd.f32 %v10669_v24, %v5289_v22 }
 0xbbf   :  { %v7271_v11 = vpop.eup %7270  ;;  %v5246_v37 = vpop.xlane.xlu0 %5245 }
 0xbc0   :  { %7280 = vrcp.f32 %v5452_v27  ;;  %v5457_v28 = vadd.f32 1.0, %v7271_v11  ;;  %v5748_v48 = vmul.f32 -1.442695, %v5328_v58  ;;  %v5294_v21 = vsel %vm5275_vm0, %v5146_v4, %v5246_v37  ;;  %v5148_v3 = vpop.xlane.xlu1 %5147 }
 0xbc1   :  { %v5333_v16 = vadd.f32 %v10669_v24, %v5294_v21 }
 0xbc2   :  { %v7273_v18 = vpop.eup %7272  ;;  %7282 = vrcp.f32 %v5457_v28 }
 0xbc3   :  { %5551 = vst.msk [vmem:[%s10922_s27 + $0x58] sm:$0xff] %vm5539_vm1, %v7273_v18  ;;  %7284 = vpow2.f32 %v5748_v48  ;;  %v5753_v32 = vmul.f32 -1.442695, %v5333_v16  ;;  %v5142_v14 = vpop.xlane.xlu0 %5141 }
 0xbc4   :  { %v7275_v15 = vpop.eup %7274  ;;  %v5248_v55 = vpop.xlane.xlu1 %5247 }
 0xbc5   :  { %v7277_v31 = vpop.eup %7276  ;;  %5548 = vst.msk [vmem:[%s10922_s27 + $0x40] sm:$0xff] %vm5539_vm1, %v7275_v15  ;;  %7286 = vpow2.f32 %v5753_v32  ;;  %v5295_v19 = vsel %vm5275_vm0, %v5148_v3, %v5248_v55 }
 0xbc6   :  { %v5458_v26 = vadd.f32 1.0, %v7277_v31  ;;  %v5334_v1 = vadd.f32 %v10669_v24, %v5295_v19 }
 0xbc7   :  { %v7279_v30 = vpop.eup %7278  ;;  %v5242_v61 = vpop.xlane.xlu0 %5241 }
 0xbc8   :  { %7288 = vrcp.f32 %v5458_v26  ;;  %v5455_v60 = vadd.f32 1.0, %v7279_v30  ;;  %v5754_v44 = vmul.f32 -1.442695, %v5334_v1  ;;  %v5292_v63 = vsel %vm5275_vm0, %v5142_v14, %v5242_v61  ;;  %v5144_v50 = vpop.xlane.xlu1 %5143 }
 0xbc9   :  { %v5331_v62 = vadd.f32 %v10669_v24, %v5292_v63 }
 0xbca   :  { %v7281_v20 = vpop.eup %7280  ;;  %7290 = vrcp.f32 %v5455_v60 }
 0xbcb   :  { %5549 = vst.msk [vmem:[%s10922_s27 + $0x48] sm:$0xff] %vm5539_vm1, %v7281_v20  ;;  %7292 = vpow2.f32 %v5754_v44  ;;  %v5751_v2 = vmul.f32 -1.442695, %v5331_v62  ;;  %v5154_v54 = vpop.xlane.xlu0 %5153 }
 0xbcc   :  { %v7283_v36 = vpop.eup %7282  ;;  %v5244_v39 = vpop.xlane.xlu1 %5243 }
 0xbcd   :  { %v7285_v29 = vpop.eup %7284  ;;  %5554 = vst.msk [vmem:[%s10922_s27 + $0x70] sm:$0xff] %vm5539_vm1, %v7283_v36  ;;  %7294 = vpow2.f32 %v5751_v2  ;;  %v5293_v5 = vsel %vm5275_vm0, %v5144_v50, %v5244_v39 }
 0xbce   :  { %v5456_v47 = vadd.f32 1.0, %v7285_v29  ;;  %v5332_v56 = vadd.f32 %v10669_v24, %v5293_v5 }
 0xbcf   :  { %v7287_v10 = vpop.eup %7286  ;;  %v5254_v7 = vpop.xlane.xlu0 %5253 }
 0xbd0   :  { %7296 = vrcp.f32 %v5456_v47  ;;  %v5461_v12 = vadd.f32 1.0, %v7287_v10  ;;  %v5752_v8 = vmul.f32 -1.442695, %v5332_v56  ;;  %v5298_v23 = vsel %vm5275_vm0, %v5154_v54, %v5254_v7  ;;  %v5156_v40 = vpop.xlane.xlu1 %5155 }
 0xbd1   :  { %v5337_v6 = vadd.f32 %v10669_v24, %v5298_v23 }
 0xbd2   :  { %v7289_v43 = vpop.eup %7288  ;;  %7298 = vrcp.f32 %v5461_v12 }
 0xbd3   :  { %5555 = vst.msk [vmem:[%s10922_s27 + $0x78] sm:$0xff] %vm5539_vm1, %v7289_v43  ;;  %7300 = vpow2.f32 %v5752_v8  ;;  %v5757_v52 = vmul.f32 -1.442695, %v5337_v6  ;;  %v5150_v35 = vpop.xlane.xlu0 %5149 }
 0xbd4   :  { %v7291_v49 = vpop.eup %7290  ;;  %v5256_v45 = vpop.xlane.xlu1 %5255 }
 0xbd5   :  { %v7293_v17 = vpop.eup %7292  ;;  %5552 = vst.msk [vmem:[%s10922_s27 + $0x60] sm:$0xff] %vm5539_vm1, %v7291_v49  ;;  %7302 = vpow2.f32 %v5757_v52  ;;  %v5299_v25 = vsel %vm5275_vm0, %v5156_v40, %v5256_v45 }
 0xbd6   :  { %v5462_v51 = vadd.f32 1.0, %v7293_v17  ;;  %v5338_v34 = vadd.f32 %v10669_v24, %v5299_v25 }
 0xbd7   :  { %v7295_v42 = vpop.eup %7294  ;;  %v5250_v33 = vpop.xlane.xlu0 %5249 }
 0xbd8   :  { %7304 = vrcp.f32 %v5462_v51  ;;  %v5459_v9 = vadd.f32 1.0, %v7295_v42  ;;  %v5758_v59 = vmul.f32 -1.442695, %v5338_v34  ;;  %v5296_v13 = vsel %vm5275_vm0, %v5150_v35, %v5250_v33  ;;  %v5152_v57 = vpop.xlane.xlu1 %5151 }
 0xbd9   :  { %v5335_v38 = vadd.f32 %v10669_v24, %v5296_v13 }
 0xbda   :  { %v7297_v4 = vpop.eup %7296  ;;  %7306 = vrcp.f32 %v5459_v9 }
 0xbdb   :  { %5553 = vst.msk [vmem:[%s10922_s27 + $0x68] sm:$0xff] %vm5539_vm1, %v7297_v4  ;;  %7308 = vpow2.f32 %v5758_v59  ;;  %v5755_v41 = vmul.f32 -1.442695, %v5335_v38  ;;  %v5162_v0 = vpop.xlane.xlu0 %5161 }
 0xbdc   :  { %v7299_v46 = vpop.eup %7298  ;;  %v5252_v22 = vpop.xlane.xlu1 %5251 }
 0xbdd   :  { %v7301_v27 = vpop.eup %7300  ;;  %5558 = vst.msk [vmem:[%s10922_s27 + $0x90] sm:$0xff] %vm5539_vm1, %v7299_v46  ;;  %7310 = vpow2.f32 %v5755_v41  ;;  %v5297_v58 = vsel %vm5275_vm0, %v5152_v57, %v5252_v22 }
 0xbde   :  { %v5460_v11 = vadd.f32 1.0, %v7301_v27  ;;  %v5336_v37 = vadd.f32 %v10669_v24, %v5297_v58 }
 0xbdf   :  { %v7303_v28 = vpop.eup %7302  ;;  %v5262_v48 = vpop.xlane.xlu0 %5261 }
 0xbe0   :  { %7312 = vrcp.f32 %v5460_v11  ;;  %v5465_v21 = vadd.f32 1.0, %v7303_v28  ;;  %v5756_v3 = vmul.f32 -1.442695, %v5336_v37  ;;  %v5302_v16 = vsel %vm5275_vm0, %v5162_v0, %v5262_v48  ;;  %v5164_v18 = vpop.xlane.xlu1 %5163 }
 0xbe1   :  { %v5341_v32 = vadd.f32 %v10669_v24, %v5302_v16 }
 0xbe2   :  { %v7305_v14 = vpop.eup %7304  ;;  %7314 = vrcp.f32 %v5465_v21 }
 0xbe3   :  { %5559 = vst.msk [vmem:[%s10922_s27 + $0x98] sm:$0xff] %vm5539_vm1, %v7305_v14  ;;  %7316 = vpow2.f32 %v5756_v3  ;;  %v5761_v15 = vmul.f32 -1.442695, %v5341_v32  ;;  %v5158_v55 = vpop.xlane.xlu0 %5157 }
 0xbe4   :  { %v7307_v31 = vpop.eup %7306  ;;  %v5264_v19 = vpop.xlane.xlu1 %5263 }
 0xbe5   :  { %v7309_v26 = vpop.eup %7308  ;;  %5556 = vst.msk [vmem:[%s10922_s27 + $0x80] sm:$0xff] %vm5539_vm1, %v7307_v31  ;;  %7318 = vpow2.f32 %v5761_v15  ;;  %v5303_v1 = vsel %vm5275_vm0, %v5164_v18, %v5264_v19 }
 0xbe6   :  { %v5466_v30 = vadd.f32 1.0, %v7309_v26  ;;  %v5342_v61 = vadd.f32 %v10669_v24, %v5303_v1 }
 0xbe7   :  { %v7311_v60 = vpop.eup %7310  ;;  %v5258_v44 = vpop.xlane.xlu0 %5257 }
 0xbe8   :  { %7320 = vrcp.f32 %v5466_v30  ;;  %v5463_v63 = vadd.f32 1.0, %v7311_v60  ;;  %v5762_v50 = vmul.f32 -1.442695, %v5342_v61  ;;  %v5300_v62 = vsel %vm5275_vm0, %v5158_v55, %v5258_v44  ;;  %v5160_v20 = vpop.xlane.xlu1 %5159 }
 0xbe9   :  { %v5339_v2 = vadd.f32 %v10669_v24, %v5300_v62 }
 0xbea   :  { %v7313_v54 = vpop.eup %7312  ;;  %7322 = vrcp.f32 %v5463_v63 }
 0xbeb   :  { %5557 = vst.msk [vmem:[%s10922_s27 + $0x88] sm:$0xff] %vm5539_vm1, %v7313_v54  ;;  %7324 = vpow2.f32 %v5762_v50  ;;  %v5759_v36 = vmul.f32 -1.442695, %v5339_v2  ;;  %v5170_v39 = vpop.xlane.xlu0 %5169 }
 0xbec   :  { %v7315_v29 = vpop.eup %7314  ;;  %v5260_v5 = vpop.xlane.xlu1 %5259 }
 0xbed   :  { %v7317_v47 = vpop.eup %7316  ;;  %5562 = vst.msk [vmem:[%s10922_s27 + $0xb0] sm:$0xff] %vm5539_vm1, %v7315_v29  ;;  %7326 = vpow2.f32 %v5759_v36  ;;  %v5301_v56 = vsel %vm5275_vm0, %v5160_v20, %v5260_v5 }
 0xbee   :  { %v5464_v10 = vadd.f32 1.0, %v7317_v47  ;;  %v5340_v7 = vadd.f32 %v10669_v24, %v5301_v56 }
 0xbef   :  { %v7319_v12 = vpop.eup %7318  ;;  %v5166_v8 = vpop.xlane.xlu0 %5165 }
 0xbf0   :  { %7328 = vrcp.f32 %v5464_v10  ;;  %v5469_v23 = vadd.f32 1.0, %v7319_v12  ;;  %v5760_v40 = vmul.f32 -1.442695, %v5340_v7  ;;  %v5172_v6 = vpop.xlane.xlu1 %5171 }
 0xbf2   :  { %v7321_v43 = vpop.eup %7320  ;;  %7330 = vrcp.f32 %v5469_v23 }
 0xbf3   :  { %5563 = vst.msk [vmem:[%s10922_s27 + $0xb8] sm:$0xff] %vm5539_vm1, %v7321_v43  ;;  %7332 = vpow2.f32 %v5760_v40  ;;  %v5266_v52 = vpop.xlane.xlu0 %5265 }
 0xbf4   :  { %v7323_v35 = vpop.eup %7322  ;;  %v5304_v49 = vsel %vm5275_vm0, %v5166_v8, %v5266_v52  ;;  %v5168_v45 = vpop.xlane.xlu1 %5167 }
 0xbf5   :  { %v7325_v17 = vpop.eup %7324  ;;  %5560 = vst.msk [vmem:[%s10922_s27 + $0xa0] sm:$0xff] %vm5539_vm1, %v7323_v35  ;;  %v5343_v25 = vadd.f32 %v10669_v24, %v5304_v49 }
 0xbf6   :  { %v5470_v51 = vadd.f32 1.0, %v7325_v17 }
 0xbf7   :  { %v7327_v34 = vpop.eup %7326  ;;  %v5763_v42 = vmul.f32 -1.442695, %v5343_v25  ;;  %v5270_v33 = vpop.xlane.xlu0 %5269 }
 0xbf8   :  { %7334 = vrcp.f32 %v5470_v51  ;;  %v5467_v9 = vadd.f32 1.0, %v7327_v34  ;;  %v5306_v59 = vsel %vm5275_vm0, %v5170_v39, %v5270_v33  ;;  %v5268_v13 = vpop.xlane.xlu1 %5267 }
 0xbf9   :  { %7336 = vpow2.f32 %v5763_v42  ;;  %v5345_v57 = vadd.f32 %v10669_v24, %v5306_v59  ;;  %v5305_v38 = vsel %vm5275_vm0, %v5168_v45, %v5268_v13 }
 0xbfa   :  { %v7329_v4 = vpop.eup %7328  ;;  %7338 = vrcp.f32 %v5467_v9  ;;  %v5344_v41 = vadd.f32 %v10669_v24, %v5305_v38 }
 0xbfb   :  { %5561 = vst.msk [vmem:[%s10922_s27 + $0xa8] sm:$0xff] %vm5539_vm1, %v7329_v4  ;;  %v5765_v0 = vmul.f32 -1.442695, %v5345_v57 }
 0xbfc   :  { %v7331_v46 = vpop.eup %7330  ;;  %v5764_v22 = vmul.f32 -1.442695, %v5344_v41  ;;  %v5272_v27 = vpop.xlane.xlu1 %5271 }
 0xbfd   :  { %v7333_v58 = vpop.eup %7332  ;;  %5566 = vst.msk [vmem:[%s10922_s27 + $0xd0] sm:$0xff] %vm5539_vm1, %v7331_v46  ;;  %7340 = vpow2.f32 %v5765_v0  ;;  %v5307_v11 = vsel %vm5275_vm0, %v5172_v6, %v5272_v27 }
 0xbfe   :  { %v5468_v37 = vadd.f32 1.0, %v7333_v58  ;;  %7342 = vpow2.f32 %v5764_v22  ;;  %v5346_v28 = vadd.f32 %v10669_v24, %v5307_v11 }
 0xc00   :  { %7344 = vrcp.f32 %v5468_v37  ;;  %v5766_v48 = vmul.f32 -1.442695, %v5346_v28 }
 0xc02   :  { %v7335_v21 = vpop.eup %7334  ;;  %7346 = vpow2.f32 %v5766_v48 }
 0xc03   :  { %v7337_v3 = vpop.eup %7336  ;;  %5567 = vst.msk [vmem:[%s10922_s27 + $0xd8] sm:$0xff] %vm5539_vm1, %v7335_v21 }
 0xc04   :  { %v7339_v16 = vpop.eup %7338  ;;  %v5471_v18 = vadd.f32 1.0, %v7337_v3 }
 0xc05   :  { %5564 = vst.msk [vmem:[%s10922_s27 + $0xc0] sm:$0xff] %vm5539_vm1, %v7339_v16 }
 0xc06   :  { %7348 = vrcp.f32 %v5471_v18 }
 0xc07   :  { %v7341_v53 = vpop.eup %7340 }
 0xc08   :  { %v7343_v24 = vpop.eup %7342  ;;  %v5473_v32 = vadd.f32 1.0, %v7341_v53 }
 0xc09   :  { %v5472_v14 = vadd.f32 1.0, %v7343_v24 }
 0xc0a   :  { %v7345_v15 = vpop.eup %7344  ;;  %7350 = vrcp.f32 %v5473_v32 }
 0xc0b   :  { %5565 = vst.msk [vmem:[%s10922_s27 + $0xc8] sm:$0xff] %vm5539_vm1, %v7345_v15  ;;  %7352 = vrcp.f32 %v5472_v14 }
 0xc0c   :  { %v7347_v55 = vpop.eup %7346 }
 0xc0d   :  { %v5474_v31 = vadd.f32 1.0, %v7347_v55 }
 0xc0f   :  { %7354 = vrcp.f32 %v5474_v31 }
 0xc10   :  { %v7349_v19 = vpop.eup %7348 }
 0xc11   :  { %5568 = vst.msk [vmem:[%s10922_s27 + $0xe0] sm:$0xff] %vm5539_vm1, %v7349_v19 }
 0xc14   :  { %v7351_v26 = vpop.eup %7350 }
 0xc15   :  { %v7353_v1 = vpop.eup %7352  ;;  %5570 = vst.msk [vmem:[%s10922_s27 + $0xf0] sm:$0xff] %vm5539_vm1, %v7351_v26 }
 0xc16   :  { %5569 = vst.msk [vmem:[%s10922_s27 + $0xe8] sm:$0xff] %vm5539_vm1, %v7353_v1 }
 0xc19   :  { %v7355_v30 = vpop.eup %7354 }
 0xc1a   :  { %5571 = vst.msk [vmem:[%s10922_s27 + $0xf8] sm:$0xff] %vm5539_vm1, %v7355_v30 }

</bundles_post_ra>
